<compile_context>
chip_gen: v7x
topology: tpu7x:2x2x1
jax: 0.10.0
libtpu: 0.0.40
codegen_flags: <defaults>
</compile_context>

<pallas_src>
import functools

import jax
import jax.numpy as jnp
from jax.experimental import pallas as pl
from jax.experimental.pallas import tpu as pltpu


# -----------------------------------------------------------------------------
# Small helpers
# -----------------------------------------------------------------------------
def _full_spec(shape):
    """BlockSpec covering the whole array (single block), for grid=(1,)."""
    nd = len(shape)
    return pl.BlockSpec(shape, lambda i, _nd=nd: (0,) * _nd)


def _pick_spatial_tile(S, bytes_per_lane, budget_bytes=8 << 20, max_lanes=2048):
    """Largest lane tile that is a multiple of 128, divides S and fits the budget.

    Small deep levels (S not a multiple of 128) fall back to a single full block.
    """
    if S % 128 != 0:
        return S
    cap = min(S, max_lanes,
              max(128, (budget_bytes // max(bytes_per_lane, 1)) // 128 * 128))
    t = cap
    while t >= 128:
        if S % t == 0:
            return t
        t -= 128
    return S


def _vmem_limit_bytes(per_step_bytes):
    """Double-buffered pipeline + headroom; capped so v7x (64 MiB VMEM) is safe."""
    need = 2 * per_step_bytes + (4 << 20)
    return int(min(max(need, 32 << 20), 48 << 20))


# -----------------------------------------------------------------------------
# Pallas kernel 1: fused style-code network
#   CommonCode (two Linear+ReLU) followed by all 14 IndividualCode heads fused
#   into one lane-dense (128, 44*ngf) matmul.  One launch instead of 16.
# -----------------------------------------------------------------------------
def _style_code_kernel(v_ref, w1_ref, b1_ref, w2_ref, b2_ref, wh_ref, bh_ref, o_ref):
    c = jnp.dot(v_ref[...], w1_ref[...], preferred_element_type=jnp.float32) + b1_ref[...]
    c = jnp.maximum(c, 0.0)
    c = jnp.dot(c, w2_ref[...], preferred_element_type=jnp.float32) + b2_ref[...]
    c = jnp.maximum(c, 0.0)
    o = jnp.dot(c, wh_ref[...], preferred_element_type=jnp.float32) + bh_ref[...]
    o_ref[...] = o.astype(o_ref.dtype)


def style_codes(p, voxel, head_names, head_dims):
    """Returns dict name -> (mean, std), each (N, C_name)."""
    whs, bhs = [], []
    for name in head_names:
        whs.append(p[name + '_mw']); bhs.append(p[name + '_mb'])
        whs.append(p[name + '_sw']); bhs.append(p[name + '_sb'])
    wh = jnp.concatenate(whs, axis=1).astype(jnp.float32)            # (128, total)
    bh = jnp.concatenate(bhs, axis=0).reshape(1, -1).astype(jnp.float32)
    total = wh.shape[1]

    v = voxel.astype(jnp.float32)
    N = v.shape[0]
    w1 = p['cc_w1'].astype(jnp.float32)
    b1 = p['cc_b1'].reshape(1, -1).astype(jnp.float32)
    w2 = p['cc_w2'].astype(jnp.float32)
    b2 = p['cc_b2'].reshape(1, -1).astype(jnp.float32)

    args = (v, w1, b1, w2, b2, wh, bh)
    out = pl.pallas_call(
        _style_code_kernel,
        out_shape=jax.ShapeDtypeStruct((N, total), jnp.float32),
        grid=(1,),
        in_specs=[_full_spec(a.shape) for a in args],
        out_specs=_full_spec((N, total)),
    )(*args)

    codes = {}
    off = 0
    for name in head_names:
        c = head_dims[name]
        m = out[:, off:off + c]; off += c
        s = out[:, off:off + c]; off += c
        codes[name] = (m, s)
    return codes


# -----------------------------------------------------------------------------
# AdaIN epilogue (shared): collapsed to one per-channel FMA, alpha specialized.
#   AdaIN + blend:  z = alpha*(s*rstd*(y-mu)+m) + (1-alpha)*y
#                    = (alpha*s*rstd + (1-alpha)) * y + alpha*(m - s*rstd*mu)
# -----------------------------------------------------------------------------
def _adain_epilogue(y, mu, var, m, s, skip, wl, bl, *, alpha, eps, relu):
    rstd = jax.lax.rsqrt(var + eps)
    srs = s * rstd                                      # (Co, 1)
    if alpha == 1.0:                                    # trace-time specialization
        a = srs
        c = m - srs * mu
    else:
        a = alpha * srs + (1.0 - alpha)
        c = alpha * (m - srs * mu)
    z = a * y + c                                       # one per-channel FMA per elem
    if relu:
        z = jnp.maximum(z, 0.0)
    if skip is not None:                                # decoder additive skip
        z = z + skip.astype(jnp.float32)
    if wl is not None:                                  # fused 1x1x1 last_conv
        z = jnp.dot(wl, z, preferred_element_type=jnp.float32) + bl
    return z


# -----------------------------------------------------------------------------
# Kernel 2a: fully fused single-block layer (small S levels).
#   conv matmul + bias + single-pass stats + AdaIN FMA + ReLU (+skip) (+last_conv)
# -----------------------------------------------------------------------------
def _conv_adain_fused_kernel(*refs, alpha, eps, inv_s, relu, has_skip, has_last):
    refs = list(refs)
    w_ref = refs.pop(0); b_ref = refs.pop(0); x_ref = refs.pop(0)
    m_ref = refs.pop(0); s_ref = refs.pop(0)
    skip_ref = refs.pop(0) if has_skip else None
    wl_ref = refs.pop(0) if has_last else None
    bl_ref = refs.pop(0) if has_last else None
    o_ref = refs.pop(0)

    y = jnp.dot(w_ref[...], x_ref[...], preferred_element_type=jnp.float32) + b_ref[...]
    mu = jnp.sum(y, axis=1, keepdims=True) * inv_s
    var = jnp.maximum(jnp.sum(y * y, axis=1, keepdims=True) * inv_s - mu * mu, 0.0)
    z = _adain_epilogue(
        y, mu, var, m_ref[...], s_ref[...],
        None if skip_ref is None else skip_ref[...],
        None if wl_ref is None else wl_ref[...],
        None if bl_ref is None else bl_ref[...],
        alpha=alpha, eps=eps, relu=relu)
    o_ref[...] = z.astype(o_ref.dtype)


# -----------------------------------------------------------------------------
# Kernel 2b (pass 1 of tiled path): conv matmul + bias, write bf16 conv output,
# accumulate per-channel sum / sum-of-squares into resident (Co,1) outputs.
# -----------------------------------------------------------------------------
def _conv_stats_kernel(w_ref, b_ref, x_ref, y_ref, sum_ref, sq_ref):
    y = jnp.dot(w_ref[...], x_ref[...], preferred_element_type=jnp.float32) + b_ref[...]
    y_ref[...] = y.astype(y_ref.dtype)

    @pl.when(pl.program_id(1) == 0)
    def _():
        sum_ref[...] = jnp.zeros_like(sum_ref)
        sq_ref[...] = jnp.zeros_like(sq_ref)

    sum_ref[...] += jnp.sum(y, axis=1, keepdims=True)
    sq_ref[...] += jnp.sum(y * y, axis=1, keepdims=True)


# -----------------------------------------------------------------------------
# Kernel 2c (pass 2 of tiled path): per-channel FMA epilogue per spatial tile.
# -----------------------------------------------------------------------------
def _adain_apply_kernel(*refs, alpha, eps, inv_s, relu, has_skip, has_last):
    refs = list(refs)
    y_ref = refs.pop(0); sum_ref = refs.pop(0); sq_ref = refs.pop(0)
    m_ref = refs.pop(0); s_ref = refs.pop(0)
    skip_ref = refs.pop(0) if has_skip else None
    wl_ref = refs.pop(0) if has_last else None
    bl_ref = refs.pop(0) if has_last else None
    o_ref = refs.pop(0)

    y = y_ref[...].astype(jnp.float32)
    mu = sum_ref[...] * inv_s
    var = jnp.maximum(sq_ref[...] * inv_s - mu * mu, 0.0)
    z = _adain_epilogue(
        y, mu, var, m_ref[...], s_ref[...],
        None if skip_ref is None else skip_ref[...],
        None if wl_ref is None else wl_ref[...],
        None if bl_ref is None else bl_ref[...],
        alpha=alpha, eps=eps, relu=relu)
    o_ref[...] = z.astype(o_ref.dtype)


# -----------------------------------------------------------------------------
# im2col in (N, Ci*k^3, S) layout -- reshape-only glue, done in bf16.
# TODO(synk): move patch construction into the kernel (27 shifted matmuls from a
# halo'd VMEM tile) so the k^3-expanded tensor never hits HBM.
# -----------------------------------------------------------------------------
def _im2col_ncs(x, k, stride, padding):
    N, Ci, D, H, W = x.shape
    if padding > 0:
        x = jnp.pad(x, ((0, 0), (0, 0),
                        (padding, padding), (padding, padding), (padding, padding)))
    oD = (D + 2 * padding - k) // stride + 1
    oH = (H + 2 * padding - k) // stride + 1
    oW = (W + 2 * padding - k) // stride + 1
    patches = []
    for dz in range(k):
        for dy in range(k):
            for dx in range(k):
                patches.append(
                    x[:, :,
                      dz:dz + (oD - 1) * stride + 1:stride,
                      dy:dy + (oH - 1) * stride + 1:stride,
                      dx:dx + (oW - 1) * stride + 1:stride])
    p = jnp.stack(patches, axis=2)                     # (N, Ci, k^3, oD, oH, oW)
    p = p.reshape(N, Ci * k * k * k, oD * oH * oW)     # contiguous reshape only
    return p, (oD, oH, oW)


def upsample_nearest2(x):
    # single reshape -> broadcast -> reshape (no repeated materialization)
    # TODO(synk): fuse the 2x replication into the conv patch gather.
    N, C, D, H, W = x.shape
    x = x.reshape(N, C, D, 1, H, 1, W, 1)
    x = jnp.broadcast_to(x, (N, C, D, 2, H, 2, W, 2))
    return x.reshape(N, C, 2 * D, 2 * H, 2 * W)


# -----------------------------------------------------------------------------
# One U-Net layer: Conv3d -> AdaIN -> alpha blend -> ReLU (-> +skip) (-> last_conv)
# -----------------------------------------------------------------------------
def conv_adain_block(x, w, b, m, s, alpha, *, stride=1, padding=1, relu=True,
                     skip=None, last_w=None, last_b=None, eps=1e-5):
    N, Ci = x.shape[0], x.shape[1]
    Co, _, k, _, _ = w.shape
    # bf16 BEFORE im2col: the 27x-expanded intermediate moves half the bytes.
    patches, (oD, oH, oW) = _im2col_ncs(x.astype(jnp.bfloat16), k, stride, padding)
    K = Ci * k * k * k
    S = oD * oH * oW

    has_skip = skip is not None
    has_last = last_w is not None
    out_C = last_w.shape[0] if has_last else Co
    out_dtype = jnp.float32 if has_last else jnp.bfloat16

    tS = _pick_spatial_tile(S, bytes_per_lane=2 * K + 4 * Co + 4 * out_C)
    nS = S // tS

    wm = w.reshape(Co, K).astype(jnp.bfloat16)           # MXU in bf16
    b2 = b.reshape(Co, 1).astype(jnp.float32)
    m3 = m.reshape(N, Co, 1).astype(jnp.float32)
    s3 = s.reshape(N, Co, 1).astype(jnp.float32)
    skip3 = skip.reshape(N, Co, S).astype(jnp.bfloat16) if has_skip else None
    if has_last:
        wl = last_w.reshape(out_C, Co).astype(jnp.float32)
        bl = last_b.reshape(out_C, 1).astype(jnp.float32)

    # BlockSpecs shared by both paths (grid = (N, nS); nS may be 1).
    spec_w = pl.BlockSpec((Co, K), lambda n, sb: (0, 0))
    spec_b = pl.BlockSpec((Co, 1), lambda n, sb: (0, 0))
    spec_x = pl.BlockSpec((None, K, tS), lambda n, sb: (n, 0, sb))
    spec_code = pl.BlockSpec((None, Co, 1), lambda n, sb: (n, 0, 0))
    spec_ytile = pl.BlockSpec((None, Co, tS), lambda n, sb: (n, 0, sb))
    spec_stat = pl.BlockSpec((None, Co, 1), lambda n, sb: (n, 0, 0))
    spec_skip = pl.BlockSpec((None, Co, tS), lambda n, sb: (n, 0, sb))
    spec_out = pl.BlockSpec((None, out_C, tS), lambda n, sb: (n, 0, sb))
    spec_wl = pl.BlockSpec((out_C, Co), lambda n, sb: (0, 0))
    spec_bl = pl.BlockSpec((out_C, 1), lambda n, sb: (0, 0))

    per_step_bytes = (Co * K * 2 + K * tS * 2 + Co * tS * 2 + out_C * tS * 4
                      + (Co * tS * 2 if has_skip else 0) + (1 << 20))
    vlim = _vmem_limit_bytes(per_step_bytes)

    common_kw = dict(alpha=float(alpha), eps=float(eps), inv_s=1.0 / S,
                     relu=relu, has_skip=has_skip, has_last=has_last)

    if nS == 1:
        # Fully fused single-launch layer (small / deep levels).
        args = [wm, b2, patches, m3, s3]
        in_specs = [spec_w, spec_b, spec_x, spec_code, spec_code]
        if has_skip:
            args.append(skip3); in_specs.append(spec_skip)
        if has_last:
            args += [wl, bl]; in_specs += [spec_wl, spec_bl]
        out = pl.pallas_call(
            functools.partial(_conv_adain_fused_kernel, **common_kw),
            out_shape=jax.ShapeDtypeStruct((N, out_C, S), out_dtype),
            grid=(N, 1),
            in_specs=in_specs,
            out_specs=spec_out,
            compiler_params=pltpu.CompilerParams(
                dimension_semantics=("parallel", "parallel"),
                vmem_limit_bytes=vlim),
        )(*args)
    else:
        # Pass 1: conv + per-channel sum/sumsq accumulated across spatial tiles.
        y, ssum, ssq = pl.pallas_call(
            _conv_stats_kernel,
            out_shape=(jax.ShapeDtypeStruct((N, Co, S), jnp.bfloat16),
                       jax.ShapeDtypeStruct((N, Co, 1), jnp.float32),
                       jax.ShapeDtypeStruct((N, Co, 1), jnp.float32)),
            grid=(N, nS),
            in_specs=[spec_w, spec_b, spec_x],
            out_specs=(spec_ytile, spec_stat, spec_stat),
            compiler_params=pltpu.CompilerParams(
                dimension_semantics=("parallel", "arbitrary"),
                vmem_limit_bytes=vlim),
        )(wm, b2, patches)

        # Pass 2: per-channel FMA epilogue (+ReLU +skip +fused last_conv) per tile.
        args = [y, ssum, ssq, m3, s3]
        in_specs = [spec_ytile, spec_stat, spec_stat, spec_code, spec_code]
        if has_skip:
            args.append(skip3); in_specs.append(spec_skip)
        if has_last:
            args += [wl, bl]; in_specs += [spec_wl, spec_bl]
        out = pl.pallas_call(
            functools.partial(_adain_apply_kernel, **common_kw),
            out_shape=jax.ShapeDtypeStruct((N, out_C, S), out_dtype),
            grid=(N, nS),
            in_specs=in_specs,
            out_specs=spec_out,
            compiler_params=pltpu.CompilerParams(
                dimension_semantics=("parallel", "parallel"),
                vmem_limit_bytes=vlim),
        )(*args)

    return out.reshape(N, out_C, oD, oH, oW)


# -----------------------------------------------------------------------------
# Deterministic parameter initialization (synthetic weights)
# -----------------------------------------------------------------------------
def _init_linear(key, din, dout):
    kw, kb = jax.random.split(key)
    w = jax.random.normal(kw, (din, dout), jnp.float32) * (1.0 / (din ** 0.5))
    b = jax.random.normal(kb, (dout,), jnp.float32) * 0.01
    return w, b


def _init_conv(key, co, ci, k):
    kw, kb = jax.random.split(key)
    w = jax.random.normal(kw, (co, ci, k, k, k), jnp.float32) * (1.0 / ((ci * k ** 3) ** 0.5))
    b = jax.random.normal(kb, (co,), jnp.float32) * 0.01
    return w, b


def init_params(key, in_channels, out_channels, ngf):
    keys = iter(jax.random.split(key, 32))
    p = {}
    # CommonCode(3, 128)
    p['cc_w1'], p['cc_b1'] = _init_linear(next(keys), 3, 128)
    p['cc_w2'], p['cc_b2'] = _init_linear(next(keys), 128, 128)
    # IndividualCode(128, C) heads
    code_dims = {'d1': ngf, 'd2': ngf * 2, 'd3': ngf * 4, 'br': ngf * 8,
                 'u3': ngf * 4, 'u2': ngf * 2, 'u1': ngf}
    for name, c in code_dims.items():
        p[name + '_mw'], p[name + '_mb'] = _init_linear(next(keys), 128, c)
        p[name + '_sw'], p[name + '_sb'] = _init_linear(next(keys), 128, c)
    # Conv blocks
    p['down1_w'], p['down1_b'] = _init_conv(next(keys), ngf, in_channels, 3)
    p['down2_w'], p['down2_b'] = _init_conv(next(keys), ngf * 2, ngf, 3)
    p['down3_w'], p['down3_b'] = _init_conv(next(keys), ngf * 4, ngf * 2, 3)
    p['bridge_w'], p['bridge_b'] = _init_conv(next(keys), ngf * 8, ngf * 4, 3)
    p['up3_w'], p['up3_b'] = _init_conv(next(keys), ngf * 4, ngf * 8, 3)
    p['up2_w'], p['up2_b'] = _init_conv(next(keys), ngf * 2, ngf * 4, 3)
    p['up1_w'], p['up1_b'] = _init_conv(next(keys), ngf, ngf * 2, 3)
    p['last_w'], p['last_b'] = _init_conv(next(keys), out_channels, ngf, 1)
    return p, code_dims


# -----------------------------------------------------------------------------
# Unet_AdaIN forward
# -----------------------------------------------------------------------------
def unet_adain_forward(params, code_dims, x, voxel, alpha=1.0):
    p = params
    head_names = ['d1', 'd2', 'd3', 'br', 'u3', 'u2', 'u1']

    # Fused CommonCode + all IndividualCode heads: one Pallas launch.
    codes = style_codes(p, voxel, head_names, code_dims)

    xb = x.astype(jnp.bfloat16)   # bf16 activations end-to-end

    # Encoder (each level: fused conv+AdaIN+ReLU, spatially tiled where large)
    d1 = conv_adain_block(xb, p['down1_w'], p['down1_b'], *codes['d1'], alpha, stride=1)
    d2 = conv_adain_block(d1, p['down2_w'], p['down2_b'], *codes['d2'], alpha, stride=2)
    d3 = conv_adain_block(d2, p['down3_w'], p['down3_b'], *codes['d3'], alpha, stride=2)
    br = conv_adain_block(d3, p['bridge_w'], p['bridge_b'], *codes['br'], alpha, stride=2)

    # Decoder (upsample -> fused conv+AdaIN+ReLU+skip); last_conv fused into up1.
    u3 = conv_adain_block(upsample_nearest2(br), p['up3_w'], p['up3_b'],
                          *codes['u3'], alpha, stride=1, skip=d3)
    u2 = conv_adain_block(upsample_nearest2(u3), p['up2_w'], p['up2_b'],
                          *codes['u2'], alpha, stride=1, skip=d2)
    out = conv_adain_block(upsample_nearest2(u2), p['up1_w'], p['up1_b'],
                           *codes['u1'], alpha, stride=1, skip=d1,
                           last_w=p['last_w'], last_b=p['last_b'])
    return out


if __name__ == "__main__":
    key = jax.random.PRNGKey(0)
    kx, kv, kp = jax.random.split(key, 3)

    in_channels, out_channels, ngf = 2, 2, 8
    N, D = 2, 16

    x = jax.random.normal(kx, (N, in_channels, D, D, D), jnp.float32)   # NCDHW
    voxel = jax.random.normal(kv, (N, 3), jnp.float32)                  # voxel condition code
    params, code_dims = init_params(kp, in_channels, out_channels, ngf)

    fwd = jax.jit(functools.partial(unet_adain_forward, params, code_dims, alpha=1.0))
    out = fwd(x, voxel)
    out = jax.block_until_ready(out)
    assert out.shape == (N, out_channels, D, D, D), out.shape
    assert bool(jnp.all(jnp.isfinite(out)))
    print("KERNEL_OK")
</pallas_src>

<mosaic_0001>
module attributes {stable_mosaic.version = 11 : i64} {
  func.func @_conv_stats_kernel(%arg0: i32, %arg1: i32, %arg2: memref<8x54xbf16, #tpu.memory_space<vmem>>, %arg3: memref<8x1xf32, #tpu.memory_space<vmem>>, %arg4: memref<1x54x2048xbf16, #tpu.memory_space<vmem>>, %arg5: memref<1x8x2048xbf16, #tpu.memory_space<vmem>>, %arg6: memref<1x8x1xf32, #tpu.memory_space<vmem>>, %arg7: memref<1x8x1xf32, #tpu.memory_space<vmem>>) attributes {dimension_semantics = [#tpu.dimension_semantics<parallel>, #tpu.dimension_semantics<arbitrary>], iteration_bounds = array<i64: 2, 2>, scalar_prefetch = 0 : i64, scratch_operands = 0 : i64, tpu.core_type = #tpu.core_type<tc>, window_params = [{pipeline_mode = #tpu.pipeline_mode<synchronous>, transform_indices = @transform_0, window_bounds = array<i64: 8, 54>}, {pipeline_mode = #tpu.pipeline_mode<synchronous>, transform_indices = @transform_1, window_bounds = array<i64: 8, 1>}, {transform_indices = @transform_2, window_bounds = array<i64: 1, 54, 2048>}, {transform_indices = @transform_3, window_bounds = array<i64: 1, 8, 2048>}, {transform_indices = @transform_4, window_bounds = array<i64: 1, 8, 1>}, {transform_indices = @transform_5, window_bounds = array<i64: 1, 8, 1>}]} {
    %c0 = arith.constant 0 : index
    %c0_0 = arith.constant 0 : index
    %0 = vector.load %arg2[%c0, %c0_0] : memref<8x54xbf16, #tpu.memory_space<vmem>>, vector<8x54xbf16>
    %c0_1 = arith.constant 0 : index
    %c0_2 = arith.constant 0 : index
    %c0_3 = arith.constant 0 : index
    %1 = vector.load %arg4[%c0_1, %c0_2, %c0_3] : memref<1x54x2048xbf16, #tpu.memory_space<vmem>>, vector<1x54x2048xbf16>
    %2 = vector.shape_cast %1 : vector<1x54x2048xbf16> to vector<54x2048xbf16>
    %cst = arith.constant dense<0.000000e+00> : vector<8x2048xf32>
    %3 = tpu.matmul %0, %2, %cst {dimension_numbers = #tpu.dot_dimension_numbers<[1], [0], [0], [1], [0, 0, 1, 1], [], []>} : vector<8x54xbf16>, vector<54x2048xbf16>, vector<8x2048xf32> -> vector<8x2048xf32>
    %c0_4 = arith.constant 0 : index
    %c0_5 = arith.constant 0 : index
    %4 = vector.load %arg3[%c0_4, %c0_5] : memref<8x1xf32, #tpu.memory_space<vmem>>, vector<8x1xf32>
    %5 = vector.broadcast %4 : vector<8x1xf32> to vector<8x2048xf32>
    %6 = arith.addf %3, %5 : vector<8x2048xf32>
    %7 = arith.truncf %6 : vector<8x2048xf32> to vector<8x2048xbf16>
    %c0_6 = arith.constant 0 : index
    %c0_7 = arith.constant 0 : index
    %c0_8 = arith.constant 0 : index
    %8 = vector.load %arg5[%c0_6, %c0_7, %c0_8] : memref<1x8x2048xbf16, #tpu.memory_space<vmem>>, vector<1x8x2048xbf16>
    %9 = vector.shape_cast %8 : vector<1x8x2048xbf16> to vector<8x2048xbf16>
    %10 = vector.shape_cast %7 : vector<8x2048xbf16> to vector<1x8x2048xbf16>
    tpu.vector_store %arg5[%c0_6, %c0_7, %c0_8], %10 {strides = array<i32>} : memref<1x8x2048xbf16, #tpu.memory_space<vmem>>, vector<1x8x2048xbf16>,
    %c0_i32 = arith.constant 0 : i32
    %11 = arith.cmpi eq, %arg1, %c0_i32 : i32
    %12 = arith.extui %11 : i1 to i32
    %c0_i32_9 = arith.constant 0 : i32
    %13 = arith.cmpi ne, %12, %c0_i32_9 : i32
    scf.if %13 {
      %cst_24 = arith.constant 0.000000e+00 : f32
      %31 = vector.broadcast %cst_24 : f32 to vector<8x1xf32>
      %c0_25 = arith.constant 0 : index
      %c0_26 = arith.constant 0 : index
      %c0_27 = arith.constant 0 : index
      %32 = vector.load %arg6[%c0_25, %c0_26, %c0_27] : memref<1x8x1xf32, #tpu.memory_space<vmem>>, vector<1x8x1xf32>
      %33 = vector.shape_cast %32 : vector<1x8x1xf32> to vector<8x1xf32>
      %34 = vector.shape_cast %31 : vector<8x1xf32> to vector<1x8x1xf32>
      tpu.vector_store %arg6[%c0_25, %c0_26, %c0_27], %34 {strides = array<i32>} : memref<1x8x1xf32, #tpu.memory_space<vmem>>, vector<1x8x1xf32>,
      %cst_28 = arith.constant 0.000000e+00 : f32
      %35 = vector.broadcast %cst_28 : f32 to vector<8x1xf32>
      %c0_29 = arith.constant 0 : index
      %c0_30 = arith.constant 0 : index
      %c0_31 = arith.constant 0 : index
      %36 = vector.load %arg7[%c0_29, %c0_30, %c0_31] : memref<1x8x1xf32, #tpu.memory_space<vmem>>, vector<1x8x1xf32>
      %37 = vector.shape_cast %36 : vector<1x8x1xf32> to vector<8x1xf32>
      %38 = vector.shape_cast %35 : vector<8x1xf32> to vector<1x8x1xf32>
      tpu.vector_store %arg7[%c0_29, %c0_30, %c0_31], %38 {strides = array<i32>} : memref<1x8x1xf32, #tpu.memory_space<vmem>>, vector<1x8x1xf32>,
    } else {
    }
    %c0_10 = arith.constant 0 : index
    %c0_11 = arith.constant 0 : index
    %c0_12 = arith.constant 0 : index
    %14 = vector.load %arg6[%c0_10, %c0_11, %c0_12] : memref<1x8x1xf32, #tpu.memory_space<vmem>>, vector<1x8x1xf32>
    %15 = vector.shape_cast %14 : vector<1x8x1xf32> to vector<8x1xf32>
    %cst_13 = arith.constant dense<0.000000e+00> : vector<8xf32>
    %16 = vector.multi_reduction <add>, %6, %cst_13 [1] : vector<8x2048xf32> to vector<8xf32>
    %17 = vector.shape_cast %16 : vector<8xf32> to vector<8x1xf32>
    %18 = arith.addf %15, %17 : vector<8x1xf32>
    %c0_14 = arith.constant 0 : index
    %c0_15 = arith.constant 0 : index
    %c0_16 = arith.constant 0 : index
    %19 = vector.load %arg6[%c0_14, %c0_15, %c0_16] : memref<1x8x1xf32, #tpu.memory_space<vmem>>, vector<1x8x1xf32>
    %20 = vector.shape_cast %19 : vector<1x8x1xf32> to vector<8x1xf32>
    %21 = vector.shape_cast %18 : vector<8x1xf32> to vector<1x8x1xf32>
    tpu.vector_store %arg6[%c0_14, %c0_15, %c0_16], %21 {strides = array<i32>} : memref<1x8x1xf32, #tpu.memory_space<vmem>>, vector<1x8x1xf32>,
    %c0_17 = arith.constant 0 : index
    %c0_18 = arith.constant 0 : index
    %c0_19 = arith.constant 0 : index
    %22 = vector.load %arg7[%c0_17, %c0_18, %c0_19] : memref<1x8x1xf32, #tpu.memory_space<vmem>>, vector<1x8x1xf32>
    %23 = vector.shape_cast %22 : vector<1x8x1xf32> to vector<8x1xf32>
    %24 = arith.mulf %6, %6 : vector<8x2048xf32>
    %cst_20 = arith.constant dense<0.000000e+00> : vector<8xf32>
    %25 = vector.multi_reduction <add>, %24, %cst_20 [1] : vector<8x2048xf32> to vector<8xf32>
    %26 = vector.shape_cast %25 : vector<8xf32> to vector<8x1xf32>
    %27 = arith.addf %23, %26 : vector<8x1xf32>
    %c0_21 = arith.constant 0 : index
    %c0_22 = arith.constant 0 : index
    %c0_23 = arith.constant 0 : index
    %28 = vector.load %arg7[%c0_21, %c0_22, %c0_23] : memref<1x8x1xf32, #tpu.memory_space<vmem>>, vector<1x8x1xf32>
    %29 = vector.shape_cast %28 : vector<1x8x1xf32> to vector<8x1xf32>
    %30 = vector.shape_cast %27 : vector<8x1xf32> to vector<1x8x1xf32>
    tpu.vector_store %arg7[%c0_21, %c0_22, %c0_23], %30 {strides = array<i32>} : memref<1x8x1xf32, #tpu.memory_space<vmem>>, vector<1x8x1xf32>,
    return
  }
  func.func @transform_0(%arg0: i32, %arg1: i32) -> (i32, i32) {
    %c0_i32 = arith.constant 0 : i32
    %c0_i32_0 = arith.constant 0 : i32
    %c0_i32_1 = arith.constant 0 : i32
    return %c0_i32, %c0_i32_0 : i32, i32
  }
  func.func @transform_1(%arg0: i32, %arg1: i32) -> (i32, i32) {
    %c0_i32 = arith.constant 0 : i32
    %c0_i32_0 = arith.constant 0 : i32
    %c0_i32_1 = arith.constant 0 : i32
    return %c0_i32, %c0_i32_0 : i32, i32
  }
  func.func @transform_2(%arg0: i32, %arg1: i32) -> (i32, i32, i32) {
    %c0_i32 = arith.constant 0 : i32
    %c0_i32_0 = arith.constant 0 : i32
    return %arg0, %c0_i32, %arg1 : i32, i32, i32
  }
  func.func @transform_3(%arg0: i32, %arg1: i32) -> (i32, i32, i32) {
    %c0_i32 = arith.constant 0 : i32
    %c0_i32_0 = arith.constant 0 : i32
    return %arg0, %c0_i32, %arg1 : i32, i32, i32
  }
  func.func @transform_4(%arg0: i32, %arg1: i32) -> (i32, i32, i32) {
    %c0_i32 = arith.constant 0 : i32
    %c0_i32_0 = arith.constant 0 : i32
    %c0_i32_1 = arith.constant 0 : i32
    return %arg0, %c0_i32, %c0_i32_0 : i32, i32, i32
  }
  func.func @transform_5(%arg0: i32, %arg1: i32) -> (i32, i32, i32) {
    %c0_i32 = arith.constant 0 : i32
    %c0_i32_0 = arith.constant 0 : i32
    %c0_i32_1 = arith.constant 0 : i32
    return %arg0, %c0_i32, %c0_i32_0 : i32, i32, i32
  }
}

module attributes {stable_mosaic.version = 11 : i64} {
  func.func @_style_code_kernel(%arg0: i32, %arg1: memref<2x3xf32, #tpu.memory_space<vmem>>, %arg2: memref<3x128xf32, #tpu.memory_space<vmem>>, %arg3: memref<1x128xf32, #tpu.memory_space<vmem>>, %arg4: memref<128x128xf32, #tpu.memory_space<vmem>>, %arg5: memref<1x128xf32, #tpu.memory_space<vmem>>, %arg6: memref<128x352xf32, #tpu.memory_space<vmem>>, %arg7: memref<1x352xf32, #tpu.memory_space<vmem>>, %arg8: memref<2x352xf32, #tpu.memory_space<vmem>>) attributes {dimension_semantics = [#tpu.dimension_semantics<arbitrary>], iteration_bounds = array<i64: 1>, scalar_prefetch = 0 : i64, scratch_operands = 0 : i64, tpu.core_type = #tpu.core_type<tc>, window_params = [{pipeline_mode = #tpu.pipeline_mode<synchronous>, transform_indices = @transform_0, window_bounds = array<i64: 2, 3>}, {pipeline_mode = #tpu.pipeline_mode<synchronous>, transform_indices = @transform_1, window_bounds = array<i64: 3, 128>}, {pipeline_mode = #tpu.pipeline_mode<synchronous>, transform_indices = @transform_2, window_bounds = array<i64: 1, 128>}, {pipeline_mode = #tpu.pipeline_mode<synchronous>, transform_indices = @transform_3, window_bounds = array<i64: 128, 128>}, {pipeline_mode = #tpu.pipeline_mode<synchronous>, transform_indices = @transform_4, window_bounds = array<i64: 1, 128>}, {pipeline_mode = #tpu.pipeline_mode<synchronous>, transform_indices = @transform_5, window_bounds = array<i64: 128, 352>}, {pipeline_mode = #tpu.pipeline_mode<synchronous>, transform_indices = @transform_6, window_bounds = array<i64: 1, 352>}, {pipeline_mode = #tpu.pipeline_mode<synchronous>, transform_indices = @transform_7, window_bounds = array<i64: 2, 352>}]} {
    %c0 = arith.constant 0 : index
    %c0_0 = arith.constant 0 : index
    %0 = vector.load %arg1[%c0, %c0_0] : memref<2x3xf32, #tpu.memory_space<vmem>>, vector<2x3xf32>
    %c0_1 = arith.constant 0 : index
    %c0_2 = arith.constant 0 : index
    %1 = vector.load %arg2[%c0_1, %c0_2] : memref<3x128xf32, #tpu.memory_space<vmem>>, vector<3x128xf32>
    %cst = arith.constant dense<0.000000e+00> : vector<2x128xf32>
    %2 = tpu.matmul %0, %1, %cst {dimension_numbers = #tpu.dot_dimension_numbers<[1], [0], [0], [1], [0, 0, 1, 1], [], []>} : vector<2x3xf32>, vector<3x128xf32>, vector<2x128xf32> -> vector<2x128xf32>
    %c0_3 = arith.constant 0 : index
    %c0_4 = arith.constant 0 : index
    %3 = vector.load %arg3[%c0_3, %c0_4] : memref<1x128xf32, #tpu.memory_space<vmem>>, vector<1x128xf32>
    %4 = vector.broadcast %3 : vector<1x128xf32> to vector<2x128xf32>
    %5 = arith.addf %2, %4 : vector<2x128xf32>
    %cst_5 = arith.constant 0.000000e+00 : f32
    %6 = vector.broadcast %cst_5 : f32 to vector<2x128xf32>
    %7 = arith.maximumf %5, %6 : vector<2x128xf32>
    %c0_6 = arith.constant 0 : index
    %c0_7 = arith.constant 0 : index
    %8 = vector.load %arg4[%c0_6, %c0_7] : memref<128x128xf32, #tpu.memory_space<vmem>>, vector<128x128xf32>
    %cst_8 = arith.constant dense<0.000000e+00> : vector<2x128xf32>
    %9 = tpu.matmul %7, %8, %cst_8 {dimension_numbers = #tpu.dot_dimension_numbers<[1], [0], [0], [1], [0, 0, 1, 1], [], []>} : vector<2x128xf32>, vector<128x128xf32>, vector<2x128xf32> -> vector<2x128xf32>
    %c0_9 = arith.constant 0 : index
    %c0_10 = arith.constant 0 : index
    %10 = vector.load %arg5[%c0_9, %c0_10] : memref<1x128xf32, #tpu.memory_space<vmem>>, vector<1x128xf32>
    %11 = vector.broadcast %10 : vector<1x128xf32> to vector<2x128xf32>
    %12 = arith.addf %9, %11 : vector<2x128xf32>
    %cst_11 = arith.constant 0.000000e+00 : f32
    %13 = vector.broadcast %cst_11 : f32 to vector<2x128xf32>
    %14 = arith.maximumf %12, %13 : vector<2x128xf32>
    %c0_12 = arith.constant 0 : index
    %c0_13 = arith.constant 0 : index
    %15 = vector.load %arg6[%c0_12, %c0_13] : memref<128x352xf32, #tpu.memory_space<vmem>>, vector<128x352xf32>
    %cst_14 = arith.constant dense<0.000000e+00> : vector<2x352xf32>
    %16 = tpu.matmul %14, %15, %cst_14 {dimension_numbers = #tpu.dot_dimension_numbers<[1], [0], [0], [1], [0, 0, 1, 1], [], []>} : vector<2x128xf32>, vector<128x352xf32>, vector<2x352xf32> -> vector<2x352xf32>
    %c0_15 = arith.constant 0 : index
    %c0_16 = arith.constant 0 : index
    %17 = vector.load %arg7[%c0_15, %c0_16] : memref<1x352xf32, #tpu.memory_space<vmem>>, vector<1x352xf32>
    %18 = vector.broadcast %17 : vector<1x352xf32> to vector<2x352xf32>
    %19 = arith.addf %16, %18 : vector<2x352xf32>
    %c0_17 = arith.constant 0 : index
    %c0_18 = arith.constant 0 : index
    %20 = vector.load %arg8[%c0_17, %c0_18] : memref<2x352xf32, #tpu.memory_space<vmem>>, vector<2x352xf32>
    tpu.vector_store %arg8[%c0_17, %c0_18], %19 {strides = array<i32>} : memref<2x352xf32, #tpu.memory_space<vmem>>, vector<2x352xf32>,
    return
  }
  func.func @transform_0(%arg0: i32) -> (i32, i32) {
    %c0_i32 = arith.constant 0 : i32
    %c0_i32_0 = arith.constant 0 : i32
    %c0_i32_1 = arith.constant 0 : i32
    return %c0_i32, %c0_i32_0 : i32, i32
  }
  func.func @transform_1(%arg0: i32) -> (i32, i32) {
    %c0_i32 = arith.constant 0 : i32
    %c0_i32_0 = arith.constant 0 : i32
    %c0_i32_1 = arith.constant 0 : i32
    return %c0_i32, %c0_i32_0 : i32, i32
  }
  func.func @transform_2(%arg0: i32) -> (i32, i32) {
    %c0_i32 = arith.constant 0 : i32
    %c0_i32_0 = arith.constant 0 : i32
    %c0_i32_1 = arith.constant 0 : i32
    return %c0_i32, %c0_i32_0 : i32, i32
  }
  func.func @transform_3(%arg0: i32) -> (i32, i32) {
    %c0_i32 = arith.constant 0 : i32
    %c0_i32_0 = arith.constant 0 : i32
    %c0_i32_1 = arith.constant 0 : i32
    return %c0_i32, %c0_i32_0 : i32, i32
  }
  func.func @transform_4(%arg0: i32) -> (i32, i32) {
    %c0_i32 = arith.constant 0 : i32
    %c0_i32_0 = arith.constant 0 : i32
    %c0_i32_1 = arith.constant 0 : i32
    return %c0_i32, %c0_i32_0 : i32, i32
  }
  func.func @transform_5(%arg0: i32) -> (i32, i32) {
    %c0_i32 = arith.constant 0 : i32
    %c0_i32_0 = arith.constant 0 : i32
    %c0_i32_1 = arith.constant 0 : i32
    return %c0_i32, %c0_i32_0 : i32, i32
  }
  func.func @transform_6(%arg0: i32) -> (i32, i32) {
    %c0_i32 = arith.constant 0 : i32
    %c0_i32_0 = arith.constant 0 : i32
    %c0_i32_1 = arith.constant 0 : i32
    return %c0_i32, %c0_i32_0 : i32, i32
  }
  func.func @transform_7(%arg0: i32) -> (i32, i32) {
    %c0_i32 = arith.constant 0 : i32
    %c0_i32_0 = arith.constant 0 : i32
    %c0_i32_1 = arith.constant 0 : i32
    return %c0_i32, %c0_i32_0 : i32, i32
  }
}

module attributes {stable_mosaic.version = 11 : i64} {
  func.func @_adain_apply_kernel(%arg0: i32, %arg1: i32, %arg2: memref<1x8x2048xbf16, #tpu.memory_space<vmem>>, %arg3: memref<1x8x1xf32, #tpu.memory_space<vmem>>, %arg4: memref<1x8x1xf32, #tpu.memory_space<vmem>>, %arg5: memref<1x8x1xf32, #tpu.memory_space<vmem>>, %arg6: memref<1x8x1xf32, #tpu.memory_space<vmem>>, %arg7: memref<1x8x2048xbf16, #tpu.memory_space<vmem>>) attributes {dimension_semantics = [#tpu.dimension_semantics<parallel>, #tpu.dimension_semantics<parallel>], iteration_bounds = array<i64: 2, 2>, scalar_prefetch = 0 : i64, scratch_operands = 0 : i64, tpu.core_type = #tpu.core_type<tc>, window_params = [{transform_indices = @transform_0, window_bounds = array<i64: 1, 8, 2048>}, {transform_indices = @transform_1, window_bounds = array<i64: 1, 8, 1>}, {transform_indices = @transform_2, window_bounds = array<i64: 1, 8, 1>}, {transform_indices = @transform_3, window_bounds = array<i64: 1, 8, 1>}, {transform_indices = @transform_4, window_bounds = array<i64: 1, 8, 1>}, {transform_indices = @transform_5, window_bounds = array<i64: 1, 8, 2048>}]} {
    %c0 = arith.constant 0 : index
    %c0_0 = arith.constant 0 : index
    %c0_1 = arith.constant 0 : index
    %0 = vector.load %arg2[%c0, %c0_0, %c0_1] : memref<1x8x2048xbf16, #tpu.memory_space<vmem>>, vector<1x8x2048xbf16>
    %1 = vector.shape_cast %0 : vector<1x8x2048xbf16> to vector<8x2048xbf16>
    %2 = arith.extf %1 : vector<8x2048xbf16> to vector<8x2048xf32>
    %c0_2 = arith.constant 0 : index
    %c0_3 = arith.constant 0 : index
    %c0_4 = arith.constant 0 : index
    %3 = vector.load %arg3[%c0_2, %c0_3, %c0_4] : memref<1x8x1xf32, #tpu.memory_space<vmem>>, vector<1x8x1xf32>
    %4 = vector.shape_cast %3 : vector<1x8x1xf32> to vector<8x1xf32>
    %cst = arith.constant 2.44140625E-4 : f32
    %5 = vector.broadcast %cst : f32 to vector<8x1xf32>
    %6 = arith.mulf %4, %5 : vector<8x1xf32>
    %c0_5 = arith.constant 0 : index
    %c0_6 = arith.constant 0 : index
    %c0_7 = arith.constant 0 : index
    %7 = vector.load %arg4[%c0_5, %c0_6, %c0_7] : memref<1x8x1xf32, #tpu.memory_space<vmem>>, vector<1x8x1xf32>
    %8 = vector.shape_cast %7 : vector<1x8x1xf32> to vector<8x1xf32>
    %cst_8 = arith.constant 2.44140625E-4 : f32
    %9 = vector.broadcast %cst_8 : f32 to vector<8x1xf32>
    %10 = arith.mulf %8, %9 : vector<8x1xf32>
    %11 = arith.mulf %6, %6 : vector<8x1xf32>
    %12 = arith.subf %10, %11 : vector<8x1xf32>
    %cst_9 = arith.constant 0.000000e+00 : f32
    %13 = vector.broadcast %cst_9 : f32 to vector<8x1xf32>
    %14 = arith.maximumf %12, %13 : vector<8x1xf32>
    %c0_10 = arith.constant 0 : index
    %c0_11 = arith.constant 0 : index
    %c0_12 = arith.constant 0 : index
    %15 = vector.load %arg5[%c0_10, %c0_11, %c0_12] : memref<1x8x1xf32, #tpu.memory_space<vmem>>, vector<1x8x1xf32>
    %16 = vector.shape_cast %15 : vector<1x8x1xf32> to vector<8x1xf32>
    %c0_13 = arith.constant 0 : index
    %c0_14 = arith.constant 0 : index
    %c0_15 = arith.constant 0 : index
    %17 = vector.load %arg6[%c0_13, %c0_14, %c0_15] : memref<1x8x1xf32, #tpu.memory_space<vmem>>, vector<1x8x1xf32>
    %18 = vector.shape_cast %17 : vector<1x8x1xf32> to vector<8x1xf32>
    %cst_16 = arith.constant 9.99999974E-6 : f32
    %19 = vector.broadcast %cst_16 : f32 to vector<8x1xf32>
    %20 = arith.addf %14, %19 : vector<8x1xf32>
    %21 = math.rsqrt %20 : vector<8x1xf32>
    %22 = arith.mulf %18, %21 : vector<8x1xf32>
    %23 = arith.mulf %22, %6 : vector<8x1xf32>
    %24 = arith.subf %16, %23 : vector<8x1xf32>
    %25 = vector.broadcast %22 : vector<8x1xf32> to vector<8x2048xf32>
    %26 = arith.mulf %25, %2 : vector<8x2048xf32>
    %27 = vector.broadcast %24 : vector<8x1xf32> to vector<8x2048xf32>
    %28 = arith.addf %26, %27 : vector<8x2048xf32>
    %cst_17 = arith.constant 0.000000e+00 : f32
    %29 = vector.broadcast %cst_17 : f32 to vector<8x2048xf32>
    %30 = arith.maximumf %28, %29 : vector<8x2048xf32>
    %31 = arith.truncf %30 : vector<8x2048xf32> to vector<8x2048xbf16>
    %c0_18 = arith.constant 0 : index
    %c0_19 = arith.constant 0 : index
    %c0_20 = arith.constant 0 : index
    %32 = vector.load %arg7[%c0_18, %c0_19, %c0_20] : memref<1x8x2048xbf16, #tpu.memory_space<vmem>>, vector<1x8x2048xbf16>
    %33 = vector.shape_cast %32 : vector<1x8x2048xbf16> to vector<8x2048xbf16>
    %34 = vector.shape_cast %31 : vector<8x2048xbf16> to vector<1x8x2048xbf16>
    tpu.vector_store %arg7[%c0_18, %c0_19, %c0_20], %34 {strides = array<i32>} : memref<1x8x2048xbf16, #tpu.memory_space<vmem>>, vector<1x8x2048xbf16>,
    return
  }
  func.func @transform_0(%arg0: i32, %arg1: i32) -> (i32, i32, i32) {
    %c0_i32 = arith.constant 0 : i32
    %c0_i32_0 = arith.constant 0 : i32
    return %arg0, %c0_i32, %arg1 : i32, i32, i32
  }
  func.func @transform_1(%arg0: i32, %arg1: i32) -> (i32, i32, i32) {
    %c0_i32 = arith.constant 0 : i32
    %c0_i32_0 = arith.constant 0 : i32
    %c0_i32_1 = arith.constant 0 : i32
    return %arg0, %c0_i32, %c0_i32_0 : i32, i32, i32
  }
  func.func @transform_2(%arg0: i32, %arg1: i32) -> (i32, i32, i32) {
    %c0_i32 = arith.constant 0 : i32
    %c0_i32_0 = arith.constant 0 : i32
    %c0_i32_1 = arith.constant 0 : i32
    return %arg0, %c0_i32, %c0_i32_0 : i32, i32, i32
  }
  func.func @transform_3(%arg0: i32, %arg1: i32) -> (i32, i32, i32) {
    %c0_i32 = arith.constant 0 : i32
    %c0_i32_0 = arith.constant 0 : i32
    %c0_i32_1 = arith.constant 0 : i32
    return %arg0, %c0_i32, %c0_i32_0 : i32, i32, i32
  }
  func.func @transform_4(%arg0: i32, %arg1: i32) -> (i32, i32, i32) {
    %c0_i32 = arith.constant 0 : i32
    %c0_i32_0 = arith.constant 0 : i32
    %c0_i32_1 = arith.constant 0 : i32
    return %arg0, %c0_i32, %c0_i32_0 : i32, i32, i32
  }
  func.func @transform_5(%arg0: i32, %arg1: i32) -> (i32, i32, i32) {
    %c0_i32 = arith.constant 0 : i32
    %c0_i32_0 = arith.constant 0 : i32
    return %arg0, %c0_i32, %arg1 : i32, i32, i32
  }
}

module attributes {stable_mosaic.version = 11 : i64} {
  func.func @_conv_adain_fused_kernel(%arg0: i32, %arg1: i32, %arg2: memref<16x216xbf16, #tpu.memory_space<vmem>>, %arg3: memref<16x1xf32, #tpu.memory_space<vmem>>, %arg4: memref<1x216x512xbf16, #tpu.memory_space<vmem>>, %arg5: memref<1x16x1xf32, #tpu.memory_space<vmem>>, %arg6: memref<1x16x1xf32, #tpu.memory_space<vmem>>, %arg7: memref<1x16x512xbf16, #tpu.memory_space<vmem>>) attributes {dimension_semantics = [#tpu.dimension_semantics<parallel>, #tpu.dimension_semantics<parallel>], iteration_bounds = array<i64: 2, 1>, scalar_prefetch = 0 : i64, scratch_operands = 0 : i64, tpu.core_type = #tpu.core_type<tc>, window_params = [{pipeline_mode = #tpu.pipeline_mode<synchronous>, transform_indices = @transform_0, window_bounds = array<i64: 16, 216>}, {pipeline_mode = #tpu.pipeline_mode<synchronous>, transform_indices = @transform_1, window_bounds = array<i64: 16, 1>}, {transform_indices = @transform_2, window_bounds = array<i64: 1, 216, 512>}, {transform_indices = @transform_3, window_bounds = array<i64: 1, 16, 1>}, {transform_indices = @transform_4, window_bounds = array<i64: 1, 16, 1>}, {transform_indices = @transform_5, window_bounds = array<i64: 1, 16, 512>}]} {
    %c0 = arith.constant 0 : index
    %c0_0 = arith.constant 0 : index
    %0 = vector.load %arg2[%c0, %c0_0] : memref<16x216xbf16, #tpu.memory_space<vmem>>, vector<16x216xbf16>
    %c0_1 = arith.constant 0 : index
    %c0_2 = arith.constant 0 : index
    %c0_3 = arith.constant 0 : index
    %1 = vector.load %arg4[%c0_1, %c0_2, %c0_3] : memref<1x216x512xbf16, #tpu.memory_space<vmem>>, vector<1x216x512xbf16>
    %2 = vector.shape_cast %1 : vector<1x216x512xbf16> to vector<216x512xbf16>
    %cst = arith.constant dense<0.000000e+00> : vector<16x512xf32>
    %3 = tpu.matmul %0, %2, %cst {dimension_numbers = #tpu.dot_dimension_numbers<[1], [0], [0], [1], [0, 0, 1, 1], [], []>} : vector<16x216xbf16>, vector<216x512xbf16>, vector<16x512xf32> -> vector<16x512xf32>
    %c0_4 = arith.constant 0 : index
    %c0_5 = arith.constant 0 : index
    %4 = vector.load %arg3[%c0_4, %c0_5] : memref<16x1xf32, #tpu.memory_space<vmem>>, vector<16x1xf32>
    %5 = vector.broadcast %4 : vector<16x1xf32> to vector<16x512xf32>
    %6 = arith.addf %3, %5 : vector<16x512xf32>
    %cst_6 = arith.constant dense<0.000000e+00> : vector<16xf32>
    %7 = vector.multi_reduction <add>, %6, %cst_6 [1] : vector<16x512xf32> to vector<16xf32>
    %8 = vector.shape_cast %7 : vector<16xf32> to vector<16x1xf32>
    %cst_7 = arith.constant 0.001953125 : f32
    %9 = vector.broadcast %cst_7 : f32 to vector<16x1xf32>
    %10 = arith.mulf %8, %9 : vector<16x1xf32>
    %11 = arith.mulf %6, %6 : vector<16x512xf32>
    %cst_8 = arith.constant dense<0.000000e+00> : vector<16xf32>
    %12 = vector.multi_reduction <add>, %11, %cst_8 [1] : vector<16x512xf32> to vector<16xf32>
    %13 = vector.shape_cast %12 : vector<16xf32> to vector<16x1xf32>
    %cst_9 = arith.constant 0.001953125 : f32
    %14 = vector.broadcast %cst_9 : f32 to vector<16x1xf32>
    %15 = arith.mulf %13, %14 : vector<16x1xf32>
    %16 = arith.mulf %10, %10 : vector<16x1xf32>
    %17 = arith.subf %15, %16 : vector<16x1xf32>
    %cst_10 = arith.constant 0.000000e+00 : f32
    %18 = vector.broadcast %cst_10 : f32 to vector<16x1xf32>
    %19 = arith.maximumf %17, %18 : vector<16x1xf32>
    %c0_11 = arith.constant 0 : index
    %c0_12 = arith.constant 0 : index
    %c0_13 = arith.constant 0 : index
    %20 = vector.load %arg5[%c0_11, %c0_12, %c0_13] : memref<1x16x1xf32, #tpu.memory_space<vmem>>, vector<1x16x1xf32>
    %21 = vector.shape_cast %20 : vector<1x16x1xf32> to vector<16x1xf32>
    %c0_14 = arith.constant 0 : index
    %c0_15 = arith.constant 0 : index
    %c0_16 = arith.constant 0 : index
    %22 = vector.load %arg6[%c0_14, %c0_15, %c0_16] : memref<1x16x1xf32, #tpu.memory_space<vmem>>, vector<1x16x1xf32>
    %23 = vector.shape_cast %22 : vector<1x16x1xf32> to vector<16x1xf32>
    %cst_17 = arith.constant 9.99999974E-6 : f32
    %24 = vector.broadcast %cst_17 : f32 to vector<16x1xf32>
    %25 = arith.addf %19, %24 : vector<16x1xf32>
    %26 = math.rsqrt %25 : vector<16x1xf32>
    %27 = arith.mulf %23, %26 : vector<16x1xf32>
    %28 = arith.mulf %27, %10 : vector<16x1xf32>
    %29 = arith.subf %21, %28 : vector<16x1xf32>
    %30 = vector.broadcast %27 : vector<16x1xf32> to vector<16x512xf32>
    %31 = arith.mulf %30, %6 : vector<16x512xf32>
    %32 = vector.broadcast %29 : vector<16x1xf32> to vector<16x512xf32>
    %33 = arith.addf %31, %32 : vector<16x512xf32>
    %cst_18 = arith.constant 0.000000e+00 : f32
    %34 = vector.broadcast %cst_18 : f32 to vector<16x512xf32>
    %35 = arith.maximumf %33, %34 : vector<16x512xf32>
    %36 = arith.truncf %35 : vector<16x512xf32> to vector<16x512xbf16>
    %c0_19 = arith.constant 0 : index
    %c0_20 = arith.constant 0 : index
    %c0_21 = arith.constant 0 : index
    %37 = vector.load %arg7[%c0_19, %c0_20, %c0_21] : memref<1x16x512xbf16, #tpu.memory_space<vmem>>, vector<1x16x512xbf16>
    %38 = vector.shape_cast %37 : vector<1x16x512xbf16> to vector<16x512xbf16>
    %39 = vector.shape_cast %36 : vector<16x512xbf16> to vector<1x16x512xbf16>
    tpu.vector_store %arg7[%c0_19, %c0_20, %c0_21], %39 {strides = array<i32>} : memref<1x16x512xbf16, #tpu.memory_space<vmem>>, vector<1x16x512xbf16>,
    return
  }
  func.func @transform_0(%arg0: i32, %arg1: i32) -> (i32, i32) {
    %c0_i32 = arith.constant 0 : i32
    %c0_i32_0 = arith.constant 0 : i32
    %c0_i32_1 = arith.constant 0 : i32
    return %c0_i32, %c0_i32_0 : i32, i32
  }
  func.func @transform_1(%arg0: i32, %arg1: i32) -> (i32, i32) {
    %c0_i32 = arith.constant 0 : i32
    %c0_i32_0 = arith.constant 0 : i32
    %c0_i32_1 = arith.constant 0 : i32
    return %c0_i32, %c0_i32_0 : i32, i32
  }
  func.func @transform_2(%arg0: i32, %arg1: i32) -> (i32, i32, i32) {
    %c0_i32 = arith.constant 0 : i32
    %c0_i32_0 = arith.constant 0 : i32
    return %arg0, %c0_i32, %arg1 : i32, i32, i32
  }
  func.func @transform_3(%arg0: i32, %arg1: i32) -> (i32, i32, i32) {
    %c0_i32 = arith.constant 0 : i32
    %c0_i32_0 = arith.constant 0 : i32
    %c0_i32_1 = arith.constant 0 : i32
    return %arg0, %c0_i32, %c0_i32_0 : i32, i32, i32
  }
  func.func @transform_4(%arg0: i32, %arg1: i32) -> (i32, i32, i32) {
    %c0_i32 = arith.constant 0 : i32
    %c0_i32_0 = arith.constant 0 : i32
    %c0_i32_1 = arith.constant 0 : i32
    return %arg0, %c0_i32, %c0_i32_0 : i32, i32, i32
  }
  func.func @transform_5(%arg0: i32, %arg1: i32) -> (i32, i32, i32) {
    %c0_i32 = arith.constant 0 : i32
    %c0_i32_0 = arith.constant 0 : i32
    return %arg0, %c0_i32, %arg1 : i32, i32, i32
  }
}

module attributes {stable_mosaic.version = 11 : i64} {
  func.func @_conv_adain_fused_kernel(%arg0: i32, %arg1: i32, %arg2: memref<32x432xbf16, #tpu.memory_space<vmem>>, %arg3: memref<32x1xf32, #tpu.memory_space<vmem>>, %arg4: memref<1x432x64xbf16, #tpu.memory_space<vmem>>, %arg5: memref<1x32x1xf32, #tpu.memory_space<vmem>>, %arg6: memref<1x32x1xf32, #tpu.memory_space<vmem>>, %arg7: memref<1x32x64xbf16, #tpu.memory_space<vmem>>) attributes {dimension_semantics = [#tpu.dimension_semantics<parallel>, #tpu.dimension_semantics<parallel>], iteration_bounds = array<i64: 2, 1>, scalar_prefetch = 0 : i64, scratch_operands = 0 : i64, tpu.core_type = #tpu.core_type<tc>, window_params = [{pipeline_mode = #tpu.pipeline_mode<synchronous>, transform_indices = @transform_0, window_bounds = array<i64: 32, 432>}, {pipeline_mode = #tpu.pipeline_mode<synchronous>, transform_indices = @transform_1, window_bounds = array<i64: 32, 1>}, {transform_indices = @transform_2, window_bounds = array<i64: 1, 432, 64>}, {transform_indices = @transform_3, window_bounds = array<i64: 1, 32, 1>}, {transform_indices = @transform_4, window_bounds = array<i64: 1, 32, 1>}, {transform_indices = @transform_5, window_bounds = array<i64: 1, 32, 64>}]} {
    %c0 = arith.constant 0 : index
    %c0_0 = arith.constant 0 : index
    %0 = vector.load %arg2[%c0, %c0_0] : memref<32x432xbf16, #tpu.memory_space<vmem>>, vector<32x432xbf16>
    %c0_1 = arith.constant 0 : index
    %c0_2 = arith.constant 0 : index
    %c0_3 = arith.constant 0 : index
    %1 = vector.load %arg4[%c0_1, %c0_2, %c0_3] : memref<1x432x64xbf16, #tpu.memory_space<vmem>>, vector<1x432x64xbf16>
    %2 = vector.shape_cast %1 : vector<1x432x64xbf16> to vector<432x64xbf16>
    %cst = arith.constant dense<0.000000e+00> : vector<32x64xf32>
    %3 = tpu.matmul %0, %2, %cst {dimension_numbers = #tpu.dot_dimension_numbers<[1], [0], [0], [1], [0, 0, 1, 1], [], []>} : vector<32x432xbf16>, vector<432x64xbf16>, vector<32x64xf32> -> vector<32x64xf32>
    %c0_4 = arith.constant 0 : index
    %c0_5 = arith.constant 0 : index
    %4 = vector.load %arg3[%c0_4, %c0_5] : memref<32x1xf32, #tpu.memory_space<vmem>>, vector<32x1xf32>
    %5 = vector.broadcast %4 : vector<32x1xf32> to vector<32x64xf32>
    %6 = arith.addf %3, %5 : vector<32x64xf32>
    %cst_6 = arith.constant dense<0.000000e+00> : vector<32xf32>
    %7 = vector.multi_reduction <add>, %6, %cst_6 [1] : vector<32x64xf32> to vector<32xf32>
    %8 = vector.shape_cast %7 : vector<32xf32> to vector<32x1xf32>
    %cst_7 = arith.constant 1.562500e-02 : f32
    %9 = vector.broadcast %cst_7 : f32 to vector<32x1xf32>
    %10 = arith.mulf %8, %9 : vector<32x1xf32>
    %11 = arith.mulf %6, %6 : vector<32x64xf32>
    %cst_8 = arith.constant dense<0.000000e+00> : vector<32xf32>
    %12 = vector.multi_reduction <add>, %11, %cst_8 [1] : vector<32x64xf32> to vector<32xf32>
    %13 = vector.shape_cast %12 : vector<32xf32> to vector<32x1xf32>
    %cst_9 = arith.constant 1.562500e-02 : f32
    %14 = vector.broadcast %cst_9 : f32 to vector<32x1xf32>
    %15 = arith.mulf %13, %14 : vector<32x1xf32>
    %16 = arith.mulf %10, %10 : vector<32x1xf32>
    %17 = arith.subf %15, %16 : vector<32x1xf32>
    %cst_10 = arith.constant 0.000000e+00 : f32
    %18 = vector.broadcast %cst_10 : f32 to vector<32x1xf32>
    %19 = arith.maximumf %17, %18 : vector<32x1xf32>
    %c0_11 = arith.constant 0 : index
    %c0_12 = arith.constant 0 : index
    %c0_13 = arith.constant 0 : index
    %20 = vector.load %arg5[%c0_11, %c0_12, %c0_13] : memref<1x32x1xf32, #tpu.memory_space<vmem>>, vector<1x32x1xf32>
    %21 = vector.shape_cast %20 : vector<1x32x1xf32> to vector<32x1xf32>
    %c0_14 = arith.constant 0 : index
    %c0_15 = arith.constant 0 : index
    %c0_16 = arith.constant 0 : index
    %22 = vector.load %arg6[%c0_14, %c0_15, %c0_16] : memref<1x32x1xf32, #tpu.memory_space<vmem>>, vector<1x32x1xf32>
    %23 = vector.shape_cast %22 : vector<1x32x1xf32> to vector<32x1xf32>
    %cst_17 = arith.constant 9.99999974E-6 : f32
    %24 = vector.broadcast %cst_17 : f32 to vector<32x1xf32>
    %25 = arith.addf %19, %24 : vector<32x1xf32>
    %26 = math.rsqrt %25 : vector<32x1xf32>
    %27 = arith.mulf %23, %26 : vector<32x1xf32>
    %28 = arith.mulf %27, %10 : vector<32x1xf32>
    %29 = arith.subf %21, %28 : vector<32x1xf32>
    %30 = vector.broadcast %27 : vector<32x1xf32> to vector<32x64xf32>
    %31 = arith.mulf %30, %6 : vector<32x64xf32>
    %32 = vector.broadcast %29 : vector<32x1xf32> to vector<32x64xf32>
    %33 = arith.addf %31, %32 : vector<32x64xf32>
    %cst_18 = arith.constant 0.000000e+00 : f32
    %34 = vector.broadcast %cst_18 : f32 to vector<32x64xf32>
    %35 = arith.maximumf %33, %34 : vector<32x64xf32>
    %36 = arith.truncf %35 : vector<32x64xf32> to vector<32x64xbf16>
    %c0_19 = arith.constant 0 : index
    %c0_20 = arith.constant 0 : index
    %c0_21 = arith.constant 0 : index
    %37 = vector.load %arg7[%c0_19, %c0_20, %c0_21] : memref<1x32x64xbf16, #tpu.memory_space<vmem>>, vector<1x32x64xbf16>
    %38 = vector.shape_cast %37 : vector<1x32x64xbf16> to vector<32x64xbf16>
    %39 = vector.shape_cast %36 : vector<32x64xbf16> to vector<1x32x64xbf16>
    tpu.vector_store %arg7[%c0_19, %c0_20, %c0_21], %39 {strides = array<i32>} : memref<1x32x64xbf16, #tpu.memory_space<vmem>>, vector<1x32x64xbf16>,
    return
  }
  func.func @transform_0(%arg0: i32, %arg1: i32) -> (i32, i32) {
    %c0_i32 = arith.constant 0 : i32
    %c0_i32_0 = arith.constant 0 : i32
    %c0_i32_1 = arith.constant 0 : i32
    return %c0_i32, %c0_i32_0 : i32, i32
  }
  func.func @transform_1(%arg0: i32, %arg1: i32) -> (i32, i32) {
    %c0_i32 = arith.constant 0 : i32
    %c0_i32_0 = arith.constant 0 : i32
    %c0_i32_1 = arith.constant 0 : i32
    return %c0_i32, %c0_i32_0 : i32, i32
  }
  func.func @transform_2(%arg0: i32, %arg1: i32) -> (i32, i32, i32) {
    %c0_i32 = arith.constant 0 : i32
    %c0_i32_0 = arith.constant 0 : i32
    return %arg0, %c0_i32, %arg1 : i32, i32, i32
  }
  func.func @transform_3(%arg0: i32, %arg1: i32) -> (i32, i32, i32) {
    %c0_i32 = arith.constant 0 : i32
    %c0_i32_0 = arith.constant 0 : i32
    %c0_i32_1 = arith.constant 0 : i32
    return %arg0, %c0_i32, %c0_i32_0 : i32, i32, i32
  }
  func.func @transform_4(%arg0: i32, %arg1: i32) -> (i32, i32, i32) {
    %c0_i32 = arith.constant 0 : i32
    %c0_i32_0 = arith.constant 0 : i32
    %c0_i32_1 = arith.constant 0 : i32
    return %arg0, %c0_i32, %c0_i32_0 : i32, i32, i32
  }
  func.func @transform_5(%arg0: i32, %arg1: i32) -> (i32, i32, i32) {
    %c0_i32 = arith.constant 0 : i32
    %c0_i32_0 = arith.constant 0 : i32
    return %arg0, %c0_i32, %arg1 : i32, i32, i32
  }
}

module attributes {stable_mosaic.version = 11 : i64} {
  func.func @_conv_adain_fused_kernel(%arg0: i32, %arg1: i32, %arg2: memref<64x864xbf16, #tpu.memory_space<vmem>>, %arg3: memref<64x1xf32, #tpu.memory_space<vmem>>, %arg4: memref<1x864x8xbf16, #tpu.memory_space<vmem>>, %arg5: memref<1x64x1xf32, #tpu.memory_space<vmem>>, %arg6: memref<1x64x1xf32, #tpu.memory_space<vmem>>, %arg7: memref<1x64x8xbf16, #tpu.memory_space<vmem>>) attributes {dimension_semantics = [#tpu.dimension_semantics<parallel>, #tpu.dimension_semantics<parallel>], iteration_bounds = array<i64: 2, 1>, scalar_prefetch = 0 : i64, scratch_operands = 0 : i64, tpu.core_type = #tpu.core_type<tc>, window_params = [{pipeline_mode = #tpu.pipeline_mode<synchronous>, transform_indices = @transform_0, window_bounds = array<i64: 64, 864>}, {pipeline_mode = #tpu.pipeline_mode<synchronous>, transform_indices = @transform_1, window_bounds = array<i64: 64, 1>}, {transform_indices = @transform_2, window_bounds = array<i64: 1, 864, 8>}, {transform_indices = @transform_3, window_bounds = array<i64: 1, 64, 1>}, {transform_indices = @transform_4, window_bounds = array<i64: 1, 64, 1>}, {transform_indices = @transform_5, window_bounds = array<i64: 1, 64, 8>}]} {
    %c0 = arith.constant 0 : index
    %c0_0 = arith.constant 0 : index
    %0 = vector.load %arg2[%c0, %c0_0] : memref<64x864xbf16, #tpu.memory_space<vmem>>, vector<64x864xbf16>
    %c0_1 = arith.constant 0 : index
    %c0_2 = arith.constant 0 : index
    %c0_3 = arith.constant 0 : index
    %1 = vector.load %arg4[%c0_1, %c0_2, %c0_3] : memref<1x864x8xbf16, #tpu.memory_space<vmem>>, vector<1x864x8xbf16>
    %2 = vector.shape_cast %1 : vector<1x864x8xbf16> to vector<864x8xbf16>
    %cst = arith.constant dense<0.000000e+00> : vector<64x8xf32>
    %3 = tpu.matmul %0, %2, %cst {dimension_numbers = #tpu.dot_dimension_numbers<[1], [0], [0], [1], [0, 0, 1, 1], [], []>} : vector<64x864xbf16>, vector<864x8xbf16>, vector<64x8xf32> -> vector<64x8xf32>
    %c0_4 = arith.constant 0 : index
    %c0_5 = arith.constant 0 : index
    %4 = vector.load %arg3[%c0_4, %c0_5] : memref<64x1xf32, #tpu.memory_space<vmem>>, vector<64x1xf32>
    %5 = vector.broadcast %4 : vector<64x1xf32> to vector<64x8xf32>
    %6 = arith.addf %3, %5 : vector<64x8xf32>
    %cst_6 = arith.constant dense<0.000000e+00> : vector<64xf32>
    %7 = vector.multi_reduction <add>, %6, %cst_6 [1] : vector<64x8xf32> to vector<64xf32>
    %8 = vector.shape_cast %7 : vector<64xf32> to vector<64x1xf32>
    %cst_7 = arith.constant 1.250000e-01 : f32
    %9 = vector.broadcast %cst_7 : f32 to vector<64x1xf32>
    %10 = arith.mulf %8, %9 : vector<64x1xf32>
    %11 = arith.mulf %6, %6 : vector<64x8xf32>
    %cst_8 = arith.constant dense<0.000000e+00> : vector<64xf32>
    %12 = vector.multi_reduction <add>, %11, %cst_8 [1] : vector<64x8xf32> to vector<64xf32>
    %13 = vector.shape_cast %12 : vector<64xf32> to vector<64x1xf32>
    %cst_9 = arith.constant 1.250000e-01 : f32
    %14 = vector.broadcast %cst_9 : f32 to vector<64x1xf32>
    %15 = arith.mulf %13, %14 : vector<64x1xf32>
    %16 = arith.mulf %10, %10 : vector<64x1xf32>
    %17 = arith.subf %15, %16 : vector<64x1xf32>
    %cst_10 = arith.constant 0.000000e+00 : f32
    %18 = vector.broadcast %cst_10 : f32 to vector<64x1xf32>
    %19 = arith.maximumf %17, %18 : vector<64x1xf32>
    %c0_11 = arith.constant 0 : index
    %c0_12 = arith.constant 0 : index
    %c0_13 = arith.constant 0 : index
    %20 = vector.load %arg5[%c0_11, %c0_12, %c0_13] : memref<1x64x1xf32, #tpu.memory_space<vmem>>, vector<1x64x1xf32>
    %21 = vector.shape_cast %20 : vector<1x64x1xf32> to vector<64x1xf32>
    %c0_14 = arith.constant 0 : index
    %c0_15 = arith.constant 0 : index
    %c0_16 = arith.constant 0 : index
    %22 = vector.load %arg6[%c0_14, %c0_15, %c0_16] : memref<1x64x1xf32, #tpu.memory_space<vmem>>, vector<1x64x1xf32>
    %23 = vector.shape_cast %22 : vector<1x64x1xf32> to vector<64x1xf32>
    %cst_17 = arith.constant 9.99999974E-6 : f32
    %24 = vector.broadcast %cst_17 : f32 to vector<64x1xf32>
    %25 = arith.addf %19, %24 : vector<64x1xf32>
    %26 = math.rsqrt %25 : vector<64x1xf32>
    %27 = arith.mulf %23, %26 : vector<64x1xf32>
    %28 = arith.mulf %27, %10 : vector<64x1xf32>
    %29 = arith.subf %21, %28 : vector<64x1xf32>
    %30 = vector.broadcast %27 : vector<64x1xf32> to vector<64x8xf32>
    %31 = arith.mulf %30, %6 : vector<64x8xf32>
    %32 = vector.broadcast %29 : vector<64x1xf32> to vector<64x8xf32>
    %33 = arith.addf %31, %32 : vector<64x8xf32>
    %cst_18 = arith.constant 0.000000e+00 : f32
    %34 = vector.broadcast %cst_18 : f32 to vector<64x8xf32>
    %35 = arith.maximumf %33, %34 : vector<64x8xf32>
    %36 = arith.truncf %35 : vector<64x8xf32> to vector<64x8xbf16>
    %c0_19 = arith.constant 0 : index
    %c0_20 = arith.constant 0 : index
    %c0_21 = arith.constant 0 : index
    %37 = vector.load %arg7[%c0_19, %c0_20, %c0_21] : memref<1x64x8xbf16, #tpu.memory_space<vmem>>, vector<1x64x8xbf16>
    %38 = vector.shape_cast %37 : vector<1x64x8xbf16> to vector<64x8xbf16>
    %39 = vector.shape_cast %36 : vector<64x8xbf16> to vector<1x64x8xbf16>
    tpu.vector_store %arg7[%c0_19, %c0_20, %c0_21], %39 {strides = array<i32>} : memref<1x64x8xbf16, #tpu.memory_space<vmem>>, vector<1x64x8xbf16>,
    return
  }
  func.func @transform_0(%arg0: i32, %arg1: i32) -> (i32, i32) {
    %c0_i32 = arith.constant 0 : i32
    %c0_i32_0 = arith.constant 0 : i32
    %c0_i32_1 = arith.constant 0 : i32
    return %c0_i32, %c0_i32_0 : i32, i32
  }
  func.func @transform_1(%arg0: i32, %arg1: i32) -> (i32, i32) {
    %c0_i32 = arith.constant 0 : i32
    %c0_i32_0 = arith.constant 0 : i32
    %c0_i32_1 = arith.constant 0 : i32
    return %c0_i32, %c0_i32_0 : i32, i32
  }
  func.func @transform_2(%arg0: i32, %arg1: i32) -> (i32, i32, i32) {
    %c0_i32 = arith.constant 0 : i32
    %c0_i32_0 = arith.constant 0 : i32
    return %arg0, %c0_i32, %arg1 : i32, i32, i32
  }
  func.func @transform_3(%arg0: i32, %arg1: i32) -> (i32, i32, i32) {
    %c0_i32 = arith.constant 0 : i32
    %c0_i32_0 = arith.constant 0 : i32
    %c0_i32_1 = arith.constant 0 : i32
    return %arg0, %c0_i32, %c0_i32_0 : i32, i32, i32
  }
  func.func @transform_4(%arg0: i32, %arg1: i32) -> (i32, i32, i32) {
    %c0_i32 = arith.constant 0 : i32
    %c0_i32_0 = arith.constant 0 : i32
    %c0_i32_1 = arith.constant 0 : i32
    return %arg0, %c0_i32, %c0_i32_0 : i32, i32, i32
  }
  func.func @transform_5(%arg0: i32, %arg1: i32) -> (i32, i32, i32) {
    %c0_i32 = arith.constant 0 : i32
    %c0_i32_0 = arith.constant 0 : i32
    return %arg0, %c0_i32, %arg1 : i32, i32, i32
  }
}

module attributes {stable_mosaic.version = 11 : i64} {
  func.func @_conv_adain_fused_kernel(%arg0: i32, %arg1: i32, %arg2: memref<32x1728xbf16, #tpu.memory_space<vmem>>, %arg3: memref<32x1xf32, #tpu.memory_space<vmem>>, %arg4: memref<1x1728x64xbf16, #tpu.memory_space<vmem>>, %arg5: memref<1x32x1xf32, #tpu.memory_space<vmem>>, %arg6: memref<1x32x1xf32, #tpu.memory_space<vmem>>, %arg7: memref<1x32x64xbf16, #tpu.memory_space<vmem>>, %arg8: memref<1x32x64xbf16, #tpu.memory_space<vmem>>) attributes {dimension_semantics = [#tpu.dimension_semantics<parallel>, #tpu.dimension_semantics<parallel>], iteration_bounds = array<i64: 2, 1>, scalar_prefetch = 0 : i64, scratch_operands = 0 : i64, tpu.core_type = #tpu.core_type<tc>, window_params = [{pipeline_mode = #tpu.pipeline_mode<synchronous>, transform_indices = @transform_0, window_bounds = array<i64: 32, 1728>}, {pipeline_mode = #tpu.pipeline_mode<synchronous>, transform_indices = @transform_1, window_bounds = array<i64: 32, 1>}, {transform_indices = @transform_2, window_bounds = array<i64: 1, 1728, 64>}, {transform_indices = @transform_3, window_bounds = array<i64: 1, 32, 1>}, {transform_indices = @transform_4, window_bounds = array<i64: 1, 32, 1>}, {transform_indices = @transform_5, window_bounds = array<i64: 1, 32, 64>}, {transform_indices = @transform_6, window_bounds = array<i64: 1, 32, 64>}]} {
    %c0 = arith.constant 0 : index
    %c0_0 = arith.constant 0 : index
    %0 = vector.load %arg2[%c0, %c0_0] : memref<32x1728xbf16, #tpu.memory_space<vmem>>, vector<32x1728xbf16>
    %c0_1 = arith.constant 0 : index
    %c0_2 = arith.constant 0 : index
    %c0_3 = arith.constant 0 : index
    %1 = vector.load %arg4[%c0_1, %c0_2, %c0_3] : memref<1x1728x64xbf16, #tpu.memory_space<vmem>>, vector<1x1728x64xbf16>
    %2 = vector.shape_cast %1 : vector<1x1728x64xbf16> to vector<1728x64xbf16>
    %cst = arith.constant dense<0.000000e+00> : vector<32x64xf32>
    %3 = tpu.matmul %0, %2, %cst {dimension_numbers = #tpu.dot_dimension_numbers<[1], [0], [0], [1], [0, 0, 1, 1], [], []>} : vector<32x1728xbf16>, vector<1728x64xbf16>, vector<32x64xf32> -> vector<32x64xf32>
    %c0_4 = arith.constant 0 : index
    %c0_5 = arith.constant 0 : index
    %4 = vector.load %arg3[%c0_4, %c0_5] : memref<32x1xf32, #tpu.memory_space<vmem>>, vector<32x1xf32>
    %5 = vector.broadcast %4 : vector<32x1xf32> to vector<32x64xf32>
    %6 = arith.addf %3, %5 : vector<32x64xf32>
    %cst_6 = arith.constant dense<0.000000e+00> : vector<32xf32>
    %7 = vector.multi_reduction <add>, %6, %cst_6 [1] : vector<32x64xf32> to vector<32xf32>
    %8 = vector.shape_cast %7 : vector<32xf32> to vector<32x1xf32>
    %cst_7 = arith.constant 1.562500e-02 : f32
    %9 = vector.broadcast %cst_7 : f32 to vector<32x1xf32>
    %10 = arith.mulf %8, %9 : vector<32x1xf32>
    %11 = arith.mulf %6, %6 : vector<32x64xf32>
    %cst_8 = arith.constant dense<0.000000e+00> : vector<32xf32>
    %12 = vector.multi_reduction <add>, %11, %cst_8 [1] : vector<32x64xf32> to vector<32xf32>
    %13 = vector.shape_cast %12 : vector<32xf32> to vector<32x1xf32>
    %cst_9 = arith.constant 1.562500e-02 : f32
    %14 = vector.broadcast %cst_9 : f32 to vector<32x1xf32>
    %15 = arith.mulf %13, %14 : vector<32x1xf32>
    %16 = arith.mulf %10, %10 : vector<32x1xf32>
    %17 = arith.subf %15, %16 : vector<32x1xf32>
    %cst_10 = arith.constant 0.000000e+00 : f32
    %18 = vector.broadcast %cst_10 : f32 to vector<32x1xf32>
    %19 = arith.maximumf %17, %18 : vector<32x1xf32>
    %c0_11 = arith.constant 0 : index
    %c0_12 = arith.constant 0 : index
    %c0_13 = arith.constant 0 : index
    %20 = vector.load %arg5[%c0_11, %c0_12, %c0_13] : memref<1x32x1xf32, #tpu.memory_space<vmem>>, vector<1x32x1xf32>
    %21 = vector.shape_cast %20 : vector<1x32x1xf32> to vector<32x1xf32>
    %c0_14 = arith.constant 0 : index
    %c0_15 = arith.constant 0 : index
    %c0_16 = arith.constant 0 : index
    %22 = vector.load %arg6[%c0_14, %c0_15, %c0_16] : memref<1x32x1xf32, #tpu.memory_space<vmem>>, vector<1x32x1xf32>
    %23 = vector.shape_cast %22 : vector<1x32x1xf32> to vector<32x1xf32>
    %c0_17 = arith.constant 0 : index
    %c0_18 = arith.constant 0 : index
    %c0_19 = arith.constant 0 : index
    %24 = vector.load %arg7[%c0_17, %c0_18, %c0_19] : memref<1x32x64xbf16, #tpu.memory_space<vmem>>, vector<1x32x64xbf16>
    %25 = vector.shape_cast %24 : vector<1x32x64xbf16> to vector<32x64xbf16>
    %cst_20 = arith.constant 9.99999974E-6 : f32
    %26 = vector.broadcast %cst_20 : f32 to vector<32x1xf32>
    %27 = arith.addf %19, %26 : vector<32x1xf32>
    %28 = math.rsqrt %27 : vector<32x1xf32>
    %29 = arith.mulf %23, %28 : vector<32x1xf32>
    %30 = arith.mulf %29, %10 : vector<32x1xf32>
    %31 = arith.subf %21, %30 : vector<32x1xf32>
    %32 = vector.broadcast %29 : vector<32x1xf32> to vector<32x64xf32>
    %33 = arith.mulf %32, %6 : vector<32x64xf32>
    %34 = vector.broadcast %31 : vector<32x1xf32> to vector<32x64xf32>
    %35 = arith.addf %33, %34 : vector<32x64xf32>
    %cst_21 = arith.constant 0.000000e+00 : f32
    %36 = vector.broadcast %cst_21 : f32 to vector<32x64xf32>
    %37 = arith.maximumf %35, %36 : vector<32x64xf32>
    %38 = arith.extf %25 : vector<32x64xbf16> to vector<32x64xf32>
    %39 = arith.addf %37, %38 : vector<32x64xf32>
    %40 = arith.truncf %39 : vector<32x64xf32> to vector<32x64xbf16>
    %c0_22 = arith.constant 0 : index
    %c0_23 = arith.constant 0 : index
    %c0_24 = arith.constant 0 : index
    %41 = vector.load %arg8[%c0_22, %c0_23, %c0_24] : memref<1x32x64xbf16, #tpu.memory_space<vmem>>, vector<1x32x64xbf16>
    %42 = vector.shape_cast %41 : vector<1x32x64xbf16> to vector<32x64xbf16>
    %43 = vector.shape_cast %40 : vector<32x64xbf16> to vector<1x32x64xbf16>
    tpu.vector_store %arg8[%c0_22, %c0_23, %c0_24], %43 {strides = array<i32>} : memref<1x32x64xbf16, #tpu.memory_space<vmem>>, vector<1x32x64xbf16>,
    return
  }
  func.func @transform_0(%arg0: i32, %arg1: i32) -> (i32, i32) {
    %c0_i32 = arith.constant 0 : i32
    %c0_i32_0 = arith.constant 0 : i32
    %c0_i32_1 = arith.constant 0 : i32
    return %c0_i32, %c0_i32_0 : i32, i32
  }
  func.func @transform_1(%arg0: i32, %arg1: i32) -> (i32, i32) {
    %c0_i32 = arith.constant 0 : i32
    %c0_i32_0 = arith.constant 0 : i32
    %c0_i32_1 = arith.constant 0 : i32
    return %c0_i32, %c0_i32_0 : i32, i32
  }
  func.func @transform_2(%arg0: i32, %arg1: i32) -> (i32, i32, i32) {
    %c0_i32 = arith.constant 0 : i32
    %c0_i32_0 = arith.constant 0 : i32
    return %arg0, %c0_i32, %arg1 : i32, i32, i32
  }
  func.func @transform_3(%arg0: i32, %arg1: i32) -> (i32, i32, i32) {
    %c0_i32 = arith.constant 0 : i32
    %c0_i32_0 = arith.constant 0 : i32
    %c0_i32_1 = arith.constant 0 : i32
    return %arg0, %c0_i32, %c0_i32_0 : i32, i32, i32
  }
  func.func @transform_4(%arg0: i32, %arg1: i32) -> (i32, i32, i32) {
    %c0_i32 = arith.constant 0 : i32
    %c0_i32_0 = arith.constant 0 : i32
    %c0_i32_1 = arith.constant 0 : i32
    return %arg0, %c0_i32, %c0_i32_0 : i32, i32, i32
  }
  func.func @transform_5(%arg0: i32, %arg1: i32) -> (i32, i32, i32) {
    %c0_i32 = arith.constant 0 : i32
    %c0_i32_0 = arith.constant 0 : i32
    return %arg0, %c0_i32, %arg1 : i32, i32, i32
  }
  func.func @transform_6(%arg0: i32, %arg1: i32) -> (i32, i32, i32) {
    %c0_i32 = arith.constant 0 : i32
    %c0_i32_0 = arith.constant 0 : i32
    return %arg0, %c0_i32, %arg1 : i32, i32, i32
  }
}

module attributes {stable_mosaic.version = 11 : i64} {
  func.func @_conv_adain_fused_kernel(%arg0: i32, %arg1: i32, %arg2: memref<16x864xbf16, #tpu.memory_space<vmem>>, %arg3: memref<16x1xf32, #tpu.memory_space<vmem>>, %arg4: memref<1x864x512xbf16, #tpu.memory_space<vmem>>, %arg5: memref<1x16x1xf32, #tpu.memory_space<vmem>>, %arg6: memref<1x16x1xf32, #tpu.memory_space<vmem>>, %arg7: memref<1x16x512xbf16, #tpu.memory_space<vmem>>, %arg8: memref<1x16x512xbf16, #tpu.memory_space<vmem>>) attributes {dimension_semantics = [#tpu.dimension_semantics<parallel>, #tpu.dimension_semantics<parallel>], iteration_bounds = array<i64: 2, 1>, scalar_prefetch = 0 : i64, scratch_operands = 0 : i64, tpu.core_type = #tpu.core_type<tc>, window_params = [{pipeline_mode = #tpu.pipeline_mode<synchronous>, transform_indices = @transform_0, window_bounds = array<i64: 16, 864>}, {pipeline_mode = #tpu.pipeline_mode<synchronous>, transform_indices = @transform_1, window_bounds = array<i64: 16, 1>}, {transform_indices = @transform_2, window_bounds = array<i64: 1, 864, 512>}, {transform_indices = @transform_3, window_bounds = array<i64: 1, 16, 1>}, {transform_indices = @transform_4, window_bounds = array<i64: 1, 16, 1>}, {transform_indices = @transform_5, window_bounds = array<i64: 1, 16, 512>}, {transform_indices = @transform_6, window_bounds = array<i64: 1, 16, 512>}]} {
    %c0 = arith.constant 0 : index
    %c0_0 = arith.constant 0 : index
    %0 = vector.load %arg2[%c0, %c0_0] : memref<16x864xbf16, #tpu.memory_space<vmem>>, vector<16x864xbf16>
    %c0_1 = arith.constant 0 : index
    %c0_2 = arith.constant 0 : index
    %c0_3 = arith.constant 0 : index
    %1 = vector.load %arg4[%c0_1, %c0_2, %c0_3] : memref<1x864x512xbf16, #tpu.memory_space<vmem>>, vector<1x864x512xbf16>
    %2 = vector.shape_cast %1 : vector<1x864x512xbf16> to vector<864x512xbf16>
    %cst = arith.constant dense<0.000000e+00> : vector<16x512xf32>
    %3 = tpu.matmul %0, %2, %cst {dimension_numbers = #tpu.dot_dimension_numbers<[1], [0], [0], [1], [0, 0, 1, 1], [], []>} : vector<16x864xbf16>, vector<864x512xbf16>, vector<16x512xf32> -> vector<16x512xf32>
    %c0_4 = arith.constant 0 : index
    %c0_5 = arith.constant 0 : index
    %4 = vector.load %arg3[%c0_4, %c0_5] : memref<16x1xf32, #tpu.memory_space<vmem>>, vector<16x1xf32>
    %5 = vector.broadcast %4 : vector<16x1xf32> to vector<16x512xf32>
    %6 = arith.addf %3, %5 : vector<16x512xf32>
    %cst_6 = arith.constant dense<0.000000e+00> : vector<16xf32>
    %7 = vector.multi_reduction <add>, %6, %cst_6 [1] : vector<16x512xf32> to vector<16xf32>
    %8 = vector.shape_cast %7 : vector<16xf32> to vector<16x1xf32>
    %cst_7 = arith.constant 0.001953125 : f32
    %9 = vector.broadcast %cst_7 : f32 to vector<16x1xf32>
    %10 = arith.mulf %8, %9 : vector<16x1xf32>
    %11 = arith.mulf %6, %6 : vector<16x512xf32>
    %cst_8 = arith.constant dense<0.000000e+00> : vector<16xf32>
    %12 = vector.multi_reduction <add>, %11, %cst_8 [1] : vector<16x512xf32> to vector<16xf32>
    %13 = vector.shape_cast %12 : vector<16xf32> to vector<16x1xf32>
    %cst_9 = arith.constant 0.001953125 : f32
    %14 = vector.broadcast %cst_9 : f32 to vector<16x1xf32>
    %15 = arith.mulf %13, %14 : vector<16x1xf32>
    %16 = arith.mulf %10, %10 : vector<16x1xf32>
    %17 = arith.subf %15, %16 : vector<16x1xf32>
    %cst_10 = arith.constant 0.000000e+00 : f32
    %18 = vector.broadcast %cst_10 : f32 to vector<16x1xf32>
    %19 = arith.maximumf %17, %18 : vector<16x1xf32>
    %c0_11 = arith.constant 0 : index
    %c0_12 = arith.constant 0 : index
    %c0_13 = arith.constant 0 : index
    %20 = vector.load %arg5[%c0_11, %c0_12, %c0_13] : memref<1x16x1xf32, #tpu.memory_space<vmem>>, vector<1x16x1xf32>
    %21 = vector.shape_cast %20 : vector<1x16x1xf32> to vector<16x1xf32>
    %c0_14 = arith.constant 0 : index
    %c0_15 = arith.constant 0 : index
    %c0_16 = arith.constant 0 : index
    %22 = vector.load %arg6[%c0_14, %c0_15, %c0_16] : memref<1x16x1xf32, #tpu.memory_space<vmem>>, vector<1x16x1xf32>
    %23 = vector.shape_cast %22 : vector<1x16x1xf32> to vector<16x1xf32>
    %c0_17 = arith.constant 0 : index
    %c0_18 = arith.constant 0 : index
    %c0_19 = arith.constant 0 : index
    %24 = vector.load %arg7[%c0_17, %c0_18, %c0_19] : memref<1x16x512xbf16, #tpu.memory_space<vmem>>, vector<1x16x512xbf16>
    %25 = vector.shape_cast %24 : vector<1x16x512xbf16> to vector<16x512xbf16>
    %cst_20 = arith.constant 9.99999974E-6 : f32
    %26 = vector.broadcast %cst_20 : f32 to vector<16x1xf32>
    %27 = arith.addf %19, %26 : vector<16x1xf32>
    %28 = math.rsqrt %27 : vector<16x1xf32>
    %29 = arith.mulf %23, %28 : vector<16x1xf32>
    %30 = arith.mulf %29, %10 : vector<16x1xf32>
    %31 = arith.subf %21, %30 : vector<16x1xf32>
    %32 = vector.broadcast %29 : vector<16x1xf32> to vector<16x512xf32>
    %33 = arith.mulf %32, %6 : vector<16x512xf32>
    %34 = vector.broadcast %31 : vector<16x1xf32> to vector<16x512xf32>
    %35 = arith.addf %33, %34 : vector<16x512xf32>
    %cst_21 = arith.constant 0.000000e+00 : f32
    %36 = vector.broadcast %cst_21 : f32 to vector<16x512xf32>
    %37 = arith.maximumf %35, %36 : vector<16x512xf32>
    %38 = arith.extf %25 : vector<16x512xbf16> to vector<16x512xf32>
    %39 = arith.addf %37, %38 : vector<16x512xf32>
    %40 = arith.truncf %39 : vector<16x512xf32> to vector<16x512xbf16>
    %c0_22 = arith.constant 0 : index
    %c0_23 = arith.constant 0 : index
    %c0_24 = arith.constant 0 : index
    %41 = vector.load %arg8[%c0_22, %c0_23, %c0_24] : memref<1x16x512xbf16, #tpu.memory_space<vmem>>, vector<1x16x512xbf16>
    %42 = vector.shape_cast %41 : vector<1x16x512xbf16> to vector<16x512xbf16>
    %43 = vector.shape_cast %40 : vector<16x512xbf16> to vector<1x16x512xbf16>
    tpu.vector_store %arg8[%c0_22, %c0_23, %c0_24], %43 {strides = array<i32>} : memref<1x16x512xbf16, #tpu.memory_space<vmem>>, vector<1x16x512xbf16>,
    return
  }
  func.func @transform_0(%arg0: i32, %arg1: i32) -> (i32, i32) {
    %c0_i32 = arith.constant 0 : i32
    %c0_i32_0 = arith.constant 0 : i32
    %c0_i32_1 = arith.constant 0 : i32
    return %c0_i32, %c0_i32_0 : i32, i32
  }
  func.func @transform_1(%arg0: i32, %arg1: i32) -> (i32, i32) {
    %c0_i32 = arith.constant 0 : i32
    %c0_i32_0 = arith.constant 0 : i32
    %c0_i32_1 = arith.constant 0 : i32
    return %c0_i32, %c0_i32_0 : i32, i32
  }
  func.func @transform_2(%arg0: i32, %arg1: i32) -> (i32, i32, i32) {
    %c0_i32 = arith.constant 0 : i32
    %c0_i32_0 = arith.constant 0 : i32
    return %arg0, %c0_i32, %arg1 : i32, i32, i32
  }
  func.func @transform_3(%arg0: i32, %arg1: i32) -> (i32, i32, i32) {
    %c0_i32 = arith.constant 0 : i32
    %c0_i32_0 = arith.constant 0 : i32
    %c0_i32_1 = arith.constant 0 : i32
    return %arg0, %c0_i32, %c0_i32_0 : i32, i32, i32
  }
  func.func @transform_4(%arg0: i32, %arg1: i32) -> (i32, i32, i32) {
    %c0_i32 = arith.constant 0 : i32
    %c0_i32_0 = arith.constant 0 : i32
    %c0_i32_1 = arith.constant 0 : i32
    return %arg0, %c0_i32, %c0_i32_0 : i32, i32, i32
  }
  func.func @transform_5(%arg0: i32, %arg1: i32) -> (i32, i32, i32) {
    %c0_i32 = arith.constant 0 : i32
    %c0_i32_0 = arith.constant 0 : i32
    return %arg0, %c0_i32, %arg1 : i32, i32, i32
  }
  func.func @transform_6(%arg0: i32, %arg1: i32) -> (i32, i32, i32) {
    %c0_i32 = arith.constant 0 : i32
    %c0_i32_0 = arith.constant 0 : i32
    return %arg0, %c0_i32, %arg1 : i32, i32, i32
  }
}

module attributes {stable_mosaic.version = 11 : i64} {
  func.func @_conv_stats_kernel(%arg0: i32, %arg1: i32, %arg2: memref<8x432xbf16, #tpu.memory_space<vmem>>, %arg3: memref<8x1xf32, #tpu.memory_space<vmem>>, %arg4: memref<1x432x2048xbf16, #tpu.memory_space<vmem>>, %arg5: memref<1x8x2048xbf16, #tpu.memory_space<vmem>>, %arg6: memref<1x8x1xf32, #tpu.memory_space<vmem>>, %arg7: memref<1x8x1xf32, #tpu.memory_space<vmem>>) attributes {dimension_semantics = [#tpu.dimension_semantics<parallel>, #tpu.dimension_semantics<arbitrary>], iteration_bounds = array<i64: 2, 2>, scalar_prefetch = 0 : i64, scratch_operands = 0 : i64, tpu.core_type = #tpu.core_type<tc>, window_params = [{pipeline_mode = #tpu.pipeline_mode<synchronous>, transform_indices = @transform_0, window_bounds = array<i64: 8, 432>}, {pipeline_mode = #tpu.pipeline_mode<synchronous>, transform_indices = @transform_1, window_bounds = array<i64: 8, 1>}, {transform_indices = @transform_2, window_bounds = array<i64: 1, 432, 2048>}, {transform_indices = @transform_3, window_bounds = array<i64: 1, 8, 2048>}, {transform_indices = @transform_4, window_bounds = array<i64: 1, 8, 1>}, {transform_indices = @transform_5, window_bounds = array<i64: 1, 8, 1>}]} {
    %c0 = arith.constant 0 : index
    %c0_0 = arith.constant 0 : index
    %0 = vector.load %arg2[%c0, %c0_0] : memref<8x432xbf16, #tpu.memory_space<vmem>>, vector<8x432xbf16>
    %c0_1 = arith.constant 0 : index
    %c0_2 = arith.constant 0 : index
    %c0_3 = arith.constant 0 : index
    %1 = vector.load %arg4[%c0_1, %c0_2, %c0_3] : memref<1x432x2048xbf16, #tpu.memory_space<vmem>>, vector<1x432x2048xbf16>
    %2 = vector.shape_cast %1 : vector<1x432x2048xbf16> to vector<432x2048xbf16>
    %cst = arith.constant dense<0.000000e+00> : vector<8x2048xf32>
    %3 = tpu.matmul %0, %2, %cst {dimension_numbers = #tpu.dot_dimension_numbers<[1], [0], [0], [1], [0, 0, 1, 1], [], []>} : vector<8x432xbf16>, vector<432x2048xbf16>, vector<8x2048xf32> -> vector<8x2048xf32>
    %c0_4 = arith.constant 0 : index
    %c0_5 = arith.constant 0 : index
    %4 = vector.load %arg3[%c0_4, %c0_5] : memref<8x1xf32, #tpu.memory_space<vmem>>, vector<8x1xf32>
    %5 = vector.broadcast %4 : vector<8x1xf32> to vector<8x2048xf32>
    %6 = arith.addf %3, %5 : vector<8x2048xf32>
    %7 = arith.truncf %6 : vector<8x2048xf32> to vector<8x2048xbf16>
    %c0_6 = arith.constant 0 : index
    %c0_7 = arith.constant 0 : index
    %c0_8 = arith.constant 0 : index
    %8 = vector.load %arg5[%c0_6, %c0_7, %c0_8] : memref<1x8x2048xbf16, #tpu.memory_space<vmem>>, vector<1x8x2048xbf16>
    %9 = vector.shape_cast %8 : vector<1x8x2048xbf16> to vector<8x2048xbf16>
    %10 = vector.shape_cast %7 : vector<8x2048xbf16> to vector<1x8x2048xbf16>
    tpu.vector_store %arg5[%c0_6, %c0_7, %c0_8], %10 {strides = array<i32>} : memref<1x8x2048xbf16, #tpu.memory_space<vmem>>, vector<1x8x2048xbf16>,
    %c0_i32 = arith.constant 0 : i32
    %11 = arith.cmpi eq, %arg1, %c0_i32 : i32
    %12 = arith.extui %11 : i1 to i32
    %c0_i32_9 = arith.constant 0 : i32
    %13 = arith.cmpi ne, %12, %c0_i32_9 : i32
    scf.if %13 {
      %cst_24 = arith.constant 0.000000e+00 : f32
      %31 = vector.broadcast %cst_24 : f32 to vector<8x1xf32>
      %c0_25 = arith.constant 0 : index
      %c0_26 = arith.constant 0 : index
      %c0_27 = arith.constant 0 : index
      %32 = vector.load %arg6[%c0_25, %c0_26, %c0_27] : memref<1x8x1xf32, #tpu.memory_space<vmem>>, vector<1x8x1xf32>
      %33 = vector.shape_cast %32 : vector<1x8x1xf32> to vector<8x1xf32>
      %34 = vector.shape_cast %31 : vector<8x1xf32> to vector<1x8x1xf32>
      tpu.vector_store %arg6[%c0_25, %c0_26, %c0_27], %34 {strides = array<i32>} : memref<1x8x1xf32, #tpu.memory_space<vmem>>, vector<1x8x1xf32>,
      %cst_28 = arith.constant 0.000000e+00 : f32
      %35 = vector.broadcast %cst_28 : f32 to vector<8x1xf32>
      %c0_29 = arith.constant 0 : index
      %c0_30 = arith.constant 0 : index
      %c0_31 = arith.constant 0 : index
      %36 = vector.load %arg7[%c0_29, %c0_30, %c0_31] : memref<1x8x1xf32, #tpu.memory_space<vmem>>, vector<1x8x1xf32>
      %37 = vector.shape_cast %36 : vector<1x8x1xf32> to vector<8x1xf32>
      %38 = vector.shape_cast %35 : vector<8x1xf32> to vector<1x8x1xf32>
      tpu.vector_store %arg7[%c0_29, %c0_30, %c0_31], %38 {strides = array<i32>} : memref<1x8x1xf32, #tpu.memory_space<vmem>>, vector<1x8x1xf32>,
    } else {
    }
    %c0_10 = arith.constant 0 : index
    %c0_11 = arith.constant 0 : index
    %c0_12 = arith.constant 0 : index
    %14 = vector.load %arg6[%c0_10, %c0_11, %c0_12] : memref<1x8x1xf32, #tpu.memory_space<vmem>>, vector<1x8x1xf32>
    %15 = vector.shape_cast %14 : vector<1x8x1xf32> to vector<8x1xf32>
    %cst_13 = arith.constant dense<0.000000e+00> : vector<8xf32>
    %16 = vector.multi_reduction <add>, %6, %cst_13 [1] : vector<8x2048xf32> to vector<8xf32>
    %17 = vector.shape_cast %16 : vector<8xf32> to vector<8x1xf32>
    %18 = arith.addf %15, %17 : vector<8x1xf32>
    %c0_14 = arith.constant 0 : index
    %c0_15 = arith.constant 0 : index
    %c0_16 = arith.constant 0 : index
    %19 = vector.load %arg6[%c0_14, %c0_15, %c0_16] : memref<1x8x1xf32, #tpu.memory_space<vmem>>, vector<1x8x1xf32>
    %20 = vector.shape_cast %19 : vector<1x8x1xf32> to vector<8x1xf32>
    %21 = vector.shape_cast %18 : vector<8x1xf32> to vector<1x8x1xf32>
    tpu.vector_store %arg6[%c0_14, %c0_15, %c0_16], %21 {strides = array<i32>} : memref<1x8x1xf32, #tpu.memory_space<vmem>>, vector<1x8x1xf32>,
    %c0_17 = arith.constant 0 : index
    %c0_18 = arith.constant 0 : index
    %c0_19 = arith.constant 0 : index
    %22 = vector.load %arg7[%c0_17, %c0_18, %c0_19] : memref<1x8x1xf32, #tpu.memory_space<vmem>>, vector<1x8x1xf32>
    %23 = vector.shape_cast %22 : vector<1x8x1xf32> to vector<8x1xf32>
    %24 = arith.mulf %6, %6 : vector<8x2048xf32>
    %cst_20 = arith.constant dense<0.000000e+00> : vector<8xf32>
    %25 = vector.multi_reduction <add>, %24, %cst_20 [1] : vector<8x2048xf32> to vector<8xf32>
    %26 = vector.shape_cast %25 : vector<8xf32> to vector<8x1xf32>
    %27 = arith.addf %23, %26 : vector<8x1xf32>
    %c0_21 = arith.constant 0 : index
    %c0_22 = arith.constant 0 : index
    %c0_23 = arith.constant 0 : index
    %28 = vector.load %arg7[%c0_21, %c0_22, %c0_23] : memref<1x8x1xf32, #tpu.memory_space<vmem>>, vector<1x8x1xf32>
    %29 = vector.shape_cast %28 : vector<1x8x1xf32> to vector<8x1xf32>
    %30 = vector.shape_cast %27 : vector<8x1xf32> to vector<1x8x1xf32>
    tpu.vector_store %arg7[%c0_21, %c0_22, %c0_23], %30 {strides = array<i32>} : memref<1x8x1xf32, #tpu.memory_space<vmem>>, vector<1x8x1xf32>,
    return
  }
  func.func @transform_0(%arg0: i32, %arg1: i32) -> (i32, i32) {
    %c0_i32 = arith.constant 0 : i32
    %c0_i32_0 = arith.constant 0 : i32
    %c0_i32_1 = arith.constant 0 : i32
    return %c0_i32, %c0_i32_0 : i32, i32
  }
  func.func @transform_1(%arg0: i32, %arg1: i32) -> (i32, i32) {
    %c0_i32 = arith.constant 0 : i32
    %c0_i32_0 = arith.constant 0 : i32
    %c0_i32_1 = arith.constant 0 : i32
    return %c0_i32, %c0_i32_0 : i32, i32
  }
  func.func @transform_2(%arg0: i32, %arg1: i32) -> (i32, i32, i32) {
    %c0_i32 = arith.constant 0 : i32
    %c0_i32_0 = arith.constant 0 : i32
    return %arg0, %c0_i32, %arg1 : i32, i32, i32
  }
  func.func @transform_3(%arg0: i32, %arg1: i32) -> (i32, i32, i32) {
    %c0_i32 = arith.constant 0 : i32
    %c0_i32_0 = arith.constant 0 : i32
    return %arg0, %c0_i32, %arg1 : i32, i32, i32
  }
  func.func @transform_4(%arg0: i32, %arg1: i32) -> (i32, i32, i32) {
    %c0_i32 = arith.constant 0 : i32
    %c0_i32_0 = arith.constant 0 : i32
    %c0_i32_1 = arith.constant 0 : i32
    return %arg0, %c0_i32, %c0_i32_0 : i32, i32, i32
  }
  func.func @transform_5(%arg0: i32, %arg1: i32) -> (i32, i32, i32) {
    %c0_i32 = arith.constant 0 : i32
    %c0_i32_0 = arith.constant 0 : i32
    %c0_i32_1 = arith.constant 0 : i32
    return %arg0, %c0_i32, %c0_i32_0 : i32, i32, i32
  }
}

module attributes {stable_mosaic.version = 11 : i64} {
  func.func @_adain_apply_kernel(%arg0: i32, %arg1: i32, %arg2: memref<1x8x2048xbf16, #tpu.memory_space<vmem>>, %arg3: memref<1x8x1xf32, #tpu.memory_space<vmem>>, %arg4: memref<1x8x1xf32, #tpu.memory_space<vmem>>, %arg5: memref<1x8x1xf32, #tpu.memory_space<vmem>>, %arg6: memref<1x8x1xf32, #tpu.memory_space<vmem>>, %arg7: memref<1x8x2048xbf16, #tpu.memory_space<vmem>>, %arg8: memref<2x8xf32, #tpu.memory_space<vmem>>, %arg9: memref<2x1xf32, #tpu.memory_space<vmem>>, %arg10: memref<1x2x2048xf32, #tpu.memory_space<vmem>>) attributes {dimension_semantics = [#tpu.dimension_semantics<parallel>, #tpu.dimension_semantics<parallel>], iteration_bounds = array<i64: 2, 2>, scalar_prefetch = 0 : i64, scratch_operands = 0 : i64, tpu.core_type = #tpu.core_type<tc>, window_params = [{transform_indices = @transform_0, window_bounds = array<i64: 1, 8, 2048>}, {transform_indices = @transform_1, window_bounds = array<i64: 1, 8, 1>}, {transform_indices = @transform_2, window_bounds = array<i64: 1, 8, 1>}, {transform_indices = @transform_3, window_bounds = array<i64: 1, 8, 1>}, {transform_indices = @transform_4, window_bounds = array<i64: 1, 8, 1>}, {transform_indices = @transform_5, window_bounds = array<i64: 1, 8, 2048>}, {pipeline_mode = #tpu.pipeline_mode<synchronous>, transform_indices = @transform_6, window_bounds = array<i64: 2, 8>}, {pipeline_mode = #tpu.pipeline_mode<synchronous>, transform_indices = @transform_7, window_bounds = array<i64: 2, 1>}, {transform_indices = @transform_8, window_bounds = array<i64: 1, 2, 2048>}]} {
    %c0 = arith.constant 0 : index
    %c0_0 = arith.constant 0 : index
    %c0_1 = arith.constant 0 : index
    %0 = vector.load %arg2[%c0, %c0_0, %c0_1] : memref<1x8x2048xbf16, #tpu.memory_space<vmem>>, vector<1x8x2048xbf16>
    %1 = vector.shape_cast %0 : vector<1x8x2048xbf16> to vector<8x2048xbf16>
    %2 = arith.extf %1 : vector<8x2048xbf16> to vector<8x2048xf32>
    %c0_2 = arith.constant 0 : index
    %c0_3 = arith.constant 0 : index
    %c0_4 = arith.constant 0 : index
    %3 = vector.load %arg3[%c0_2, %c0_3, %c0_4] : memref<1x8x1xf32, #tpu.memory_space<vmem>>, vector<1x8x1xf32>
    %4 = vector.shape_cast %3 : vector<1x8x1xf32> to vector<8x1xf32>
    %cst = arith.constant 2.44140625E-4 : f32
    %5 = vector.broadcast %cst : f32 to vector<8x1xf32>
    %6 = arith.mulf %4, %5 : vector<8x1xf32>
    %c0_5 = arith.constant 0 : index
    %c0_6 = arith.constant 0 : index
    %c0_7 = arith.constant 0 : index
    %7 = vector.load %arg4[%c0_5, %c0_6, %c0_7] : memref<1x8x1xf32, #tpu.memory_space<vmem>>, vector<1x8x1xf32>
    %8 = vector.shape_cast %7 : vector<1x8x1xf32> to vector<8x1xf32>
    %cst_8 = arith.constant 2.44140625E-4 : f32
    %9 = vector.broadcast %cst_8 : f32 to vector<8x1xf32>
    %10 = arith.mulf %8, %9 : vector<8x1xf32>
    %11 = arith.mulf %6, %6 : vector<8x1xf32>
    %12 = arith.subf %10, %11 : vector<8x1xf32>
    %cst_9 = arith.constant 0.000000e+00 : f32
    %13 = vector.broadcast %cst_9 : f32 to vector<8x1xf32>
    %14 = arith.maximumf %12, %13 : vector<8x1xf32>
    %c0_10 = arith.constant 0 : index
    %c0_11 = arith.constant 0 : index
    %c0_12 = arith.constant 0 : index
    %15 = vector.load %arg5[%c0_10, %c0_11, %c0_12] : memref<1x8x1xf32, #tpu.memory_space<vmem>>, vector<1x8x1xf32>
    %16 = vector.shape_cast %15 : vector<1x8x1xf32> to vector<8x1xf32>
    %c0_13 = arith.constant 0 : index
    %c0_14 = arith.constant 0 : index
    %c0_15 = arith.constant 0 : index
    %17 = vector.load %arg6[%c0_13, %c0_14, %c0_15] : memref<1x8x1xf32, #tpu.memory_space<vmem>>, vector<1x8x1xf32>
    %18 = vector.shape_cast %17 : vector<1x8x1xf32> to vector<8x1xf32>
    %c0_16 = arith.constant 0 : index
    %c0_17 = arith.constant 0 : index
    %c0_18 = arith.constant 0 : index
    %19 = vector.load %arg7[%c0_16, %c0_17, %c0_18] : memref<1x8x2048xbf16, #tpu.memory_space<vmem>>, vector<1x8x2048xbf16>
    %20 = vector.shape_cast %19 : vector<1x8x2048xbf16> to vector<8x2048xbf16>
    %c0_19 = arith.constant 0 : index
    %c0_20 = arith.constant 0 : index
    %21 = vector.load %arg8[%c0_19, %c0_20] : memref<2x8xf32, #tpu.memory_space<vmem>>, vector<2x8xf32>
    %c0_21 = arith.constant 0 : index
    %c0_22 = arith.constant 0 : index
    %22 = vector.load %arg9[%c0_21, %c0_22] : memref<2x1xf32, #tpu.memory_space<vmem>>, vector<2x1xf32>
    %cst_23 = arith.constant 9.99999974E-6 : f32
    %23 = vector.broadcast %cst_23 : f32 to vector<8x1xf32>
    %24 = arith.addf %14, %23 : vector<8x1xf32>
    %25 = math.rsqrt %24 : vector<8x1xf32>
    %26 = arith.mulf %18, %25 : vector<8x1xf32>
    %27 = arith.mulf %26, %6 : vector<8x1xf32>
    %28 = arith.subf %16, %27 : vector<8x1xf32>
    %29 = vector.broadcast %26 : vector<8x1xf32> to vector<8x2048xf32>
    %30 = arith.mulf %29, %2 : vector<8x2048xf32>
    %31 = vector.broadcast %28 : vector<8x1xf32> to vector<8x2048xf32>
    %32 = arith.addf %30, %31 : vector<8x2048xf32>
    %cst_24 = arith.constant 0.000000e+00 : f32
    %33 = vector.broadcast %cst_24 : f32 to vector<8x2048xf32>
    %34 = arith.maximumf %32, %33 : vector<8x2048xf32>
    %35 = arith.extf %20 : vector<8x2048xbf16> to vector<8x2048xf32>
    %36 = arith.addf %34, %35 : vector<8x2048xf32>
    %cst_25 = arith.constant dense<0.000000e+00> : vector<2x2048xf32>
    %37 = tpu.matmul %21, %36, %cst_25 {dimension_numbers = #tpu.dot_dimension_numbers<[1], [0], [0], [1], [0, 0, 1, 1], [], []>} : vector<2x8xf32>, vector<8x2048xf32>, vector<2x2048xf32> -> vector<2x2048xf32>
    %38 = vector.broadcast %22 : vector<2x1xf32> to vector<2x2048xf32>
    %39 = arith.addf %37, %38 : vector<2x2048xf32>
    %c0_26 = arith.constant 0 : index
    %c0_27 = arith.constant 0 : index
    %c0_28 = arith.constant 0 : index
    %40 = vector.load %arg10[%c0_26, %c0_27, %c0_28] : memref<1x2x2048xf32, #tpu.memory_space<vmem>>, vector<1x2x2048xf32>
    %41 = vector.shape_cast %40 : vector<1x2x2048xf32> to vector<2x2048xf32>
    %42 = vector.shape_cast %39 : vector<2x2048xf32> to vector<1x2x2048xf32>
    tpu.vector_store %arg10[%c0_26, %c0_27, %c0_28], %42 {strides = array<i32>} : memref<1x2x2048xf32, #tpu.memory_space<vmem>>, vector<1x2x2048xf32>,
    return
  }
  func.func @transform_0(%arg0: i32, %arg1: i32) -> (i32, i32, i32) {
    %c0_i32 = arith.constant 0 : i32
    %c0_i32_0 = arith.constant 0 : i32
    return %arg0, %c0_i32, %arg1 : i32, i32, i32
  }
  func.func @transform_1(%arg0: i32, %arg1: i32) -> (i32, i32, i32) {
    %c0_i32 = arith.constant 0 : i32
    %c0_i32_0 = arith.constant 0 : i32
    %c0_i32_1 = arith.constant 0 : i32
    return %arg0, %c0_i32, %c0_i32_0 : i32, i32, i32
  }
  func.func @transform_2(%arg0: i32, %arg1: i32) -> (i32, i32, i32) {
    %c0_i32 = arith.constant 0 : i32
    %c0_i32_0 = arith.constant 0 : i32
    %c0_i32_1 = arith.constant 0 : i32
    return %arg0, %c0_i32, %c0_i32_0 : i32, i32, i32
  }
  func.func @transform_3(%arg0: i32, %arg1: i32) -> (i32, i32, i32) {
    %c0_i32 = arith.constant 0 : i32
    %c0_i32_0 = arith.constant 0 : i32
    %c0_i32_1 = arith.constant 0 : i32
    return %arg0, %c0_i32, %c0_i32_0 : i32, i32, i32
  }
  func.func @transform_4(%arg0: i32, %arg1: i32) -> (i32, i32, i32) {
    %c0_i32 = arith.constant 0 : i32
    %c0_i32_0 = arith.constant 0 : i32
    %c0_i32_1 = arith.constant 0 : i32
    return %arg0, %c0_i32, %c0_i32_0 : i32, i32, i32
  }
  func.func @transform_5(%arg0: i32, %arg1: i32) -> (i32, i32, i32) {
    %c0_i32 = arith.constant 0 : i32
    %c0_i32_0 = arith.constant 0 : i32
    return %arg0, %c0_i32, %arg1 : i32, i32, i32
  }
  func.func @transform_6(%arg0: i32, %arg1: i32) -> (i32, i32) {
    %c0_i32 = arith.constant 0 : i32
    %c0_i32_0 = arith.constant 0 : i32
    %c0_i32_1 = arith.constant 0 : i32
    return %c0_i32, %c0_i32_0 : i32, i32
  }
  func.func @transform_7(%arg0: i32, %arg1: i32) -> (i32, i32) {
    %c0_i32 = arith.constant 0 : i32
    %c0_i32_0 = arith.constant 0 : i32
    %c0_i32_1 = arith.constant 0 : i32
    return %c0_i32, %c0_i32_0 : i32, i32
  }
  func.func @transform_8(%arg0: i32, %arg1: i32) -> (i32, i32, i32) {
    %c0_i32 = arith.constant 0 : i32
    %c0_i32_0 = arith.constant 0 : i32
    return %arg0, %c0_i32, %arg1 : i32, i32, i32
  }
}

</mosaic_0001>

<bundles_post_ra>
// kernel: unet_adain_forward.10
= control target key start
LH: loop header
LB: loop body
LE: loop exit
PB: predicated region body
PF: predicated region fallthrough
CT: control target
= control target key end

     0   :  { %vm39_vm0 = vcmask 1042432   ;;  %vm35_vm1 = vcmask 23552   ;;  %v643_v0 = vmov 0.0   ;;  %vm644_vm2 = vmmov 0   ;;  %s921_s1 = inlined_call_operand.vmem [shape: f32[3,128], index: 1, kind: input, shape index: {}]   ;;  %s922_s0 = inlined_call_operand.vmem [shape: f32[2,3], index: 0, kind: input, shape index: {}]   ;;  %s923_s3 = inlined_call_operand.vmem [shape: f32[128,128], index: 3, kind: input, shape index: {}]   ;;  %s924_s5 = inlined_call_operand.vmem [shape: f32[128,352], index: 5, kind: input, shape index: {}]   ;;  %s925_s2 = inlined_call_operand.vmem [shape: f32[1,128], index: 2, kind: input, shape index: {}]   ;;  %s926_s4 = inlined_call_operand.vmem [shape: f32[1,128], index: 4, kind: input, shape index: {}]   ;;  %s927_s6 = inlined_call_operand.vmem [shape: f32[1,352], index: 6, kind: input, shape index: {}]   ;;  %s928_s7 = inlined_call_operand.vmem [shape: f32[2,352], index: 7, kind: output, shape index: {}]  }
   0x1   :  { %484 = vmatprep.subr.mxu0 %v643_v0  ;;  %v27_v1 = vld [vmem:[%s921_s1] sm:$0x7]  ;;  %486 = vmatprep.mubr.msk.f32.mxu0 %vm644_vm2, %v643_v0  ;;  %v645_v4 = vmov 0.0|0.0   ;;  %v115_v5 = vld [vmem:[%s923_s3 + $0x8] sm:$0xff]  ;;  %v116_v6 = vld [vmem:[%s923_s3 + $0x10] sm:$0xff]  ;;  %vm434_vm3 = vcmask 1041408  }
   0x2   :  { %v26_v2 = vld [vmem:[%s922_s0] sm:$0x3]  ;;  %485 = vmatpush3.msk.msra.mxu0 %vm39_vm0, %v27_v1  ;;  %559 = vmatprep.subr.bf16.mxu1 %v645_v4  ;;  %v117_v7 = vld [vmem:[%s923_s3 + $0x18] sm:$0xff]  ;;  %v119_v11 = vld [vmem:[%s923_s3 + $0x28] sm:$0xff]  ;;  %vm435_vm4 = vcmask 1043458   ;;  %vm437_vm6 = vcmask 783364  }
   0x3   :  { %v114_v3 = vld [vmem:[%s923_s3] sm:$0xff]  ;;  %487 = vmatmul.mubr.msk.f32.vlgmr.msra.gmra.mrb[0].mxu0 %vm35_vm1, %v26_v2  ;;  %521 = vmatprep.mubr.msk.f32.mxu1 %vm644_vm2, %v643_v0  ;;  %v563_v9 = vpack.c.bf16 %v117_v7, %v116_v6  ;;  %v120_v13 = vld [vmem:[%s923_s3 + $0x30] sm:$0xff]  ;;  %v121_v14 = vld [vmem:[%s923_s3 + $0x38] sm:$0xff] }
   0x4   :  { %v560_v8 = vpack.c.bf16 %v115_v5, %v114_v3  ;;  %337 = vmatprep.mubr.f32.mxu0 %v643_v0  ;;  %v118_v10 = vld [vmem:[%s923_s3 + $0x20] sm:$0xff]  ;;  %v569_v15 = vpack.c.bf16 %v121_v14, %v120_v13  ;;  %v123_v17 = vld [vmem:[%s923_s3 + $0x48] sm:$0xff]  ;;  %v124_v19 = vld [vmem:[%s923_s3 + $0x50] sm:$0xff] }
   0x5   :  { %v566_v12 = vpack.c.bf16 %v119_v11, %v118_v10  ;;  %v122_v16 = vld [vmem:[%s923_s3 + $0x40] sm:$0xff]  ;;  %v125_v20 = vld [vmem:[%s923_s3 + $0x58] sm:$0xff]  ;;  %v127_v23 = vld [vmem:[%s923_s3 + $0x68] sm:$0xff] }
   0x6   :  { %561 = vmatpush3.bf16.msra.mxu1 %v560_v8  ;;  %v572_v18 = vpack.c.bf16 %v123_v17, %v122_v16  ;;  %v575_v21 = vpack.c.bf16 %v125_v20, %v124_v19  ;;  %v126_v22 = vld [vmem:[%s923_s3 + $0x60] sm:$0xff]  ;;  %v128_v25 = vld [vmem:[%s923_s3 + $0x70] sm:$0xff]  ;;  %v129_v26 = vld [vmem:[%s923_s3 + $0x78] sm:$0xff] }
   0x7   :  { %562 = vmatprep.subr.bf16.mxu1 %v645_v4  ;;  %v578_v24 = vpack.c.bf16 %v127_v23, %v126_v22  ;;  %v581_v27 = vpack.c.bf16 %v129_v26, %v128_v25  ;;  %v209_v28 = vld [vmem:[%s924_s5 + $0x8] sm:$0xff]  ;;  %v212_v29 = vld [vmem:[%s924_s5 + $0x20] sm:$0xff]  ;;  %v211_v32 = vld [vmem:[%s924_s5 + $0x18] sm:$0xff] }
   0x8   :  { %v208_v30 = vld [vmem:[%s924_s5] sm:$0xff]  ;;  %v583_v31 = vpack.c.bf16 %v212_v29, %v209_v28  ;;  %v215_v34 = vld [vmem:[%s924_s5 + $0x38] sm:$0xff]  ;;  %v218_v35 = vld [vmem:[%s924_s5 + $0x50] sm:$0xff] }
   0x9   :  { %v585_v33 = vpack.c.bf16 %v211_v32, %v208_v30  ;;  %v214_v36 = vld [vmem:[%s924_s5 + $0x30] sm:$0xff]  ;;  %v587_v37 = vpack.c.bf16 %v218_v35, %v215_v34  ;;  %v217_v38 = vld [vmem:[%s924_s5 + $0x48] sm:$0xff]  ;;  %v224_v41 = vld [vmem:[%s924_s5 + $0x80] sm:$0xff] }
   0xa   :  { %564 = vmatpush3.bf16.msra.mxu1 %v563_v9  ;;  %584 = vmatprep.subr.bf16.mxu0 %v583_v31  ;;  %v589_v39 = vpack.c.bf16 %v217_v38, %v214_v36  ;;  %v221_v40 = vld [vmem:[%s924_s5 + $0x68] sm:$0xff]  ;;  %v220_v43 = vld [vmem:[%s924_s5 + $0x60] sm:$0xff]  ;;  %v223_v44 = vld [vmem:[%s924_s5 + $0x78] sm:$0xff] }
   0xb   :  { %565 = vmatprep.subr.bf16.mxu1 %v645_v4  ;;  %586 = vmatpush1.bf16.msra.mxu0 %v585_v33  ;;  %v591_v42 = vpack.c.bf16 %v224_v41, %v221_v40  ;;  %v593_v45 = vpack.c.bf16 %v223_v44, %v220_v43  ;;  %v227_v46 = vld [vmem:[%s924_s5 + $0x98] sm:$0xff]  ;;  %v230_v47 = vld [vmem:[%s924_s5 + $0xb0] sm:$0xff]  ;;  %v229_v50 = vld [vmem:[%s924_s5 + $0xa8] sm:$0xff] }
   0xc   :  { %588 = vmatprep.subr.bf16.mxu0 %v587_v37  ;;  %v595_v48 = vpack.c.bf16 %v230_v47, %v227_v46  ;;  %v226_v49 = vld [vmem:[%s924_s5 + $0x90] sm:$0xff]  ;;  %v233_v52 = vld [vmem:[%s924_s5 + $0xc8] sm:$0xff]  ;;  %v236_v53 = vld [vmem:[%s924_s5 + $0xe0] sm:$0xff]  ;;  %v258_v46 = vlaneseq }
   0xd   :  { %v597_v51 = vpack.c.bf16 %v229_v50, %v226_v49  ;;  %v599_v54 = vpack.c.bf16 %v236_v53, %v233_v52  ;;  %v232_v55 = vld [vmem:[%s924_s5 + $0xc0] sm:$0xff]  ;;  %v235_v56 = vld [vmem:[%s924_s5 + $0xd8] sm:$0xff]  ;;  %v242_v59 = vld [vmem:[%s924_s5 + $0x110] sm:$0xff] }
   0xe   :  { %567 = vmatpush3.bf16.msra.mxu1 %v566_v12  ;;  %v601_v57 = vpack.c.bf16 %v235_v56, %v232_v55  ;;  %v239_v58 = vld [vmem:[%s924_s5 + $0xf8] sm:$0xff]  ;;  %v238_v61 = vld [vmem:[%s924_s5 + $0xf0] sm:$0xff]  ;;  %v241_v62 = vld [vmem:[%s924_s5 + $0x108] sm:$0xff]  ;;  %v259_v47 = vshrl.u32 %v258_v46, 7 }
   0xf   :  { %568 = vmatprep.subr.bf16.mxu1 %v645_v4  ;;  %590 = vmatpush1.bf16.msra.mxu0 %v589_v39  ;;  %v603_v60 = vpack.c.bf16 %v242_v59, %v239_v58  ;;  %v605_v63 = vpack.c.bf16 %v241_v62, %v238_v61  ;;  %v245_v1 = vld [vmem:[%s924_s5 + $0x128] sm:$0xff]  ;;  %v248_v2 = vld [vmem:[%s924_s5 + $0x140] sm:$0xff]  ;;  %v247_v6 = vld [vmem:[%s924_s5 + $0x138] sm:$0xff] }
  0x10   :  { %592 = vmatprep.subr.bf16.mxu0 %v591_v42  ;;  %v607_v3 = vpack.c.bf16 %v248_v2, %v245_v1  ;;  %v244_v5 = vld [vmem:[%s924_s5 + $0x120] sm:$0xff]  ;;  %v210_v9 = vld [vmem:[%s924_s5 + $0x10] sm:$0xff]  ;;  %v213_v10 = vld [vmem:[%s924_s5 + $0x28] sm:$0xff]  ;;  %v268_v50 = vsub.s32 2, %v259_v47  ;;  %v264_v53 = vsub.s32 1, %v259_v47 }
  0x11   :  { %v609_v7 = vpack.c.bf16 %v247_v6, %v244_v5  ;;  %v444_v8 = vld [vmem:[%s925_s2] ss:$0 sm:$0xff]  ;;  %v616_v14 = vpack.c.bf16 %v213_v10, %v210_v9  ;;  %v219_v17 = vld [vmem:[%s924_s5 + $0x58] sm:$0xff]  ;;  %v222_v19 = vld [vmem:[%s924_s5 + $0x70] sm:$0xff] }
  0x12   :  { %570 = vmatpush3.bf16.msra.mxu1 %v569_v15  ;;  %v216_v16 = vld [vmem:[%s924_s5 + $0x40] sm:$0xff]  ;;  %v225_v20 = vld [vmem:[%s924_s5 + $0x88] sm:$0xff]  ;;  %v243_v28 = vld [vmem:[%s924_s5 + $0x118] sm:$0xff] }
  0x13   :  { %571 = vmatprep.subr.bf16.mxu1 %v645_v4  ;;  %594 = vmatpush1.bf16.msra.mxu0 %v593_v45  ;;  %v228_v22 = vld [vmem:[%s924_s5 + $0xa0] sm:$0xff]  ;;  %v237_v25 = vld [vmem:[%s924_s5 + $0xe8] sm:$0xff]  ;;  %v246_v30 = vld [vmem:[%s924_s5 + $0x130] sm:$0xff] }
  0x14   :  { %596 = vmatprep.subr.bf16.mxu0 %v595_v48  ;;  %v249_v31 = vld [vmem:[%s924_s5 + $0x148] sm:$0xff]  ;;  %v251_v33 = vld [vmem:[%s924_s5 + $0x158] sm:$0xff]  ;;  %v254_v34 = vld [vmem:[%s924_s5 + $0x170] sm:$0xff]  ;;  %v260_v48 = vsub.s32 0, %v259_v47 }
  0x15   :  { %v634_v32 = vpack.c.bf16 %v249_v31, %v246_v30  ;;  %v611_v35 = vpack.c.bf16 %v254_v34, %v251_v33  ;;  %v250_v36 = vld [vmem:[%s924_s5 + $0x150] sm:$0xff]  ;;  %v253_v37 = vld [vmem:[%s924_s5 + $0x168] sm:$0xff]  ;;  %v255_v39 = vld [vmem:[%s924_s5 + $0x178] sm:$0xff] }
  0x16   :  { %573 = vmatpush3.bf16.msra.mxu1 %v572_v18  ;;  %v619_v18 = vpack.c.bf16 %v219_v17, %v216_v16  ;;  %v613_v38 = vpack.c.bf16 %v253_v37, %v250_v36  ;;  %v447_v41 = vld [vmem:[%s926_s4] ss:$0 sm:$0xff]  ;;  %vm436_vm5 = vmor %vm435_vm4, %vm434_vm3 }
  0x17   :  { %574 = vmatprep.subr.bf16.mxu1 %v645_v4  ;;  %598 = vmatpush1.bf16.msra.mxu0 %v597_v51  ;;  %v256_v49 = vld [vmem:[%s927_s6] sm:$0x7]  ;;  %v646_v51 = vmov 1983009808   ;;  %vm438_vm7 = vmor %vm437_vm6, %vm436_vm5 }
  0x18   :  { %600 = vmatprep.subr.bf16.mxu0 %v599_v54  ;;  %v419_v52 = vunpack.c.l.s4 %v646_v51  ;;  %v261_v54 = vrot.slane %v256_v49, %v260_v48  ;;  %v269_v55 = vrot.slane %v256_v49, %v268_v50 }
  0x1a   :  { %576 = vmatpush3.bf16.msra.mxu1 %v575_v21  ;;  %v622_v21 = vpack.c.bf16 %v225_v20, %v222_v19  ;;  %v420_v56 = vunpack.c.0.s8 %v419_v52 }
  0x1b   :  { %577 = vmatprep.subr.bf16.mxu1 %v645_v4  ;;  %602 = vmatpush1.bf16.msra.mxu0 %v601_v57  ;;  %v265_v57 = vrot.slane %v256_v49, %v264_v53 }
  0x1c   :  { %604 = vmatprep.subr.bf16.mxu0 %v603_v60  ;;  %v423_v1 = vsub.s32 %v420_v56, %v259_v47 }
  0x1e   :  { %579 = vmatpush3.bf16.msra.mxu1 %v578_v24  ;;  %v234_v24 = vld [vmem:[%s924_s5 + $0xd0] sm:$0xff] }
  0x1f   :  { %580 = vmatprep.subr.bf16.mxu1 %v645_v4  ;;  %606 = vmatpush1.bf16.msra.mxu0 %v605_v63  ;;  %v628_v26 = vpack.c.bf16 %v237_v25, %v234_v24 }
  0x20   :  { %608 = vmatprep.subr.bf16.mxu0 %v607_v3 }
  0x22   :  { %582 = vmatpush3.bf16.msra.mxu1 %v581_v27  ;;  %v240_v27 = vld [vmem:[%s924_s5 + $0x100] sm:$0xff] }
  0x23   :  { %615 = vmatprep.subr.bf16.mxu1 %v645_v4  ;;  %610 = vmatpush1.bf16.msra.mxu0 %v609_v7  ;;  %v631_v29 = vpack.c.bf16 %v243_v28, %v240_v27 }
  0x24   :  { %612 = vmatprep.subr.bf16.mxu0 %v611_v35 }
  0x27   :  { %614 = vmatpush1.bf16.msra.mxu0 %v613_v38 }
  0xd6   :  { %v109_v11 = vpop.f32.mrb[0].mxu0 }
  0xd7   :  { %v110_v12 = vadd.f32 %v444_v8, %v109_v11  ;;  %v488_v13 = vpop.f32.mrb[1].mxu0 }
  0xd9   :  { %v113_v15 = vmax.f32 %v110_v12, 0.0 }
  0xdb   :  { %522 = vmatmul.mubr.f32.vlgmr.msra.gmra.mrb[0].mxu1 %v113_v15 }
  0xdc   :  { %617 = vmatpush3.bf16.msra.mxu1 %v616_v14  ;;  %556 = vmatprep.mubr.msk.f32.mxu1 %vm644_vm2, %v643_v0  ;;  %v231_v0 = vld [vmem:[%s924_s5 + $0xb8] sm:$0xff] }
  0xdd   :  { %618 = vmatprep.subr.bf16.mxu1 %v645_v4  ;;  %v625_v23 = vpack.c.bf16 %v231_v0, %v228_v22 }
  0xe0   :  { %620 = vmatpush3.bf16.msra.mxu1 %v619_v18 }
  0xe1   :  { %621 = vmatprep.subr.bf16.mxu1 %v645_v4 }
  0xe4   :  { %623 = vmatpush3.bf16.msra.mxu1 %v622_v21 }
  0xe5   :  { %624 = vmatprep.subr.bf16.mxu1 %v645_v4 }
  0xe8   :  { %626 = vmatpush3.bf16.msra.mxu1 %v625_v23 }
  0xe9   :  { %627 = vmatprep.subr.bf16.mxu1 %v645_v4 }
  0xec   :  { %629 = vmatpush3.bf16.msra.mxu1 %v628_v26 }
  0xed   :  { %630 = vmatprep.subr.bf16.mxu1 %v645_v4 }
  0xf0   :  { %632 = vmatpush3.bf16.msra.mxu1 %v631_v29 }
  0xf1   :  { %633 = vmatprep.subr.bf16.mxu1 %v645_v4 }
  0xf4   :  { %635 = vmatpush3.bf16.msra.mxu1 %v634_v32 }
  0xf5   :  { %636 = vmatprep.subr.bf16.mxu1 %v645_v4  ;;  %v252_v4 = vld [vmem:[%s924_s5 + $0x160] sm:$0xff] }
  0xf6   :  { %v637_v40 = vpack.c.bf16 %v255_v39, %v252_v4 }
  0xf8   :  { %638 = vmatpush3.bf16.msra.mxu1 %v637_v40 }
 0x1ae   :  { %v203_v42 = vpop.f32.mrb[0].mxu1 }
 0x1af   :  { %v204_v43 = vadd.f32 %v447_v41, %v203_v42  ;;  %v523_v44 = vpop.f32.mrb[1].mxu1 }
 0x1b1   :  { %v207_v45 = vmax.f32 %v204_v43, 0.0 }
 0x1b3   :  { %338 = vmatmul.mubr.f32.vlgmr.msra.gmra.mrb[2].mxu0 %v207_v45  ;;  %557 = vmatmul.mubr.f32.vlgmr.msra.gmra.mrb[2].mxu1 %v207_v45 }
 0x286   :  { %v339_v58 = vpop.f32.mrb[2].mxu0  ;;  %v410_v59 = vpop.f32.mrb[2].mxu1 }
 0x287   :  { %v340_v60 = vadd.f32 %v339_v58, %v261_v54  ;;  %v341_v61 = vpop.f32.mrb[3].mxu0  ;;  %v558_v62 = vpop.f32.mrb[3].mxu1  ;;  %v411_v63 = vadd.f32 %v410_v59, %v269_v55 }
 0x288   :  { %v342_v2 = vadd.f32 %v341_v61, %v265_v57 }
 0x289   :  { %v431_v5 = vrot.slane %v411_v63, %v423_v1 }
 0x28a   :  { %v417_v3 = vcombine.low %v340_v60, %v342_v2 }
 0x28c   :  { %v424_v6 = vrot.slane %v417_v3, %v423_v1 }
 0x28e   :  { %v432_v7 = vcombine.low %v424_v6, %v431_v5 }
 0x290   :  { %439 = vst.msk [vmem:[%s928_s7] sm:$0x3f] %vm438_vm7, %v432_v7 }

// kernel: unet_adain_forward.11
= control target key start
LH: loop header
LB: loop body
LE: loop exit
PB: predicated region body
PF: predicated region fallthrough
CT: control target
= control target key end

     0   :  { %s1697_s18 = smov 0   ;;  %s1699_s19 = smov 0   ;;  %s2073_s0 = inlined_call_operand.vmem [shape: bf16[8,54], index: 0, kind: input, shape index: {}]   ;;  %s2074_s1 = inlined_call_operand.vmem [shape: f32[8,1], index: 1, kind: input, shape index: {}]   ;;  %s2075_s2 = inlined_call_operand.vmem [shape: bf16[2,54,4096], index: 2, kind: input, shape index: {}]   ;;  %s2076_s3 = inlined_call_operand.vmem [shape: bf16[2,8,4096], index: 3, kind: output, shape index: {0}]   ;;  %s2077_s4 = inlined_call_operand.vmem [shape: f32[2,8,1], index: 4, kind: output, shape index: {1}]   ;;  %s2078_s5 = inlined_call_operand.vmem [shape: f32[2,8,1], index: 5, kind: output, shape index: {2}]  }
   0x1   :  { %s1701_s20 = smov 0   ;;  %s1703_s21 = smov 0  }
   0x2   :  { %s1705_s22 = smov 0   ;;  %s1707_s23 = smov 0  }
   0x3   :  { %s1709_s24 = smov 0  }
   0x4 LB: > { %s25_s25 = sadd.s32 1, %s1655_s22  ;;  %s28_s26 = sadd.s32 1, %s1659_s23  ;;  %s1663_s24 = sphi %s1709_s24, %s16_s24   ;;  %s1659_s23 = sphi %s1707_s23, %s2084_s23   ;;  %s1655_s22 = sphi %s1705_s22, %s2083_s22   ;;  %s1651_s21 = sphi %s1703_s21, %s2082_s21   ;;  %s1647_s20 = sphi %s1701_s20, %s2081_s20   ;;  %s1643_s19 = sphi %s1699_s19, %s2080_s19   ;;  %s1639_s18 = sphi %s1697_s18, %s2079_s18  }
   0x5   : > { %p26_p0 = scmp.ge.s32.totalorder %s25_s25, 2  ;;  %p86_p1 = scmp.ne.s32.totalorder %s1643_s19, %s1639_s18 }
   0x6   : > { %p87_p2 = scmp.eq.s32.totalorder %s1663_s24, 0  ;;  %s79_s30 = sadd.s32 1, %s1643_s19 }
   0x7   : > { %s2086_s25 = smov (%p26_p0, %s25_s25), 0  ;;  %s2088_s26 = smov (!%p26_p0, %s28_s26), %s1659_s23 }
   0x8   : > { %p88_p3 = por %p87_p2, %p86_p1  ;;  %p30_p4 = scmp.ge.s32.totalorder %s2088_s26, 2 }
   0x9   : > { %s75_s27 = ssub.s32 %s1655_s22, %s2086_s25  ;;  %p1423_p6 = scmp.ge.s32.totalorder %s1663_s24, 4 }
   0xa   : > { %s2090_s26 = smov (%p30_p4, %s2088_s26), 0 }
   0xb   : > { %s74_s28 = ssub.s32 %s1659_s23, %s2090_s26  ;;  %198 = sbr.rel (%p1423_p6) target bundleno = 54 (0x36), region = 24 }
   0xc   : > { %s76_s29 = sor.u32 %s75_s27, %s74_s28 }
   0xd   : > { %p77_p5 = scmp.eq.s32.totalorder %s76_s29, 0 }
   0xf   : > { %s1748_s6 = scalar_select %p77_p5, %s1643_s19, %s79_s30  }
  0x12   : > { %201 = sbr.rel (!%p88_p3) target bundleno = 54 (0x36), region = 28  ;;  %s203_s7 = sand.u32 (%p88_p3), 1, %s1643_s19  }
  0x13   : > { %s1531_s8 = smul.u32 (%p88_p3), 448, %s203_s7  ;;  %s1424_s9 = sshll.u32 (%p88_p3), %s1655_s22, 4 }
  0x14   : > { %s1532_s10 = smul.u32 (%p88_p3), 224, %s1659_s23 }
  0x15   : > { %s1762_s16 = scalar_lea.vmem (%p88_p3), [#allocation2], %s1531_s8 }
  0x16   : > { %s208_s11 = sadd.s32 (%p88_p3), %s1532_s10, %s1424_s9 }
  0x17   : > { %s1425_s12 = sshll.u32 (%p88_p3), %s208_s11, 2 }
  0x18   : > { %s1757_s15 = scalar_lea.vmem (%p88_p3), %s2075_s2, %s1425_s12 }
  0x19   : > { %v223_v0 = vld [vmem:[%s1757_s15] sm:$0xff]  ;;  %v225_v1 = vld [vmem:[%s1757_s15 + $0x8] sm:$0xff]  ;;  %v227_v2 = vld [vmem:[%s1757_s15 + $0x10] sm:$0xff] }
  0x1a   : > { %224 = vst [vmem:[%s1762_s16] sm:$0xff] %v223_v0  ;;  %226 = vst [vmem:[%s1762_s16 + $0x8] sm:$0xff] %v225_v1  ;;  %v229_v3 = vld [vmem:[%s1757_s15 + $0x18] sm:$0xff]  ;;  %v231_v4 = vld [vmem:[%s1757_s15 + $0x20] sm:$0xff] }
  0x1b   : > { %228 = vst [vmem:[%s1762_s16 + $0x10] sm:$0xff] %v227_v2  ;;  %v233_v5 = vld [vmem:[%s1757_s15 + $0x28] sm:$0xff]  ;;  %230 = vst [vmem:[%s1762_s16 + $0x18] sm:$0xff] %v229_v3  ;;  %v235_v6 = vld [vmem:[%s1757_s15 + $0x30] sm:$0xff] }
  0x1c   : > { %232 = vst [vmem:[%s1762_s16 + $0x20] sm:$0xff] %v231_v4  ;;  %234 = vst [vmem:[%s1762_s16 + $0x28] sm:$0xff] %v233_v5  ;;  %v237_v7 = vld [vmem:[%s1757_s15 + $0x38] sm:$0xff]  ;;  %v239_v8 = vld [vmem:[%s1757_s15 + $0x80] sm:$0xff] }
  0x1d   : > { %236 = vst [vmem:[%s1762_s16 + $0x30] sm:$0xff] %v235_v6  ;;  %238 = vst [vmem:[%s1762_s16 + $0x38] sm:$0xff] %v237_v7  ;;  %v241_v9 = vld [vmem:[%s1757_s15 + $0x88] sm:$0xff]  ;;  %v243_v10 = vld [vmem:[%s1757_s15 + $0x90] sm:$0xff] }
  0x1e   : > { %240 = vst [vmem:[%s1762_s16 + $0x40] sm:$0xff] %v239_v8  ;;  %v245_v11 = vld [vmem:[%s1757_s15 + $0x98] sm:$0xff]  ;;  %242 = vst [vmem:[%s1762_s16 + $0x48] sm:$0xff] %v241_v9  ;;  %v247_v12 = vld [vmem:[%s1757_s15 + $0xa0] sm:$0xff] }
  0x1f   : > { %244 = vst [vmem:[%s1762_s16 + $0x50] sm:$0xff] %v243_v10  ;;  %246 = vst [vmem:[%s1762_s16 + $0x58] sm:$0xff] %v245_v11  ;;  %v249_v13 = vld [vmem:[%s1757_s15 + $0xa8] sm:$0xff]  ;;  %v251_v14 = vld [vmem:[%s1757_s15 + $0xb0] sm:$0xff] }
  0x20   : > { %248 = vst [vmem:[%s1762_s16 + $0x60] sm:$0xff] %v247_v12  ;;  %250 = vst [vmem:[%s1762_s16 + $0x68] sm:$0xff] %v249_v13  ;;  %v253_v15 = vld [vmem:[%s1757_s15 + $0xb8] sm:$0xff]  ;;  %v255_v16 = vld [vmem:[%s1757_s15 + $0x100] sm:$0xff] }
  0x21   : > { %252 = vst [vmem:[%s1762_s16 + $0x70] sm:$0xff] %v251_v14  ;;  %v257_v17 = vld [vmem:[%s1757_s15 + $0x108] sm:$0xff]  ;;  %254 = vst [vmem:[%s1762_s16 + $0x78] sm:$0xff] %v253_v15  ;;  %v259_v18 = vld [vmem:[%s1757_s15 + $0x110] sm:$0xff] }
  0x22   : > { %256 = vst [vmem:[%s1762_s16 + $0x80] sm:$0xff] %v255_v16  ;;  %258 = vst [vmem:[%s1762_s16 + $0x88] sm:$0xff] %v257_v17  ;;  %v261_v19 = vld [vmem:[%s1757_s15 + $0x118] sm:$0xff]  ;;  %v263_v20 = vld [vmem:[%s1757_s15 + $0x120] sm:$0xff] }
  0x23   : > { %260 = vst [vmem:[%s1762_s16 + $0x90] sm:$0xff] %v259_v18  ;;  %262 = vst [vmem:[%s1762_s16 + $0x98] sm:$0xff] %v261_v19  ;;  %v265_v21 = vld [vmem:[%s1757_s15 + $0x128] sm:$0xff]  ;;  %v267_v22 = vld [vmem:[%s1757_s15 + $0x130] sm:$0xff] }
  0x24   : > { %264 = vst [vmem:[%s1762_s16 + $0xa0] sm:$0xff] %v263_v20  ;;  %v269_v23 = vld [vmem:[%s1757_s15 + $0x138] sm:$0xff]  ;;  %266 = vst [vmem:[%s1762_s16 + $0xa8] sm:$0xff] %v265_v21  ;;  %v271_v24 = vld [vmem:[%s1757_s15 + $0x180] sm:$0xff] }
  0x25   : > { %268 = vst [vmem:[%s1762_s16 + $0xb0] sm:$0xff] %v267_v22  ;;  %270 = vst [vmem:[%s1762_s16 + $0xb8] sm:$0xff] %v269_v23  ;;  %v273_v25 = vld [vmem:[%s1757_s15 + $0x188] sm:$0xff]  ;;  %v275_v26 = vld [vmem:[%s1757_s15 + $0x190] sm:$0xff] }
  0x26   : > { %272 = vst [vmem:[%s1762_s16 + $0xc0] sm:$0xff] %v271_v24  ;;  %274 = vst [vmem:[%s1762_s16 + $0xc8] sm:$0xff] %v273_v25  ;;  %v277_v27 = vld [vmem:[%s1757_s15 + $0x198] sm:$0xff]  ;;  %v279_v28 = vld [vmem:[%s1757_s15 + $0x1a0] sm:$0xff] }
  0x27   : > { %276 = vst [vmem:[%s1762_s16 + $0xd0] sm:$0xff] %v275_v26  ;;  %v281_v29 = vld [vmem:[%s1757_s15 + $0x1a8] sm:$0xff]  ;;  %278 = vst [vmem:[%s1762_s16 + $0xd8] sm:$0xff] %v277_v27  ;;  %v283_v30 = vld [vmem:[%s1757_s15 + $0x1b0] sm:$0xff] }
  0x28   : > { %280 = vst [vmem:[%s1762_s16 + $0xe0] sm:$0xff] %v279_v28  ;;  %282 = vst [vmem:[%s1762_s16 + $0xe8] sm:$0xff] %v281_v29  ;;  %v285_v31 = vld [vmem:[%s1757_s15 + $0x1b8] sm:$0xff]  ;;  %v287_v32 = vld [vmem:[%s1757_s15 + $0x200] sm:$0xff] }
  0x29   : > { %284 = vst [vmem:[%s1762_s16 + $0xf0] sm:$0xff] %v283_v30  ;;  %286 = vst [vmem:[%s1762_s16 + $0xf8] sm:$0xff] %v285_v31  ;;  %v289_v33 = vld [vmem:[%s1757_s15 + $0x208] sm:$0xff]  ;;  %v291_v34 = vld [vmem:[%s1757_s15 + $0x210] sm:$0xff] }
  0x2a   : > { %288 = vst [vmem:[%s1762_s16 + $0x100] sm:$0xff] %v287_v32  ;;  %v293_v35 = vld [vmem:[%s1757_s15 + $0x218] sm:$0xff]  ;;  %290 = vst [vmem:[%s1762_s16 + $0x108] sm:$0xff] %v289_v33  ;;  %v295_v36 = vld [vmem:[%s1757_s15 + $0x220] sm:$0xff] }
  0x2b   : > { %292 = vst [vmem:[%s1762_s16 + $0x110] sm:$0xff] %v291_v34  ;;  %294 = vst [vmem:[%s1762_s16 + $0x118] sm:$0xff] %v293_v35  ;;  %v297_v37 = vld [vmem:[%s1757_s15 + $0x228] sm:$0xff]  ;;  %v299_v38 = vld [vmem:[%s1757_s15 + $0x230] sm:$0xff] }
  0x2c   : > { %296 = vst [vmem:[%s1762_s16 + $0x120] sm:$0xff] %v295_v36  ;;  %298 = vst [vmem:[%s1762_s16 + $0x128] sm:$0xff] %v297_v37  ;;  %v301_v39 = vld [vmem:[%s1757_s15 + $0x238] sm:$0xff]  ;;  %v303_v40 = vld [vmem:[%s1757_s15 + $0x280] sm:$0xff] }
  0x2d   : > { %300 = vst [vmem:[%s1762_s16 + $0x130] sm:$0xff] %v299_v38  ;;  %v305_v41 = vld [vmem:[%s1757_s15 + $0x288] sm:$0xff]  ;;  %302 = vst [vmem:[%s1762_s16 + $0x138] sm:$0xff] %v301_v39  ;;  %v307_v42 = vld [vmem:[%s1757_s15 + $0x290] sm:$0xff] }
  0x2e   : > { %304 = vst [vmem:[%s1762_s16 + $0x140] sm:$0xff] %v303_v40  ;;  %306 = vst [vmem:[%s1762_s16 + $0x148] sm:$0xff] %v305_v41  ;;  %v309_v43 = vld [vmem:[%s1757_s15 + $0x298] sm:$0xff]  ;;  %v311_v44 = vld [vmem:[%s1757_s15 + $0x2a0] sm:$0xff] }
  0x2f   : > { %308 = vst [vmem:[%s1762_s16 + $0x150] sm:$0xff] %v307_v42  ;;  %310 = vst [vmem:[%s1762_s16 + $0x158] sm:$0xff] %v309_v43  ;;  %v313_v45 = vld [vmem:[%s1757_s15 + $0x2a8] sm:$0xff]  ;;  %v315_v46 = vld [vmem:[%s1757_s15 + $0x2b0] sm:$0xff] }
  0x30   : > { %312 = vst [vmem:[%s1762_s16 + $0x160] sm:$0xff] %v311_v44  ;;  %v317_v47 = vld [vmem:[%s1757_s15 + $0x2b8] sm:$0xff]  ;;  %314 = vst [vmem:[%s1762_s16 + $0x168] sm:$0xff] %v313_v45  ;;  %v319_v48 = vld [vmem:[%s1757_s15 + $0x300] sm:$0xff] }
  0x31   : > { %316 = vst [vmem:[%s1762_s16 + $0x170] sm:$0xff] %v315_v46  ;;  %318 = vst [vmem:[%s1762_s16 + $0x178] sm:$0xff] %v317_v47  ;;  %v321_v49 = vld [vmem:[%s1757_s15 + $0x308] sm:$0xff]  ;;  %v323_v50 = vld [vmem:[%s1757_s15 + $0x310] sm:$0xff] }
  0x32   : > { %320 = vst [vmem:[%s1762_s16 + $0x180] sm:$0xff] %v319_v48  ;;  %322 = vst [vmem:[%s1762_s16 + $0x188] sm:$0xff] %v321_v49  ;;  %v325_v51 = vld [vmem:[%s1757_s15 + $0x318] sm:$0xff]  ;;  %v327_v52 = vld [vmem:[%s1757_s15 + $0x320] sm:$0xff] }
  0x33   : > { %324 = vst [vmem:[%s1762_s16 + $0x190] sm:$0xff] %v323_v50  ;;  %v329_v53 = vld [vmem:[%s1757_s15 + $0x328] sm:$0xff]  ;;  %326 = vst [vmem:[%s1762_s16 + $0x198] sm:$0xff] %v325_v51  ;;  %v331_v54 = vld [vmem:[%s1757_s15 + $0x330] sm:$0xff] }
  0x34   : > { %328 = vst [vmem:[%s1762_s16 + $0x1a0] sm:$0xff] %v327_v52  ;;  %330 = vst [vmem:[%s1762_s16 + $0x1a8] sm:$0xff] %v329_v53  ;;  %v333_v55 = vld [vmem:[%s1757_s15 + $0x338] sm:$0xff] }
  0x35   : > { %332 = vst [vmem:[%s1762_s16 + $0x1b0] sm:$0xff] %v331_v54  ;;  %334 = vst [vmem:[%s1762_s16 + $0x1b8] sm:$0xff] %v333_v55 }
  0x36 PF: > { %p1426_p7 = scmp.ge.s32.totalorder %s1663_s24, 1  ;;  %p339_p8 = scmp.lt.s32.totalorder %s1663_s24, 5 }
  0x38   : > { %p340_p9 = pnand %p1426_p7, %p339_p8 }
  0x39   : > { %s346_s17 = sand.u32 (!%p340_p9), 1, %s1639_s18   ;;  %v1665_v56 = vmov (!%p340_p9), 0   ;;  %v462_v57 = vld [vmem:[%s2074_s1] sm:$0xff] (!%p340_p9)  ;;  %vm752_vm0 = vcmask (!%p340_p9), 1042432   ;;  %vm748_vm1 = vcmask (!%p340_p9), 441344   ;;  %p387_p10 = scmp.lt.s32.totalorder (!%p340_p9), %s1651_s21, 1 }
  0x3a   : > { %343 = sbr.rel (%p340_p9) target bundleno = 527 (0x20f), region = 51  ;;  %833 = vmatprep.mubr.bf16.mxu0 (!%p340_p9), %v1665_v56  ;;  %874 = vmatprep.mubr.bf16.mxu1 (!%p340_p9), %v1665_v56  ;;  %v1913_v36 = vld [vmem:[%s2073_s0] sm:$0xf] (!%p340_p9)  ;;  %s1427_s15 = sshll.u32 (!%p340_p9), %s1647_s20, 4 }
  0x3b   : > { %s1533_s27 = smul.u32 (!%p340_p9), 448, %s346_s17  ;;  %1592 = vset.pattern.permute.xlu0 (!%p340_p9), %v1665_v56  ;;  %p389_p11 = scmp.lt.s32.totalorder (!%p340_p9), %s1427_s15, 31 }
  0x3c   : > { %465 = vperm.xlu0 (!%p340_p9), %1592, %v462_v57   ;;  %p1520_p12 = scmp.ne.s32.totalorder (!%p340_p9), %s1647_s20, 0 }
  0x3d   : > { %s1882_s30 = scalar_lea.vmem (!%p340_p9), [#allocation2], %s1533_s27 }
  0x3e   : > { %v406_v58 = vld [vmem:[%s1882_s30] sm:$0xff] (!%p340_p9)  ;;  %v407_v60 = vld [vmem:[%s1882_s30 + $0x8] sm:$0xff] (!%p340_p9)  ;;  %v408_v24 = vld [vmem:[%s1882_s30 + $0x10] sm:$0xff] (!%p340_p9) }
  0x3f   : > { %v414_v59 = vld [vmem:[%s1882_s30 + $0x40] sm:$0xff] (!%p340_p9)  ;;  %v415_v62 = vld [vmem:[%s1882_s30 + $0x48] sm:$0xff] (!%p340_p9)  ;;  %v416_v25 = vld [vmem:[%s1882_s30 + $0x50] sm:$0xff] (!%p340_p9) }
  0x40   : > { %v1433_v61 = vcombine.high (!%p340_p9), %v406_v58, %v414_v59  ;;  %v1432_v63 = vcombine.low (!%p340_p9), %v406_v58, %v414_v59  ;;  %v422_v0 = vld [vmem:[%s1882_s30 + $0x80] sm:$0xff] (!%p340_p9)  ;;  %v1435_v2 = vcombine.high (!%p340_p9), %v407_v60, %v415_v62  ;;  %v1434_v3 = vcombine.low (!%p340_p9), %v407_v60, %v415_v62  ;;  %v423_v5 = vld [vmem:[%s1882_s30 + $0x88] sm:$0xff] (!%p340_p9)  ;;  %v409_v26 = vld [vmem:[%s1882_s30 + $0x18] sm:$0xff] (!%p340_p9) }
  0x41   : > { %v430_v1 = vld [vmem:[%s1882_s30 + $0xc0] sm:$0xff]  ;;  %v431_v6 = vld [vmem:[%s1882_s30 + $0xc8] sm:$0xff]  ;;  %v417_v27 = vld [vmem:[%s1882_s30 + $0x58] sm:$0xff]  ;;  %v1437_v29 = vcombine.high %v408_v24, %v416_v25  ;;  %v1436_v37 = vcombine.low %v408_v24, %v416_v25  ;;  %s2092_s21 = smov (!%p387_p10, %s1651_s21), 1  ;;  %s2094_s15 = smov (!%p389_p11, %s1427_s15), 31 }
  0x42   : > { %v1449_v4 = vcombine.high %v422_v0, %v430_v1  ;;  %v438_v7 = vld [vmem:[%s1882_s30 + $0x100] sm:$0xff]  ;;  %801 = vmatprep.subr.bf16.mxu0 %v1433_v61  ;;  %v1451_v8 = vcombine.high %v423_v5, %v431_v6  ;;  %v439_v10 = vld [vmem:[%s1882_s30 + $0x108] sm:$0xff]  ;;  %842 = vmatprep.subr.bf16.mxu1 %v1435_v2  ;;  %v1448_v12 = vcombine.low %v422_v0, %v430_v1  ;;  %v424_v32 = vld [vmem:[%s1882_s30 + $0x90] sm:$0xff]  ;;  %s1430_s8 = sshll.u32 %s2092_s21, 3  ;;  %s1428_s16 = sshll.u32 %s2092_s21, 5  ;;  %vm1205_vm2 = vcmask (!%p1520_p12), 7168  }
  0x43   : > { %v446_v9 = vld [vmem:[%s1882_s30 + $0x140] sm:$0xff]  ;;  %v447_v11 = vld [vmem:[%s1882_s30 + $0x148] sm:$0xff]  ;;  %802 = vmatpush1.bf16.msra.mxu0 %v1432_v63  ;;  %843 = vmatpush1.bf16.msra.mxu1 %v1434_v3  ;;  %v1450_v13 = vcombine.low %v423_v5, %v431_v6  ;;  %v1439_v31 = vcombine.high %v409_v26, %v417_v27  ;;  %v432_v33 = vld [vmem:[%s1882_s30 + $0xd0] sm:$0xff]  ;;  %v1438_v38 = vcombine.low %v409_v26, %v417_v27  ;;  %s1988_s11 = scalar_lea.vmem %s2077_s4, %s1430_s8  ;;  %s1993_s14 = scalar_lea.vmem %s2078_s5, %s1430_s8 }
  0x44   : > { %803 = vmatprep.subr.bf16.mxu0 %v1449_v4  ;;  %v1465_v14 = vcombine.high %v438_v7, %v446_v9  ;;  %844 = vmatprep.subr.bf16.mxu1 %v1451_v8  ;;  %v1467_v15 = vcombine.high %v439_v10, %v447_v11  ;;  %v454_v16 = vld [vmem:[%s1882_s30 + $0x180] sm:$0x77]  ;;  %v455_v17 = vld [vmem:[%s1882_s30 + $0x188] sm:$0x77]  ;;  %v1464_v18 = vcombine.low %v438_v7, %v446_v9  ;;  %v425_v34 = vld [vmem:[%s1882_s30 + $0x98] sm:$0xff]  ;;  %s392_s17 = sadd.s32 %s1428_s16, %s2094_s15 }
  0x45   : > { %v1466_v19 = vcombine.low %v439_v10, %v447_v11  ;;  %v1481_v20 = vcombine.high %v454_v16, %v454_v16  ;;  %v1480_v21 = vcombine.low %v454_v16, %v454_v16  ;;  %v1483_v22 = vcombine.high %v455_v17, %v455_v17  ;;  %v433_v35 = vld [vmem:[%s1882_s30 + $0xd8] sm:$0xff]  ;;  %v440_v41 = vld [vmem:[%s1882_s30 + $0x110] sm:$0xff]  ;;  %v410_v58 = vld [vmem:[%s1882_s30 + $0x20] sm:$0xff]  ;;  %s1429_s27 = sshll.u32 %s392_s17, 2 }
  0x46   : > { %v1482_v23 = vcombine.low %v455_v17, %v455_v17  ;;  %v1453_v39 = vcombine.high %v424_v32, %v432_v33  ;;  %v1455_v40 = vcombine.high %v425_v34, %v433_v35  ;;  %v448_v42 = vld [vmem:[%s1882_s30 + $0x150] sm:$0xff]  ;;  %v441_v43 = vld [vmem:[%s1882_s30 + $0x118] sm:$0xff]  ;;  %v1452_v45 = vcombine.low %v424_v32, %v432_v33  ;;  %v418_v59 = vld [vmem:[%s1882_s30 + $0x60] sm:$0xff] }
  0x47   : > { %804 = vmatpush1.bf16.msra.mxu0 %v1448_v12  ;;  %845 = vmatpush1.bf16.msra.mxu1 %v1450_v13  ;;  %v754_v28 = vsel %vm752_vm0, %v1480_v21, 0  ;;  %v449_v44 = vld [vmem:[%s1882_s30 + $0x158] sm:$0xff]  ;;  %v1454_v46 = vcombine.low %v425_v34, %v433_v35  ;;  %v1469_v47 = vcombine.high %v440_v41, %v448_v42  ;;  %v456_v49 = vld [vmem:[%s1882_s30 + $0x190] sm:$0x77]  ;;  %v1468_v51 = vcombine.low %v440_v41, %v448_v42  ;;  %v411_v60 = vld [vmem:[%s1882_s30 + $0x28] sm:$0xff] }
  0x48   : > { %805 = vmatprep.subr.bf16.mxu0 %v1465_v14  ;;  %846 = vmatprep.subr.bf16.mxu1 %v1467_v15  ;;  %v760_v30 = vsel %vm752_vm0, %v1482_v23, 0  ;;  %v1471_v48 = vcombine.high %v441_v43, %v449_v44  ;;  %v457_v50 = vld [vmem:[%s1882_s30 + $0x198] sm:$0x77]  ;;  %v1470_v52 = vcombine.low %v441_v43, %v449_v44  ;;  %v1485_v53 = vcombine.high %v456_v49, %v456_v49  ;;  %v419_v61 = vld [vmem:[%s1882_s30 + $0x68] sm:$0xff]  ;;  %v426_v2 = vld [vmem:[%s1882_s30 + $0xa0] sm:$0xff] }
  0x49   : > { %v1484_v54 = vcombine.low %v456_v49, %v456_v49  ;;  %v1487_v55 = vcombine.high %v457_v50, %v457_v50  ;;  %v1486_v57 = vcombine.low %v457_v50, %v457_v50  ;;  %v1441_v63 = vcombine.high %v410_v58, %v418_v59  ;;  %v434_v3 = vld [vmem:[%s1882_s30 + $0xe0] sm:$0xff]  ;;  %v427_v4 = vld [vmem:[%s1882_s30 + $0xa8] sm:$0xff]  ;;  %v412_v26 = vld [vmem:[%s1882_s30 + $0x30] sm:$0xff] }
  0x4a   : > { %v1443_v1 = vcombine.high %v411_v60, %v419_v61  ;;  %v435_v5 = vld [vmem:[%s1882_s30 + $0xe8] sm:$0xff]  ;;  %v1440_v6 = vcombine.low %v410_v58, %v418_v59  ;;  %v1442_v7 = vcombine.low %v411_v60, %v419_v61  ;;  %v1457_v8 = vcombine.high %v426_v2, %v434_v3  ;;  %v442_v10 = vld [vmem:[%s1882_s30 + $0x120] sm:$0xff]  ;;  %v420_v27 = vld [vmem:[%s1882_s30 + $0x70] sm:$0xff] }
  0x4b   : > { %806 = vmatpush1.bf16.msra.mxu0 %v1464_v18  ;;  %847 = vmatpush1.bf16.msra.mxu1 %v1466_v19  ;;  %v766_v62 = vsel %vm752_vm0, %v1484_v54, 0  ;;  %v772_v0 = vsel %vm752_vm0, %v1486_v57, 0  ;;  %v1459_v9 = vcombine.high %v427_v4, %v435_v5  ;;  %v450_v11 = vld [vmem:[%s1882_s30 + $0x160] sm:$0xff]  ;;  %v443_v12 = vld [vmem:[%s1882_s30 + $0x128] sm:$0xff]  ;;  %v1456_v14 = vcombine.low %v426_v2, %v434_v3  ;;  %v428_v34 = vld [vmem:[%s1882_s30 + $0xb0] sm:$0xff] }
  0x4c   : > { %1496 = vmatprep.subr.msk.bf16.mxu0 %vm752_vm0, %v1481_v20  ;;  %1498 = vmatprep.subr.msk.bf16.mxu1 %vm752_vm0, %v1483_v22  ;;  %v451_v13 = vld [vmem:[%s1882_s30 + $0x168] sm:$0xff]  ;;  %v1458_v15 = vcombine.low %v427_v4, %v435_v5  ;;  %v1473_v16 = vcombine.high %v442_v10, %v450_v11  ;;  %v458_v18 = vld [vmem:[%s1882_s30 + $0x1a0] sm:$0x77]  ;;  %v1472_v20 = vcombine.low %v442_v10, %v450_v11  ;;  %v436_v35 = vld [vmem:[%s1882_s30 + $0xf0] sm:$0xff] }
  0x4d   : > { %v1475_v17 = vcombine.high %v443_v12, %v451_v13  ;;  %v459_v19 = vld [vmem:[%s1882_s30 + $0x1a8] sm:$0x77]  ;;  %v1474_v21 = vcombine.low %v443_v12, %v451_v13  ;;  %v1489_v22 = vcombine.high %v458_v18, %v458_v18  ;;  %v1488_v23 = vcombine.low %v458_v18, %v458_v18  ;;  %v444_v43 = vld [vmem:[%s1882_s30 + $0x130] sm:$0xff] }
  0x4e   : > { %v1491_v24 = vcombine.high %v459_v19, %v459_v19  ;;  %v1490_v25 = vcombine.low %v459_v19, %v459_v19  ;;  %v1461_v41 = vcombine.high %v428_v34, %v436_v35  ;;  %v452_v44 = vld [vmem:[%s1882_s30 + $0x170] sm:$0xff] }
  0x4f   : > { %808 = vmatpush1.bf16.msra.mxu0 %v754_v28  ;;  %849 = vmatpush1.bf16.msra.mxu1 %v760_v30  ;;  %v413_v28 = vld [vmem:[%s1882_s30 + $0x38] sm:$0xff]  ;;  %v778_v30 = vsel %vm752_vm0, %v1488_v23, 0  ;;  %v1477_v49 = vcombine.high %v444_v43, %v452_v44 }
  0x50   : > { %883 = vmatprep.subr.bf16.mxu0 %v1437_v29  ;;  %924 = vmatprep.subr.bf16.mxu1 %v1439_v31  ;;  %v421_v29 = vld [vmem:[%s1882_s30 + $0x78] sm:$0xff]  ;;  %v1445_v31 = vcombine.high %v412_v26, %v420_v27  ;;  %v784_v32 = vsel %vm752_vm0, %v1490_v25, 0 }
  0x51   : > { %v1447_v33 = vcombine.high %v413_v28, %v421_v29 }
  0x52   : > { %1497 = vmatmul.mubr.msk.bf16.vlgmr.msra.gmra.mrb[0].mxu0 %vm748_vm1, %v1913_v36  ;;  %1499 = vmatmul.mubr.msk.bf16.vlgmr.msra.gmra.mrb[0].mxu1 %vm748_vm1, %v1913_v36 }
  0x53   : > { %884 = vmatpush1.bf16.msra.mxu0 %v1436_v37  ;;  %925 = vmatpush1.bf16.msra.mxu1 %v1438_v38  ;;  %v429_v37 = vld [vmem:[%s1882_s30 + $0xb8] sm:$0xff] }
  0x54   : > { %885 = vmatprep.subr.bf16.mxu0 %v1453_v39  ;;  %926 = vmatprep.subr.bf16.mxu1 %v1455_v40  ;;  %v437_v38 = vld [vmem:[%s1882_s30 + $0xf8] sm:$0xff]  ;;  %v1444_v39 = vcombine.low %v412_v26, %v420_v27  ;;  %v1446_v40 = vcombine.low %v413_v28, %v421_v29 }
  0x55   : > { %915 = vmatprep.mubr.bf16.mxu0 %v1665_v56  ;;  %956 = vmatprep.mubr.bf16.mxu1 %v1665_v56  ;;  %v1463_v42 = vcombine.high %v429_v37, %v437_v38 }
  0x57   : > { %886 = vmatpush1.bf16.msra.mxu0 %v1452_v45  ;;  %927 = vmatpush1.bf16.msra.mxu1 %v1454_v46  ;;  %v445_v45 = vld [vmem:[%s1882_s30 + $0x138] sm:$0xff] }
  0x58   : > { %887 = vmatprep.subr.bf16.mxu0 %v1469_v47  ;;  %928 = vmatprep.subr.bf16.mxu1 %v1471_v48  ;;  %v453_v46 = vld [vmem:[%s1882_s30 + $0x178] sm:$0xff]  ;;  %v1460_v47 = vcombine.low %v428_v34, %v436_v35  ;;  %v1462_v48 = vcombine.low %v429_v37, %v437_v38 }
  0x59   : > { %v1479_v50 = vcombine.high %v445_v45, %v453_v46  ;;  %v1478_v54 = vcombine.low %v445_v45, %v453_v46 }
  0x5b   : > { %888 = vmatpush1.bf16.msra.mxu0 %v1468_v51  ;;  %929 = vmatpush1.bf16.msra.mxu1 %v1470_v52  ;;  %v460_v51 = vld [vmem:[%s1882_s30 + $0x1b0] sm:$0x77]  ;;  %v461_v52 = vld [vmem:[%s1882_s30 + $0x1b8] sm:$0x77]  ;;  %s2005_s30 = scalar_lea.vmem %s2076_s3, %s1429_s27 }
  0x5c   : > { %1500 = vmatprep.subr.msk.bf16.mxu0 %vm752_vm0, %v1485_v53  ;;  %1502 = vmatprep.subr.msk.bf16.mxu1 %vm752_vm0, %v1487_v55  ;;  %v1476_v53 = vcombine.low %v444_v43, %v452_v44  ;;  %v1493_v55 = vcombine.high %v460_v51, %v460_v51  ;;  %v1492_v57 = vcombine.low %v460_v51, %v460_v51 }
  0x5d   : > { %v1495_v58 = vcombine.high %v461_v52, %v461_v52  ;;  %v1494_v59 = vcombine.low %v461_v52, %v461_v52 }
  0x5e   : > { %v790_v60 = vsel %vm752_vm0, %v1492_v57, 0 }
  0x5f   : > { %890 = vmatpush1.bf16.msra.mxu0 %v766_v62  ;;  %931 = vmatpush1.bf16.msra.mxu1 %v772_v0 }
  0x60   : > { %965 = vmatprep.subr.bf16.mxu0 %v1441_v63  ;;  %1006 = vmatprep.subr.bf16.mxu1 %v1443_v1 }
  0x62   : > { %1501 = vmatmul.mubr.msk.bf16.vlgmr.msra.gmra.mrb[4].mxu0 %vm748_vm1, %v1913_v36  ;;  %1503 = vmatmul.mubr.msk.bf16.vlgmr.msra.gmra.mrb[4].mxu1 %vm748_vm1, %v1913_v36 }
  0x63   : > { %966 = vmatpush1.bf16.msra.mxu0 %v1440_v6  ;;  %1007 = vmatpush1.bf16.msra.mxu1 %v1442_v7 }
  0x64   : > { %967 = vmatprep.subr.bf16.mxu0 %v1457_v8  ;;  %1008 = vmatprep.subr.bf16.mxu1 %v1459_v9 }
  0x65   : > { %997 = vmatprep.mubr.bf16.mxu0 %v1665_v56  ;;  %1038 = vmatprep.mubr.bf16.mxu1 %v1665_v56 }
  0x67   : > { %968 = vmatpush1.bf16.msra.mxu0 %v1456_v14  ;;  %1009 = vmatpush1.bf16.msra.mxu1 %v1458_v15 }
  0x68   : > { %969 = vmatprep.subr.bf16.mxu0 %v1473_v16  ;;  %1010 = vmatprep.subr.bf16.mxu1 %v1475_v17 }
  0x6b   : > { %970 = vmatpush1.bf16.msra.mxu0 %v1472_v20  ;;  %1011 = vmatpush1.bf16.msra.mxu1 %v1474_v21 }
  0x6c   : > { %1504 = vmatprep.subr.msk.bf16.mxu0 %vm752_vm0, %v1489_v22  ;;  %1506 = vmatprep.subr.msk.bf16.mxu1 %vm752_vm0, %v1491_v24 }
  0x6f   : > { %972 = vmatpush1.bf16.msra.mxu0 %v778_v30  ;;  %1013 = vmatpush1.bf16.msra.mxu1 %v784_v32 }
  0x70   : > { %1047 = vmatprep.subr.bf16.mxu0 %v1445_v31  ;;  %1088 = vmatprep.subr.bf16.mxu1 %v1447_v33 }
  0x72   : > { %1505 = vmatmul.mubr.msk.bf16.vlgmr.msra.gmra.mrb[8].mxu0 %vm748_vm1, %v1913_v36  ;;  %1507 = vmatmul.mubr.msk.bf16.vlgmr.msra.gmra.mrb[8].mxu1 %vm748_vm1, %v1913_v36 }
  0x73   : > { %1048 = vmatpush1.bf16.msra.mxu0 %v1444_v39  ;;  %1089 = vmatpush1.bf16.msra.mxu1 %v1446_v40 }
  0x74   : > { %1049 = vmatprep.subr.bf16.mxu0 %v1461_v41  ;;  %1090 = vmatprep.subr.bf16.mxu1 %v1463_v42 }
  0x75   : > { %1079 = vmatprep.mubr.bf16.mxu0 %v1665_v56  ;;  %1120 = vmatprep.mubr.bf16.mxu1 %v1665_v56  ;;  %v796_v56 = vsel %vm752_vm0, %v1494_v59, 0 }
  0x77   : > { %1050 = vmatpush1.bf16.msra.mxu0 %v1460_v47  ;;  %1091 = vmatpush1.bf16.msra.mxu1 %v1462_v48 }
  0x78   : > { %1051 = vmatprep.subr.bf16.mxu0 %v1477_v49  ;;  %1092 = vmatprep.subr.bf16.mxu1 %v1479_v50 }
  0x7b   : > { %1052 = vmatpush1.bf16.msra.mxu0 %v1476_v53  ;;  %1093 = vmatpush1.bf16.msra.mxu1 %v1478_v54  ;;  %v1666_v54 = vmov (!%p1520_p12), 0.0  }
  0x7c   : > { %1508 = vmatprep.subr.msk.bf16.mxu0 %vm752_vm0, %v1493_v55  ;;  %1510 = vmatprep.subr.msk.bf16.mxu1 %vm752_vm0, %v1495_v58  ;;  %1206 = vst.msk [vmem:[%s1988_s11] sm:$0xff] (!%p1520_p12), %vm1205_vm2, %v1666_v54  ;;  %1207 = vst.msk [vmem:[%s1993_s14] sm:$0xff] (!%p1520_p12), %vm1205_vm2, %v1666_v54 }
  0x7f   : > { %1054 = vmatpush1.bf16.msra.mxu0 %v790_v60  ;;  %1095 = vmatpush1.bf16.msra.mxu1 %v796_v56 }
  0x82   : > { %1509 = vmatmul.mubr.msk.bf16.vlgmr.msra.gmra.mrb[12].mxu0 %vm748_vm1, %v1913_v36  ;;  %1511 = vmatmul.mubr.msk.bf16.vlgmr.msra.gmra.mrb[12].mxu1 %vm748_vm1, %v1913_v36 }
  0xbb   : > { %v466_v61 = vpop.permute.xlu0 %465 }
 0x125   : > { %v835_v36 = vpop.f32.mrb[0].mxu0  ;;  %v876_v62 = vpop.f32.mrb[0].mxu1 }
 0x126   : > { %v1996_v63 = vadd.f32 %v835_v36, %v466_v61  ;;  %v837_v0 = vpop.f32.mrb[1].mxu0  ;;  %v2000_v2 = vadd.f32 %v876_v62, %v466_v61  ;;  %v878_v3 = vpop.f32.mrb[1].mxu1 }
 0x127   : > { %v1998_v1 = vadd.f32 %v837_v0, %v466_v61  ;;  %v839_v4 = vpop.f32.mrb[2].mxu0  ;;  %v2007_v5 = vadd.f32 %v878_v3, %v466_v61  ;;  %v880_v6 = vpop.f32.mrb[2].mxu1 }
 0x128   : > { %v840_v7 = vpop.f32.mrb[3].mxu0  ;;  %v881_v9 = vpop.f32.mrb[3].mxu1 }
 0x129   : > { %v1523_v8 = vpack.c.bf16 %v1998_v1, %v1996_v63  ;;  %v1524_v10 = vpack.c.bf16 %v2007_v5, %v2000_v2 }
 0x12b   : > { %1193 = vst [vmem:[%s2005_s30] sm:$0xff] %v1523_v8  ;;  %1194 = vst [vmem:[%s2005_s30 + $0x8] sm:$0xff] %v1524_v10 }
 0x135   : > { %v917_v11 = vpop.f32.mrb[4].mxu0  ;;  %v958_v13 = vpop.f32.mrb[4].mxu1 }
 0x136   : > { %v918_v12 = vadd.f32 %v917_v11, %v466_v61  ;;  %v919_v14 = vpop.f32.mrb[5].mxu0  ;;  %v2015_v15 = vadd.f32 %v958_v13, %v466_v61  ;;  %v960_v17 = vpop.f32.mrb[5].mxu1 }
 0x137   : > { %v920_v16 = vadd.f32 %v919_v14, %v466_v61  ;;  %v921_v18 = vpop.f32.mrb[6].mxu0  ;;  %v2017_v19 = vadd.f32 %v960_v17, %v466_v61  ;;  %v962_v20 = vpop.f32.mrb[6].mxu1 }
 0x138   : > { %v922_v21 = vpop.f32.mrb[7].mxu0  ;;  %v963_v23 = vpop.f32.mrb[7].mxu1 }
 0x139   : > { %v1525_v22 = vpack.c.bf16 %v920_v16, %v918_v12  ;;  %v1526_v24 = vpack.c.bf16 %v2017_v19, %v2015_v15 }
 0x13b   : > { %1195 = vst [vmem:[%s2005_s30 + $0x10] sm:$0xff] %v1525_v22  ;;  %1196 = vst [vmem:[%s2005_s30 + $0x18] sm:$0xff] %v1526_v24 }
 0x145   : > { %v999_v25 = vpop.f32.mrb[8].mxu0  ;;  %v1040_v27 = vpop.f32.mrb[8].mxu1 }
 0x146   : > { %v1000_v26 = vadd.f32 %v999_v25, %v466_v61  ;;  %v1001_v28 = vpop.f32.mrb[9].mxu0  ;;  %v1041_v29 = vadd.f32 %v1040_v27, %v466_v61  ;;  %v1042_v31 = vpop.f32.mrb[9].mxu1 }
 0x147   : > { %v1002_v30 = vadd.f32 %v1001_v28, %v466_v61  ;;  %v1003_v32 = vpop.f32.mrb[10].mxu0  ;;  %v1043_v33 = vadd.f32 %v1042_v31, %v466_v61  ;;  %v1044_v34 = vpop.f32.mrb[10].mxu1 }
 0x148   : > { %v1004_v35 = vpop.f32.mrb[11].mxu0  ;;  %v1045_v38 = vpop.f32.mrb[11].mxu1 }
 0x149   : > { %v1527_v37 = vpack.c.bf16 %v1002_v30, %v1000_v26  ;;  %v1528_v39 = vpack.c.bf16 %v1043_v33, %v1041_v29 }
 0x14b   : > { %1197 = vst [vmem:[%s2005_s30 + $0x20] sm:$0xff] %v1527_v37  ;;  %1198 = vst [vmem:[%s2005_s30 + $0x28] sm:$0xff] %v1528_v39 }
 0x155   : > { %v1081_v40 = vpop.f32.mrb[12].mxu0  ;;  %v1122_v42 = vpop.f32.mrb[12].mxu1  ;;  %1204 = sbr.rel (%p1520_p12) target bundleno = 348 (0x15c), region = 59 }
 0x156   : > { %v1082_v41 = vadd.f32 %v1081_v40, %v466_v61  ;;  %v1083_v43 = vpop.f32.mrb[13].mxu0  ;;  %v1123_v44 = vadd.f32 %v1122_v42, %v466_v61  ;;  %v1124_v46 = vpop.f32.mrb[13].mxu1 }
 0x157   : > { %v1084_v45 = vadd.f32 %v1083_v43, %v466_v61  ;;  %v1085_v47 = vpop.f32.mrb[14].mxu0  ;;  %v1125_v48 = vadd.f32 %v1124_v46, %v466_v61  ;;  %v1126_v49 = vpop.f32.mrb[14].mxu1 }
 0x158   : > { %v1086_v50 = vpop.f32.mrb[15].mxu0  ;;  %v1127_v52 = vpop.f32.mrb[15].mxu1 }
 0x159   : > { %v1529_v51 = vpack.c.bf16 %v1084_v45, %v1082_v41  ;;  %v1530_v53 = vpack.c.bf16 %v1125_v48, %v1123_v44 }
 0x15b   : > { %1199 = vst [vmem:[%s2005_s30 + $0x30] sm:$0xff] %v1529_v51  ;;  %1200 = vst [vmem:[%s2005_s30 + $0x38] sm:$0xff] %v1530_v53 }
 0x15c PF: > { %v1209_v55 = vadd.f32 %v1998_v1, %v1996_v63  ;;  %v1230_v57 = vmul.f32 %v1996_v63, %v1996_v63  ;;  %v1231_v58 = vmul.f32 %v1998_v1, %v1998_v1  ;;  %v1232_v60 = vmul.f32 %v2000_v2, %v2000_v2  ;;  %v1208_v37 = vld [vmem:[%s1988_s11] sm:$0xff] }
 0x15d   : > { %v1233_v61 = vmul.f32 %v2007_v5, %v2007_v5  ;;  %v1234_v0 = vmul.f32 %v918_v12, %v918_v12  ;;  %v1235_v6 = vmul.f32 %v920_v16, %v920_v16  ;;  %v1236_v1 = vmul.f32 %v2015_v15, %v2015_v15  ;;  %v1229_v40 = vld [vmem:[%s1993_s14] sm:$0xff] }
 0x15e   : > { %v1210_v59 = vadd.f32 %v1209_v55, %v2000_v2  ;;  %v1246_v36 = vadd.f32 %v1231_v58, %v1230_v57  ;;  %v1237_v9 = vmul.f32 %v2017_v19, %v2017_v19  ;;  %v1238_v11 = vmul.f32 %v1000_v26, %v1000_v26 }
 0x15f   : > { %v1239_v14 = vmul.f32 %v1002_v30, %v1002_v30  ;;  %v1240_v18 = vmul.f32 %v1041_v29, %v1041_v29  ;;  %v1241_v22 = vmul.f32 %v1043_v33, %v1043_v33  ;;  %v1242_v24 = vmul.f32 %v1082_v41, %v1082_v41 }
 0x160   : > { %v1211_v56 = vadd.f32 %v1210_v59, %v2007_v5  ;;  %v1247_v3 = vadd.f32 %v1246_v36, %v1232_v60  ;;  %v1243_v28 = vmul.f32 %v1084_v45, %v1084_v45  ;;  %v1244_v31 = vmul.f32 %v1123_v44, %v1123_v44 }
 0x161   : > { %v1245_v34 = vmul.f32 %v1125_v48, %v1125_v48  ;;  %vm1227_vm3 = vcmask 7168  }
 0x162   : > { %v1212_v62 = vadd.f32 %v1211_v56, %v918_v12  ;;  %v1248_v63 = vadd.f32 %v1247_v3, %v1233_v61 }
 0x164   : > { %v1213_v4 = vadd.f32 %v1212_v62, %v920_v16  ;;  %v1249_v8 = vadd.f32 %v1248_v63, %v1234_v0 }
 0x166   : > { %v1214_v7 = vadd.f32 %v1213_v4, %v2015_v15  ;;  %v1250_v10 = vadd.f32 %v1249_v8, %v1235_v6 }
 0x168   : > { %v1215_v2 = vadd.f32 %v1214_v7, %v2017_v19  ;;  %v1251_v13 = vadd.f32 %v1250_v10, %v1236_v1 }
 0x16a   : > { %v1216_v5 = vadd.f32 %v1215_v2, %v1000_v26  ;;  %v1252_v17 = vadd.f32 %v1251_v13, %v1237_v9 }
 0x16c   : > { %v1217_v12 = vadd.f32 %v1216_v5, %v1002_v30  ;;  %v1253_v20 = vadd.f32 %v1252_v17, %v1238_v11 }
 0x16e   : > { %v1218_v16 = vadd.f32 %v1217_v12, %v1041_v29  ;;  %v1254_v23 = vadd.f32 %v1253_v20, %v1239_v14 }
 0x170   : > { %v1219_v21 = vadd.f32 %v1218_v16, %v1043_v33  ;;  %v1255_v25 = vadd.f32 %v1254_v23, %v1240_v18 }
 0x172   : > { %v1220_v15 = vadd.f32 %v1219_v21, %v1082_v41  ;;  %v1256_v19 = vadd.f32 %v1255_v25, %v1241_v22 }
 0x174   : > { %v1221_v27 = vadd.f32 %v1220_v15, %v1084_v45  ;;  %v1257_v32 = vadd.f32 %v1256_v19, %v1242_v24 }
 0x176   : > { %v1222_v26 = vadd.f32 %v1221_v27, %v1123_v44  ;;  %v1258_v29 = vadd.f32 %v1257_v32, %v1243_v28 }
 0x178   : > { %v1223_v30 = vadd.f32 %v1222_v26, %v1125_v48  ;;  %v1259_v35 = vadd.f32 %v1258_v29, %v1244_v31 }
 0x17a   : > { %1224 = vadd.xlane.f32.xlu0 %v1223_v30  ;;  %v1260_v33 = vadd.f32 %v1259_v35, %v1245_v34 }
 0x17e   : > { %1261 = vadd.xlane.f32.xlu0 %v1260_v33 }
 0x207   : > { %v1225_v38 = vpop.xlane.xlu0 %1224 }
 0x208   : > { %v1226_v39 = vadd.f32 %v1225_v38, %v1208_v37 }
 0x20a   : > { %1228 = vst.msk [vmem:[%s1988_s11] sm:$0xff] %vm1227_vm3, %v1226_v39 }
 0x20b   : > { %v1262_v41 = vpop.xlane.xlu0 %1261 }
 0x20c   : > { %v1263_v42 = vadd.f32 %v1262_v41, %v1229_v40 }
 0x20e   : > { %1264 = vst.msk [vmem:[%s1993_s14] sm:$0xff] %vm1227_vm3, %v1263_v42 }
 0x20f PF: > { %s16_s24 = sadd.s32 1, %s1663_s24   ;;  %s2079_s18 = smov %s1643_s19 }
 0x210   : > { %p13_p13 = scmp.ge.s32.totalorder %s16_s24, 6   ;;  %s2080_s19 = smov %s1748_s6 }
 0x211   : > { %s2081_s20 = smov %s1655_s22  ;;  %s2082_s21 = smov %s1659_s23 }
 0x212   : > { %s2083_s22 = smov %s2086_s25  ;;  %s2084_s23 = smov %s2090_s26 }
 0x213   :  { %15 = sbr.rel (!%p13_p13) target bundleno = 4 (0x4), region = 118 }

// kernel: unet_adain_forward.12
= control target key start
LH: loop header
LB: loop body
LE: loop exit
PB: predicated region body
PF: predicated region fallthrough
CT: control target
= control target key end

     0   :  { %s786_s18 = smov 0   ;;  %s788_s19 = smov 0   ;;  %s859_s0 = inlined_call_operand.vmem [shape: bf16[2,8,4096], index: 0, kind: input, shape index: {}]   ;;  %s860_s1 = inlined_call_operand.vmem [shape: f32[2,8,1], index: 1, kind: input, shape index: {}]   ;;  %s861_s2 = inlined_call_operand.vmem [shape: f32[2,8,1], index: 2, kind: input, shape index: {}]   ;;  %s862_s3 = inlined_call_operand.vmem [shape: f32[2,8,1], index: 3, kind: input, shape index: {}]   ;;  %s863_s4 = inlined_call_operand.vmem [shape: f32[2,8,1], index: 4, kind: input, shape index: {}]   ;;  %s864_s5 = inlined_call_operand.vmem [shape: bf16[2,8,4096], index: 5, kind: output, shape index: {}]  }
   0x1   :  { %s790_s20 = smov 0   ;;  %s792_s21 = smov 0  }
   0x2   :  { %s794_s22 = smov 0  }
   0x3 LB: > { %s24_s23 = sadd.s32 1, %s745_s20  ;;  %s27_s24 = sadd.s32 1, %s749_s21  ;;  %s753_s22 = sphi %s794_s22, %s15_s22   ;;  %s749_s21 = sphi %s792_s21, %s868_s21   ;;  %s745_s20 = sphi %s790_s20, %s867_s20   ;;  %s741_s19 = sphi %s788_s19, %s866_s19   ;;  %s737_s18 = sphi %s786_s18, %s865_s18  }
   0x4   : > { %p25_p0 = scmp.ge.s32.totalorder %s24_s23, 2  ;;  %p642_p1 = scmp.ge.s32.totalorder %s753_s22, 1 }
   0x5   : > { %p244_p2 = scmp.lt.s32.totalorder %s753_s22, 5 }
   0x6   : > { %s870_s23 = smov (%p25_p0, %s24_s23), 0  ;;  %s872_s24 = smov (!%p25_p0, %s27_s24), %s749_s21 }
   0x7   : > { %p245_p3 = pnand %p642_p1, %p244_p2  ;;  %p29_p4 = scmp.ge.s32.totalorder %s872_s24, 2 }
   0x8   : > { %p297_p5 = scmp.lt.s32.totalorder (!%p245_p3), %s741_s19, 1  ;;  %v755_v0 = vmov (!%p245_p3), 0   ;;  %s643_s13 = sshll.u32 (!%p245_p3), %s737_s18, 4 }
   0x9   : > { %s874_s24 = smov (%p29_p4, %s872_s24), 0  ;;  %248 = sbr.rel (%p245_p3) target bundleno = 189 (0xbd), region = 40 }
   0xa   : > { %712 = vset.pattern.permute.xlu0 (!%p245_p3), %v755_v0  ;;  %p299_p6 = scmp.lt.s32.totalorder (!%p245_p3), %s643_s13, 31 }
  0x10   : > { %s876_s19 = smov (!%p297_p5, %s741_s19), 1  ;;  %s878_s13 = smov (!%p299_p6, %s643_s13), 31 }
  0x11   : > { %s646_s25 = sshll.u32 %s876_s19, 3  ;;  %s644_s14 = sshll.u32 %s876_s19, 5 }
  0x12   : > { %s309_s28 = scalar_lea.vmem %s860_s1, %s646_s25  ;;  %s313_s6 = scalar_lea.vmem %s861_s2, %s646_s25 }
  0x13   : > { %v356_v1 = vld [vmem:[%s309_s28] sm:$0xff]  ;;  %s321_s9 = scalar_lea.vmem %s863_s4, %s646_s25  ;;  %s317_s12 = scalar_lea.vmem %s862_s3, %s646_s25 }
  0x14   : > { %v358_v2 = vld [vmem:[%s313_s6] sm:$0xff]  ;;  %v357_v3 = vmul.f32 0.00024414063, %v356_v1  ;;  %s831_s15 = sadd.s32 %s644_s14, %s878_s13 }
  0x15   : > { %v359_v4 = vmul.f32 0.00024414063, %v358_v2  ;;  %v364_v9 = vld [vmem:[%s321_s9] sm:$0xff]  ;;  %s645_s16 = sshll.u32 %s831_s15, 2 }
  0x16   : > { %v360_v5 = vmul.f32 %v357_v3, %v357_v3  ;;  %v363_v12 = vld [vmem:[%s317_s12] sm:$0xff]  ;;  %s304_s25 = scalar_lea.vmem %s859_s0, %s645_s16  ;;  %s330_s27 = scalar_lea.vmem %s864_s5, %s645_s16 }
  0x17   : > { %v332_v15 = vld [vmem:[%s304_s25] sm:$0xff]  ;;  %v333_v16 = vld [vmem:[%s304_s25 + $0x8] sm:$0xff]  ;;  %v334_v17 = vld [vmem:[%s304_s25 + $0x10] sm:$0xff] }
  0x18   : > { %v361_v6 = vsub.f32 %v359_v4, %v360_v5  ;;  %v335_v18 = vld [vmem:[%s304_s25 + $0x18] sm:$0xff]  ;;  %v336_v19 = vld [vmem:[%s304_s25 + $0x20] sm:$0xff]  ;;  %v337_v20 = vld [vmem:[%s304_s25 + $0x28] sm:$0xff]  ;;  %v340_v23 = vunpack.c.l.bf16 %v332_v15  ;;  %v341_v24 = vunpack.c.h.bf16 %v332_v15  ;;  %v342_v25 = vunpack.c.l.bf16 %v333_v16 }
  0x19   : > { %v338_v21 = vld [vmem:[%s304_s25 + $0x30] sm:$0xff]  ;;  %v339_v22 = vld [vmem:[%s304_s25 + $0x38] sm:$0xff]  ;;  %v343_v26 = vunpack.c.h.bf16 %v333_v16  ;;  %v344_v27 = vunpack.c.l.bf16 %v334_v17  ;;  %v345_v28 = vunpack.c.h.bf16 %v334_v17  ;;  %v346_v29 = vunpack.c.l.bf16 %v335_v18 }
  0x1a   : > { %v362_v7 = vmax.f32 %v361_v6, 0.0  ;;  %v347_v30 = vunpack.c.h.bf16 %v335_v18  ;;  %v348_v31 = vunpack.c.l.bf16 %v336_v19  ;;  %v349_v32 = vunpack.c.h.bf16 %v336_v19 }
  0x1b   : > { %v350_v33 = vunpack.c.l.bf16 %v337_v20  ;;  %v351_v34 = vunpack.c.h.bf16 %v337_v20  ;;  %v352_v35 = vunpack.c.l.bf16 %v338_v21  ;;  %v353_v36 = vunpack.c.h.bf16 %v338_v21 }
  0x1c   : > { %v365_v8 = vadd.f32 1e-05, %v362_v7  ;;  %v354_v37 = vunpack.c.l.bf16 %v339_v22  ;;  %v355_v38 = vunpack.c.h.bf16 %v339_v22 }
  0x1e   : > { %713 = vrsqrt.f32 %v365_v8 }
  0x28   : > { %v714_v10 = vpop.eup %713 }
  0x29   : > { %v367_v11 = vmul.f32 %v714_v10, %v364_v9 }
  0x2b   : > { %372 = vperm.xlu0 %712, %v367_v11   ;;  %v368_v13 = vmul.f32 %v367_v11, %v357_v3 }
  0x2d   : > { %v369_v14 = vsub.f32 %v363_v12, %v368_v13 }
  0x2f   : > { %393 = vperm.xlu0 %712, %v369_v14  }
  0xaa   : > { %v373_v39 = vpop.permute.xlu0 %372 }
  0xab   : > { %v375_v40 = vmul.f32 %v373_v39, %v340_v23  ;;  %v376_v41 = vmul.f32 %v373_v39, %v341_v24  ;;  %v377_v42 = vmul.f32 %v373_v39, %v342_v25  ;;  %v378_v43 = vmul.f32 %v373_v39, %v343_v26 }
  0xac   : > { %v379_v44 = vmul.f32 %v373_v39, %v344_v27  ;;  %v380_v45 = vmul.f32 %v373_v39, %v345_v28  ;;  %v381_v46 = vmul.f32 %v373_v39, %v346_v29  ;;  %v382_v47 = vmul.f32 %v373_v39, %v347_v30 }
  0xad   : > { %v383_v48 = vmul.f32 %v373_v39, %v348_v31  ;;  %v384_v49 = vmul.f32 %v373_v39, %v349_v32  ;;  %v385_v50 = vmul.f32 %v373_v39, %v350_v33  ;;  %v386_v51 = vmul.f32 %v373_v39, %v351_v34 }
  0xae   : > { %v394_v52 = vpop.permute.xlu0 %393  ;;  %v387_v53 = vmul.f32 %v373_v39, %v352_v35  ;;  %v388_v54 = vmul.f32 %v373_v39, %v353_v36  ;;  %v389_v55 = vmul.f32 %v373_v39, %v354_v37  ;;  %v390_v56 = vmul.f32 %v373_v39, %v355_v38 }
  0xaf   : > { %v396_v57 = vadd.f32 %v394_v52, %v375_v40  ;;  %v397_v58 = vadd.f32 %v394_v52, %v376_v41  ;;  %v398_v59 = vadd.f32 %v394_v52, %v377_v42  ;;  %v399_v60 = vadd.f32 %v394_v52, %v378_v43 }
  0xb0   : > { %v400_v61 = vadd.f32 %v394_v52, %v379_v44  ;;  %v401_v62 = vadd.f32 %v394_v52, %v380_v45  ;;  %v402_v63 = vadd.f32 %v394_v52, %v381_v46  ;;  %v403_v0 = vadd.f32 %v394_v52, %v382_v47 }
  0xb1   : > { %v404_v1 = vadd.f32 %v394_v52, %v383_v48  ;;  %v405_v2 = vadd.f32 %v394_v52, %v384_v49  ;;  %v406_v3 = vadd.f32 %v394_v52, %v385_v50  ;;  %v407_v4 = vadd.f32 %v394_v52, %v386_v51 }
  0xb2   : > { %v408_v5 = vadd.f32 %v394_v52, %v387_v53  ;;  %v409_v6 = vadd.f32 %v394_v52, %v388_v54  ;;  %v410_v7 = vadd.f32 %v394_v52, %v389_v55  ;;  %v411_v8 = vadd.f32 %v394_v52, %v390_v56 }
  0xb3   : > { %v412_v9 = vmax.f32 %v396_v57, 0.0  ;;  %v413_v10 = vmax.f32 %v397_v58, 0.0  ;;  %v414_v11 = vmax.f32 %v398_v59, 0.0  ;;  %v415_v12 = vmax.f32 %v399_v60, 0.0 }
  0xb4   : > { %v416_v13 = vmax.f32 %v400_v61, 0.0  ;;  %v417_v14 = vmax.f32 %v401_v62, 0.0  ;;  %v418_v15 = vmax.f32 %v402_v63, 0.0  ;;  %v419_v16 = vmax.f32 %v403_v0, 0.0 }
  0xb5   : > { %v420_v17 = vmax.f32 %v404_v1, 0.0  ;;  %v421_v18 = vmax.f32 %v405_v2, 0.0  ;;  %v422_v19 = vmax.f32 %v406_v3, 0.0  ;;  %v423_v20 = vmax.f32 %v407_v4, 0.0 }
  0xb6   : > { %v424_v21 = vmax.f32 %v408_v5, 0.0  ;;  %v425_v22 = vmax.f32 %v409_v6, 0.0  ;;  %v426_v23 = vmax.f32 %v410_v7, 0.0  ;;  %v427_v24 = vmax.f32 %v411_v8, 0.0 }
  0xb7   : > { %v663_v25 = vpack.c.bf16 %v413_v10, %v412_v9  ;;  %v664_v26 = vpack.c.bf16 %v415_v12, %v414_v11  ;;  %v665_v27 = vpack.c.bf16 %v417_v14, %v416_v13  ;;  %v666_v28 = vpack.c.bf16 %v419_v16, %v418_v15 }
  0xb8   : > { %v667_v29 = vpack.c.bf16 %v421_v18, %v420_v17  ;;  %v668_v30 = vpack.c.bf16 %v423_v20, %v422_v19  ;;  %v669_v31 = vpack.c.bf16 %v425_v22, %v424_v21  ;;  %v670_v32 = vpack.c.bf16 %v427_v24, %v426_v23 }
  0xb9   : > { %492 = vst [vmem:[%s330_s27] sm:$0xff] %v663_v25  ;;  %493 = vst [vmem:[%s330_s27 + $0x8] sm:$0xff] %v664_v26 }
  0xba   : > { %494 = vst [vmem:[%s330_s27 + $0x10] sm:$0xff] %v665_v27  ;;  %495 = vst [vmem:[%s330_s27 + $0x18] sm:$0xff] %v666_v28 }
  0xbb   : > { %496 = vst [vmem:[%s330_s27 + $0x20] sm:$0xff] %v667_v29  ;;  %497 = vst [vmem:[%s330_s27 + $0x28] sm:$0xff] %v668_v30 }
  0xbc   : > { %498 = vst [vmem:[%s330_s27 + $0x30] sm:$0xff] %v669_v31  ;;  %499 = vst [vmem:[%s330_s27 + $0x38] sm:$0xff] %v670_v32 }
  0xbd PF: > { %s15_s22 = sadd.s32 1, %s753_s22   ;;  %s865_s18 = smov %s745_s20 }
  0xbe   : > { %p12_p7 = scmp.ge.s32.totalorder %s15_s22, 6   ;;  %s866_s19 = smov %s749_s21 }
  0xbf   : > { %s867_s20 = smov %s870_s23  ;;  %s868_s21 = smov %s874_s24 }
  0xc0   :  { %14 = sbr.rel (!%p12_p7) target bundleno = 3 (0x3), region = 82 }

// kernel: unet_adain_forward.13
= control target key start
LH: loop header
LB: loop body
LE: loop exit
PB: predicated region body
PF: predicated region fallthrough
CT: control target
= control target key end

     0   :  { %s1249_s18 = smov 0   ;;  %s1251_s19 = smov 0   ;;  %s1409_s0 = inlined_call_operand.vmem [shape: bf16[16,216], index: 0, kind: input, shape index: {}]   ;;  %s1410_s1 = inlined_call_operand.vmem [shape: f32[16,1], index: 1, kind: input, shape index: {}]   ;;  %s1411_s2 = inlined_call_operand.vmem [shape: bf16[2,216,512], index: 2, kind: input, shape index: {}]   ;;  %s1412_s3 = inlined_call_operand.vmem [shape: f32[2,16,1], index: 3, kind: input, shape index: {}]   ;;  %s1413_s4 = inlined_call_operand.vmem [shape: f32[2,16,1], index: 4, kind: input, shape index: {}]   ;;  %s1414_s5 = inlined_call_operand.vmem [shape: bf16[2,16,512], index: 5, kind: output, shape index: {}]  }
   0x1   :  { %s1253_s20 = smov 0  }
   0x2 LB: > { %s27_s21 = sadd.s32 1, %s1212_s19  ;;  %p994_p0 = scmp.ge.s32.totalorder %s1216_s20, 1  ;;  %s1216_s20 = sphi %s1253_s20, %s15_s20   ;;  %s1212_s19 = sphi %s1251_s19, %s1416_s19   ;;  %s1208_s18 = sphi %s1249_s18, %s1415_s18  }
   0x3   : > { %p29_p1 = scmp.ge.s32.totalorder %s27_s21, 2  ;;  %p228_p2 = scmp.lt.s32.totalorder %s1216_s20, 3 }
   0x5   : > { %s1418_s21 = smov (%p29_p1, %s27_s21), 0  ;;  %p229_p3 = pnand %p994_p0, %p228_p2 }
   0x6   : > { %p275_p4 = scmp.lt.s32.totalorder (!%p229_p3), %s1208_s18, 1  ;;  %v1189_v0 = vld [vmem:[%s1409_s0 + $0x4] ss:$8 sps:$4 sm:$0xff] (!%p229_p3)   ;;  %vm652_vm0 = vcmask (!%p229_p3), 719872   ;;  %v1218_v2 = vmov (!%p229_p3), 0   ;;  %vm656_vm1 = vcmask (!%p229_p3), 1043456  }
   0x7   : > { %232 = sbr.rel (%p229_p3) target bundleno = 611 (0x263), region = 40  ;;  %v361_v1 = vld [vmem:[%s1410_s1] sm:$0xff] (!%p229_p3)  ;;  %1103 = vset.pattern.permute.xlu0 (!%p229_p3), %v1218_v2  ;;  %1104 = vset.pattern.permute.xlu1 (!%p229_p3), %v1218_v2  ;;  %v362_v3 = vld [vmem:[%s1410_s1 + $0x8] sm:$0xff] (!%p229_p3) }
   0x8   : > { %1061 = vmatprep.mubr.msk.bf16.mxu0 (!%p229_p3), %vm652_vm0, %v1189_v0  ;;  %1063 = vmatprep.mubr.msk.bf16.mxu1 (!%p229_p3), %vm652_vm0, %v1189_v0  ;;  %v1187_v0 = vld [vmem:[%s1409_s0] ss:$8 sps:$4 sm:$0xff] (!%p229_p3)  }
   0x9   : > { %365 = vperm.xlu0 (!%p229_p3), %1103, %v361_v1  }
   0xd   : > { %370 = vperm.xlu0 (!%p229_p3), %1103, %v362_v3  }
   0xe   : > { %s1420_s18 = smov (!%p275_p4, %s1208_s18), 1 }
   0xf   : > { %s1077_s26 = smul.u32 432, %s1420_s18  ;;  %s1070_s9 = sshll.u32 %s1420_s18, 4 }
  0x10   : > { %s293_s12 = scalar_lea.vmem %s1413_s4, %s1070_s9  ;;  %s288_s15 = scalar_lea.vmem %s1412_s3, %s1070_s9 }
  0x11   : > { %s1282_s6 = scalar_lea.vmem %s1411_s2, %s1077_s26  ;;  %s1072_s16 = sshll.u32 %s1420_s18, 5 }
  0x12   : > { %v1105_v4 = vld [vmem:[%s1282_s6 + $0x4] ss:$16 sps:$4 sm:$0xff]   ;;  %v1107_v5 = vld [vmem:[%s1282_s6 + $0xc] ss:$16 sps:$4 sm:$0xff]   ;;  %v1109_v6 = vld [vmem:[%s1282_s6] ss:$16 sps:$4 sm:$0xff]   ;;  %s302_s23 = scalar_lea.vmem %s1414_s5, %s1072_s16 }
  0x13   : > { %669 = vmatprep.subr.bf16.mxu0 %v1105_v4  ;;  %v1110_v7 = vld [vmem:[%s1282_s6 + $0x8] ss:$16 sps:$4 sm:$0xff]   ;;  %712 = vmatprep.subr.bf16.mxu1 %v1107_v5  ;;  %v1111_v8 = vld [vmem:[%s1282_s6 + $0x24] ss:$16 sps:$4 sm:$0xff]   ;;  %v1113_v9 = vld [vmem:[%s1282_s6 + $0x2c] ss:$16 sps:$4 sm:$0xff]  }
  0x14   : > { %670 = vmatpush1.bf16.msra.mxu0 %v1109_v6  ;;  %713 = vmatpush1.bf16.msra.mxu1 %v1110_v7  ;;  %v1115_v10 = vld [vmem:[%s1282_s6 + $0x20] ss:$16 sps:$4 sm:$0xff]   ;;  %v1116_v11 = vld [vmem:[%s1282_s6 + $0x28] ss:$16 sps:$4 sm:$0xff]   ;;  %v1117_v12 = vld [vmem:[%s1282_s6 + $0x44] ss:$16 sps:$4 sm:$0xff]  }
  0x15   : > { %671 = vmatprep.subr.bf16.mxu0 %v1111_v8  ;;  %714 = vmatprep.subr.bf16.mxu1 %v1113_v9  ;;  %v1119_v13 = vld [vmem:[%s1282_s6 + $0x4c] ss:$16 sps:$4 sm:$0xff]   ;;  %v1121_v14 = vld [vmem:[%s1282_s6 + $0x40] ss:$16 sps:$4 sm:$0xff]   ;;  %v1122_v15 = vld [vmem:[%s1282_s6 + $0x48] ss:$16 sps:$4 sm:$0xff]  }
  0x16   : > { %v1123_v16 = vld [vmem:[%s1282_s6 + $0x64] ss:$16 sps:$4 sm:$0xff]   ;;  %v1125_v17 = vld [vmem:[%s1282_s6 + $0x6c] ss:$16 sps:$4 sm:$0xff]   ;;  %v1127_v18 = vld [vmem:[%s1282_s6 + $0x60] ss:$16 sps:$4 sm:$0xff]  }
  0x17   : > { %v1128_v19 = vld [vmem:[%s1282_s6 + $0x68] ss:$16 sps:$4 sm:$0xff]   ;;  %v1129_v20 = vld [vmem:[%s1282_s6 + $0x84] ss:$16 sps:$4 sm:$0xff]   ;;  %v1131_v21 = vld [vmem:[%s1282_s6 + $0x8c] ss:$16 sps:$4 sm:$0xff]  }
  0x18   : > { %672 = vmatpush1.bf16.msra.mxu0 %v1115_v10  ;;  %715 = vmatpush1.bf16.msra.mxu1 %v1116_v11  ;;  %v1133_v22 = vld [vmem:[%s1282_s6 + $0x80] ss:$16 sps:$4 sm:$0xff]   ;;  %v1134_v23 = vld [vmem:[%s1282_s6 + $0x88] ss:$16 sps:$4 sm:$0xff]   ;;  %v1135_v24 = vld [vmem:[%s1282_s6 + $0xa4] ss:$16 sps:$4 sm:$0xff]  }
  0x19   : > { %673 = vmatprep.subr.bf16.mxu0 %v1117_v12  ;;  %716 = vmatprep.subr.bf16.mxu1 %v1119_v13  ;;  %v1137_v25 = vld [vmem:[%s1282_s6 + $0xac] ss:$16 sps:$4 sm:$0xff]   ;;  %v1139_v26 = vld [vmem:[%s1282_s6 + $0xa0] ss:$16 sps:$4 sm:$0xff]   ;;  %v1140_v27 = vld [vmem:[%s1282_s6 + $0xa8] ss:$16 sps:$4 sm:$0xff]  }
  0x1a   : > { %v1141_v28 = vld [vmem:[%s1282_s6 + $0xc4] ss:$16 sps:$4 sm:$0xff]   ;;  %v1143_v29 = vld [vmem:[%s1282_s6 + $0xcc] ss:$16 sps:$4 sm:$0xff]   ;;  %v1145_v30 = vld [vmem:[%s1282_s6 + $0xc0] ss:$16 sps:$4 sm:$0xff]  }
  0x1b   : > { %v1146_v31 = vld [vmem:[%s1282_s6 + $0xc8] ss:$16 sps:$4 sm:$0xff]   ;;  %v1147_v32 = vld [vmem:[%s1282_s6 + $0xe4] ss:$16 sps:$4 sm:$0xff]   ;;  %v1149_v33 = vld [vmem:[%s1282_s6 + $0xec] ss:$16 sps:$4 sm:$0xff]  }
  0x1c   : > { %674 = vmatpush1.bf16.msra.mxu0 %v1121_v14  ;;  %717 = vmatpush1.bf16.msra.mxu1 %v1122_v15  ;;  %v1151_v34 = vld [vmem:[%s1282_s6 + $0xe0] ss:$16 sps:$4 sm:$0xff]   ;;  %v1152_v35 = vld [vmem:[%s1282_s6 + $0xe8] ss:$16 sps:$4 sm:$0xff]   ;;  %v1153_v36 = vld [vmem:[%s1282_s6 + $0x104] ss:$16 sps:$4 sm:$0xff]  }
  0x1d   : > { %675 = vmatprep.subr.bf16.mxu0 %v1123_v16  ;;  %718 = vmatprep.subr.bf16.mxu1 %v1125_v17  ;;  %v1155_v37 = vld [vmem:[%s1282_s6 + $0x10c] ss:$16 sps:$4 sm:$0xff]   ;;  %v1157_v38 = vld [vmem:[%s1282_s6 + $0x100] ss:$16 sps:$4 sm:$0xff]   ;;  %v1158_v39 = vld [vmem:[%s1282_s6 + $0x108] ss:$16 sps:$4 sm:$0xff]  }
  0x1e   : > { %v1159_v40 = vld [vmem:[%s1282_s6 + $0x124] ss:$16 sps:$4 sm:$0xff]   ;;  %v1161_v41 = vld [vmem:[%s1282_s6 + $0x12c] ss:$16 sps:$4 sm:$0xff]   ;;  %v1163_v42 = vld [vmem:[%s1282_s6 + $0x120] ss:$16 sps:$4 sm:$0xff]  }
  0x1f   : > { %v1164_v43 = vld [vmem:[%s1282_s6 + $0x128] ss:$16 sps:$4 sm:$0xff]   ;;  %v1165_v44 = vld [vmem:[%s1282_s6 + $0x144] ss:$16 sps:$4 sm:$0xff]   ;;  %v1167_v45 = vld [vmem:[%s1282_s6 + $0x14c] ss:$16 sps:$4 sm:$0xff]  }
  0x20   : > { %676 = vmatpush1.bf16.msra.mxu0 %v1127_v18  ;;  %719 = vmatpush1.bf16.msra.mxu1 %v1128_v19  ;;  %v1169_v46 = vld [vmem:[%s1282_s6 + $0x140] ss:$16 sps:$4 sm:$0xff]   ;;  %v1170_v47 = vld [vmem:[%s1282_s6 + $0x148] ss:$16 sps:$4 sm:$0xff]   ;;  %v1171_v48 = vld [vmem:[%s1282_s6 + $0x164] ss:$16 sps:$4 sm:$0xff]  }
  0x21   : > { %677 = vmatprep.subr.bf16.mxu0 %v1129_v20  ;;  %720 = vmatprep.subr.bf16.mxu1 %v1131_v21  ;;  %v1173_v49 = vld [vmem:[%s1282_s6 + $0x16c] ss:$16 sps:$4 sm:$0xff]   ;;  %v1175_v50 = vld [vmem:[%s1282_s6 + $0x160] ss:$16 sps:$4 sm:$0xff]   ;;  %v1176_v51 = vld [vmem:[%s1282_s6 + $0x168] ss:$16 sps:$4 sm:$0xff]  }
  0x22   : > { %v1177_v52 = vld [vmem:[%s1282_s6 + $0x184] ss:$16 sps:$4 sm:$0xff]   ;;  %v1179_v53 = vld [vmem:[%s1282_s6 + $0x18c] ss:$16 sps:$4 sm:$0xff]   ;;  %v1181_v56 = vld [vmem:[%s1282_s6 + $0x180] ss:$16 sps:$4 sm:$0xff]  }
  0x23   : > { %v359_v54 = vld [vmem:[%s1282_s6 + $0x1a0] sm:$0xff]  ;;  %v360_v55 = vld [vmem:[%s1282_s6 + $0x1a8] sm:$0xff] }
  0x24   : > { %678 = vmatpush1.bf16.msra.mxu0 %v1133_v22  ;;  %721 = vmatpush1.bf16.msra.mxu1 %v1134_v23  ;;  %v1182_v57 = vld [vmem:[%s1282_s6 + $0x188] ss:$16 sps:$4 sm:$0xff]   ;;  %v1057_v58 = vcombine.high %v359_v54, %v359_v54  ;;  %v1059_v59 = vcombine.high %v360_v55, %v360_v55  ;;  %v1056_v60 = vcombine.low %v359_v54, %v359_v54 }
  0x25   : > { %679 = vmatprep.subr.bf16.mxu0 %v1135_v24  ;;  %722 = vmatprep.subr.bf16.mxu1 %v1137_v25  ;;  %v1058_v61 = vcombine.low %v360_v55, %v360_v55  ;;  %v795_v55 = vld [vmem:[%s293_s12] sm:$0xff] }
  0x26   : > { %v658_v62 = vsel %vm656_vm1, %v1056_v60, 0 }
  0x27   : > { %v664_v63 = vsel %vm656_vm1, %v1058_v61, 0 }
  0x28   : > { %680 = vmatpush1.bf16.msra.mxu0 %v1139_v26  ;;  %723 = vmatpush1.bf16.msra.mxu1 %v1140_v27 }
  0x29   : > { %681 = vmatprep.subr.bf16.mxu0 %v1141_v28  ;;  %724 = vmatprep.subr.bf16.mxu1 %v1143_v29 }
  0x2c   : > { %682 = vmatpush1.bf16.msra.mxu0 %v1145_v30  ;;  %725 = vmatpush1.bf16.msra.mxu1 %v1146_v31 }
  0x2d   : > { %683 = vmatprep.subr.bf16.mxu0 %v1147_v32  ;;  %726 = vmatprep.subr.bf16.mxu1 %v1149_v33 }
  0x30   : > { %684 = vmatpush1.bf16.msra.mxu0 %v1151_v34  ;;  %727 = vmatpush1.bf16.msra.mxu1 %v1152_v35 }
  0x31   : > { %685 = vmatprep.subr.bf16.mxu0 %v1153_v36  ;;  %728 = vmatprep.subr.bf16.mxu1 %v1155_v37 }
  0x34   : > { %686 = vmatpush1.bf16.msra.mxu0 %v1157_v38  ;;  %729 = vmatpush1.bf16.msra.mxu1 %v1158_v39 }
  0x35   : > { %687 = vmatprep.subr.bf16.mxu0 %v1159_v40  ;;  %730 = vmatprep.subr.bf16.mxu1 %v1161_v41 }
  0x38   : > { %688 = vmatpush1.bf16.msra.mxu0 %v1163_v42  ;;  %731 = vmatpush1.bf16.msra.mxu1 %v1164_v43 }
  0x39   : > { %689 = vmatprep.subr.bf16.mxu0 %v1165_v44  ;;  %732 = vmatprep.subr.bf16.mxu1 %v1167_v45 }
  0x3c   : > { %690 = vmatpush1.bf16.msra.mxu0 %v1169_v46  ;;  %733 = vmatpush1.bf16.msra.mxu1 %v1170_v47 }
  0x3d   : > { %691 = vmatprep.subr.bf16.mxu0 %v1171_v48  ;;  %734 = vmatprep.subr.bf16.mxu1 %v1173_v49 }
  0x40   : > { %692 = vmatpush1.bf16.msra.mxu0 %v1175_v50  ;;  %735 = vmatpush1.bf16.msra.mxu1 %v1176_v51 }
  0x41   : > { %693 = vmatprep.subr.bf16.mxu0 %v1177_v52  ;;  %736 = vmatprep.subr.bf16.mxu1 %v1179_v53 }
  0x44   : > { %694 = vmatpush1.bf16.msra.mxu0 %v1181_v56  ;;  %737 = vmatpush1.bf16.msra.mxu1 %v1182_v57 }
  0x45   : > { %1060 = vmatprep.subr.msk.bf16.mxu0 %vm656_vm1, %v1057_v58  ;;  %1062 = vmatprep.subr.msk.bf16.mxu1 %vm656_vm1, %v1059_v59  ;;  %v796_v58 = vld [vmem:[%s293_s12 + $0x8] sm:$0xff] }
  0x48   : > { %696 = vmatpush1.bf16.msra.mxu0 %v658_v62  ;;  %739 = vmatpush1.bf16.msra.mxu1 %v664_v63  ;;  %v793_v62 = vld [vmem:[%s288_s15] sm:$0xff] }
  0x4b   : > { %702 = vmatmul.mubr.bf16.vlgmr.msra.gmra.mrb[0].mxu0 %v1187_v0  ;;  %745 = vmatmul.mubr.bf16.vlgmr.msra.gmra.mrb[0].mxu1 %v1187_v0 }
  0x88   : > { %v366_v1 = vpop.permute.xlu0 %365 }
  0x8c   : > { %v371_v2 = vpop.permute.xlu0 %370 }
 0x11e   : > { %v703_v3 = vpop.f32.mrb[0].mxu0  ;;  %v746_v4 = vpop.f32.mrb[0].mxu1 }
 0x11f   : > { %v1341_v5 = vadd.f32 %v703_v3, %v366_v1  ;;  %v1343_v6 = vadd.f32 %v746_v4, %v366_v1  ;;  %v705_v7 = vpop.f32.mrb[1].mxu0  ;;  %v748_v8 = vpop.f32.mrb[1].mxu1 }
 0x120   : > { %v1345_v9 = vadd.f32 %v705_v7, %v366_v1  ;;  %v707_v10 = vpop.f32.mrb[2].mxu0  ;;  %v750_v11 = vpop.f32.mrb[2].mxu1  ;;  %v1349_v13 = vadd.f32 %v748_v8, %v366_v1  ;;  %v794_v1 = vld [vmem:[%s288_s15 + $0x8] sm:$0xff] }
 0x121   : > { %v767_v12 = vmul.f32 %v1341_v5, %v1341_v5  ;;  %v1351_v14 = vadd.f32 %v707_v10, %v371_v2  ;;  %v709_v15 = vpop.f32.mrb[3].mxu0  ;;  %v752_v16 = vpop.f32.mrb[3].mxu1  ;;  %v769_v20 = vmul.f32 %v1343_v6, %v1343_v6  ;;  %v1363_v22 = vadd.f32 %v750_v11, %v371_v2 }
 0x122   : > { %v768_v17 = vmul.f32 %v1345_v9, %v1345_v9  ;;  %v1355_v18 = vadd.f32 %v709_v15, %v371_v2  ;;  %v755_v19 = vadd.f32 %v1345_v9, %v1341_v5  ;;  %v770_v27 = vmul.f32 %v1349_v13, %v1349_v13 }
 0x123   : > { %v771_v21 = vmul.f32 %v1351_v14, %v1351_v14  ;;  %v773_v32 = vmul.f32 %v1363_v22, %v1363_v22  ;;  %v1376_v33 = vadd.f32 %v752_v16, %v371_v2 }
 0x124   : > { %v760_v23 = vadd.f32 %v1355_v18, %v1351_v14  ;;  %v772_v24 = vmul.f32 %v1355_v18, %v1355_v18  ;;  %v756_v25 = vadd.f32 %v755_v19, %v1343_v6  ;;  %v775_v26 = vadd.f32 %v768_v17, %v767_v12 }
 0x125   : > { %v774_v37 = vmul.f32 %v1376_v33, %v1376_v33 }
 0x126   : > { %v757_v28 = vadd.f32 %v756_v25, %v1349_v13  ;;  %v776_v29 = vadd.f32 %v775_v26, %v769_v20  ;;  %v761_v30 = vadd.f32 %v760_v23, %v1363_v22  ;;  %v780_v31 = vadd.f32 %v772_v24, %v771_v21 }
 0x128   : > { %758 = vadd.xlane.f32.xlu1 %v757_v28  ;;  %v777_v34 = vadd.f32 %v776_v29, %v770_v27  ;;  %v762_v35 = vadd.f32 %v761_v30, %v1376_v33  ;;  %v781_v36 = vadd.f32 %v780_v31, %v773_v32 }
 0x12a   : > { %778 = vadd.xlane.f32.xlu0 %v777_v34  ;;  %v782_v38 = vadd.f32 %v781_v36, %v774_v37 }
 0x12c   : > { %763 = vadd.xlane.f32.xlu1 %v762_v35 }
 0x130   : > { %783 = vadd.xlane.f32.xlu1 %v782_v38 }
 0x1b5   : > { %v759_v39 = vpop.xlane.xlu1 %758 }
 0x1b6   : > { %v765_v40 = vmul.f32 0.001953125, %v759_v39 }
 0x1b7   : > { %v779_v41 = vpop.xlane.xlu0 %778 }
 0x1b8   : > { %v787_v42 = vmul.f32 %v765_v40, %v765_v40  ;;  %v785_v43 = vmul.f32 0.001953125, %v779_v41 }
 0x1b9   : > { %v764_v44 = vpop.xlane.xlu1 %763 }
 0x1ba   : > { %v789_v45 = vsub.f32 %v785_v43, %v787_v42  ;;  %v766_v46 = vmul.f32 0.001953125, %v764_v44 }
 0x1bc   : > { %v791_v47 = vmax.f32 %v789_v45, 0.0  ;;  %v788_v50 = vmul.f32 %v766_v46, %v766_v46 }
 0x1bd   : > { %v784_v48 = vpop.xlane.xlu1 %783 }
 0x1be   : > { %v797_v49 = vadd.f32 1e-05, %v791_v47  ;;  %v786_v51 = vmul.f32 0.001953125, %v784_v48 }
 0x1c0   : > { %1190 = vrsqrt.f32 %v797_v49  ;;  %v790_v52 = vsub.f32 %v786_v51, %v788_v50 }
 0x1c2   : > { %v792_v53 = vmax.f32 %v790_v52, 0.0 }
 0x1c4   : > { %v798_v54 = vadd.f32 1e-05, %v792_v53 }
 0x1c6   : > { %1192 = vrsqrt.f32 %v798_v54 }
 0x1ca   : > { %v1191_v56 = vpop.eup %1190 }
 0x1cb   : > { %v801_v57 = vmul.f32 %v1191_v56, %v795_v55 }
 0x1cd   : > { %809 = vperm.xlu1 %1104, %v801_v57   ;;  %v803_v61 = vmul.f32 %v801_v57, %v765_v40 }
 0x1cf   : > { %v805_v63 = vsub.f32 %v793_v62, %v803_v61 }
 0x1d0   : > { %v1193_v59 = vpop.eup %1192 }
 0x1d1   : > { %v802_v60 = vmul.f32 %v1193_v59, %v796_v58 }
 0x1d3   : > { %814 = vperm.xlu1 %1104, %v802_v60   ;;  %v804_v0 = vmul.f32 %v802_v60, %v766_v46 }
 0x1d5   : > { %v806_v2 = vsub.f32 %v794_v1, %v804_v0 }
 0x1d7   : > { %827 = vperm.xlu1 %1104, %v805_v63  }
 0x1db   : > { %832 = vperm.xlu1 %1104, %v806_v2  }
 0x24c   : > { %v810_v3 = vpop.permute.xlu1 %809 }
 0x24d   : > { %v817_v7 = vmul.f32 %v810_v3, %v1341_v5  ;;  %v818_v8 = vmul.f32 %v810_v3, %v1345_v9  ;;  %v819_v10 = vmul.f32 %v810_v3, %v1343_v6  ;;  %v820_v11 = vmul.f32 %v810_v3, %v1349_v13 }
 0x252   : > { %v815_v4 = vpop.permute.xlu1 %814 }
 0x253   : > { %v821_v20 = vmul.f32 %v815_v4, %v1351_v14  ;;  %v822_v21 = vmul.f32 %v815_v4, %v1355_v18  ;;  %v823_v6 = vmul.f32 %v815_v4, %v1363_v22  ;;  %v824_v9 = vmul.f32 %v815_v4, %v1376_v33 }
 0x256   : > { %v828_v12 = vpop.permute.xlu1 %827 }
 0x257   : > { %v835_v15 = vadd.f32 %v828_v12, %v817_v7  ;;  %v836_v16 = vadd.f32 %v828_v12, %v818_v8  ;;  %v837_v17 = vadd.f32 %v828_v12, %v819_v10  ;;  %v838_v19 = vadd.f32 %v828_v12, %v820_v11 }
 0x259   : > { %v843_v23 = vmax.f32 %v835_v15, 0.0  ;;  %v844_v24 = vmax.f32 %v836_v16, 0.0  ;;  %v845_v25 = vmax.f32 %v837_v17, 0.0  ;;  %v846_v5 = vmax.f32 %v838_v19, 0.0 }
 0x25a   : > { %v833_v13 = vpop.permute.xlu1 %832 }
 0x25b   : > { %v1073_v26 = vpack.c.bf16 %v844_v24, %v843_v23  ;;  %v1074_v27 = vpack.c.bf16 %v846_v5, %v845_v25  ;;  %v839_v28 = vadd.f32 %v833_v13, %v821_v20  ;;  %v840_v29 = vadd.f32 %v833_v13, %v822_v21 }
 0x25c   : > { %v841_v14 = vadd.f32 %v833_v13, %v823_v6  ;;  %v842_v30 = vadd.f32 %v833_v13, %v824_v9 }
 0x25d   : > { %875 = vst [vmem:[%s302_s23] sm:$0xff] %v1073_v26  ;;  %876 = vst [vmem:[%s302_s23 + $0x8] sm:$0xff] %v1074_v27  ;;  %v847_v18 = vmax.f32 %v839_v28, 0.0  ;;  %v848_v31 = vmax.f32 %v840_v29, 0.0 }
 0x25e   : > { %v849_v32 = vmax.f32 %v841_v14, 0.0  ;;  %v850_v34 = vmax.f32 %v842_v30, 0.0 }
 0x25f   : > { %v1075_v35 = vpack.c.bf16 %v848_v31, %v847_v18 }
 0x260   : > { %v1076_v36 = vpack.c.bf16 %v850_v34, %v849_v32 }
 0x261   : > { %877 = vst [vmem:[%s302_s23 + $0x10] sm:$0xff] %v1075_v35 }
 0x262   : > { %878 = vst [vmem:[%s302_s23 + $0x18] sm:$0xff] %v1076_v36 }
 0x263 PF: > { %s15_s20 = sadd.s32 1, %s1216_s20   ;;  %s1415_s18 = smov %s1212_s19 }
 0x264   : > { %p12_p5 = scmp.ge.s32.totalorder %s15_s20, 4   ;;  %s1416_s19 = smov %s1418_s21 }
 0x266   :  { %14 = sbr.rel (!%p12_p5) target bundleno = 2 (0x2), region = 76 }

// kernel: unet_adain_forward.14
= control target key start
LH: loop header
LB: loop body
LE: loop exit
PB: predicated region body
PF: predicated region fallthrough
CT: control target
= control target key end

     0   :  { %s1165_s18 = smov 0   ;;  %s1167_s19 = smov 0   ;;  %s1325_s0 = inlined_call_operand.vmem [shape: bf16[32,432], index: 0, kind: input, shape index: {}]   ;;  %s1326_s1 = inlined_call_operand.vmem [shape: f32[32,1], index: 1, kind: input, shape index: {}]   ;;  %s1327_s2 = inlined_call_operand.vmem [shape: bf16[2,432,64], index: 2, kind: input, shape index: {}]   ;;  %s1328_s3 = inlined_call_operand.vmem [shape: f32[2,32,1], index: 3, kind: input, shape index: {}]   ;;  %s1329_s4 = inlined_call_operand.vmem [shape: f32[2,32,1], index: 4, kind: input, shape index: {}]   ;;  %s1330_s5 = inlined_call_operand.vmem [shape: bf16[2,32,64], index: 5, kind: output, shape index: {}]  }
   0x1   :  { %s1169_s20 = smov 0  }
   0x2 LB: > { %s27_s21 = sadd.s32 1, %s1128_s19  ;;  %p949_p0 = scmp.ge.s32.totalorder %s1132_s20, 1  ;;  %s1132_s20 = sphi %s1169_s20, %s15_s20   ;;  %s1128_s19 = sphi %s1167_s19, %s1332_s19   ;;  %s1124_s18 = sphi %s1165_s18, %s1331_s18  }
   0x3   : > { %p29_p1 = scmp.ge.s32.totalorder %s27_s21, 2  ;;  %p226_p2 = scmp.lt.s32.totalorder %s1132_s20, 3 }
   0x5   : > { %s1334_s21 = smov (%p29_p1, %s27_s21), 0  ;;  %p227_p3 = pnand %p949_p0, %p226_p2 }
   0x6   : > { %p270_p4 = scmp.lt.s32.totalorder (!%p227_p3), %s1124_s18, 1  ;;  %v1134_v0 = vmov (!%p227_p3), 0   ;;  %v1090_v1 = vld [vmem:[%s1325_s0 + $0x4] ss:$16 sps:$4 sm:$0xff] (!%p227_p3)   ;;  %vm583_vm0 = vcmask (!%p227_p3), 392192   ;;  %v360_v4 = vld [vmem:[%s1326_s1 + $0x8] sm:$0xff] (!%p227_p3) }
   0x7   : > { %230 = sbr.rel (%p227_p3) target bundleno = 597 (0x255), region = 40  ;;  %639 = vmatprep.subr.bf16.mxu1 (!%p227_p3), %v1134_v0  ;;  %1061 = vset.pattern.permute.xlu0 (!%p227_p3), %v1134_v0  ;;  %v1095_v2 = vld [vmem:[%s1325_s0 + $0xc] ss:$16 sps:$4 sm:$0xff] (!%p227_p3)   ;;  %v359_v3 = vld [vmem:[%s1326_s1] sm:$0xff] (!%p227_p3)  ;;  %v361_v5 = vld [vmem:[%s1326_s1 + $0x10] sm:$0xff] (!%p227_p3)  ;;  %vm688_vm1 = vcmask (!%p227_p3), 523264  }
   0x8   : > { %1062 = vset.pattern.permute.xlu1 (!%p227_p3), %v1134_v0  ;;  %622 = vmatprep.mubr.bf16.mxu0 (!%p227_p3), %v1090_v1  ;;  %v362_v7 = vld [vmem:[%s1326_s1 + $0x18] sm:$0xff] (!%p227_p3)  ;;  %v1088_v32 = vld [vmem:[%s1325_s0] ss:$16 sps:$4 sm:$0xff] (!%p227_p3)   ;;  %v1096_v33 = vld [vmem:[%s1325_s0 + $0x24] ss:$16 sps:$4 sm:$0xff] (!%p227_p3)   ;;  %vm833_vm2 = vcmask (!%p227_p3), 519168  }
   0x9   : > { %992 = vmatprep.mubr.msk.bf16.mxu1 (!%p227_p3), %vm583_vm0, %v1095_v2  ;;  %365 = vperm.xlu0 (!%p227_p3), %1061, %v359_v3   ;;  %v1098_v36 = vld [vmem:[%s1325_s0 + $0x20] ss:$16 sps:$4 sm:$0xff] (!%p227_p3)   ;;  %v1093_v37 = vld [vmem:[%s1325_s0 + $0x8] ss:$16 sps:$4 sm:$0xff] (!%p227_p3)   ;;  %v1099_v38 = vld [vmem:[%s1325_s0 + $0x2c] ss:$16 sps:$4 sm:$0xff] (!%p227_p3)  }
   0xa   : > { %375 = vperm.xlu1 (!%p227_p3), %1062, %v361_v5   ;;  %v1101_v39 = vld [vmem:[%s1325_s0 + $0x28] ss:$16 sps:$4 sm:$0xff] (!%p227_p3)  }
   0xd   : > { %370 = vperm.xlu0 (!%p227_p3), %1061, %v360_v4  }
   0xe   : > { %s1336_s18 = smov (!%p270_p4, %s1124_s18), 1  ;;  %380 = vperm.xlu1 %1062, %v362_v7  }
   0xf   : > { %s1035_s26 = smul.u32 216, %s1336_s18  ;;  %s1000_s29 = sshll.u32 %s1336_s18, 5 }
  0x10   : > { %s287_s7 = scalar_lea.vmem %s1329_s4, %s1000_s29  ;;  %s282_s10 = scalar_lea.vmem %s1328_s3, %s1000_s29 }
  0x11   : > { %s1202_s6 = scalar_lea.vmem %s1327_s2, %s1035_s26  ;;  %s1002_s11 = sshll.u32 %s1336_s18, 4 }
  0x12   : > { %v1063_v6 = vld [vmem:[%s1202_s6 + $0x80] sm:$0xff]   ;;  %v1066_v10 = vld [vmem:[%s1202_s6 + $0x88] sm:$0xff]   ;;  %v1069_v13 = vld [vmem:[%s1202_s6 + $0x90] sm:$0xff]   ;;  %s295_s14 = scalar_lea.vmem %s1330_s5, %s1002_s11 }
  0x13   : > { %v1064_v8 = vld [vmem:[%s1202_s6 + $0x40] sm:$0xff]   ;;  %640 = vmatpush1.bf16.msra.mxu1 %v1063_v6  ;;  %v1067_v11 = vld [vmem:[%s1202_s6 + $0x48] sm:$0xff]   ;;  %v1070_v14 = vld [vmem:[%s1202_s6 + $0x50] sm:$0xff]  }
  0x14   : > { %v1065_v9 = vld [vmem:[%s1202_s6] sm:$0xff]   ;;  %1007 = vmatprep.subr.bf16.mxu0 %v1064_v8  ;;  %641 = vmatprep.subr.bf16.mxu1 %v1134_v0  ;;  %v1068_v12 = vld [vmem:[%s1202_s6 + $0x8] sm:$0xff]   ;;  %v1071_v15 = vld [vmem:[%s1202_s6 + $0x10] sm:$0xff]  }
  0x15   : > { %1008 = vmatpush3.bf16.msra.mxu0 %v1065_v9  ;;  %v1072_v16 = vld [vmem:[%s1202_s6 + $0x98] sm:$0xff]   ;;  %v1076_v19 = vld [vmem:[%s1202_s6 + $0x60] sm:$0xff]   ;;  %v1079_v22 = vld [vmem:[%s1202_s6 + $0x68] sm:$0xff]  }
  0x16   : > { %1009 = vmatprep.subr.bf16.mxu0 %v1067_v11  ;;  %v1073_v17 = vld [vmem:[%s1202_s6 + $0x58] sm:$0xff]   ;;  %v1075_v20 = vld [vmem:[%s1202_s6 + $0xa0] sm:$0xff]   ;;  %v1078_v23 = vld [vmem:[%s1202_s6 + $0xa8] sm:$0xff]  }
  0x17   : > { %642 = vmatpush1.bf16.msra.mxu1 %v1066_v10  ;;  %v1074_v18 = vld [vmem:[%s1202_s6 + $0x18] sm:$0xff]   ;;  %v1077_v21 = vld [vmem:[%s1202_s6 + $0x20] sm:$0xff]   ;;  %v1080_v24 = vld [vmem:[%s1202_s6 + $0x28] sm:$0xff]  }
  0x18   : > { %643 = vmatprep.subr.bf16.mxu1 %v1134_v0  ;;  %v1082_v25 = vld [vmem:[%s1202_s6 + $0x70] sm:$0xff]   ;;  %v1085_v28 = vld [vmem:[%s1202_s6 + $0x78] sm:$0xff]   ;;  %v1087_v31 = vld [vmem:[%s1202_s6 + $0xc0] sm:$0xff]  }
  0x19   : > { %1010 = vmatpush3.bf16.msra.mxu0 %v1068_v12  ;;  %v1081_v26 = vld [vmem:[%s1202_s6 + $0xb0] sm:$0xff]   ;;  %v1084_v29 = vld [vmem:[%s1202_s6 + $0xb8] sm:$0xff]   ;;  %v1091_v34 = vld [vmem:[%s1202_s6 + $0xc8] sm:$0xff]  }
  0x1a   : > { %1011 = vmatprep.subr.bf16.mxu0 %v1070_v14  ;;  %v1083_v27 = vld [vmem:[%s1202_s6 + $0x30] sm:$0xff]   ;;  %v1086_v30 = vld [vmem:[%s1202_s6 + $0x38] sm:$0xff]  }
  0x1b   : > { %644 = vmatpush1.bf16.msra.mxu1 %v1069_v13  ;;  %v1092_v35 = vld [vmem:[%s1202_s6 + $0xd0] sm:$0xff]  }
  0x1c   : > { %645 = vmatprep.subr.bf16.mxu1 %v1134_v0 }
  0x1d   : > { %1012 = vmatpush3.bf16.msra.mxu0 %v1071_v15 }
  0x1e   : > { %1013 = vmatprep.subr.bf16.mxu0 %v1073_v17 }
  0x1f   : > { %646 = vmatpush1.bf16.msra.mxu1 %v1072_v16 }
  0x20   : > { %647 = vmatprep.subr.bf16.mxu1 %v1134_v0 }
  0x21   : > { %1014 = vmatpush3.bf16.msra.mxu0 %v1074_v18 }
  0x22   : > { %1015 = vmatprep.subr.bf16.mxu0 %v1076_v19 }
  0x23   : > { %648 = vmatpush1.bf16.msra.mxu1 %v1075_v20 }
  0x24   : > { %649 = vmatprep.subr.bf16.mxu1 %v1134_v0 }
  0x25   : > { %1016 = vmatpush3.bf16.msra.mxu0 %v1077_v21 }
  0x26   : > { %1017 = vmatprep.subr.bf16.mxu0 %v1079_v22 }
  0x27   : > { %650 = vmatpush1.bf16.msra.mxu1 %v1078_v23 }
  0x28   : > { %651 = vmatprep.subr.bf16.mxu1 %v1134_v0 }
  0x29   : > { %1018 = vmatpush3.bf16.msra.mxu0 %v1080_v24 }
  0x2a   : > { %1019 = vmatprep.subr.bf16.mxu0 %v1082_v25 }
  0x2b   : > { %652 = vmatpush1.bf16.msra.mxu1 %v1081_v26 }
  0x2c   : > { %653 = vmatprep.subr.bf16.mxu1 %v1134_v0 }
  0x2d   : > { %1020 = vmatpush3.bf16.msra.mxu0 %v1083_v27 }
  0x2e   : > { %1021 = vmatprep.subr.bf16.mxu0 %v1085_v28 }
  0x2f   : > { %654 = vmatpush1.bf16.msra.mxu1 %v1084_v29 }
  0x30   : > { %655 = vmatprep.subr.bf16.mxu1 %v1134_v0 }
  0x31   : > { %1022 = vmatpush3.bf16.msra.mxu0 %v1086_v30 }
  0x33   : > { %656 = vmatpush1.bf16.msra.mxu1 %v1087_v31 }
  0x34   : > { %623 = vmatmul.mubr.bf16.vlgmr.msra.gmra.mrb[0].mxu0 %v1088_v32  ;;  %657 = vmatprep.subr.bf16.mxu1 %v1134_v0 }
  0x35   : > { %630 = vmatprep.mubr.bf16.mxu0 %v1096_v33 }
  0x37   : > { %658 = vmatpush1.bf16.msra.mxu1 %v1091_v34 }
  0x38   : > { %659 = vmatprep.subr.bf16.mxu1 %v1134_v0 }
  0x3b   : > { %660 = vmatpush1.bf16.msra.mxu1 %v1092_v35 }
  0x3c   : > { %631 = vmatmul.mubr.bf16.gmra.mrb[4].mxu0 %v1098_v36 }
  0x3e   : > { %672 = vmatmul.mubr.bf16.vlgmr.msra.gmra.mrb[0].mxu1 %v1093_v37 }
  0x3f   : > { %993 = vmatprep.mubr.msk.bf16.mxu1 %vm583_vm0, %v1099_v38 }
  0x46   : > { %680 = vmatmul.mubr.bf16.gmra.mrb[4].mxu1 %v1101_v39 }
  0x88   : > { %v366_v41 = vpop.permute.xlu0 %365 }
  0x89   : > { %v376_v49 = vpop.permute.xlu1 %375 }
  0x8c   : > { %v371_v47 = vpop.permute.xlu0 %370 }
  0x8d   : > { %v381_v0 = vpop.permute.xlu1 %380 }
 0x107   : > { %v1023_v40 = vpop.f32.mrb[0].mxu0 }
 0x108   : > { %v1024_v42 = vpop.f32.mrb[1].mxu0 }
 0x109   : > { %v1025_v43 = vadd.f32 %v1024_v42, %v1023_v40  ;;  %v1026_v44 = vpop.f32.mrb[2].mxu0 }
 0x10a   : > { %v1027_v45 = vpop.f32.mrb[3].mxu0 }
 0x10b   : > { %v1028_v46 = vadd.f32 %v1027_v45, %v1026_v44  ;;  %v625_v50 = vadd.f32 %v1025_v43, %v366_v41 }
 0x10d   : > { %v628_v55 = vadd.f32 %v1028_v46, %v371_v47 }
 0x10f   : > { %v1029_v48 = vpop.f32.mrb[4].mxu0 }
 0x110   : > { %v1030_v51 = vpop.f32.mrb[5].mxu0 }
 0x111   : > { %v673_v52 = vpop.f32.mrb[0].mxu1  ;;  %v1031_v53 = vadd.f32 %v1030_v51, %v1029_v48  ;;  %v1032_v54 = vpop.f32.mrb[6].mxu0  ;;  %v742_v51 = vld [vmem:[%s287_s7 + $0x8] sm:$0xff] }
 0x112   : > { %v1269_v56 = vadd.f32 %v673_v52, %v625_v50  ;;  %v675_v57 = vpop.f32.mrb[1].mxu1  ;;  %v1033_v58 = vpop.f32.mrb[7].mxu0 }
 0x113   : > { %v676_v59 = vpop.f32.mrb[2].mxu1  ;;  %v1034_v60 = vadd.f32 %v1033_v58, %v1032_v54  ;;  %v633_v2 = vadd.f32 %v1031_v53, %v376_v49  ;;  %v741_v54 = vld [vmem:[%s287_s7] sm:$0xff] }
 0x114   : > { %v1271_v61 = vadd.f32 %v676_v59, %v628_v55  ;;  %v678_v62 = vpop.f32.mrb[3].mxu1  ;;  %v689_v63 = vsel %vm688_vm1, %v1269_v56, 0.0  ;;  %v705_v4 = vmul.f32 %v1269_v56, %v1269_v56 }
 0x115   : > { %690 = vadd.xlane.f32.xlu0 %v689_v63  ;;  %v636_v5 = vadd.f32 %v1034_v60, %v381_v0  ;;  %v737_v60 = vld [vmem:[%s282_s10] sm:$0xff]  ;;  %v738_v62 = vld [vmem:[%s282_s10 + $0x8] sm:$0xff]  ;;  %v743_v63 = vld [vmem:[%s287_s7 + $0x10] sm:$0xff] }
 0x116   : > { %v692_v1 = vsel %vm688_vm1, %v1271_v61, 0.0  ;;  %v706_v3 = vmul.f32 %v1271_v61, %v1271_v61  ;;  %v709_v10 = vsel %vm688_vm1, %v705_v4, 0.0 }
 0x117   : > { %693 = vadd.xlane.f32.xlu1 %v692_v1 }
 0x118   : > { %v712_v6 = vsel %vm688_vm1, %v706_v3, 0.0 }
 0x119   : > { %v681_v7 = vpop.f32.mrb[4].mxu1  ;;  %713 = vadd.xlane.f32.xlu0 %v712_v6 }
 0x11a   : > { %v1282_v8 = vadd.f32 %v681_v7, %v633_v2  ;;  %v683_v9 = vpop.f32.mrb[5].mxu1  ;;  %v744_v7 = vld [vmem:[%s287_s7 + $0x18] sm:$0xff] }
 0x11b   : > { %v684_v11 = vpop.f32.mrb[6].mxu1  ;;  %710 = vadd.xlane.f32.xlu1 %v709_v10 }
 0x11c   : > { %v1285_v12 = vadd.f32 %v684_v11, %v636_v5  ;;  %v686_v13 = vpop.f32.mrb[7].mxu1  ;;  %v695_v14 = vsel %vm688_vm1, %v1282_v8, 0.0  ;;  %v707_v15 = vmul.f32 %v1282_v8, %v1282_v8  ;;  %v739_v5 = vld [vmem:[%s282_s10 + $0x10] sm:$0xff] }
 0x11d   : > { %696 = vadd.xlane.f32.xlu0 %v695_v14  ;;  %v740_v14 = vld [vmem:[%s282_s10 + $0x18] sm:$0xff] }
 0x11e   : > { %v715_v16 = vsel %vm688_vm1, %v707_v15, 0.0  ;;  %v698_v17 = vsel %vm688_vm1, %v1285_v12, 0.0  ;;  %v708_v18 = vmul.f32 %v1285_v12, %v1285_v12 }
 0x11f   : > { %716 = vadd.xlane.f32.xlu1 %v715_v16 }
 0x120   : > { %v718_v19 = vsel %vm688_vm1, %v708_v18, 0.0 }
 0x121   : > { %699 = vadd.xlane.f32.xlu0 %v698_v17 }
 0x125   : > { %719 = vadd.xlane.f32.xlu0 %v718_v19 }
 0x1a2   : > { %v691_v20 = vpop.xlane.xlu0 %690 }
 0x1a3   : > { %v701_v22 = vmul.f32 0.015625, %v691_v20 }
 0x1a4   : > { %v694_v21 = vpop.xlane.xlu1 %693 }
 0x1a5   : > { %v702_v23 = vmul.f32 0.015625, %v694_v21  ;;  %v725_v28 = vmul.f32 %v701_v22, %v701_v22 }
 0x1a6   : > { %v714_v24 = vpop.xlane.xlu0 %713 }
 0x1a7   : > { %v726_v25 = vmul.f32 %v702_v23, %v702_v23  ;;  %v722_v26 = vmul.f32 0.015625, %v714_v24 }
 0x1a8   : > { %v711_v27 = vpop.xlane.xlu1 %710 }
 0x1a9   : > { %v730_v29 = vsub.f32 %v722_v26, %v726_v25  ;;  %v721_v30 = vmul.f32 0.015625, %v711_v27 }
 0x1aa   : > { %v697_v31 = vpop.xlane.xlu0 %696 }
 0x1ab   : > { %v734_v32 = vmax.f32 %v730_v29, 0.0  ;;  %v729_v33 = vsub.f32 %v721_v30, %v725_v28  ;;  %v703_v34 = vmul.f32 0.015625, %v697_v31 }
 0x1ac   : > { %v717_v35 = vpop.xlane.xlu1 %716 }
 0x1ad   : > { %v746_v36 = vadd.f32 1e-05, %v734_v32  ;;  %v733_v37 = vmax.f32 %v729_v33, 0.0  ;;  %v727_v38 = vmul.f32 %v703_v34, %v703_v34  ;;  %v723_v39 = vmul.f32 0.015625, %v717_v35 }
 0x1ae   : > { %v700_v40 = vpop.xlane.xlu0 %699 }
 0x1af   : > { %1102 = vrsqrt.f32 %v746_v36  ;;  %v745_v41 = vadd.f32 1e-05, %v733_v37  ;;  %v731_v42 = vsub.f32 %v723_v39, %v727_v38  ;;  %v704_v43 = vmul.f32 0.015625, %v700_v40 }
 0x1b1   : > { %1104 = vrsqrt.f32 %v745_v41  ;;  %v735_v44 = vmax.f32 %v731_v42, 0.0  ;;  %v728_v47 = vmul.f32 %v704_v43, %v704_v43 }
 0x1b2   : > { %v720_v45 = vpop.xlane.xlu0 %719 }
 0x1b3   : > { %v747_v46 = vadd.f32 1e-05, %v735_v44  ;;  %v724_v48 = vmul.f32 0.015625, %v720_v45 }
 0x1b5   : > { %1106 = vrsqrt.f32 %v747_v46  ;;  %v732_v49 = vsub.f32 %v724_v48, %v728_v47 }
 0x1b7   : > { %v736_v50 = vmax.f32 %v732_v49, 0.0 }
 0x1b9   : > { %v1103_v52 = vpop.eup %1102  ;;  %v748_v53 = vadd.f32 1e-05, %v736_v50 }
 0x1ba   : > { %v754_v55 = vmul.f32 %v1103_v52, %v742_v51 }
 0x1bb   : > { %v1105_v57 = vpop.eup %1104  ;;  %1108 = vrsqrt.f32 %v748_v53 }
 0x1bc   : > { %772 = vperm.xlu0 %1061, %v754_v55   ;;  %v753_v58 = vmul.f32 %v1105_v57, %v741_v54  ;;  %v758_v59 = vmul.f32 %v754_v55, %v702_v23 }
 0x1be   : > { %767 = vperm.xlu1 %1062, %v753_v58   ;;  %v757_v0 = vmul.f32 %v753_v58, %v701_v22  ;;  %v762_v3 = vsub.f32 %v738_v62, %v758_v59 }
 0x1bf   : > { %v1107_v1 = vpop.eup %1106 }
 0x1c0   : > { %v761_v2 = vsub.f32 %v737_v60, %v757_v0  ;;  %v755_v4 = vmul.f32 %v1107_v1, %v743_v63 }
 0x1c2   : > { %791 = vperm.xlu0 %1061, %v761_v2   ;;  %796 = vperm.xlu1 %1062, %v762_v3   ;;  %v759_v6 = vmul.f32 %v755_v4, %v703_v34 }
 0x1c4   : > { %v763_v9 = vsub.f32 %v739_v5, %v759_v6 }
 0x1c5   : > { %v1109_v10 = vpop.eup %1108 }
 0x1c6   : > { %777 = vperm.xlu1 %1062, %v755_v4   ;;  %801 = vperm.xlu0 %1061, %v763_v9   ;;  %v756_v11 = vmul.f32 %v1109_v10, %v744_v7 }
 0x1c8   : > { %v760_v13 = vmul.f32 %v756_v11, %v704_v43 }
 0x1ca   : > { %782 = vperm.xlu1 %1062, %v756_v11   ;;  %v764_v15 = vsub.f32 %v740_v14, %v760_v13 }
 0x1ce   : > { %806 = vperm.xlu1 %1062, %v764_v15  }
 0x23b   : > { %v773_v16 = vpop.permute.xlu0 %772 }
 0x23c   : > { %v786_v18 = vmul.f32 %v773_v16, %v1271_v61 }
 0x23d   : > { %v768_v17 = vpop.permute.xlu1 %767 }
 0x23e   : > { %v785_v19 = vmul.f32 %v768_v17, %v1269_v56 }
 0x241   : > { %v797_v20 = vpop.permute.xlu1 %796  ;;  %v792_v21 = vpop.permute.xlu0 %791 }
 0x242   : > { %v810_v22 = vadd.f32 %v797_v20, %v786_v18  ;;  %v809_v23 = vadd.f32 %v792_v21, %v785_v19 }
 0x244   : > { %v814_v24 = vmax.f32 %v810_v22, 0.0  ;;  %v813_v25 = vmax.f32 %v809_v23, 0.0 }
 0x245   : > { %v778_v26 = vpop.permute.xlu1 %777  ;;  %v802_v61 = vpop.permute.xlu0 %801 }
 0x246   : > { %v1004_v27 = vpack.c.bf16 %v814_v24, %v814_v24  ;;  %v1003_v28 = vpack.c.bf16 %v813_v25, %v813_v25  ;;  %v787_v29 = vmul.f32 %v778_v26, %v1282_v8 }
 0x248   : > { %835 = vst.msk [vmem:[%s295_s14 + $0x4] sm:$0xf] %vm833_vm2, %v1004_v27  ;;  %834 = vst.msk [vmem:[%s295_s14] sm:$0xf] %vm833_vm2, %v1003_v28  ;;  %v811_v56 = vadd.f32 %v802_v61, %v787_v29 }
 0x249   : > { %v783_v30 = vpop.permute.xlu1 %782 }
 0x24a   : > { %v815_v31 = vmax.f32 %v811_v56, 0.0  ;;  %v788_v33 = vmul.f32 %v783_v30, %v1285_v12 }
 0x24c   : > { %v1005_v32 = vpack.c.bf16 %v815_v31, %v815_v31 }
 0x24d   : > { %v807_v34 = vpop.permute.xlu1 %806 }
 0x24e   : > { %836 = vst.msk [vmem:[%s295_s14 + $0x8] sm:$0xf] %vm833_vm2, %v1005_v32  ;;  %v812_v35 = vadd.f32 %v807_v34, %v788_v33 }
 0x250   : > { %v816_v36 = vmax.f32 %v812_v35, 0.0 }
 0x252   : > { %v1006_v37 = vpack.c.bf16 %v816_v36, %v816_v36 }
 0x254   : > { %837 = vst.msk [vmem:[%s295_s14 + $0xc] sm:$0xf] %vm833_vm2, %v1006_v37 }
 0x255 PF: > { %s15_s20 = sadd.s32 1, %s1132_s20   ;;  %s1331_s18 = smov %s1128_s19 }
 0x256   : > { %p12_p5 = scmp.ge.s32.totalorder %s15_s20, 4   ;;  %s1332_s19 = smov %s1334_s21 }
 0x258   :  { %14 = sbr.rel (!%p12_p5) target bundleno = 2 (0x2), region = 76 }

// kernel: unet_adain_forward.15
= control target key start
LH: loop header
LB: loop body
LE: loop exit
PB: predicated region body
PF: predicated region fallthrough
CT: control target
= control target key end

     0   :  { %s2089_s18 = smov 0   ;;  %s2091_s19 = smov 0   ;;  %s2457_s0 = inlined_call_operand.vmem [shape: bf16[64,864], index: 0, kind: input, shape index: {}]   ;;  %s2458_s1 = inlined_call_operand.vmem [shape: f32[64,1], index: 1, kind: input, shape index: {}]   ;;  %s2459_s2 = inlined_call_operand.vmem [shape: bf16[2,864,8], index: 2, kind: input, shape index: {}]   ;;  %s2460_s3 = inlined_call_operand.vmem [shape: f32[2,64,1], index: 3, kind: input, shape index: {}]   ;;  %s2461_s4 = inlined_call_operand.vmem [shape: f32[2,64,1], index: 4, kind: input, shape index: {}]   ;;  %s2462_s5 = inlined_call_operand.vmem [shape: bf16[2,64,8], index: 5, kind: output, shape index: {}]  }
   0x1   :  { %s2093_s20 = smov 0  }
   0x2 LB: > { %s27_s21 = sadd.s32 1, %s2052_s19  ;;  %p1631_p0 = scmp.ge.s32.totalorder %s2056_s20, 1  ;;  %s2056_s20 = sphi %s2093_s20, %s15_s20   ;;  %s2052_s19 = sphi %s2091_s19, %s2464_s19   ;;  %s2048_s18 = sphi %s2089_s18, %s2463_s18  }
   0x3   : > { %p29_p1 = scmp.ge.s32.totalorder %s27_s21, 2  ;;  %p226_p2 = scmp.lt.s32.totalorder %s2056_s20, 3 }
   0x5   : > { %s2466_s21 = smov (%p29_p1, %s27_s21), 0  ;;  %p227_p3 = pnand %p1631_p0, %p226_p2 }
   0x6   : > { %p270_p4 = scmp.lt.s32.totalorder (!%p227_p3), %s2048_s18, 1  ;;  %v1957_v0 = vld [vmem:[%s2457_s0 + $0x4] ss:$28 sps:$4 sm:$0xff] (!%p227_p3)   ;;  %v1962_v1 = vld [vmem:[%s2457_s0 + $0xc] ss:$28 sps:$4 sm:$0xff] (!%p227_p3)   ;;  %v2058_v2 = vmov (!%p227_p3), 0  }
   0x7   : > { %230 = sbr.rel (%p227_p3) target bundleno = 639 (0x27f), region = 40  ;;  %1922 = vset.pattern.permute.xlu0 (!%p227_p3), %v2058_v2  ;;  %1923 = vset.pattern.permute.xlu1 (!%p227_p3), %v2058_v2  ;;  %v1955_v32 = vld [vmem:[%s2457_s0] ss:$28 sps:$4 sm:$0xff] (!%p227_p3)   ;;  %v1960_v36 = vld [vmem:[%s2457_s0 + $0x8] ss:$28 sps:$4 sm:$0xff] (!%p227_p3)   ;;  %vm949_vm0 = vcmask (!%p227_p3), 785408  }
   0x8   : > { %994 = vmatprep.mubr.bf16.mxu0 (!%p227_p3), %v1957_v0  ;;  %1059 = vmatprep.mubr.bf16.mxu1 (!%p227_p3), %v1962_v1  ;;  %v1967_v34 = vld [vmem:[%s2457_s0 + $0x3c] ss:$28 sps:$4 sm:$0xff] (!%p227_p3)   ;;  %v1971_v38 = vld [vmem:[%s2457_s0 + $0x44] ss:$28 sps:$4 sm:$0xff] (!%p227_p3)   ;;  %v1978_v46 = vld [vmem:[%s2457_s0 + $0x74] ss:$28 sps:$4 sm:$0xff] (!%p227_p3)  }
   0x9   : > { %v1969_v44 = vld [vmem:[%s2457_s0 + $0x38] ss:$28 sps:$4 sm:$0xff] (!%p227_p3)   ;;  %v1974_v48 = vld [vmem:[%s2457_s0 + $0x40] ss:$28 sps:$4 sm:$0xff] (!%p227_p3)   ;;  %v1981_v55 = vld [vmem:[%s2457_s0 + $0x70] ss:$28 sps:$4 sm:$0xff] (!%p227_p3)  }
   0xa   : > { %v1983_v54 = vld [vmem:[%s2457_s0 + $0x7c] ss:$28 sps:$4 sm:$0xff] (!%p227_p3)   ;;  %v1990_v60 = vld [vmem:[%s2457_s0 + $0xac] ss:$28 sps:$4 sm:$0xff] (!%p227_p3)   ;;  %v1994_v63 = vld [vmem:[%s2457_s0 + $0xb4] ss:$28 sps:$4 sm:$0xff] (!%p227_p3)  }
   0xb   : > { %v1986_v57 = vld [vmem:[%s2457_s0 + $0x78] ss:$28 sps:$4 sm:$0xff] (!%p227_p3)   ;;  %v1992_v0 = vld [vmem:[%s2457_s0 + $0xa8] ss:$28 sps:$4 sm:$0xff] (!%p227_p3)   ;;  %vm1222_vm1 = vcmask (!%p227_p3), 64512   ;;  %vm1511_vm2 = vcmask (!%p227_p3), 60416  }
   0xe   : > { %s2468_s18 = smov (!%p270_p4, %s2048_s18), 1 }
   0xf   : > { %s1896_s26 = smul.u32 432, %s2468_s18  ;;  %s1735_s11 = sshll.u32 %s2468_s18, 6 }
  0x10   : > { %s2379_s14 = scalar_lea.vmem %s2461_s4, %s1735_s11  ;;  %s2392_s17 = scalar_lea.vmem %s2460_s3, %s1735_s11 }
  0x11   : > { %s2119_s29 = scalar_lea.vmem %s2459_s2, %s1896_s26  ;;  %s1737_s22 = sshll.u32 %s2468_s18, 5 }
  0x12   : > { %v1924_v3 = vld [vmem:[%s2119_s29 + $0x40] sm:$0xff]   ;;  %v1928_v7 = vld [vmem:[%s2119_s29 + $0x48] sm:$0xff]   ;;  %v1932_v11 = vld [vmem:[%s2119_s29 + $0x50] sm:$0xff]   ;;  %s2424_s24 = scalar_lea.vmem %s2462_s5, %s1737_s22 }
  0x13   : > { %v1925_v4 = vld [vmem:[%s2119_s29] sm:$0xff]   ;;  %1746 = vmatprep.subr.bf16.mxu0 %v1924_v3  ;;  %v1929_v8 = vld [vmem:[%s2119_s29 + $0x8] sm:$0xff]   ;;  %v1933_v12 = vld [vmem:[%s2119_s29 + $0x10] sm:$0xff]  }
  0x14   : > { %v1926_v5 = vld [vmem:[%s2119_s29 + $0xc0] sm:$0xff]   ;;  %1747 = vmatpush3.bf16.msra.mxu0 %v1925_v4  ;;  %v1930_v9 = vld [vmem:[%s2119_s29 + $0xc8] sm:$0xff]   ;;  %v1934_v13 = vld [vmem:[%s2119_s29 + $0xd0] sm:$0xff]  }
  0x15   : > { %v1927_v6 = vld [vmem:[%s2119_s29 + $0x80] sm:$0xff]   ;;  %1786 = vmatprep.subr.bf16.mxu1 %v1926_v5  ;;  %1748 = vmatprep.subr.bf16.mxu0 %v1928_v7  ;;  %v1931_v10 = vld [vmem:[%s2119_s29 + $0x88] sm:$0xff]   ;;  %v1935_v14 = vld [vmem:[%s2119_s29 + $0x90] sm:$0xff]  }
  0x16   : > { %1787 = vmatpush3.bf16.msra.mxu1 %v1927_v6  ;;  %v1936_v15 = vld [vmem:[%s2119_s29 + $0x58] sm:$0xff]   ;;  %v1940_v19 = vld [vmem:[%s2119_s29 + $0x60] sm:$0xff]   ;;  %v1944_v23 = vld [vmem:[%s2119_s29 + $0x68] sm:$0xff]  }
  0x17   : > { %1788 = vmatprep.subr.bf16.mxu1 %v1930_v9  ;;  %v1937_v16 = vld [vmem:[%s2119_s29 + $0x18] sm:$0xff]   ;;  %v1941_v20 = vld [vmem:[%s2119_s29 + $0x20] sm:$0xff]   ;;  %v1945_v24 = vld [vmem:[%s2119_s29 + $0x28] sm:$0xff]  }
  0x18   : > { %1749 = vmatpush3.bf16.msra.mxu0 %v1929_v8  ;;  %v1938_v17 = vld [vmem:[%s2119_s29 + $0xd8] sm:$0xff]   ;;  %v1942_v21 = vld [vmem:[%s2119_s29 + $0xe0] sm:$0xff]   ;;  %v1946_v25 = vld [vmem:[%s2119_s29 + $0xe8] sm:$0xff]  }
  0x19   : > { %1750 = vmatprep.subr.bf16.mxu0 %v1932_v11  ;;  %v1939_v18 = vld [vmem:[%s2119_s29 + $0x98] sm:$0xff]   ;;  %v1943_v22 = vld [vmem:[%s2119_s29 + $0xa0] sm:$0xff]   ;;  %v1947_v26 = vld [vmem:[%s2119_s29 + $0xa8] sm:$0xff]  }
  0x1a   : > { %1789 = vmatpush3.bf16.msra.mxu1 %v1931_v10  ;;  %v1948_v27 = vld [vmem:[%s2119_s29 + $0x70] sm:$0xff]   ;;  %v1952_v31 = vld [vmem:[%s2119_s29 + $0x78] sm:$0xff]   ;;  %v1959_v39 = vld [vmem:[%s2119_s29 + $0x140] sm:$0xff]  }
  0x1b   : > { %1790 = vmatprep.subr.bf16.mxu1 %v1934_v13  ;;  %v1949_v28 = vld [vmem:[%s2119_s29 + $0x30] sm:$0xff]   ;;  %v1953_v33 = vld [vmem:[%s2119_s29 + $0x38] sm:$0xff]   ;;  %v1963_v40 = vld [vmem:[%s2119_s29 + $0x100] sm:$0xff]  }
  0x1c   : > { %1751 = vmatpush3.bf16.msra.mxu0 %v1933_v12  ;;  %v1950_v29 = vld [vmem:[%s2119_s29 + $0xf0] sm:$0xff]   ;;  %v1954_v35 = vld [vmem:[%s2119_s29 + $0xf8] sm:$0xff]   ;;  %v1964_v41 = vld [vmem:[%s2119_s29 + $0x148] sm:$0xff]  }
  0x1d   : > { %1752 = vmatprep.subr.bf16.mxu0 %v1936_v15  ;;  %v1951_v30 = vld [vmem:[%s2119_s29 + $0xb0] sm:$0xff]   ;;  %v1958_v37 = vld [vmem:[%s2119_s29 + $0xb8] sm:$0xff]   ;;  %v1965_v42 = vld [vmem:[%s2119_s29 + $0x180] sm:$0xff]  }
  0x1e   : > { %1791 = vmatpush3.bf16.msra.mxu1 %v1935_v14  ;;  %v1966_v43 = vld [vmem:[%s2119_s29 + $0x108] sm:$0xff]   ;;  %v1970_v45 = vld [vmem:[%s2119_s29 + $0x150] sm:$0xff]   ;;  %v1976_v50 = vld [vmem:[%s2119_s29 + $0x158] sm:$0xff]  }
  0x1f   : > { %1792 = vmatprep.subr.bf16.mxu1 %v1938_v17  ;;  %v1973_v47 = vld [vmem:[%s2119_s29 + $0x110] sm:$0xff]   ;;  %v1975_v49 = vld [vmem:[%s2119_s29 + $0x188] sm:$0xff]   ;;  %v1977_v51 = vld [vmem:[%s2119_s29 + $0x118] sm:$0xff]  }
  0x20   : > { %1753 = vmatpush3.bf16.msra.mxu0 %v1937_v16  ;;  %v1980_v52 = vld [vmem:[%s2119_s29 + $0x190] sm:$0xff]   ;;  %v1982_v53 = vld [vmem:[%s2119_s29 + $0x160] sm:$0xff]   ;;  %v1988_v58 = vld [vmem:[%s2119_s29 + $0x198] sm:$0xff]  }
  0x21   : > { %1754 = vmatprep.subr.bf16.mxu0 %v1940_v19  ;;  %v1985_v56 = vld [vmem:[%s2119_s29 + $0x120] sm:$0xff]   ;;  %v1987_v59 = vld [vmem:[%s2119_s29 + $0x168] sm:$0xff]   ;;  %v1993_v62 = vld [vmem:[%s2119_s29 + $0x170] sm:$0xff]  }
  0x22   : > { %1793 = vmatpush3.bf16.msra.mxu1 %v1939_v18  ;;  %v1989_v61 = vld [vmem:[%s2119_s29 + $0x128] sm:$0xff]   ;;  %v1996_v1 = vld [vmem:[%s2119_s29 + $0x130] sm:$0xff]   ;;  %v1998_v2 = vld [vmem:[%s2119_s29 + $0x1a0] sm:$0xff]  }
  0x23   : > { %1794 = vmatprep.subr.bf16.mxu1 %v1942_v21  ;;  %v1997_v3 = vld [vmem:[%s2457_s0 + $0xb0] ss:$28 sps:$4 sm:$0xff]   ;;  %v1999_v4 = vld [vmem:[%s2119_s29 + $0x178] sm:$0xff]   ;;  %v2013_v12 = vld [vmem:[%s2457_s0 + $0x88] ss:$28 sps:$4 sm:$0xff]  }
  0x24   : > { %1755 = vmatpush3.bf16.msra.mxu0 %v1941_v20  ;;  %v2001_v5 = vld [vmem:[%s2119_s29 + $0x1a8] sm:$0xff]   ;;  %v2000_v6 = vld [vmem:[%s2119_s29 + $0x138] sm:$0xff]   ;;  %v2004_v7 = vld [vmem:[%s2457_s0 + $0x14] ss:$28 sps:$4 sm:$0xff]  }
  0x25   : > { %1756 = vmatprep.subr.bf16.mxu0 %v1944_v23  ;;  %v2005_v8 = vld [vmem:[%s2457_s0 + $0x18] ss:$28 sps:$4 sm:$0xff]   ;;  %v2002_v9 = vld [vmem:[%s2457_s0 + $0x10] ss:$28 sps:$4 sm:$0xff]   ;;  %v437_v13 = vld [vmem:[%s2458_s1] sm:$0xff] }
  0x26   : > { %1795 = vmatpush3.bf16.msra.mxu1 %v1943_v22  ;;  %v2007_v10 = vld [vmem:[%s2457_s0 + $0x4c] ss:$28 sps:$4 sm:$0xff]   ;;  %v439_v14 = vld [vmem:[%s2458_s1 + $0x10] sm:$0xff]  ;;  %447 = vperm.xlu0 %1922, %v437_v13   ;;  %v440_v17 = vld [vmem:[%s2458_s1 + $0x18] sm:$0xff] }
  0x27   : > { %1796 = vmatprep.subr.bf16.mxu1 %v1946_v25  ;;  %v2006_v11 = vld [vmem:[%s2457_s0 + $0x50] ss:$28 sps:$4 sm:$0xff]   ;;  %457 = vperm.xlu1 %1923, %v439_v14   ;;  %v2009_v16 = vld [vmem:[%s2457_s0 + $0x48] ss:$28 sps:$4 sm:$0xff]   ;;  %v2014_v19 = vld [vmem:[%s2457_s0 + $0xc0] ss:$28 sps:$4 sm:$0xff]  }
  0x28   : > { %1757 = vmatpush3.bf16.msra.mxu0 %v1945_v24  ;;  %v438_v15 = vld [vmem:[%s2458_s1 + $0x8] sm:$0xff]  ;;  %v2010_v18 = vld [vmem:[%s2457_s0 + $0x84] ss:$28 sps:$4 sm:$0xff]   ;;  %v443_v22 = vld [vmem:[%s2458_s1 + $0x30] sm:$0xff] }
  0x29   : > { %1758 = vmatprep.subr.bf16.mxu0 %v1948_v27  ;;  %v441_v20 = vld [vmem:[%s2458_s1 + $0x20] sm:$0xff]  ;;  %v442_v21 = vld [vmem:[%s2458_s1 + $0x28] sm:$0xff]  ;;  %v444_v24 = vld [vmem:[%s2458_s1 + $0x38] sm:$0xff] }
  0x2a   : > { %1797 = vmatpush3.bf16.msra.mxu1 %v1947_v26  ;;  %452 = vperm.xlu0 %1922, %v438_v15   ;;  %v2012_v23 = vld [vmem:[%s2457_s0 + $0x80] ss:$28 sps:$4 sm:$0xff]   ;;  %v2017_v26 = vld [vmem:[%s2457_s0 + $0xb8] ss:$28 sps:$4 sm:$0xff]  }
  0x2b   : > { %1798 = vmatprep.subr.bf16.mxu1 %v1950_v29  ;;  %462 = vperm.xlu1 %1923, %v440_v17   ;;  %v2015_v25 = vld [vmem:[%s2457_s0 + $0xbc] ss:$28 sps:$4 sm:$0xff]  }
  0x2c   : > { %1759 = vmatpush3.bf16.msra.mxu0 %v1949_v28 }
  0x2d   : > { %1760 = vmatprep.subr.bf16.mxu0 %v1952_v31 }
  0x2e   : > { %1799 = vmatpush3.bf16.msra.mxu1 %v1951_v30  ;;  %467 = vperm.xlu0 %1922, %v441_v20  }
  0x2f   : > { %1800 = vmatprep.subr.bf16.mxu1 %v1954_v35  ;;  %472 = vperm.xlu1 %1923, %v442_v21  }
  0x30   : > { %1761 = vmatpush3.bf16.msra.mxu0 %v1953_v33 }
  0x31   : > { %1826 = vmatprep.subr.bf16.mxu0 %v1959_v39 }
  0x32   : > { %1801 = vmatpush3.bf16.msra.mxu1 %v1958_v37  ;;  %477 = vperm.xlu0 %1922, %v443_v22  }
  0x33   : > { %995 = vmatmul.mubr.bf16.vlgmr.msra.gmra.mrb[0].mxu0 %v1955_v32  ;;  %1876 = vmatprep.subr.bf16.mxu1 %v1965_v42 }
  0x34   : > { %1827 = vmatpush3.bf16.msra.mxu0 %v1963_v40  ;;  %1002 = vmatprep.mubr.bf16.mxu0 %v1967_v34 }
  0x35   : > { %1060 = vmatmul.mubr.bf16.vlgmr.msra.gmra.mrb[0].mxu1 %v1960_v36  ;;  %1828 = vmatprep.subr.bf16.mxu0 %v1964_v41 }
  0x36   : > { %1067 = vmatprep.mubr.bf16.mxu1 %v1971_v38  ;;  %1877 = vmatpush3.bf16.msra.mxu1 %v1965_v42 }
  0x37   : > { %1878 = vmatprep.subr.bf16.mxu1 %v1975_v49  ;;  %482 = vperm.xlu1 %1923, %v444_v24  }
  0x38   : > { %1829 = vmatpush3.bf16.msra.mxu0 %v1966_v43 }
  0x39   : > { %1830 = vmatprep.subr.bf16.mxu0 %v1970_v45 }
  0x3a   : > { %1879 = vmatpush3.bf16.msra.mxu1 %v1975_v49 }
  0x3b   : > { %1003 = vmatmul.mubr.bf16.gmra.mrb[4].mxu0 %v1969_v44  ;;  %1880 = vmatprep.subr.bf16.mxu1 %v1980_v52 }
  0x3c   : > { %1831 = vmatpush3.bf16.msra.mxu0 %v1973_v47  ;;  %1010 = vmatprep.mubr.bf16.mxu0 %v1978_v46 }
  0x3d   : > { %1068 = vmatmul.mubr.bf16.gmra.mrb[4].mxu1 %v1974_v48  ;;  %1832 = vmatprep.subr.bf16.mxu0 %v1976_v50 }
  0x3e   : > { %1881 = vmatpush3.bf16.msra.mxu1 %v1980_v52  ;;  %1075 = vmatprep.mubr.bf16.mxu1 %v1983_v54 }
  0x3f   : > { %1882 = vmatprep.subr.bf16.mxu1 %v1988_v58 }
  0x40   : > { %1833 = vmatpush3.bf16.msra.mxu0 %v1977_v51 }
  0x41   : > { %1834 = vmatprep.subr.bf16.mxu0 %v1982_v53 }
  0x42   : > { %1883 = vmatpush3.bf16.msra.mxu1 %v1988_v58 }
  0x43   : > { %1011 = vmatmul.mubr.bf16.gmra.mrb[8].mxu0 %v1981_v55  ;;  %1884 = vmatprep.subr.bf16.mxu1 %v1998_v2 }
  0x44   : > { %1835 = vmatpush3.bf16.msra.mxu0 %v1985_v56  ;;  %1018 = vmatprep.mubr.bf16.mxu0 %v1990_v60 }
  0x45   : > { %1076 = vmatmul.mubr.bf16.gmra.mrb[8].mxu1 %v1986_v57  ;;  %1836 = vmatprep.subr.bf16.mxu0 %v1987_v59 }
  0x46   : > { %1083 = vmatprep.mubr.bf16.mxu1 %v1994_v63  ;;  %1885 = vmatpush3.bf16.msra.mxu1 %v1998_v2 }
  0x47   : > { %1886 = vmatprep.subr.bf16.mxu1 %v2001_v5 }
  0x48   : > { %1837 = vmatpush3.bf16.msra.mxu0 %v1989_v61 }
  0x49   : > { %1838 = vmatprep.subr.bf16.mxu0 %v1993_v62 }
  0x4a   : > { %1887 = vmatpush3.bf16.msra.mxu1 %v2001_v5 }
  0x4b   : > { %1019 = vmatmul.mubr.bf16.gmra.mrb[12].mxu0 %v1992_v0 }
  0x4c   : > { %1839 = vmatpush3.bf16.msra.mxu0 %v1996_v1  ;;  %1124 = vmatprep.mubr.bf16.mxu0 %v2004_v7 }
  0x4d   : > { %1084 = vmatmul.mubr.bf16.gmra.mrb[12].mxu1 %v1997_v3  ;;  %1840 = vmatprep.subr.bf16.mxu0 %v1999_v4 }
  0x4e   : > { %1888 = vmatprep.mubr.msk.bf16.mxu1 %vm949_vm0, %v2005_v8 }
  0x50   : > { %1841 = vmatpush3.bf16.msra.mxu0 %v2000_v6 }
  0x53   : > { %1125 = vmatmul.mubr.bf16.vlgmr.msra.gmra.mrb[16].mxu0 %v2002_v9 }
  0x54   : > { %1132 = vmatprep.mubr.bf16.mxu0 %v2007_v10 }
  0x55   : > { %1889 = vmatmul.mubr.msk.bf16.vlgmr.msra.gmra.mrb[16].mxu1 %vm949_vm0, %v2006_v11 }
  0x56   : > { %1892 = vmatprep.mubr.msk.bf16.mxu1 %vm949_vm0, %v2013_v12 }
  0x5b   : > { %1133 = vmatmul.mubr.bf16.gmra.mrb[20].mxu0 %v2009_v16 }
  0x5c   : > { %1140 = vmatprep.mubr.bf16.mxu0 %v2010_v18 }
  0x5d   : > { %1893 = vmatmul.mubr.msk.bf16.gmra.mrb[20].mxu1 %vm949_vm0, %v2014_v19 }
  0x63   : > { %1141 = vmatmul.mubr.bf16.gmra.mrb[24].mxu0 %v2012_v23 }
  0x64   : > { %1148 = vmatprep.mubr.bf16.mxu0 %v2015_v25 }
  0x6b   : > { %1149 = vmatmul.mubr.bf16.gmra.mrb[28].mxu0 %v2017_v26 }
  0xa5   : > { %v448_v27 = vpop.permute.xlu0 %447 }
  0xa6   : > { %v458_v29 = vpop.permute.xlu1 %457 }
  0xa9   : > { %v453_v31 = vpop.permute.xlu0 %452 }
  0xaa   : > { %v463_v48 = vpop.permute.xlu1 %462 }
  0xad   : > { %v468_v0 = vpop.permute.xlu0 %467 }
  0xae   : > { %v473_v2 = vpop.permute.xlu1 %472 }
  0xb1   : > { %v478_v18 = vpop.permute.xlu0 %477 }
  0xb6   : > { %v483_v20 = vpop.permute.xlu1 %482 }
 0x106   : > { %v1762_v28 = vpop.f32.mrb[0].mxu0 }
 0x107   : > { %v1763_v30 = vpop.f32.mrb[1].mxu0 }
 0x108   : > { %v1764_v32 = vadd.f32 %v1763_v30, %v1762_v28  ;;  %v1765_v33 = vpop.f32.mrb[2].mxu0  ;;  %v1802_v34 = vpop.f32.mrb[0].mxu1 }
 0x109   : > { %v1766_v35 = vpop.f32.mrb[3].mxu0  ;;  %v1803_v36 = vpop.f32.mrb[1].mxu1 }
 0x10a   : > { %v997_v37 = vadd.f32 %v1764_v32, %v448_v27  ;;  %v1767_v38 = vadd.f32 %v1766_v35, %v1765_v33  ;;  %v1804_v39 = vadd.f32 %v1803_v36, %v1802_v34  ;;  %v1805_v40 = vpop.f32.mrb[2].mxu1 }
 0x10b   : > { %v1806_v41 = vpop.f32.mrb[3].mxu1 }
 0x10c   : > { %v2281_v42 = vadd.f32 %v1804_v39, %v997_v37  ;;  %v1000_v43 = vadd.f32 %v1767_v38, %v453_v31  ;;  %v1807_v44 = vadd.f32 %v1806_v41, %v1805_v40 }
 0x10e   : > { %v2283_v45 = vadd.f32 %v1807_v44, %v1000_v43  ;;  %v1768_v46 = vpop.f32.mrb[4].mxu0 }
 0x10f   : > { %v1769_v47 = vpop.f32.mrb[5].mxu0 }
 0x110   : > { %v1770_v49 = vadd.f32 %v1769_v47, %v1768_v46  ;;  %v1771_v50 = vpop.f32.mrb[6].mxu0  ;;  %v1808_v51 = vpop.f32.mrb[4].mxu1 }
 0x111   : > { %v1772_v52 = vpop.f32.mrb[7].mxu0  ;;  %v1809_v53 = vpop.f32.mrb[5].mxu1 }
 0x112   : > { %v1005_v54 = vadd.f32 %v1770_v49, %v458_v29  ;;  %v1773_v55 = vadd.f32 %v1772_v52, %v1771_v50  ;;  %v1810_v56 = vadd.f32 %v1809_v53, %v1808_v51  ;;  %v1811_v57 = vpop.f32.mrb[6].mxu1 }
 0x113   : > { %v1812_v58 = vpop.f32.mrb[7].mxu1 }
 0x114   : > { %v2285_v59 = vadd.f32 %v1810_v56, %v1005_v54  ;;  %v1008_v60 = vadd.f32 %v1773_v55, %v463_v48  ;;  %v1813_v61 = vadd.f32 %v1812_v58, %v1811_v57 }
 0x116   : > { %v2287_v62 = vadd.f32 %v1813_v61, %v1008_v60  ;;  %v1774_v63 = vpop.f32.mrb[8].mxu0 }
 0x117   : > { %v1775_v1 = vpop.f32.mrb[9].mxu0 }
 0x118   : > { %v1776_v3 = vadd.f32 %v1775_v1, %v1774_v63  ;;  %v1777_v4 = vpop.f32.mrb[10].mxu0  ;;  %v1814_v5 = vpop.f32.mrb[8].mxu1 }
 0x119   : > { %v1778_v6 = vpop.f32.mrb[11].mxu0  ;;  %v1815_v7 = vpop.f32.mrb[9].mxu1 }
 0x11a   : > { %v1013_v8 = vadd.f32 %v1776_v3, %v468_v0  ;;  %v1779_v9 = vadd.f32 %v1778_v6, %v1777_v4  ;;  %v1816_v10 = vadd.f32 %v1815_v7, %v1814_v5  ;;  %v1817_v11 = vpop.f32.mrb[10].mxu1 }
 0x11b   : > { %v1818_v12 = vpop.f32.mrb[11].mxu1 }
 0x11c   : > { %v2289_v13 = vadd.f32 %v1816_v10, %v1013_v8  ;;  %v1016_v14 = vadd.f32 %v1779_v9, %v473_v2  ;;  %v1819_v15 = vadd.f32 %v1818_v12, %v1817_v11 }
 0x11e   : > { %v2291_v16 = vadd.f32 %v1819_v15, %v1016_v14  ;;  %v1780_v17 = vpop.f32.mrb[12].mxu0 }
 0x11f   : > { %v1781_v19 = vpop.f32.mrb[13].mxu0 }
 0x120   : > { %v1782_v21 = vadd.f32 %v1781_v19, %v1780_v17  ;;  %v1783_v22 = vpop.f32.mrb[14].mxu0  ;;  %v1820_v23 = vpop.f32.mrb[12].mxu1 }
 0x121   : > { %v1784_v24 = vpop.f32.mrb[15].mxu0  ;;  %v1821_v25 = vpop.f32.mrb[13].mxu1 }
 0x122   : > { %v1021_v26 = vadd.f32 %v1782_v21, %v478_v18  ;;  %v1785_v27 = vadd.f32 %v1784_v24, %v1783_v22  ;;  %v1822_v28 = vadd.f32 %v1821_v25, %v1820_v23  ;;  %v1823_v29 = vpop.f32.mrb[14].mxu1 }
 0x123   : > { %v1824_v30 = vpop.f32.mrb[15].mxu1 }
 0x124   : > { %v2293_v31 = vadd.f32 %v1822_v28, %v1021_v26  ;;  %v1024_v32 = vadd.f32 %v1785_v27, %v483_v20  ;;  %v1825_v33 = vadd.f32 %v1824_v30, %v1823_v29 }
 0x126   : > { %v2295_v34 = vadd.f32 %v1825_v33, %v1024_v32  ;;  %v1842_v35 = vpop.f32.mrb[16].mxu0 }
 0x127   : > { %v1843_v36 = vpop.f32.mrb[17].mxu0 }
 0x128   : > { %v1844_v37 = vadd.f32 %v1843_v36, %v1842_v35  ;;  %v1845_v38 = vpop.f32.mrb[18].mxu0  ;;  %v1890_v39 = vpop.f32.mrb[16].mxu1 }
 0x129   : > { %v1846_v40 = vpop.f32.mrb[19].mxu0  ;;  %v1191_v41 = vpop.f32.mrb[17].mxu1 }
 0x12a   : > { %v1847_v43 = vadd.f32 %v1846_v40, %v1845_v38  ;;  %v1127_v44 = vadd.f32 %v1844_v37, %v2281_v42  ;;  %v1891_v46 = vpop.f32.mrb[18].mxu1 }
 0x12b   : > { %v1194_v47 = vpop.f32.mrb[19].mxu1 }
 0x12c   : > { %v2298_v48 = vadd.f32 %v1191_v41, %v1127_v44  ;;  %v1130_v49 = vadd.f32 %v1847_v43, %v2283_v45 }
 0x12e   : > { %v2301_v50 = vadd.f32 %v1194_v47, %v1130_v49  ;;  %v1848_v51 = vpop.f32.mrb[20].mxu0  ;;  %v1223_v52 = vsel %vm1222_vm1, %v2298_v48, 0.0  ;;  %v1255_v57 = vmul.f32 %v2298_v48, %v2298_v48 }
 0x12f   : > { %v1849_v53 = vpop.f32.mrb[21].mxu0  ;;  %1224 = vadd.xlane.f32.xlu0 %v1223_v52 }
 0x130   : > { %v1850_v54 = vadd.f32 %v1849_v53, %v1848_v51  ;;  %v1851_v55 = vpop.f32.mrb[22].mxu0  ;;  %v1226_v42 = vsel %vm1222_vm1, %v2301_v50, 0.0  ;;  %v1256_v56 = vmul.f32 %v2301_v50, %v2301_v50  ;;  %v1894_v45 = vpop.f32.mrb[20].mxu1  ;;  %v1263_v5 = vsel %vm1222_vm1, %v1255_v57, 0.0 }
 0x131   : > { %v1852_v58 = vpop.f32.mrb[23].mxu0  ;;  %1227 = vadd.xlane.f32.xlu1 %v1226_v42  ;;  %v1207_v60 = vpop.f32.mrb[21].mxu1 }
 0x132   : > { %v1135_v61 = vadd.f32 %v1850_v54, %v2285_v59  ;;  %v1853_v63 = vadd.f32 %v1852_v58, %v1851_v55  ;;  %v1266_v0 = vsel %vm1222_vm1, %v1256_v56, 0.0  ;;  %v1895_v1 = vpop.f32.mrb[22].mxu1 }
 0x133   : > { %1267 = vadd.xlane.f32.xlu0 %v1266_v0  ;;  %v1210_v2 = vpop.f32.mrb[23].mxu1 }
 0x134   : > { %v2313_v3 = vadd.f32 %v1890_v39, %v1135_v61  ;;  %v1138_v4 = vadd.f32 %v1853_v63, %v2287_v62 }
 0x135   : > { %1264 = vadd.xlane.f32.xlu1 %v1263_v5 }
 0x136   : > { %v2317_v6 = vadd.f32 %v1891_v46, %v1138_v4  ;;  %v1854_v7 = vpop.f32.mrb[24].mxu0  ;;  %v1229_v8 = vsel %vm1222_vm1, %v2313_v3, 0.0  ;;  %v1257_v59 = vmul.f32 %v2313_v3, %v2313_v3 }
 0x137   : > { %v1855_v9 = vpop.f32.mrb[25].mxu0  ;;  %1230 = vadd.xlane.f32.xlu0 %v1229_v8 }
 0x138   : > { %v1856_v10 = vadd.f32 %v1855_v9, %v1854_v7  ;;  %v1857_v11 = vpop.f32.mrb[26].mxu0  ;;  %v1269_v12 = vsel %vm1222_vm1, %v1257_v59, 0.0  ;;  %v1232_v17 = vsel %vm1222_vm1, %v2317_v6, 0.0  ;;  %v1258_v18 = vmul.f32 %v2317_v6, %v2317_v6 }
 0x139   : > { %v1858_v14 = vpop.f32.mrb[27].mxu0  ;;  %1270 = vadd.xlane.f32.xlu1 %v1269_v12 }
 0x13a   : > { %v1859_v62 = vadd.f32 %v1858_v14, %v1857_v11  ;;  %v1143_v15 = vadd.f32 %v1856_v10, %v2289_v13  ;;  %v1272_v24 = vsel %vm1222_vm1, %v1258_v18, 0.0 }
 0x13b   : > { %1233 = vadd.xlane.f32.xlu0 %v1232_v17 }
 0x13c   : > { %v2329_v19 = vadd.f32 %v1207_v60, %v1143_v15  ;;  %v1146_v20 = vadd.f32 %v1859_v62, %v2291_v16 }
 0x13e   : > { %v2332_v21 = vadd.f32 %v1210_v2, %v1146_v20  ;;  %v1860_v22 = vpop.f32.mrb[28].mxu0  ;;  %v1235_v23 = vsel %vm1222_vm1, %v2329_v19, 0.0  ;;  %v1259_v13 = vmul.f32 %v2329_v19, %v2329_v19 }
 0x13f   : > { %v1861_v25 = vpop.f32.mrb[29].mxu0  ;;  %1236 = vadd.xlane.f32.xlu1 %v1235_v23  ;;  %1273 = vadd.xlane.f32.xlu0 %v1272_v24 }
 0x140   : > { %v1862_v26 = vadd.f32 %v1861_v25, %v1860_v22  ;;  %v1863_v27 = vpop.f32.mrb[30].mxu0  ;;  %v1275_v29 = vsel %vm1222_vm1, %v1259_v13, 0.0  ;;  %v1238_v32 = vsel %vm1222_vm1, %v2332_v21, 0.0  ;;  %v1260_v33 = vmul.f32 %v2332_v21, %v2332_v21  ;;  %v1328_v13 = vld [vmem:[%s2379_s14 + $0x8] sm:$0xff] }
 0x141   : > { %v1864_v28 = vpop.f32.mrb[31].mxu0 }
 0x142   : > { %v1151_v16 = vadd.f32 %v1862_v26, %v2293_v31  ;;  %v1865_v30 = vadd.f32 %v1864_v28, %v1863_v27  ;;  %v1278_v31 = vsel %vm1222_vm1, %v1260_v33, 0.0  ;;  %v1327_v28 = vld [vmem:[%s2379_s14] sm:$0xff] }
 0x143   : > { %1276 = vadd.xlane.f32.xlu1 %v1275_v29  ;;  %1239 = vadd.xlane.f32.xlu0 %v1238_v32 }
 0x144   : > { %v2345_v35 = vadd.f32 %v1894_v45, %v1151_v16  ;;  %v1154_v36 = vadd.f32 %v1865_v30, %v2295_v34 }
 0x146   : > { %v2348_v37 = vadd.f32 %v1895_v1, %v1154_v36  ;;  %v1241_v38 = vsel %vm1222_vm1, %v2345_v35, 0.0  ;;  %v1261_v39 = vmul.f32 %v2345_v35, %v2345_v35 }
 0x147   : > { %1242 = vadd.xlane.f32.xlu1 %v1241_v38  ;;  %1279 = vadd.xlane.f32.xlu0 %v1278_v31 }
 0x148   : > { %v1281_v40 = vsel %vm1222_vm1, %v1261_v39, 0.0  ;;  %v1244_v41 = vsel %vm1222_vm1, %v2348_v37, 0.0  ;;  %v1262_v34 = vmul.f32 %v2348_v37, %v2348_v37 }
 0x14a   : > { %v1284_v43 = vsel %vm1222_vm1, %v1262_v34, 0.0 }
 0x14b   : > { %1282 = vadd.xlane.f32.xlu1 %v1281_v40  ;;  %1245 = vadd.xlane.f32.xlu0 %v1244_v41 }
 0x14f   : > { %1285 = vadd.xlane.f32.xlu0 %v1284_v43  ;;  %v1319_v43 = vld [vmem:[%s2392_s17] sm:$0xff] }
 0x1bc   : > { %v1225_v44 = vpop.xlane.xlu0 %1224 }
 0x1bd   : > { %v2361_v47 = vmul.f32 0.125, %v1225_v44  ;;  %v1320_v44 = vld [vmem:[%s2392_s17 + $0x8] sm:$0xff] }
 0x1be   : > { %v1228_v46 = vpop.xlane.xlu1 %1227 }
 0x1bf   : > { %v1248_v49 = vmul.f32 0.125, %v1228_v46  ;;  %v1295_v55 = vmul.f32 %v2361_v47, %v2361_v47  ;;  %v1329_v46 = vld [vmem:[%s2379_s14 + $0x10] sm:$0xff] }
 0x1c0   : > { %v1268_v51 = vpop.xlane.xlu0 %1267 }
 0x1c1   : > { %v1296_v52 = vmul.f32 %v1248_v49, %v1248_v49  ;;  %v1288_v53 = vmul.f32 0.125, %v1268_v51 }
 0x1c2   : > { %v1265_v54 = vpop.xlane.xlu1 %1264 }
 0x1c3   : > { %v1304_v42 = vsub.f32 %v1288_v53, %v1296_v52  ;;  %v1287_v56 = vmul.f32 0.125, %v1265_v54 }
 0x1c4   : > { %v1231_v57 = vpop.xlane.xlu0 %1230 }
 0x1c5   : > { %v1312_v45 = vmax.f32 %v1304_v42, 0.0  ;;  %v1303_v58 = vsub.f32 %v1287_v56, %v1295_v55  ;;  %v2365_v60 = vmul.f32 0.125, %v1231_v57 }
 0x1c6   : > { %v1271_v61 = vpop.xlane.xlu1 %1270 }
 0x1c7   : > { %v1336_v63 = vadd.f32 1e-05, %v1312_v45  ;;  %v1311_v0 = vmax.f32 %v1303_v58, 0.0  ;;  %v1297_v1 = vmul.f32 %v2365_v60, %v2365_v60  ;;  %v1289_v2 = vmul.f32 0.125, %v1271_v61 }
 0x1c8   : > { %v1234_v4 = vpop.xlane.xlu0 %1233 }
 0x1c9   : > { %2018 = vrsqrt.f32 %v1336_v63  ;;  %v1335_v5 = vadd.f32 1e-05, %v1311_v0  ;;  %v1305_v7 = vsub.f32 %v1289_v2, %v1297_v1  ;;  %v2369_v8 = vmul.f32 0.125, %v1234_v4  ;;  %v1321_v0 = vld [vmem:[%s2392_s17 + $0x10] sm:$0xff] }
 0x1cb   : > { %2020 = vrsqrt.f32 %v1335_v5  ;;  %v1313_v59 = vmax.f32 %v1305_v7, 0.0  ;;  %v1298_v12 = vmul.f32 %v2369_v8, %v2369_v8  ;;  %v1330_v7 = vld [vmem:[%s2379_s14 + $0x18] sm:$0xff] }
 0x1cc   : > { %v1237_v9 = vpop.xlane.xlu1 %1236  ;;  %v1274_v10 = vpop.xlane.xlu0 %1273 }
 0x1cd   : > { %v1337_v11 = vadd.f32 1e-05, %v1313_v59  ;;  %v2374_v14 = vmul.f32 0.125, %v1237_v9  ;;  %v1290_v62 = vmul.f32 0.125, %v1274_v10 }
 0x1cf   : > { %2022 = vrsqrt.f32 %v1337_v11  ;;  %v1306_v15 = vsub.f32 %v1290_v62, %v1298_v12  ;;  %v1299_v20 = vmul.f32 %v2374_v14, %v2374_v14 }
 0x1d0   : > { %v1277_v17 = vpop.xlane.xlu1 %1276  ;;  %v1240_v18 = vpop.xlane.xlu0 %1239 }
 0x1d1   : > { %v1314_v22 = vmax.f32 %v1306_v15, 0.0  ;;  %v1291_v23 = vmul.f32 0.125, %v1277_v17  ;;  %v2383_v24 = vmul.f32 0.125, %v1240_v18  ;;  %v1331_v15 = vld [vmem:[%s2379_s14 + $0x20] sm:$0xff] }
 0x1d3   : > { %v2019_v25 = vpop.eup %2018  ;;  %v1338_v26 = vadd.f32 1e-05, %v1314_v22  ;;  %v1307_v27 = vsub.f32 %v1291_v23, %v1299_v20  ;;  %v1300_v29 = vmul.f32 %v2383_v24, %v2383_v24  ;;  %v1322_v20 = vld [vmem:[%s2392_s17 + $0x18] sm:$0xff]  ;;  %v1323_v23 = vld [vmem:[%s2392_s17 + $0x20] sm:$0xff] }
 0x1d4   : > { %v1243_v16 = vpop.xlane.xlu1 %1242  ;;  %v1280_v30 = vpop.xlane.xlu0 %1279  ;;  %v1352_v32 = vmul.f32 %v2019_v25, %v1328_v13  ;;  %v1332_v13 = vld [vmem:[%s2379_s14 + $0x28] sm:$0xff] }
 0x1d5   : > { %v2021_v33 = vpop.eup %2020  ;;  %2024 = vrsqrt.f32 %v1338_v26  ;;  %v1315_v36 = vmax.f32 %v1307_v27, 0.0  ;;  %v2394_v38 = vmul.f32 0.125, %v1243_v16  ;;  %v1292_v31 = vmul.f32 0.125, %v1280_v30 }
 0x1d6   : > { %1382 = vperm.xlu0 %1922, %v1352_v32   ;;  %v1351_v39 = vmul.f32 %v2021_v33, %v1327_v28  ;;  %v1360_v40 = vmul.f32 %v1352_v32, %v1248_v49  ;;  %v1324_v32 = vld [vmem:[%s2392_s17 + $0x28] sm:$0xff] }
 0x1d7   : > { %v1339_v41 = vadd.f32 1e-05, %v1315_v36  ;;  %v1308_v34 = vsub.f32 %v1292_v31, %v1300_v29  ;;  %v1301_v51 = vmul.f32 %v2394_v38, %v2394_v38  ;;  %v1333_v29 = vld [vmem:[%s2379_s14 + $0x30] sm:$0xff]  ;;  %v1334_v31 = vld [vmem:[%s2379_s14 + $0x38] sm:$0xff] }
 0x1d8   : > { %v1283_v52 = vpop.xlane.xlu1 %1282  ;;  %1377 = vperm.xlu1 %1923, %v1351_v39   ;;  %v1246_v53 = vpop.xlane.xlu0 %1245  ;;  %v1359_v54 = vmul.f32 %v1351_v39, %v2361_v47  ;;  %v1368_v45 = vsub.f32 %v1320_v44, %v1360_v40  ;;  %v1325_v36 = vld [vmem:[%s2392_s17 + $0x30] sm:$0xff]  ;;  %v1326_v44 = vld [vmem:[%s2392_s17 + $0x38] sm:$0xff] }
 0x1d9   : > { %v2023_v55 = vpop.eup %2022  ;;  %2026 = vrsqrt.f32 %v1339_v41  ;;  %v1316_v42 = vmax.f32 %v1308_v34, 0.0  ;;  %v1293_v56 = vmul.f32 0.125, %v1283_v52  ;;  %v1254_v49 = vmul.f32 0.125, %v1246_v53 }
 0x1da   : > { %v1367_v57 = vsub.f32 %v1319_v43, %v1359_v54  ;;  %v1353_v58 = vmul.f32 %v2023_v55, %v1329_v46 }
 0x1db   : > { %v1340_v61 = vadd.f32 1e-05, %v1316_v42  ;;  %v1309_v63 = vsub.f32 %v1293_v56, %v1301_v51  ;;  %v1302_v4 = vmul.f32 %v1254_v49, %v1254_v49 }
 0x1dc   : > { %1425 = vperm.xlu0 %1922, %v1367_v57   ;;  %1430 = vperm.xlu1 %1923, %v1368_v45   ;;  %v1286_v1 = vpop.xlane.xlu0 %1285  ;;  %v1361_v2 = vmul.f32 %v1353_v58, %v2365_v60 }
 0x1dd   : > { %2028 = vrsqrt.f32 %v1340_v61  ;;  %v1317_v47 = vmax.f32 %v1309_v63, 0.0  ;;  %v1294_v5 = vmul.f32 0.125, %v1286_v1 }
 0x1de   : > { %v1369_v59 = vsub.f32 %v1321_v0, %v1361_v2 }
 0x1df   : > { %v2025_v9 = vpop.eup %2024  ;;  %v1341_v10 = vadd.f32 1e-05, %v1317_v47  ;;  %v1310_v11 = vsub.f32 %v1294_v5, %v1302_v4 }
 0x1e0   : > { %1387 = vperm.xlu1 %1923, %v1353_v58   ;;  %1435 = vperm.xlu0 %1922, %v1369_v59   ;;  %v1354_v12 = vmul.f32 %v2025_v9, %v1330_v7 }
 0x1e1   : > { %2030 = vrsqrt.f32 %v1341_v10  ;;  %v1318_v62 = vmax.f32 %v1310_v11, 0.0 }
 0x1e2   : > { %v1362_v60 = vmul.f32 %v1354_v12, %v2369_v8 }
 0x1e3   : > { %v2027_v17 = vpop.eup %2026  ;;  %v1342_v18 = vadd.f32 1e-05, %v1318_v62 }
 0x1e4   : > { %1392 = vperm.xlu1 %1923, %v1354_v12   ;;  %v1355_v22 = vmul.f32 %v2027_v17, %v1331_v15  ;;  %v1370_v25 = vsub.f32 %v1322_v20, %v1362_v60 }
 0x1e5   : > { %2032 = vrsqrt.f32 %v1342_v18 }
 0x1e6   : > { %1397 = vperm.xlu0 %1922, %v1355_v22   ;;  %v1363_v26 = vmul.f32 %v1355_v22, %v2374_v14 }
 0x1e7   : > { %v2029_v27 = vpop.eup %2028 }
 0x1e8   : > { %1440 = vperm.xlu1 %1923, %v1370_v25   ;;  %v1371_v28 = vsub.f32 %v1323_v23, %v1363_v26  ;;  %v1356_v8 = vmul.f32 %v2029_v27, %v1332_v13 }
 0x1ea   : > { %1445 = vperm.xlu0 %1922, %v1371_v28   ;;  %v1364_v16 = vmul.f32 %v1356_v8, %v2383_v24 }
 0x1eb   : > { %v2031_v30 = vpop.eup %2030 }
 0x1ec   : > { %1402 = vperm.xlu1 %1923, %v1356_v8   ;;  %v1357_v33 = vmul.f32 %v2031_v30, %v1333_v29  ;;  %v1372_v39 = vsub.f32 %v1324_v32, %v1364_v16 }
 0x1ee   : > { %1407 = vperm.xlu0 %1922, %v1357_v33   ;;  %v1365_v40 = vmul.f32 %v1357_v33, %v2394_v38 }
 0x1ef   : > { %v2033_v14 = vpop.eup %2032 }
 0x1f0   : > { %1450 = vperm.xlu1 %1923, %v1372_v39   ;;  %v1373_v41 = vsub.f32 %v1325_v36, %v1365_v40  ;;  %v1358_v34 = vmul.f32 %v2033_v14, %v1334_v31 }
 0x1f2   : > { %1455 = vperm.xlu0 %1922, %v1373_v41   ;;  %v1366_v43 = vmul.f32 %v1358_v34, %v1254_v49 }
 0x1f4   : > { %1412 = vperm.xlu1 %1923, %v1358_v34   ;;  %v1374_v24 = vsub.f32 %v1326_v44, %v1366_v43 }
 0x1f8   : > { %1460 = vperm.xlu1 %1923, %v1374_v24  }
 0x255   : > { %v1383_v46 = vpop.permute.xlu0 %1382 }
 0x256   : > { %v1416_v52 = vmul.f32 %v1383_v46, %v2301_v50 }
 0x257   : > { %v1378_v51 = vpop.permute.xlu1 %1377 }
 0x258   : > { %v1415_v53 = vmul.f32 %v1378_v51, %v2298_v48 }
 0x25b   : > { %v1431_v54 = vpop.permute.xlu1 %1430  ;;  %v1426_v55 = vpop.permute.xlu0 %1425 }
 0x25c   : > { %v1464_v38 = vadd.f32 %v1431_v54, %v1416_v52  ;;  %v1463_v42 = vadd.f32 %v1426_v55, %v1415_v53 }
 0x25e   : > { %v1472_v56 = vmax.f32 %v1464_v38, 0.0  ;;  %v1471_v57 = vmax.f32 %v1463_v42, 0.0 }
 0x25f   : > { %v1388_v49 = vpop.permute.xlu1 %1387  ;;  %v1436_v58 = vpop.permute.xlu0 %1435 }
 0x260   : > { %v1739_v50 = vpack.c.bf16 %v1472_v56, %v1472_v56  ;;  %v1738_v45 = vpack.c.bf16 %v1471_v57, %v1471_v57  ;;  %v1417_v48 = vmul.f32 %v1388_v49, %v2313_v3 }
 0x262   : > { %1513 = vst.msk [vmem:[%s2424_s24 + $0x4] sm:$0xf] %vm1511_vm2, %v1739_v50  ;;  %1512 = vst.msk [vmem:[%s2424_s24] sm:$0xf] %vm1511_vm2, %v1738_v45  ;;  %v1465_v61 = vadd.f32 %v1436_v58, %v1417_v48 }
 0x263   : > { %v1393_v63 = vpop.permute.xlu1 %1392 }
 0x264   : > { %v1473_v0 = vmax.f32 %v1465_v61, 0.0  ;;  %v1418_v47 = vmul.f32 %v1393_v63, %v2317_v6 }
 0x265   : > { %v1398_v1 = vpop.permute.xlu0 %1397 }
 0x266   : > { %v1740_v2 = vpack.c.bf16 %v1473_v0, %v1473_v0  ;;  %v1419_v5 = vmul.f32 %v1398_v1, %v2329_v19 }
 0x267   : > { %v1441_v4 = vpop.permute.xlu1 %1440 }
 0x268   : > { %1514 = vst.msk [vmem:[%s2424_s24 + $0x8] sm:$0xf] %vm1511_vm2, %v1740_v2  ;;  %v1466_v3 = vadd.f32 %v1441_v4, %v1418_v47 }
 0x269   : > { %v1446_v7 = vpop.permute.xlu0 %1445 }
 0x26a   : > { %v1474_v59 = vmax.f32 %v1466_v3, 0.0  ;;  %v1467_v9 = vadd.f32 %v1446_v7, %v1419_v5 }
 0x26b   : > { %v1403_v10 = vpop.permute.xlu1 %1402 }
 0x26c   : > { %v1741_v11 = vpack.c.bf16 %v1474_v59, %v1474_v59  ;;  %v1475_v12 = vmax.f32 %v1467_v9, 0.0  ;;  %v1420_v6 = vmul.f32 %v1403_v10, %v2332_v21 }
 0x26d   : > { %v1408_v62 = vpop.permute.xlu0 %1407 }
 0x26e   : > { %1515 = vst.msk [vmem:[%s2424_s24 + $0xc] sm:$0xf] %vm1511_vm2, %v1741_v11  ;;  %v1742_v15 = vpack.c.bf16 %v1475_v12, %v1475_v12  ;;  %v1421_v19 = vmul.f32 %v1408_v62, %v2345_v35 }
 0x26f   : > { %v1451_v60 = vpop.permute.xlu1 %1450 }
 0x270   : > { %1516 = vst.msk [vmem:[%s2424_s24 + $0x10] sm:$0xf] %vm1511_vm2, %v1742_v15  ;;  %v1468_v17 = vadd.f32 %v1451_v60, %v1420_v6 }
 0x271   : > { %v1456_v18 = vpop.permute.xlu0 %1455 }
 0x272   : > { %v1476_v20 = vmax.f32 %v1468_v17, 0.0  ;;  %v1469_v22 = vadd.f32 %v1456_v18, %v1421_v19 }
 0x273   : > { %v1413_v23 = vpop.permute.xlu1 %1412 }
 0x274   : > { %v1743_v13 = vpack.c.bf16 %v1476_v20, %v1476_v20  ;;  %v1477_v25 = vmax.f32 %v1469_v22, 0.0  ;;  %v1422_v27 = vmul.f32 %v1413_v23, %v2348_v37 }
 0x276   : > { %1517 = vst.msk [vmem:[%s2424_s24 + $0x14] sm:$0xf] %vm1511_vm2, %v1743_v13  ;;  %v1744_v26 = vpack.c.bf16 %v1477_v25, %v1477_v25 }
 0x277   : > { %v1461_v28 = vpop.permute.xlu1 %1460 }
 0x278   : > { %1518 = vst.msk [vmem:[%s2424_s24 + $0x18] sm:$0xf] %vm1511_vm2, %v1744_v26  ;;  %v1470_v21 = vadd.f32 %v1461_v28, %v1422_v27 }
 0x27a   : > { %v1478_v8 = vmax.f32 %v1470_v21, 0.0 }
 0x27c   : > { %v1745_v29 = vpack.c.bf16 %v1478_v8, %v1478_v8 }
 0x27e   : > { %1519 = vst.msk [vmem:[%s2424_s24 + $0x1c] sm:$0xf] %vm1511_vm2, %v1745_v29 }
 0x27f PF: > { %s15_s20 = sadd.s32 1, %s2056_s20   ;;  %s2463_s18 = smov %s2052_s19 }
 0x280   : > { %p12_p5 = scmp.ge.s32.totalorder %s15_s20, 4   ;;  %s2464_s19 = smov %s2466_s21 }
 0x282   :  { %14 = sbr.rel (!%p12_p5) target bundleno = 2 (0x2), region = 76 }

// kernel: unet_adain_forward.16
= control target key start
LH: loop header
LB: loop body
LE: loop exit
PB: predicated region body
PF: predicated region fallthrough
CT: control target
= control target key end

     0   :  { %s2634_s21 = smov 0   ;;  %s2636_s22 = smov 0   ;;  %s2939_s0 = inlined_call_operand.vmem [shape: bf16[32,1728], index: 0, kind: input, shape index: {}]   ;;  %s2940_s1 = inlined_call_operand.vmem [shape: f32[32,1], index: 1, kind: input, shape index: {}]   ;;  %s2941_s2 = inlined_call_operand.vmem [shape: bf16[2,1728,64], index: 2, kind: input, shape index: {}]   ;;  %s2942_s3 = inlined_call_operand.vmem [shape: f32[2,32,1], index: 3, kind: input, shape index: {}]   ;;  %s2943_s4 = inlined_call_operand.vmem [shape: f32[2,32,1], index: 4, kind: input, shape index: {}]   ;;  %s2944_s5 = inlined_call_operand.vmem [shape: bf16[2,32,64], index: 5, kind: input, shape index: {}]   ;;  %s2945_s6 = inlined_call_operand.vmem [shape: bf16[2,32,64], index: 6, kind: output, shape index: {}]  }
   0x1   :  { %s2638_s23 = smov 0  }
   0x2 LB: > { %s28_s24 = sadd.s32 1, %s2592_s22  ;;  %p2049_p0 = scmp.ge.s32.totalorder %s2596_s23, 1  ;;  %s2596_s23 = sphi %s2638_s23, %s16_s23   ;;  %s2592_s22 = sphi %s2636_s22, %s2947_s22   ;;  %s2588_s21 = sphi %s2634_s21, %s2946_s21  }
   0x3   : > { %p30_p1 = scmp.ge.s32.totalorder %s28_s24, 2  ;;  %p266_p2 = scmp.lt.s32.totalorder %s2596_s23, 3 }
   0x5   : > { %s2949_s24 = smov (%p30_p1, %s28_s24), 0  ;;  %p267_p3 = pnand %p2049_p0, %p266_p2 }
   0x6   : > { %p320_p4 = scmp.lt.s32.totalorder (!%p267_p3), %s2588_s21, 1  ;;  %v2441_v0 = vld [vmem:[%s2939_s0 + $0x4] ss:$56 sps:$4 sm:$0xff] (!%p267_p3)   ;;  %v2598_v1 = vmov (!%p267_p3), 0   ;;  %v2463_v2 = vld [vmem:[%s2939_s0 + $0x14] ss:$56 sps:$4 sm:$0xff] (!%p267_p3)  }
   0x7   : > { %270 = sbr.rel (%p267_p3) target bundleno = 689 (0x2b1), region = 44  ;;  %2414 = vset.pattern.permute.xlu0 (!%p267_p3), %v2598_v1  ;;  %2415 = vset.pattern.permute.xlu1 (!%p267_p3), %v2598_v1  ;;  %v2439_v29 = vld [vmem:[%s2939_s0] ss:$56 sps:$4 sm:$0xff] (!%p267_p3)   ;;  %v2467_v32 = vld [vmem:[%s2939_s0 + $0x74] ss:$56 sps:$4 sm:$0xff] (!%p267_p3)   ;;  %vm1409_vm0 = vcmask (!%p267_p3), 523264  }
   0x8   : > { %1448 = vmatprep.mubr.bf16.mxu1 (!%p267_p3), %v2441_v0  ;;  %1546 = vmatprep.mubr.bf16.mxu0 (!%p267_p3), %v2463_v2  ;;  %v2470_v40 = vld [vmem:[%s2939_s0 + $0x70] ss:$56 sps:$4 sm:$0xff] (!%p267_p3)   ;;  %v2482_v42 = vld [vmem:[%s2939_s0 + $0xc] ss:$56 sps:$4 sm:$0xff] (!%p267_p3)   ;;  %vm1915_vm1 = vcmask (!%p267_p3), 519168  }
   0x9   : > { %v2461_v45 = vld [vmem:[%s2939_s0 + $0x10] ss:$56 sps:$4 sm:$0xff] (!%p267_p3)  }
   0xe   : > { %s2951_s21 = smov (!%p320_p4, %s2588_s21), 1 }
   0xf   : > { %s2388_s29 = smul.u32 864, %s2951_s21  ;;  %s2203_s11 = sshll.u32 %s2951_s21, 5 }
  0x10   : > { %s337_s14 = scalar_lea.vmem %s2943_s4, %s2203_s11  ;;  %s332_s17 = scalar_lea.vmem %s2942_s3, %s2203_s11 }
  0x11   : > { %s2666_s8 = scalar_lea.vmem %s2941_s2, %s2388_s29  ;;  %s2205_s18 = sshll.u32 %s2951_s21, 4 }
  0x12   : > { %v2416_v3 = vld [vmem:[%s2666_s8 + $0x40] sm:$0xff]   ;;  %v2418_v5 = vld [vmem:[%s2666_s8 + $0x48] sm:$0xff]   ;;  %v2420_v7 = vld [vmem:[%s2666_s8 + $0x50] sm:$0xff]   ;;  %s345_s25 = scalar_lea.vmem %s2944_s5, %s2205_s18  ;;  %s353_s27 = scalar_lea.vmem %s2945_s6, %s2205_s18 }
  0x13   : > { %v2417_v4 = vld [vmem:[%s2666_s8] sm:$0xff]   ;;  %2220 = vmatprep.subr.bf16.mxu1 %v2416_v3  ;;  %v2419_v6 = vld [vmem:[%s2666_s8 + $0x8] sm:$0xff]   ;;  %v2421_v8 = vld [vmem:[%s2666_s8 + $0x10] sm:$0xff]  }
  0x14   : > { %2221 = vmatpush3.bf16.msra.mxu1 %v2417_v4  ;;  %v2422_v9 = vld [vmem:[%s2666_s8 + $0x58] sm:$0xff]   ;;  %v2426_v11 = vld [vmem:[%s2666_s8 + $0x140] sm:$0xff]   ;;  %v2430_v15 = vld [vmem:[%s2666_s8 + $0x148] sm:$0xff]  }
  0x15   : > { %2222 = vmatprep.subr.bf16.mxu1 %v2418_v5  ;;  %v2423_v10 = vld [vmem:[%s2666_s8 + $0x18] sm:$0xff]   ;;  %v2427_v12 = vld [vmem:[%s2666_s8 + $0x100] sm:$0xff]   ;;  %2276 = vmatprep.subr.bf16.mxu0 %v2426_v11  ;;  %v2431_v16 = vld [vmem:[%s2666_s8 + $0x108] sm:$0xff]  }
  0x16   : > { %v2424_v13 = vld [vmem:[%s2666_s8 + $0x60] sm:$0xff]   ;;  %2277 = vmatpush3.bf16.msra.mxu0 %v2427_v12  ;;  %v2428_v17 = vld [vmem:[%s2666_s8 + $0x68] sm:$0xff]   ;;  %v2434_v19 = vld [vmem:[%s2666_s8 + $0x150] sm:$0xff]  }
  0x17   : > { %v2425_v14 = vld [vmem:[%s2666_s8 + $0x20] sm:$0xff]   ;;  %2278 = vmatprep.subr.bf16.mxu0 %v2430_v15  ;;  %v2429_v18 = vld [vmem:[%s2666_s8 + $0x28] sm:$0xff]   ;;  %v2435_v20 = vld [vmem:[%s2666_s8 + $0x110] sm:$0xff]  }
  0x18   : > { %2223 = vmatpush3.bf16.msra.mxu1 %v2419_v6  ;;  %v2432_v21 = vld [vmem:[%s2666_s8 + $0x70] sm:$0xff]   ;;  %v2438_v23 = vld [vmem:[%s2666_s8 + $0x158] sm:$0xff]   ;;  %v2445_v27 = vld [vmem:[%s2666_s8 + $0x160] sm:$0xff]  }
  0x19   : > { %2224 = vmatprep.subr.bf16.mxu1 %v2420_v7  ;;  %v2433_v22 = vld [vmem:[%s2666_s8 + $0x30] sm:$0xff]   ;;  %v2442_v24 = vld [vmem:[%s2666_s8 + $0x118] sm:$0xff]   ;;  %v2446_v28 = vld [vmem:[%s2666_s8 + $0x120] sm:$0xff]  }
  0x1a   : > { %2279 = vmatpush3.bf16.msra.mxu0 %v2431_v16  ;;  %v2436_v25 = vld [vmem:[%s2666_s8 + $0x78] sm:$0xff]   ;;  %v2443_v30 = vld [vmem:[%s2666_s8 + $0xc0] sm:$0xff]   ;;  %v2449_v33 = vld [vmem:[%s2666_s8 + $0x168] sm:$0xff]  }
  0x1b   : > { %2280 = vmatprep.subr.bf16.mxu0 %v2434_v19  ;;  %v2437_v26 = vld [vmem:[%s2666_s8 + $0x38] sm:$0xff]   ;;  %v2444_v31 = vld [vmem:[%s2666_s8 + $0x80] sm:$0xff]   ;;  %v2450_v34 = vld [vmem:[%s2666_s8 + $0x128] sm:$0xff]  }
  0x1c   : > { %2225 = vmatpush3.bf16.msra.mxu1 %v2421_v8  ;;  %v2447_v35 = vld [vmem:[%s2666_s8 + $0xc8] sm:$0xff]   ;;  %v2453_v37 = vld [vmem:[%s2666_s8 + $0x170] sm:$0xff]   ;;  %v2457_v43 = vld [vmem:[%s2666_s8 + $0x178] sm:$0xff]  }
  0x1d   : > { %2226 = vmatprep.subr.bf16.mxu1 %v2422_v9  ;;  %v2448_v36 = vld [vmem:[%s2666_s8 + $0x88] sm:$0xff]   ;;  %v2454_v38 = vld [vmem:[%s2666_s8 + $0x130] sm:$0xff]   ;;  %v2458_v44 = vld [vmem:[%s2666_s8 + $0x138] sm:$0xff]  }
  0x1e   : > { %2281 = vmatpush3.bf16.msra.mxu0 %v2435_v20  ;;  %v2451_v39 = vld [vmem:[%s2666_s8 + $0xd0] sm:$0xff]   ;;  %v2455_v46 = vld [vmem:[%s2666_s8 + $0xd8] sm:$0xff]   ;;  %v2464_v48 = vld [vmem:[%s2666_s8 + $0x240] sm:$0xff]  }
  0x1f   : > { %2282 = vmatprep.subr.bf16.mxu0 %v2438_v23  ;;  %v2452_v41 = vld [vmem:[%s2666_s8 + $0x90] sm:$0xff]   ;;  %v2456_v47 = vld [vmem:[%s2666_s8 + $0x98] sm:$0xff]   ;;  %v2465_v49 = vld [vmem:[%s2666_s8 + $0x200] sm:$0xff]  }
  0x20   : > { %2227 = vmatpush3.bf16.msra.mxu1 %v2423_v10  ;;  %v2459_v50 = vld [vmem:[%s2666_s8 + $0xe0] sm:$0xff]   ;;  %v2471_v52 = vld [vmem:[%s2666_s8 + $0x248] sm:$0xff]   ;;  %v2475_v56 = vld [vmem:[%s2666_s8 + $0x250] sm:$0xff]  }
  0x21   : > { %2228 = vmatprep.subr.bf16.mxu1 %v2424_v13  ;;  %v2460_v51 = vld [vmem:[%s2666_s8 + $0xa0] sm:$0xff]   ;;  %v2472_v53 = vld [vmem:[%s2666_s8 + $0x208] sm:$0xff]   ;;  %v2476_v57 = vld [vmem:[%s2666_s8 + $0x210] sm:$0xff]  }
  0x22   : > { %2283 = vmatpush3.bf16.msra.mxu0 %v2442_v24  ;;  %v2466_v54 = vld [vmem:[%s2666_s8 + $0xe8] sm:$0xff]   ;;  %v2473_v58 = vld [vmem:[%s2666_s8 + $0xf0] sm:$0xff]   ;;  %v2479_v60 = vld [vmem:[%s2666_s8 + $0x258] sm:$0xff]  }
  0x23   : > { %2284 = vmatprep.subr.bf16.mxu0 %v2445_v27  ;;  %v2469_v55 = vld [vmem:[%s2666_s8 + $0xa8] sm:$0xff]   ;;  %v2474_v59 = vld [vmem:[%s2666_s8 + $0xb0] sm:$0xff]   ;;  %v2483_v61 = vld [vmem:[%s2666_s8 + $0x218] sm:$0xff]  }
  0x24   : > { %2229 = vmatpush3.bf16.msra.mxu1 %v2425_v14  ;;  %v2477_v62 = vld [vmem:[%s2666_s8 + $0xf8] sm:$0xff]   ;;  %v2486_v0 = vld [vmem:[%s2666_s8 + $0x260] sm:$0xff]   ;;  %v2490_v7 = vld [vmem:[%s2666_s8 + $0x268] sm:$0xff]  }
  0x25   : > { %2230 = vmatprep.subr.bf16.mxu1 %v2428_v17  ;;  %v2478_v63 = vld [vmem:[%s2666_s8 + $0xb8] sm:$0xff]   ;;  %v2487_v2 = vld [vmem:[%s2666_s8 + $0x220] sm:$0xff]   ;;  %v2493_v8 = vld [vmem:[%s2666_s8 + $0x228] sm:$0xff]  }
  0x26   : > { %2285 = vmatpush3.bf16.msra.mxu0 %v2446_v28  ;;  %v2480_v3 = vld [vmem:[%s2939_s0 + $0x8] ss:$56 sps:$4 sm:$0xff]   ;;  %v2491_v6 = vld [vmem:[%s2939_s0 + $0x7c] ss:$56 sps:$4 sm:$0xff]   ;;  %v2494_v15 = vld [vmem:[%s2939_s0 + $0x78] ss:$56 sps:$4 sm:$0xff]  }
  0x27   : > { %2286 = vmatprep.subr.bf16.mxu0 %v2449_v33  ;;  %v2484_v4 = vld [vmem:[%s2666_s8 + $0x1c0] sm:$0xff]   ;;  %v2488_v9 = vld [vmem:[%s2666_s8 + $0x1c8] sm:$0xff]   ;;  %v2495_v12 = vld [vmem:[%s2666_s8 + $0x1d0] sm:$0xff]  }
  0x28   : > { %2231 = vmatpush3.bf16.msra.mxu1 %v2429_v18  ;;  %v2485_v5 = vld [vmem:[%s2666_s8 + $0x180] sm:$0xff]   ;;  %v2489_v10 = vld [vmem:[%s2666_s8 + $0x188] sm:$0xff]   ;;  %v2500_v14 = vld [vmem:[%s2666_s8 + $0x270] sm:$0xff]  }
  0x29   : > { %2232 = vmatprep.subr.bf16.mxu1 %v2432_v21  ;;  %v2496_v11 = vld [vmem:[%s2939_s0 + $0x84] ss:$56 sps:$4 sm:$0xff]   ;;  %v2499_v13 = vld [vmem:[%s2939_s0 + $0x80] ss:$56 sps:$4 sm:$0xff]   ;;  %v2501_v16 = vld [vmem:[%s2666_s8 + $0x230] sm:$0xff]  }
  0x2a   : > { %2287 = vmatpush3.bf16.msra.mxu0 %v2450_v34  ;;  %v2498_v17 = vld [vmem:[%s2666_s8 + $0x190] sm:$0xff]   ;;  %v2502_v18 = vld [vmem:[%s2666_s8 + $0x1d8] sm:$0xff]   ;;  %v2512_v27 = vld [vmem:[%s2666_s8 + $0x1e8] sm:$0xff]  }
  0x2b   : > { %2288 = vmatprep.subr.bf16.mxu0 %v2453_v37  ;;  %v2504_v19 = vld [vmem:[%s2666_s8 + $0x278] sm:$0xff]   ;;  %v2514_v28 = vld [vmem:[%s2666_s8 + $0x308] sm:$0xff]   ;;  %v2524_v37 = vld [vmem:[%s2666_s8 + $0x2c0] sm:$0xff]  }
  0x2c   : > { %2233 = vmatpush3.bf16.msra.mxu1 %v2433_v22  ;;  %v2505_v20 = vld [vmem:[%s2666_s8 + $0x238] sm:$0xff]   ;;  %v2506_v22 = vld [vmem:[%s2666_s8 + $0x1e0] sm:$0xff]  }
  0x2d   : > { %2234 = vmatprep.subr.bf16.mxu1 %v2436_v25  ;;  %v2503_v21 = vld [vmem:[%s2666_s8 + $0x198] sm:$0xff]   ;;  %v2511_v25 = vld [vmem:[%s2666_s8 + $0x300] sm:$0xff]  }
  0x2e   : > { %2289 = vmatpush3.bf16.msra.mxu0 %v2454_v38  ;;  %v2508_v23 = vld [vmem:[%s2939_s0 + $0x20] ss:$56 sps:$4 sm:$0xff]   ;;  %v2510_v24 = vld [vmem:[%s2939_s0 + $0x24] ss:$56 sps:$4 sm:$0xff]  }
  0x2f   : > { %2290 = vmatprep.subr.bf16.mxu0 %v2457_v43  ;;  %v2522_v33 = vld [vmem:[%s2939_s0 + $0x1c] ss:$56 sps:$4 sm:$0xff]   ;;  %v2520_v38 = vld [vmem:[%s2939_s0 + $0x18] ss:$56 sps:$4 sm:$0xff]   ;;  %v2531_v43 = vld [vmem:[%s2666_s8 + $0x328] sm:$0xff]  }
  0x30   : > { %2235 = vmatpush3.bf16.msra.mxu1 %v2437_v26  ;;  %v2507_v26 = vld [vmem:[%s2666_s8 + $0x1a0] sm:$0xff]   ;;  %v2518_v34 = vld [vmem:[%s2666_s8 + $0x1f8] sm:$0xff]  }
  0x31   : > { %2248 = vmatprep.subr.bf16.mxu1 %v2443_v30  ;;  %v2515_v30 = vld [vmem:[%s2666_s8 + $0x1f0] sm:$0xff]  }
  0x32   : > { %2291 = vmatpush3.bf16.msra.mxu0 %v2458_v44  ;;  %v2534_v44 = vld [vmem:[%s2939_s0 + $0x94] ss:$56 sps:$4 sm:$0xff]  }
  0x33   : > { %1449 = vmatmul.mubr.bf16.vlgmr.msra.gmra.mrb[0].mxu1 %v2439_v29  ;;  %2332 = vmatprep.subr.bf16.mxu0 %v2464_v48  ;;  %v2513_v29 = vld [vmem:[%s2666_s8 + $0x1a8] sm:$0xff]   ;;  %v2538_v48 = vld [vmem:[%s2666_s8 + $0x330] sm:$0xff]  }
  0x34   : > { %2249 = vmatpush3.bf16.msra.mxu1 %v2444_v31  ;;  %1456 = vmatprep.mubr.bf16.mxu1 %v2467_v32  ;;  %v2517_v31 = vld [vmem:[%s2666_s8 + $0x310] sm:$0xff]  }
  0x35   : > { %2250 = vmatprep.subr.bf16.mxu1 %v2447_v35  ;;  %1547 = vmatmul.mubr.bf16.vlgmr.msra.gmra.mrb[0].mxu0 %v2461_v45  ;;  %v2516_v32 = vld [vmem:[%s2666_s8 + $0x1b0] sm:$0xff]   ;;  %v2523_v35 = vld [vmem:[%s2666_s8 + $0x318] sm:$0xff]   ;;  %v2528_v45 = vld [vmem:[%s2666_s8 + $0x288] sm:$0xff]  }
  0x36   : > { %2333 = vmatpush3.bf16.msra.mxu0 %v2465_v49  ;;  %1554 = vmatprep.mubr.bf16.mxu0 %v2496_v11  ;;  %v2532_v49 = vld [vmem:[%s2939_s0 + $0x88] ss:$56 sps:$4 sm:$0xff]   ;;  %v2560_v11 = vld [vmem:[%s2939_s0 + $0x9c] ss:$56 sps:$4 sm:$0xff]  }
  0x37   : > { %2334 = vmatprep.subr.bf16.mxu0 %v2471_v52  ;;  %v2541_v52 = vld [vmem:[%s2666_s8 + $0x338] sm:$0xff]  }
  0x38   : > { %2251 = vmatpush3.bf16.msra.mxu1 %v2448_v36  ;;  %v2519_v36 = vld [vmem:[%s2666_s8 + $0x1b8] sm:$0xff]  }
  0x39   : > { %2252 = vmatprep.subr.bf16.mxu1 %v2451_v39  ;;  %v2526_v39 = vld [vmem:[%s2666_s8 + $0x320] sm:$0xff]  }
  0x3a   : > { %2335 = vmatpush3.bf16.msra.mxu0 %v2472_v53  ;;  %v2540_v53 = vld [vmem:[%s2666_s8 + $0x298] sm:$0xff]  }
  0x3b   : > { %1457 = vmatmul.mubr.bf16.gmra.mrb[4].mxu1 %v2470_v40  ;;  %2336 = vmatprep.subr.bf16.mxu0 %v2475_v56  ;;  %v2525_v40 = vld [vmem:[%s2666_s8 + $0x280] sm:$0xff]  }
  0x3c   : > { %2253 = vmatpush3.bf16.msra.mxu1 %v2452_v41  ;;  %1497 = vmatprep.mubr.bf16.mxu1 %v2482_v42  ;;  %v2527_v41 = vld [vmem:[%s2666_s8 + $0x2c8] sm:$0xff]   ;;  %v2544_v56 = vld [vmem:[%s2666_s8 + $0x340] sm:$0xff]  }
  0x3d   : > { %2254 = vmatprep.subr.bf16.mxu1 %v2455_v46  ;;  %1555 = vmatmul.mubr.bf16.gmra.mrb[4].mxu0 %v2499_v13  ;;  %v2529_v42 = vld [vmem:[%s2939_s0 + $0x8c] ss:$56 sps:$4 sm:$0xff]   ;;  %v2537_v46 = vld [vmem:[%s2939_s0 + $0x90] ss:$56 sps:$4 sm:$0xff]  }
  0x3e   : > { %2337 = vmatpush3.bf16.msra.mxu0 %v2476_v57  ;;  %1644 = vmatprep.mubr.bf16.mxu0 %v2510_v24  ;;  %v600_v57 = vld [vmem:[%s2940_s1 + $0x8] sm:$0xff]  ;;  %v2562_v13 = vld [vmem:[%s2939_s0 + $0x98] ss:$56 sps:$4 sm:$0xff]  }
  0x3f   : > { %2338 = vmatprep.subr.bf16.mxu0 %v2479_v60  ;;  %v2547_v60 = vld [vmem:[%s2666_s8 + $0x348] sm:$0xff]  }
  0x40   : > { %2255 = vmatpush3.bf16.msra.mxu1 %v2456_v47  ;;  %v2533_v47 = vld [vmem:[%s2666_s8 + $0x2d0] sm:$0xff]  }
  0x41   : > { %2256 = vmatprep.subr.bf16.mxu1 %v2459_v50  ;;  %v2536_v50 = vld [vmem:[%s2666_s8 + $0x290] sm:$0xff]  }
  0x42   : > { %2339 = vmatpush3.bf16.msra.mxu0 %v2483_v61  ;;  %v2546_v61 = vld [vmem:[%s2666_s8 + $0x2a8] sm:$0xff]  }
  0x43   : > { %2340 = vmatprep.subr.bf16.mxu0 %v2486_v0  ;;  %v2550_v0 = vld [vmem:[%s2666_s8 + $0x350] sm:$0xff]  }
  0x44   : > { %2257 = vmatpush3.bf16.msra.mxu1 %v2460_v51  ;;  %v2539_v51 = vld [vmem:[%s2666_s8 + $0x2d8] sm:$0xff]  }
  0x45   : > { %2258 = vmatprep.subr.bf16.mxu1 %v2466_v54  ;;  %v599_v54 = vld [vmem:[%s2940_s1] sm:$0xff] }
  0x46   : > { %2341 = vmatpush3.bf16.msra.mxu0 %v2487_v2  ;;  %605 = vperm.xlu0 %2414, %v599_v54   ;;  %v2559_v2 = vld [vmem:[%s2939_s0 + $0x34] ss:$56 sps:$4 sm:$0xff]  }
  0x47   : > { %2342 = vmatprep.subr.bf16.mxu0 %v2490_v7  ;;  %v602_v7 = vld [vmem:[%s2940_s1 + $0x18] sm:$0xff] }
  0x48   : > { %2259 = vmatpush3.bf16.msra.mxu1 %v2469_v55  ;;  %v2542_v55 = vld [vmem:[%s2666_s8 + $0x2e0] sm:$0xff]  }
  0x49   : > { %2260 = vmatprep.subr.bf16.mxu1 %v2473_v58  ;;  %v2543_v58 = vld [vmem:[%s2666_s8 + $0x2a0] sm:$0xff]  }
  0x4a   : > { %2343 = vmatpush3.bf16.msra.mxu0 %v2493_v8  ;;  %610 = vperm.xlu0 %2414, %v600_v57   ;;  %v2552_v8 = vld [vmem:[%s2666_s8 + $0x2b8] sm:$0xff]  }
  0x4b   : > { %2344 = vmatprep.subr.bf16.mxu0 %v2500_v14 }
  0x4c   : > { %2261 = vmatpush3.bf16.msra.mxu1 %v2474_v59  ;;  %v2545_v59 = vld [vmem:[%s2666_s8 + $0x2e8] sm:$0xff]  }
  0x4d   : > { %2262 = vmatprep.subr.bf16.mxu1 %v2477_v62  ;;  %v2548_v62 = vld [vmem:[%s2666_s8 + $0x2f0] sm:$0xff]  }
  0x4e   : > { %2345 = vmatpush3.bf16.msra.mxu0 %v2501_v16 }
  0x4f   : > { %2346 = vmatprep.subr.bf16.mxu0 %v2504_v19 }
  0x50   : > { %2263 = vmatpush3.bf16.msra.mxu1 %v2478_v63  ;;  %v2555_v63 = vld [vmem:[%s2939_s0 + $0x2c] ss:$56 sps:$4 sm:$0xff]  }
  0x51   : > { %2304 = vmatprep.subr.bf16.mxu1 %v2484_v4  ;;  %v601_v4 = vld [vmem:[%s2940_s1 + $0x10] sm:$0xff] }
  0x52   : > { %2347 = vmatpush3.bf16.msra.mxu0 %v2505_v20  ;;  %615 = vperm.xlu1 %2415, %v601_v4  }
  0x53   : > { %1498 = vmatmul.mubr.bf16.vlgmr.msra.gmra.mrb[8].mxu1 %v2480_v3  ;;  %1710 = vmatprep.subr.bf16.mxu0 %v2598_v1  ;;  %v2549_v3 = vld [vmem:[%s2666_s8 + $0x2b0] sm:$0xff]  }
  0x54   : > { %2305 = vmatpush3.bf16.msra.mxu1 %v2485_v5  ;;  %1505 = vmatprep.mubr.bf16.mxu1 %v2491_v6  ;;  %v2551_v5 = vld [vmem:[%s2666_s8 + $0x2f8] sm:$0xff]  }
  0x55   : > { %2306 = vmatprep.subr.bf16.mxu1 %v2488_v9  ;;  %1645 = vmatmul.mubr.bf16.vlgmr.msra.gmra.mrb[8].mxu0 %v2508_v23  ;;  %v2556_v6 = vld [vmem:[%s2666_s8 + $0x358] sm:$0xff]   ;;  %v2557_v9 = vld [vmem:[%s2939_s0 + $0x30] ss:$56 sps:$4 sm:$0xff]  }
  0x56   : > { %1711 = vmatpush1.bf16.msra.mxu0 %v2511_v25  ;;  %1652 = vmatprep.mubr.bf16.mxu0 %v2534_v44 }
  0x57   : > { %1712 = vmatprep.subr.bf16.mxu0 %v2598_v1  ;;  %620 = vperm.xlu1 %2415, %v602_v7  }
  0x58   : > { %2307 = vmatpush3.bf16.msra.mxu1 %v2489_v10  ;;  %v2563_v10 = vld [vmem:[%s2939_s0 + $0xa4] ss:$56 sps:$4 sm:$0xff]  }
  0x59   : > { %2308 = vmatprep.subr.bf16.mxu1 %v2495_v12  ;;  %v2565_v12 = vld [vmem:[%s2939_s0 + $0xa0] ss:$56 sps:$4 sm:$0xff]  }
  0x5a   : > { %1713 = vmatpush1.bf16.msra.mxu0 %v2514_v28 }
  0x5b   : > { %1506 = vmatmul.mubr.bf16.gmra.mrb[12].mxu1 %v2494_v15  ;;  %1714 = vmatprep.subr.bf16.mxu0 %v2598_v1 }
  0x5c   : > { %2309 = vmatpush3.bf16.msra.mxu1 %v2498_v17  ;;  %1595 = vmatprep.mubr.bf16.mxu1 %v2522_v33 }
  0x5d   : > { %2310 = vmatprep.subr.bf16.mxu1 %v2502_v18  ;;  %1653 = vmatmul.mubr.bf16.gmra.mrb[12].mxu0 %v2537_v46 }
  0x5e   : > { %1715 = vmatpush1.bf16.msra.mxu0 %v2517_v31  ;;  %2195 = vmatprep.mubr.msk.bf16.mxu0 %vm1409_vm0, %v2559_v2 }
  0x5f   : > { %1716 = vmatprep.subr.bf16.mxu0 %v2598_v1 }
  0x60   : > { %2311 = vmatpush3.bf16.msra.mxu1 %v2503_v21 }
  0x61   : > { %2312 = vmatprep.subr.bf16.mxu1 %v2506_v22 }
  0x62   : > { %1717 = vmatpush1.bf16.msra.mxu0 %v2523_v35 }
  0x63   : > { %1718 = vmatprep.subr.bf16.mxu0 %v2598_v1 }
  0x64   : > { %2313 = vmatpush3.bf16.msra.mxu1 %v2507_v26 }
  0x65   : > { %2314 = vmatprep.subr.bf16.mxu1 %v2512_v27 }
  0x66   : > { %1719 = vmatpush1.bf16.msra.mxu0 %v2526_v39 }
  0x67   : > { %1720 = vmatprep.subr.bf16.mxu0 %v2598_v1 }
  0x68   : > { %2315 = vmatpush3.bf16.msra.mxu1 %v2513_v29 }
  0x69   : > { %2316 = vmatprep.subr.bf16.mxu1 %v2515_v30 }
  0x6a   : > { %1721 = vmatpush1.bf16.msra.mxu0 %v2531_v43 }
  0x6b   : > { %1722 = vmatprep.subr.bf16.mxu0 %v2598_v1 }
  0x6c   : > { %2317 = vmatpush3.bf16.msra.mxu1 %v2516_v32 }
  0x6d   : > { %2318 = vmatprep.subr.bf16.mxu1 %v2518_v34 }
  0x6e   : > { %1723 = vmatpush1.bf16.msra.mxu0 %v2538_v48 }
  0x6f   : > { %1724 = vmatprep.subr.bf16.mxu0 %v2598_v1 }
  0x70   : > { %2319 = vmatpush3.bf16.msra.mxu1 %v2519_v36 }
  0x71   : > { %2360 = vmatprep.subr.bf16.mxu1 %v2524_v37 }
  0x72   : > { %1725 = vmatpush1.bf16.msra.mxu0 %v2541_v52 }
  0x73   : > { %1596 = vmatmul.mubr.bf16.vlgmr.msra.gmra.mrb[16].mxu1 %v2520_v38  ;;  %1726 = vmatprep.subr.bf16.mxu0 %v2598_v1 }
  0x74   : > { %2361 = vmatpush3.bf16.msra.mxu1 %v2525_v40  ;;  %1603 = vmatprep.mubr.bf16.mxu1 %v2529_v42 }
  0x75   : > { %2362 = vmatprep.subr.bf16.mxu1 %v2527_v41 }
  0x76   : > { %1727 = vmatpush1.bf16.msra.mxu0 %v2544_v56 }
  0x77   : > { %1728 = vmatprep.subr.bf16.mxu0 %v2598_v1 }
  0x78   : > { %2363 = vmatpush3.bf16.msra.mxu1 %v2528_v45 }
  0x79   : > { %2364 = vmatprep.subr.bf16.mxu1 %v2533_v47 }
  0x7a   : > { %1729 = vmatpush1.bf16.msra.mxu0 %v2547_v60 }
  0x7b   : > { %1604 = vmatmul.mubr.bf16.gmra.mrb[20].mxu1 %v2532_v49  ;;  %1730 = vmatprep.subr.bf16.mxu0 %v2598_v1 }
  0x7c   : > { %2365 = vmatpush3.bf16.msra.mxu1 %v2536_v50  ;;  %1693 = vmatprep.mubr.bf16.mxu1 %v2555_v63 }
  0x7d   : > { %2366 = vmatprep.subr.bf16.mxu1 %v2539_v51 }
  0x7e   : > { %1731 = vmatpush1.bf16.msra.mxu0 %v2550_v0 }
  0x7f   : > { %1732 = vmatprep.subr.bf16.mxu0 %v2598_v1  ;;  %v2553_v1 = vld [vmem:[%s2939_s0 + $0x28] ss:$56 sps:$4 sm:$0xff]  }
  0x80   : > { %2367 = vmatpush3.bf16.msra.mxu1 %v2540_v53 }
  0x81   : > { %2368 = vmatprep.subr.bf16.mxu1 %v2542_v55 }
  0x82   : > { %1733 = vmatpush1.bf16.msra.mxu0 %v2556_v6 }
  0x84   : > { %2369 = vmatpush3.bf16.msra.mxu1 %v2543_v58 }
  0x85   : > { %2370 = vmatprep.subr.bf16.mxu1 %v2545_v59  ;;  %1743 = vmatmul.mubr.bf16.vlgmr.msra.gmra.mrb[16].mxu0 %v2557_v9 }
  0x86   : > { %2196 = vmatprep.mubr.msk.bf16.mxu0 %vm1409_vm0, %v2563_v10 }
  0x88   : > { %2371 = vmatpush3.bf16.msra.mxu1 %v2546_v61 }
  0x89   : > { %2372 = vmatprep.subr.bf16.mxu1 %v2548_v62 }
  0x8c   : > { %2373 = vmatpush3.bf16.msra.mxu1 %v2549_v3 }
  0x8d   : > { %2374 = vmatprep.subr.bf16.mxu1 %v2551_v5  ;;  %1751 = vmatmul.mubr.bf16.gmra.mrb[20].mxu0 %v2565_v12 }
  0x90   : > { %2375 = vmatpush3.bf16.msra.mxu1 %v2552_v8 }
  0x93   : > { %1694 = vmatmul.mubr.bf16.vlgmr.msra.gmra.mrb[24].mxu1 %v2553_v1 }
  0x94   : > { %1701 = vmatprep.mubr.bf16.mxu1 %v2560_v11 }
  0x9b   : > { %1702 = vmatmul.mubr.bf16.gmra.mrb[28].mxu1 %v2562_v13 }
  0xc5   : > { %v606_v32 = vpop.permute.xlu0 %605 }
  0xc9   : > { %v611_v34 = vpop.permute.xlu0 %610 }
  0xd1   : > { %v616_v37 = vpop.permute.xlu1 %615 }
  0xd6   : > { %v621_v54 = vpop.permute.xlu1 %620 }
 0x106   : > { %v2236_v14 = vpop.f32.mrb[0].mxu1 }
 0x107   : > { %v2237_v15 = vpop.f32.mrb[1].mxu1 }
 0x108   : > { %v2238_v16 = vadd.f32 %v2237_v15, %v2236_v14  ;;  %v2239_v17 = vpop.f32.mrb[2].mxu1  ;;  %v2292_v24 = vpop.f32.mrb[0].mxu0 }
 0x109   : > { %v2240_v18 = vpop.f32.mrb[3].mxu1  ;;  %v2293_v26 = vpop.f32.mrb[1].mxu0 }
 0x10a   : > { %v2241_v19 = vadd.f32 %v2240_v18, %v2239_v17  ;;  %v2294_v28 = vadd.f32 %v2293_v26, %v2292_v24  ;;  %v2295_v29 = vpop.f32.mrb[2].mxu0  ;;  %v1451_v36 = vadd.f32 %v2238_v16, %v606_v32 }
 0x10b   : > { %v2296_v30 = vpop.f32.mrb[3].mxu0 }
 0x10c   : > { %v2297_v31 = vadd.f32 %v2296_v30, %v2295_v29  ;;  %v1454_v42 = vadd.f32 %v2241_v19, %v611_v34 }
 0x10e   : > { %v2242_v20 = vpop.f32.mrb[4].mxu1 }
 0x10f   : > { %v2243_v21 = vpop.f32.mrb[5].mxu1 }
 0x110   : > { %v2244_v22 = vadd.f32 %v2243_v21, %v2242_v20  ;;  %v2245_v23 = vpop.f32.mrb[6].mxu1  ;;  %v2298_v41 = vpop.f32.mrb[4].mxu0 }
 0x111   : > { %v2246_v25 = vpop.f32.mrb[7].mxu1  ;;  %v2299_v45 = vpop.f32.mrb[5].mxu0 }
 0x112   : > { %v2247_v27 = vadd.f32 %v2246_v25, %v2245_v23  ;;  %v2300_v46 = vadd.f32 %v2299_v45, %v2298_v41  ;;  %v2301_v47 = vpop.f32.mrb[6].mxu0  ;;  %v1459_v56 = vadd.f32 %v2244_v22, %v616_v37 }
 0x113   : > { %v2302_v49 = vpop.f32.mrb[7].mxu0 }
 0x114   : > { %v2303_v51 = vadd.f32 %v2302_v49, %v2301_v47  ;;  %v1462_v60 = vadd.f32 %v2247_v27, %v621_v54 }
 0x126   : > { %v2264_v33 = vpop.f32.mrb[8].mxu1 }
 0x127   : > { %v2265_v35 = vpop.f32.mrb[9].mxu1 }
 0x128   : > { %v2266_v38 = vadd.f32 %v2265_v35, %v2264_v33  ;;  %v2267_v39 = vpop.f32.mrb[10].mxu1  ;;  %v2348_v63 = vpop.f32.mrb[8].mxu0 }
 0x129   : > { %v2268_v40 = vpop.f32.mrb[11].mxu1  ;;  %v2349_v3 = vpop.f32.mrb[9].mxu0 }
 0x12a   : > { %v1500_v43 = vadd.f32 %v2266_v38, %v1451_v36  ;;  %v2269_v44 = vadd.f32 %v2268_v40, %v2267_v39  ;;  %v2350_v4 = vadd.f32 %v2349_v3, %v2348_v63  ;;  %v2351_v5 = vpop.f32.mrb[10].mxu0 }
 0x12b   : > { %v2352_v7 = vpop.f32.mrb[11].mxu0 }
 0x12c   : > { %v1503_v48 = vadd.f32 %v2269_v44, %v1454_v42  ;;  %v1549_v50 = vadd.f32 %v2294_v28, %v1500_v43  ;;  %v2353_v8 = vadd.f32 %v2352_v7, %v2351_v5 }
 0x12e   : > { %v2270_v52 = vpop.f32.mrb[12].mxu1  ;;  %v1552_v53 = vadd.f32 %v2297_v31, %v1503_v48 }
 0x12f   : > { %v2271_v55 = vpop.f32.mrb[13].mxu1 }
 0x130   : > { %v2272_v57 = vadd.f32 %v2271_v55, %v2270_v52  ;;  %v2273_v58 = vpop.f32.mrb[14].mxu1  ;;  %v2354_v13 = vpop.f32.mrb[12].mxu0 }
 0x131   : > { %v2274_v59 = vpop.f32.mrb[15].mxu1  ;;  %v2355_v16 = vpop.f32.mrb[13].mxu0 }
 0x132   : > { %v1508_v61 = vadd.f32 %v2272_v57, %v1459_v56  ;;  %v2275_v62 = vadd.f32 %v2274_v59, %v2273_v58  ;;  %v2356_v17 = vadd.f32 %v2355_v16, %v2354_v13  ;;  %v2357_v18 = vpop.f32.mrb[14].mxu0 }
 0x133   : > { %v2358_v20 = vpop.f32.mrb[15].mxu0 }
 0x134   : > { %v1511_v0 = vadd.f32 %v2275_v62, %v1462_v60  ;;  %v1557_v2 = vadd.f32 %v2300_v46, %v1508_v61  ;;  %v2359_v22 = vadd.f32 %v2358_v20, %v2357_v18 }
 0x136   : > { %v1560_v6 = vadd.f32 %v2303_v51, %v1511_v0 }
 0x146   : > { %v2320_v9 = vpop.f32.mrb[16].mxu1 }
 0x147   : > { %v2321_v10 = vpop.f32.mrb[17].mxu1 }
 0x148   : > { %v2322_v1 = vadd.f32 %v2321_v10, %v2320_v9  ;;  %v2323_v11 = vpop.f32.mrb[18].mxu1 }
 0x149   : > { %v2324_v12 = vpop.f32.mrb[19].mxu1 }
 0x14a   : > { %v1598_v14 = vadd.f32 %v2322_v1, %v1549_v50  ;;  %v2325_v15 = vadd.f32 %v2324_v12, %v2323_v11 }
 0x14c   : > { %v1601_v19 = vadd.f32 %v2325_v15, %v1552_v53  ;;  %v1647_v21 = vadd.f32 %v2350_v4, %v1598_v14 }
 0x14e   : > { %v2326_v23 = vpop.f32.mrb[20].mxu1  ;;  %v1650_v24 = vadd.f32 %v2353_v8, %v1601_v19 }
 0x14f   : > { %v2327_v25 = vpop.f32.mrb[21].mxu1 }
 0x150   : > { %v2328_v26 = vadd.f32 %v2327_v25, %v2326_v23  ;;  %v2329_v27 = vpop.f32.mrb[22].mxu1 }
 0x151   : > { %v2330_v28 = vpop.f32.mrb[23].mxu1 }
 0x152   : > { %v1606_v29 = vadd.f32 %v2328_v26, %v1557_v2  ;;  %v2331_v30 = vadd.f32 %v2330_v28, %v2329_v27 }
 0x154   : > { %v1609_v31 = vadd.f32 %v2331_v30, %v1560_v6  ;;  %v1655_v32 = vadd.f32 %v2356_v17, %v1606_v29 }
 0x156   : > { %v1658_v33 = vadd.f32 %v2359_v22, %v1609_v31 }
 0x158   : > { %v1744_v34 = vpop.f32.mrb[16].mxu0 }
 0x159   : > { %v1746_v35 = vpop.f32.mrb[17].mxu0 }
 0x15a   : > { %v1747_v36 = vpop.f32.mrb[18].mxu0 }
 0x15b   : > { %v1749_v38 = vpop.f32.mrb[19].mxu0 }
 0x160   : > { %v1752_v45 = vpop.f32.mrb[20].mxu0 }
 0x161   : > { %v1754_v48 = vpop.f32.mrb[21].mxu0 }
 0x162   : > { %v1755_v49 = vpop.f32.mrb[22].mxu0 }
 0x163   : > { %v1757_v53 = vpop.f32.mrb[23].mxu0 }
 0x164   : > { %v1813_v53 = vld [vmem:[%s337_s14 + $0x10] sm:$0xff] }
 0x166   : > { %v2376_v37 = vpop.f32.mrb[24].mxu1 }
 0x167   : > { %v2377_v39 = vpop.f32.mrb[25].mxu1 }
 0x168   : > { %v2378_v40 = vadd.f32 %v2377_v39, %v2376_v37  ;;  %v2379_v41 = vpop.f32.mrb[26].mxu1 }
 0x169   : > { %v2380_v42 = vpop.f32.mrb[27].mxu1 }
 0x16a   : > { %v1696_v43 = vadd.f32 %v2378_v40, %v1647_v21  ;;  %v2381_v44 = vadd.f32 %v2380_v42, %v2379_v41  ;;  %v1812_v41 = vld [vmem:[%s337_s14 + $0x8] sm:$0xff] }
 0x16c   : > { %v2880_v46 = vadd.f32 %v1744_v34, %v1696_v43  ;;  %v1699_v47 = vadd.f32 %v2381_v44, %v1650_v24  ;;  %v1811_v44 = vld [vmem:[%s337_s14] sm:$0xff] }
 0x16e   : > { %v2882_v50 = vadd.f32 %v1747_v36, %v1699_v47  ;;  %v2382_v51 = vpop.f32.mrb[28].mxu1  ;;  %v1759_v52 = vsel %vm1409_vm0, %v2880_v46, 0.0  ;;  %v1775_v59 = vmul.f32 %v2880_v46, %v2880_v46 }
 0x16f   : > { %v2383_v54 = vpop.f32.mrb[29].mxu1  ;;  %1760 = vadd.xlane.f32.xlu0 %v1759_v52  ;;  %v1808_v52 = vld [vmem:[%s332_s17 + $0x8] sm:$0xff] }
 0x170   : > { %v2384_v55 = vadd.f32 %v2383_v54, %v2382_v51  ;;  %v2385_v56 = vpop.f32.mrb[30].mxu1  ;;  %v1762_v57 = vsel %vm1409_vm0, %v2882_v50, 0.0  ;;  %v1776_v58 = vmul.f32 %v2882_v50, %v2882_v50  ;;  %v1779_v3 = vsel %vm1409_vm0, %v1775_v59, 0.0  ;;  %v1807_v51 = vld [vmem:[%s332_s17] sm:$0xff]  ;;  %v1809_v59 = vld [vmem:[%s332_s17 + $0x10] sm:$0xff] }
 0x171   : > { %v2386_v60 = vpop.f32.mrb[31].mxu1  ;;  %1763 = vadd.xlane.f32.xlu1 %v1762_v57 }
 0x172   : > { %v2387_v61 = vadd.f32 %v2386_v60, %v2385_v56  ;;  %v1704_v62 = vadd.f32 %v2384_v55, %v1655_v32  ;;  %v1782_v63 = vsel %vm1409_vm0, %v1776_v58, 0.0 }
 0x173   : > { %1783 = vadd.xlane.f32.xlu0 %v1782_v63 }
 0x174   : > { %v2893_v0 = vadd.f32 %v1752_v45, %v1704_v62  ;;  %v1707_v2 = vadd.f32 %v2387_v61, %v1658_v33  ;;  %v1814_v61 = vld [vmem:[%s337_s14 + $0x18] sm:$0xff] }
 0x175   : > { %1780 = vadd.xlane.f32.xlu1 %v1779_v3 }
 0x176   : > { %v2896_v4 = vadd.f32 %v1755_v49, %v1707_v2  ;;  %v1765_v5 = vsel %vm1409_vm0, %v2893_v0, 0.0  ;;  %v1777_v6 = vmul.f32 %v2893_v0, %v2893_v0 }
 0x177   : > { %1766 = vadd.xlane.f32.xlu0 %v1765_v5  ;;  %v1810_v5 = vld [vmem:[%s332_s17 + $0x18] sm:$0xff] }
 0x178   : > { %v1785_v7 = vsel %vm1409_vm0, %v1777_v6, 0.0  ;;  %v1768_v8 = vsel %vm1409_vm0, %v2896_v4, 0.0  ;;  %v1778_v9 = vmul.f32 %v2896_v4, %v2896_v4 }
 0x179   : > { %1786 = vadd.xlane.f32.xlu1 %v1785_v7 }
 0x17a   : > { %v1788_v10 = vsel %vm1409_vm0, %v1778_v9, 0.0  ;;  %v2212_v9 = vld [vmem:[%s345_s25] sm:$0xff]  }
 0x17b   : > { %1769 = vadd.xlane.f32.xlu0 %v1768_v8 }
 0x17f   : > { %1789 = vadd.xlane.f32.xlu0 %v1788_v10 }
 0x1fc   : > { %v1761_v1 = vpop.xlane.xlu0 %1760 }
 0x1fd   : > { %v1771_v12 = vmul.f32 0.015625, %v1761_v1 }
 0x1fe   : > { %v1764_v11 = vpop.xlane.xlu1 %1763 }
 0x1ff   : > { %v1772_v13 = vmul.f32 0.015625, %v1764_v11  ;;  %v1795_v18 = vmul.f32 %v1771_v12, %v1771_v12 }
 0x200   : > { %v1784_v14 = vpop.xlane.xlu0 %1783 }
 0x201   : > { %v1796_v15 = vmul.f32 %v1772_v13, %v1772_v13  ;;  %v1792_v16 = vmul.f32 0.015625, %v1784_v14 }
 0x202   : > { %v1781_v17 = vpop.xlane.xlu1 %1780 }
 0x203   : > { %v1800_v19 = vsub.f32 %v1792_v16, %v1796_v15  ;;  %v1791_v20 = vmul.f32 0.015625, %v1781_v17  ;;  %v2213_v15 = vunpack.c.l.bf16 %v2212_v9 }
 0x204   : > { %v1767_v21 = vpop.xlane.xlu0 %1766 }
 0x205   : > { %v1804_v22 = vmax.f32 %v1800_v19, 0.0  ;;  %v1799_v23 = vsub.f32 %v1791_v20, %v1795_v18  ;;  %v1773_v24 = vmul.f32 0.015625, %v1767_v21  ;;  %v2219_v20 = vld [vmem:[%s345_s25 + $0x8] sm:$0xff]  }
 0x206   : > { %v1787_v25 = vpop.xlane.xlu1 %1786 }
 0x207   : > { %v1820_v26 = vadd.f32 1e-05, %v1804_v22  ;;  %v1803_v27 = vmax.f32 %v1799_v23, 0.0  ;;  %v1797_v28 = vmul.f32 %v1773_v24, %v1773_v24  ;;  %v1793_v29 = vmul.f32 0.015625, %v1787_v25 }
 0x208   : > { %v1770_v30 = vpop.xlane.xlu0 %1769  ;;  %v2217_v25 = vunpack.c.l.bf16 %v2219_v20 }
 0x209   : > { %2566 = vrsqrt.f32 %v1820_v26  ;;  %v1819_v31 = vadd.f32 1e-05, %v1803_v27  ;;  %v1801_v32 = vsub.f32 %v1793_v29, %v1797_v28  ;;  %v1774_v33 = vmul.f32 0.015625, %v1770_v30 }
 0x20b   : > { %2568 = vrsqrt.f32 %v1819_v31  ;;  %v1805_v34 = vmax.f32 %v1801_v32, 0.0  ;;  %v1798_v37 = vmul.f32 %v1774_v33, %v1774_v33  ;;  %v2218_v32 = vunpack.c.h.bf16 %v2219_v20 }
 0x20c   : > { %v1790_v35 = vpop.xlane.xlu0 %1789 }
 0x20d   : > { %v1821_v36 = vadd.f32 1e-05, %v1805_v34  ;;  %v1794_v38 = vmul.f32 0.015625, %v1790_v35 }
 0x20f   : > { %2570 = vrsqrt.f32 %v1821_v36  ;;  %v1802_v39 = vsub.f32 %v1794_v38, %v1798_v37 }
 0x211   : > { %v1806_v40 = vmax.f32 %v1802_v39, 0.0 }
 0x213   : > { %v2567_v42 = vpop.eup %2566  ;;  %v1822_v43 = vadd.f32 1e-05, %v1806_v40 }
 0x214   : > { %v1828_v45 = vmul.f32 %v2567_v42, %v1812_v41 }
 0x215   : > { %v2569_v47 = vpop.eup %2568  ;;  %2572 = vrsqrt.f32 %v1822_v43 }
 0x216   : > { %1846 = vperm.xlu0 %2414, %v1828_v45   ;;  %v1827_v48 = vmul.f32 %v2569_v47, %v1811_v44  ;;  %v1832_v49 = vmul.f32 %v1828_v45, %v1772_v13  ;;  %v2214_v13 = vunpack.c.h.bf16 %v2212_v9 }
 0x218   : > { %1841 = vperm.xlu1 %2415, %v1827_v48   ;;  %v1831_v54 = vmul.f32 %v1827_v48, %v1771_v12  ;;  %v1836_v57 = vsub.f32 %v1808_v52, %v1832_v49 }
 0x219   : > { %v2571_v55 = vpop.eup %2570 }
 0x21a   : > { %v1835_v56 = vsub.f32 %v1807_v51, %v1831_v54  ;;  %v1829_v58 = vmul.f32 %v2571_v55, %v1813_v53 }
 0x21c   : > { %1865 = vperm.xlu0 %2414, %v1835_v56   ;;  %1870 = vperm.xlu1 %2415, %v1836_v57   ;;  %v1833_v60 = vmul.f32 %v1829_v58, %v1773_v24 }
 0x21e   : > { %v1837_v62 = vsub.f32 %v1809_v59, %v1833_v60 }
 0x21f   : > { %v2573_v63 = vpop.eup %2572 }
 0x220   : > { %1851 = vperm.xlu1 %2415, %v1829_v58   ;;  %1875 = vperm.xlu0 %2414, %v1837_v62   ;;  %v1830_v2 = vmul.f32 %v2573_v63, %v1814_v61 }
 0x222   : > { %v1834_v3 = vmul.f32 %v1830_v2, %v1774_v33 }
 0x224   : > { %1856 = vperm.xlu1 %2415, %v1830_v2   ;;  %v1838_v6 = vsub.f32 %v1810_v5, %v1834_v3 }
 0x228   : > { %1880 = vperm.xlu1 %2415, %v1838_v6  }
 0x295   : > { %v1847_v7 = vpop.permute.xlu0 %1846 }
 0x296   : > { %v1860_v10 = vmul.f32 %v1847_v7, %v2882_v50 }
 0x297   : > { %v1842_v8 = vpop.permute.xlu1 %1841 }
 0x298   : > { %v1859_v1 = vmul.f32 %v1842_v8, %v2880_v46 }
 0x29b   : > { %v1871_v11 = vpop.permute.xlu1 %1870  ;;  %v1866_v12 = vpop.permute.xlu0 %1865 }
 0x29c   : > { %v1884_v14 = vadd.f32 %v1871_v11, %v1860_v10  ;;  %v1883_v16 = vadd.f32 %v1866_v12, %v1859_v1 }
 0x29e   : > { %v1888_v17 = vmax.f32 %v1884_v14, 0.0  ;;  %v1887_v18 = vmax.f32 %v1883_v16, 0.0 }
 0x29f   : > { %v1852_v19 = vpop.permute.xlu1 %1851  ;;  %v1876_v46 = vpop.permute.xlu0 %1875 }
 0x2a0   : > { %v1896_v21 = vadd.f32 %v2214_v13, %v1888_v17  ;;  %v1895_v22 = vadd.f32 %v2213_v15, %v1887_v18  ;;  %v1861_v23 = vmul.f32 %v1852_v19, %v2893_v0 }
 0x2a2   : > { %v2208_v50 = vpack.c.bf16 %v1896_v21, %v1896_v21  ;;  %v2207_v24 = vpack.c.bf16 %v1895_v22, %v1895_v22  ;;  %v1885_v26 = vadd.f32 %v1876_v46, %v1861_v23 }
 0x2a3   : > { %v1857_v27 = vpop.permute.xlu1 %1856 }
 0x2a4   : > { %1917 = vst.msk [vmem:[%s353_s27 + $0x4] sm:$0xf] %vm1915_vm1, %v2208_v50  ;;  %1916 = vst.msk [vmem:[%s353_s27] sm:$0xf] %vm1915_vm1, %v2207_v24  ;;  %v1889_v28 = vmax.f32 %v1885_v26, 0.0  ;;  %v1862_v30 = vmul.f32 %v1857_v27, %v2896_v4 }
 0x2a6   : > { %v1897_v29 = vadd.f32 %v2217_v25, %v1889_v28 }
 0x2a7   : > { %v1881_v0 = vpop.permute.xlu1 %1880 }
 0x2a8   : > { %v2209_v31 = vpack.c.bf16 %v1897_v29, %v1897_v29  ;;  %v1886_v33 = vadd.f32 %v1881_v0, %v1862_v30 }
 0x2aa   : > { %1918 = vst.msk [vmem:[%s353_s27 + $0x8] sm:$0xf] %vm1915_vm1, %v2209_v31  ;;  %v1890_v34 = vmax.f32 %v1886_v33, 0.0 }
 0x2ac   : > { %v1898_v35 = vadd.f32 %v2218_v32, %v1890_v34 }
 0x2ae   : > { %v2210_v36 = vpack.c.bf16 %v1898_v35, %v1898_v35 }
 0x2b0   : > { %1919 = vst.msk [vmem:[%s353_s27 + $0xc] sm:$0xf] %vm1915_vm1, %v2210_v36 }
 0x2b1 PF: > { %s16_s23 = sadd.s32 1, %s2596_s23   ;;  %s2946_s21 = smov %s2592_s22 }
 0x2b2   : > { %p13_p5 = scmp.ge.s32.totalorder %s16_s23, 4   ;;  %s2947_s22 = smov %s2949_s24 }
 0x2b4   :  { %15 = sbr.rel (!%p13_p5) target bundleno = 2 (0x2), region = 83 }

// kernel: unet_adain_forward.17
= control target key start
LH: loop header
LB: loop body
LE: loop exit
PB: predicated region body
PF: predicated region fallthrough
CT: control target
= control target key end

     0   :  { %s3051_s21 = smov 0   ;;  %s3053_s22 = smov 0   ;;  %s3399_s0 = inlined_call_operand.vmem [shape: bf16[16,864], index: 0, kind: input, shape index: {}]   ;;  %s3400_s1 = inlined_call_operand.vmem [shape: f32[16,1], index: 1, kind: input, shape index: {}]   ;;  %s3401_s2 = inlined_call_operand.vmem [shape: bf16[2,864,512], index: 2, kind: input, shape index: {}]   ;;  %s3402_s3 = inlined_call_operand.vmem [shape: f32[2,16,1], index: 3, kind: input, shape index: {}]   ;;  %s3403_s4 = inlined_call_operand.vmem [shape: f32[2,16,1], index: 4, kind: input, shape index: {}]   ;;  %s3404_s5 = inlined_call_operand.vmem [shape: bf16[2,16,512], index: 5, kind: input, shape index: {}]   ;;  %s3405_s6 = inlined_call_operand.vmem [shape: bf16[2,16,512], index: 6, kind: output, shape index: {}]  }
   0x1   :  { %s3055_s23 = smov 0  }
   0x2 LB: > { %s28_s24 = sadd.s32 1, %s3009_s22  ;;  %p2344_p0 = scmp.ge.s32.totalorder %s3013_s23, 1  ;;  %s3013_s23 = sphi %s3055_s23, %s16_s23   ;;  %s3009_s22 = sphi %s3053_s22, %s3407_s22   ;;  %s3005_s21 = sphi %s3051_s21, %s3406_s21  }
   0x3   : > { %p30_p1 = scmp.ge.s32.totalorder %s28_s24, 2  ;;  %p270_p2 = scmp.lt.s32.totalorder %s3013_s23, 3 }
   0x5   : > { %s3409_s24 = smov (%p30_p1, %s28_s24), 0  ;;  %p271_p3 = pnand %p2344_p0, %p270_p2 }
   0x6   : > { %p328_p4 = scmp.lt.s32.totalorder (!%p271_p3), %s3005_s21, 1  ;;  %v2751_v0 = vld [vmem:[%s3399_s0 + $0x4] ss:$28 sps:$4 sm:$0xff] (!%p271_p3)   ;;  %vm1719_vm0 = vcmask (!%p271_p3), 785408  }
   0x7   : > { %274 = sbr.rel (%p271_p3) target bundleno = 773 (0x305), region = 44  ;;  %1755 = vmatprep.mubr.bf16.mxu0 (!%p271_p3), %v2751_v0  ;;  %1927 = vmatprep.mubr.bf16.mxu1 (!%p271_p3), %v2751_v0 }
   0xe   : > { %s3411_s21 = smov (!%p328_p4, %s3005_s21), 1 }
   0xf   : > { %s2625_s27 = smul.u32 1728, %s3411_s21  ;;  %s2587_s10 = sshll.u32 %s3411_s21, 5 }
  0x10   : > { %s355_s13 = scalar_lea.vmem %s3404_s5, %s2587_s10  ;;  %s365_s16 = scalar_lea.vmem %s3405_s6, %s2587_s10 }
  0x11   : > { %s3078_s30 = scalar_lea.vmem %s3401_s2, %s2625_s27  ;;  %s2585_s27 = sshll.u32 %s3411_s21, 4 }
  0x12   : > { %v2653_v1 = vld [vmem:[%s3078_s30 + $0x4] ss:$16 sps:$4 sm:$0xff]   ;;  %v2655_v2 = vld [vmem:[%s3078_s30 + $0xc] ss:$16 sps:$4 sm:$0xff]   ;;  %v2657_v3 = vld [vmem:[%s3078_s30] ss:$16 sps:$4 sm:$0xff]   ;;  %s341_s9 = scalar_lea.vmem %s3402_s3, %s2585_s27 }
  0x13   : > { %1723 = vmatprep.subr.bf16.mxu0 %v2653_v1  ;;  %v2658_v4 = vld [vmem:[%s3078_s30 + $0x8] ss:$16 sps:$4 sm:$0xff]   ;;  %1895 = vmatprep.subr.bf16.mxu1 %v2655_v2  ;;  %v2659_v5 = vld [vmem:[%s3078_s30 + $0x24] ss:$16 sps:$4 sm:$0xff]   ;;  %v2661_v6 = vld [vmem:[%s3078_s30 + $0x2c] ss:$16 sps:$4 sm:$0xff]  }
  0x14   : > { %1724 = vmatpush1.bf16.msra.mxu0 %v2657_v3  ;;  %1896 = vmatpush1.bf16.msra.mxu1 %v2658_v4  ;;  %v2663_v7 = vld [vmem:[%s3078_s30 + $0x20] ss:$16 sps:$4 sm:$0xff]   ;;  %v2664_v8 = vld [vmem:[%s3078_s30 + $0x28] ss:$16 sps:$4 sm:$0xff]   ;;  %v2665_v9 = vld [vmem:[%s3078_s30 + $0x44] ss:$16 sps:$4 sm:$0xff]  }
  0x15   : > { %1725 = vmatprep.subr.bf16.mxu0 %v2659_v5  ;;  %1897 = vmatprep.subr.bf16.mxu1 %v2661_v6  ;;  %v2667_v10 = vld [vmem:[%s3078_s30 + $0x4c] ss:$16 sps:$4 sm:$0xff]   ;;  %v2669_v11 = vld [vmem:[%s3078_s30 + $0x40] ss:$16 sps:$4 sm:$0xff]   ;;  %v2670_v12 = vld [vmem:[%s3078_s30 + $0x48] ss:$16 sps:$4 sm:$0xff]  }
  0x16   : > { %v2671_v13 = vld [vmem:[%s3078_s30 + $0x64] ss:$16 sps:$4 sm:$0xff]   ;;  %v2673_v14 = vld [vmem:[%s3078_s30 + $0x6c] ss:$16 sps:$4 sm:$0xff]   ;;  %v2675_v15 = vld [vmem:[%s3078_s30 + $0x60] ss:$16 sps:$4 sm:$0xff]  }
  0x17   : > { %v2676_v16 = vld [vmem:[%s3078_s30 + $0x68] ss:$16 sps:$4 sm:$0xff]   ;;  %v2677_v17 = vld [vmem:[%s3078_s30 + $0x84] ss:$16 sps:$4 sm:$0xff]   ;;  %v2679_v18 = vld [vmem:[%s3078_s30 + $0x8c] ss:$16 sps:$4 sm:$0xff]  }
  0x18   : > { %1726 = vmatpush1.bf16.msra.mxu0 %v2663_v7  ;;  %1898 = vmatpush1.bf16.msra.mxu1 %v2664_v8  ;;  %v2681_v19 = vld [vmem:[%s3078_s30 + $0x80] ss:$16 sps:$4 sm:$0xff]   ;;  %v2682_v20 = vld [vmem:[%s3078_s30 + $0x88] ss:$16 sps:$4 sm:$0xff]   ;;  %v2683_v21 = vld [vmem:[%s3078_s30 + $0xa4] ss:$16 sps:$4 sm:$0xff]  }
  0x19   : > { %1727 = vmatprep.subr.bf16.mxu0 %v2665_v9  ;;  %1899 = vmatprep.subr.bf16.mxu1 %v2667_v10  ;;  %v2685_v22 = vld [vmem:[%s3078_s30 + $0xac] ss:$16 sps:$4 sm:$0xff]   ;;  %v2687_v23 = vld [vmem:[%s3078_s30 + $0xa0] ss:$16 sps:$4 sm:$0xff]   ;;  %v2688_v24 = vld [vmem:[%s3078_s30 + $0xa8] ss:$16 sps:$4 sm:$0xff]  }
  0x1a   : > { %v2689_v25 = vld [vmem:[%s3078_s30 + $0xc4] ss:$16 sps:$4 sm:$0xff]   ;;  %v2691_v26 = vld [vmem:[%s3078_s30 + $0xcc] ss:$16 sps:$4 sm:$0xff]   ;;  %v2693_v27 = vld [vmem:[%s3078_s30 + $0xc0] ss:$16 sps:$4 sm:$0xff]  }
  0x1b   : > { %v2694_v28 = vld [vmem:[%s3078_s30 + $0xc8] ss:$16 sps:$4 sm:$0xff]   ;;  %v2695_v29 = vld [vmem:[%s3078_s30 + $0xe4] ss:$16 sps:$4 sm:$0xff]   ;;  %v2697_v30 = vld [vmem:[%s3078_s30 + $0xec] ss:$16 sps:$4 sm:$0xff]  }
  0x1c   : > { %1728 = vmatpush1.bf16.msra.mxu0 %v2669_v11  ;;  %1900 = vmatpush1.bf16.msra.mxu1 %v2670_v12  ;;  %v2699_v31 = vld [vmem:[%s3078_s30 + $0xe0] ss:$16 sps:$4 sm:$0xff]   ;;  %v2700_v32 = vld [vmem:[%s3078_s30 + $0xe8] ss:$16 sps:$4 sm:$0xff]   ;;  %v2701_v33 = vld [vmem:[%s3078_s30 + $0x104] ss:$16 sps:$4 sm:$0xff]  }
  0x1d   : > { %1729 = vmatprep.subr.bf16.mxu0 %v2671_v13  ;;  %1901 = vmatprep.subr.bf16.mxu1 %v2673_v14  ;;  %v2703_v34 = vld [vmem:[%s3078_s30 + $0x10c] ss:$16 sps:$4 sm:$0xff]   ;;  %v2705_v35 = vld [vmem:[%s3078_s30 + $0x100] ss:$16 sps:$4 sm:$0xff]   ;;  %v2706_v36 = vld [vmem:[%s3078_s30 + $0x108] ss:$16 sps:$4 sm:$0xff]  }
  0x1e   : > { %v2707_v37 = vld [vmem:[%s3078_s30 + $0x124] ss:$16 sps:$4 sm:$0xff]   ;;  %v2709_v38 = vld [vmem:[%s3078_s30 + $0x12c] ss:$16 sps:$4 sm:$0xff]   ;;  %v2711_v39 = vld [vmem:[%s3078_s30 + $0x120] ss:$16 sps:$4 sm:$0xff]  }
  0x1f   : > { %v2712_v40 = vld [vmem:[%s3078_s30 + $0x128] ss:$16 sps:$4 sm:$0xff]   ;;  %v2713_v41 = vld [vmem:[%s3078_s30 + $0x144] ss:$16 sps:$4 sm:$0xff]   ;;  %v2715_v42 = vld [vmem:[%s3078_s30 + $0x14c] ss:$16 sps:$4 sm:$0xff]  }
  0x20   : > { %1730 = vmatpush1.bf16.msra.mxu0 %v2675_v15  ;;  %1902 = vmatpush1.bf16.msra.mxu1 %v2676_v16  ;;  %v2717_v43 = vld [vmem:[%s3078_s30 + $0x140] ss:$16 sps:$4 sm:$0xff]   ;;  %v2718_v44 = vld [vmem:[%s3078_s30 + $0x148] ss:$16 sps:$4 sm:$0xff]   ;;  %v2719_v45 = vld [vmem:[%s3078_s30 + $0x164] ss:$16 sps:$4 sm:$0xff]  }
  0x21   : > { %1731 = vmatprep.subr.bf16.mxu0 %v2677_v17  ;;  %1903 = vmatprep.subr.bf16.mxu1 %v2679_v18  ;;  %v2721_v46 = vld [vmem:[%s3078_s30 + $0x16c] ss:$16 sps:$4 sm:$0xff]   ;;  %v2723_v47 = vld [vmem:[%s3078_s30 + $0x160] ss:$16 sps:$4 sm:$0xff]   ;;  %v2724_v48 = vld [vmem:[%s3078_s30 + $0x168] ss:$16 sps:$4 sm:$0xff]  }
  0x22   : > { %v2725_v49 = vld [vmem:[%s3078_s30 + $0x184] ss:$16 sps:$4 sm:$0xff]   ;;  %v2727_v50 = vld [vmem:[%s3078_s30 + $0x18c] ss:$16 sps:$4 sm:$0xff]   ;;  %v2729_v51 = vld [vmem:[%s3078_s30 + $0x180] ss:$16 sps:$4 sm:$0xff]  }
  0x23   : > { %v2730_v52 = vld [vmem:[%s3078_s30 + $0x188] ss:$16 sps:$4 sm:$0xff]   ;;  %v2731_v53 = vld [vmem:[%s3078_s30 + $0x1a4] ss:$16 sps:$4 sm:$0xff]   ;;  %v2733_v54 = vld [vmem:[%s3078_s30 + $0x1ac] ss:$16 sps:$4 sm:$0xff]  }
  0x24   : > { %1732 = vmatpush1.bf16.msra.mxu0 %v2681_v19  ;;  %1904 = vmatpush1.bf16.msra.mxu1 %v2682_v20  ;;  %v2735_v55 = vld [vmem:[%s3078_s30 + $0x1a0] ss:$16 sps:$4 sm:$0xff]   ;;  %v2736_v56 = vld [vmem:[%s3078_s30 + $0x1a8] ss:$16 sps:$4 sm:$0xff]   ;;  %v2737_v57 = vld [vmem:[%s3078_s30 + $0x1c4] ss:$16 sps:$4 sm:$0xff]  }
  0x25   : > { %1733 = vmatprep.subr.bf16.mxu0 %v2683_v21  ;;  %1905 = vmatprep.subr.bf16.mxu1 %v2685_v22  ;;  %v2739_v58 = vld [vmem:[%s3078_s30 + $0x1cc] ss:$16 sps:$4 sm:$0xff]   ;;  %v2741_v59 = vld [vmem:[%s3078_s30 + $0x1c0] ss:$16 sps:$4 sm:$0xff]   ;;  %v2742_v60 = vld [vmem:[%s3078_s30 + $0x1c8] ss:$16 sps:$4 sm:$0xff]  }
  0x26   : > { %v2743_v61 = vld [vmem:[%s3078_s30 + $0x1e4] ss:$16 sps:$4 sm:$0xff]   ;;  %v2745_v62 = vld [vmem:[%s3078_s30 + $0x1ec] ss:$16 sps:$4 sm:$0xff]   ;;  %v2747_v63 = vld [vmem:[%s3078_s30 + $0x1e0] ss:$16 sps:$4 sm:$0xff]  }
  0x27   : > { %v2748_v0 = vld [vmem:[%s3078_s30 + $0x1e8] ss:$16 sps:$4 sm:$0xff]   ;;  %v2754_v1 = vld [vmem:[%s3078_s30 + $0x204] ss:$16 sps:$4 sm:$0xff]   ;;  %v2757_v2 = vld [vmem:[%s3078_s30 + $0x20c] ss:$16 sps:$4 sm:$0xff]  }
  0x28   : > { %1734 = vmatpush1.bf16.msra.mxu0 %v2687_v23  ;;  %1906 = vmatpush1.bf16.msra.mxu1 %v2688_v24  ;;  %v2749_v3 = vld [vmem:[%s3399_s0] ss:$28 sps:$4 sm:$0xff]   ;;  %v2755_v5 = vld [vmem:[%s3078_s30 + $0x208] ss:$16 sps:$4 sm:$0xff]   ;;  %v2760_v6 = vld [vmem:[%s3078_s30 + $0x224] ss:$16 sps:$4 sm:$0xff]  }
  0x29   : > { %1735 = vmatprep.subr.bf16.mxu0 %v2689_v25  ;;  %1907 = vmatprep.subr.bf16.mxu1 %v2691_v26  ;;  %v2752_v4 = vld [vmem:[%s3078_s30 + $0x200] ss:$16 sps:$4 sm:$0xff]   ;;  %v2763_v7 = vld [vmem:[%s3078_s30 + $0x22c] ss:$16 sps:$4 sm:$0xff]   ;;  %v2761_v9 = vld [vmem:[%s3078_s30 + $0x228] ss:$16 sps:$4 sm:$0xff]  }
  0x2a   : > { %v2758_v8 = vld [vmem:[%s3078_s30 + $0x220] ss:$16 sps:$4 sm:$0xff]   ;;  %v2766_v10 = vld [vmem:[%s3078_s30 + $0x244] ss:$16 sps:$4 sm:$0xff]   ;;  %v2769_v11 = vld [vmem:[%s3078_s30 + $0x24c] ss:$16 sps:$4 sm:$0xff]  }
  0x2b   : > { %v2764_v12 = vld [vmem:[%s3078_s30 + $0x240] ss:$16 sps:$4 sm:$0xff]   ;;  %v2767_v13 = vld [vmem:[%s3078_s30 + $0x248] ss:$16 sps:$4 sm:$0xff]   ;;  %v2772_v14 = vld [vmem:[%s3078_s30 + $0x264] ss:$16 sps:$4 sm:$0xff]  }
  0x2c   : > { %1736 = vmatpush1.bf16.msra.mxu0 %v2693_v27  ;;  %1908 = vmatpush1.bf16.msra.mxu1 %v2694_v28  ;;  %v2775_v15 = vld [vmem:[%s3078_s30 + $0x26c] ss:$16 sps:$4 sm:$0xff]   ;;  %v2770_v16 = vld [vmem:[%s3078_s30 + $0x260] ss:$16 sps:$4 sm:$0xff]   ;;  %v2773_v17 = vld [vmem:[%s3078_s30 + $0x268] ss:$16 sps:$4 sm:$0xff]  }
  0x2d   : > { %1737 = vmatprep.subr.bf16.mxu0 %v2695_v29  ;;  %1909 = vmatprep.subr.bf16.mxu1 %v2697_v30  ;;  %v2778_v18 = vld [vmem:[%s3078_s30 + $0x284] ss:$16 sps:$4 sm:$0xff]   ;;  %v2781_v19 = vld [vmem:[%s3078_s30 + $0x28c] ss:$16 sps:$4 sm:$0xff]   ;;  %v2776_v20 = vld [vmem:[%s3078_s30 + $0x280] ss:$16 sps:$4 sm:$0xff]  }
  0x2e   : > { %v2779_v21 = vld [vmem:[%s3078_s30 + $0x288] ss:$16 sps:$4 sm:$0xff]   ;;  %v2784_v22 = vld [vmem:[%s3078_s30 + $0x2a4] ss:$16 sps:$4 sm:$0xff]   ;;  %v2787_v23 = vld [vmem:[%s3078_s30 + $0x2ac] ss:$16 sps:$4 sm:$0xff]  }
  0x2f   : > { %v2782_v24 = vld [vmem:[%s3078_s30 + $0x2a0] ss:$16 sps:$4 sm:$0xff]   ;;  %v2785_v25 = vld [vmem:[%s3078_s30 + $0x2a8] ss:$16 sps:$4 sm:$0xff]   ;;  %v2790_v26 = vld [vmem:[%s3078_s30 + $0x2c4] ss:$16 sps:$4 sm:$0xff]  }
  0x30   : > { %1738 = vmatpush1.bf16.msra.mxu0 %v2699_v31  ;;  %1910 = vmatpush1.bf16.msra.mxu1 %v2700_v32  ;;  %v2793_v27 = vld [vmem:[%s3078_s30 + $0x2cc] ss:$16 sps:$4 sm:$0xff]   ;;  %v2788_v29 = vld [vmem:[%s3078_s30 + $0x2c0] ss:$16 sps:$4 sm:$0xff]   ;;  %v2791_v30 = vld [vmem:[%s3078_s30 + $0x2c8] ss:$16 sps:$4 sm:$0xff]  }
  0x31   : > { %1739 = vmatprep.subr.bf16.mxu0 %v2701_v33  ;;  %1911 = vmatprep.subr.bf16.mxu1 %v2703_v34  ;;  %v2850_v28 = vld [vmem:[%s3399_s0 + $0xc] ss:$28 sps:$4 sm:$0xff]   ;;  %v2796_v31 = vld [vmem:[%s3078_s30 + $0x2e4] ss:$16 sps:$4 sm:$0xff]   ;;  %v3015_v33 = vmov 0  }
  0x32   : > { %v2799_v32 = vld [vmem:[%s3078_s30 + $0x2ec] ss:$16 sps:$4 sm:$0xff]   ;;  %2651 = vset.pattern.permute.xlu0 %v3015_v33  ;;  %2652 = vset.pattern.permute.xlu1 %v3015_v33  ;;  %v2794_v34 = vld [vmem:[%s3078_s30 + $0x2e0] ss:$16 sps:$4 sm:$0xff]  }
  0x34   : > { %1740 = vmatpush1.bf16.msra.mxu0 %v2705_v35  ;;  %1912 = vmatpush1.bf16.msra.mxu1 %v2706_v36  ;;  %v2797_v35 = vld [vmem:[%s3078_s30 + $0x2e8] ss:$16 sps:$4 sm:$0xff]   ;;  %v2802_v36 = vld [vmem:[%s3078_s30 + $0x304] ss:$16 sps:$4 sm:$0xff]  }
  0x35   : > { %1741 = vmatprep.subr.bf16.mxu0 %v2707_v37  ;;  %1913 = vmatprep.subr.bf16.mxu1 %v2709_v38  ;;  %v2805_v37 = vld [vmem:[%s3078_s30 + $0x30c] ss:$16 sps:$4 sm:$0xff]   ;;  %v2800_v38 = vld [vmem:[%s3078_s30 + $0x300] ss:$16 sps:$4 sm:$0xff]  }
  0x38   : > { %1742 = vmatpush1.bf16.msra.mxu0 %v2711_v39  ;;  %1914 = vmatpush1.bf16.msra.mxu1 %v2712_v40  ;;  %v2803_v39 = vld [vmem:[%s3078_s30 + $0x308] ss:$16 sps:$4 sm:$0xff]   ;;  %v2808_v40 = vld [vmem:[%s3078_s30 + $0x324] ss:$16 sps:$4 sm:$0xff]  }
  0x39   : > { %1743 = vmatprep.subr.bf16.mxu0 %v2713_v41  ;;  %1915 = vmatprep.subr.bf16.mxu1 %v2715_v42  ;;  %v2811_v41 = vld [vmem:[%s3078_s30 + $0x32c] ss:$16 sps:$4 sm:$0xff]   ;;  %v2806_v42 = vld [vmem:[%s3078_s30 + $0x320] ss:$16 sps:$4 sm:$0xff]  }
  0x3c   : > { %1744 = vmatpush1.bf16.msra.mxu0 %v2717_v43  ;;  %1916 = vmatpush1.bf16.msra.mxu1 %v2718_v44  ;;  %v2809_v43 = vld [vmem:[%s3078_s30 + $0x328] ss:$16 sps:$4 sm:$0xff]   ;;  %v2814_v44 = vld [vmem:[%s3078_s30 + $0x344] ss:$16 sps:$4 sm:$0xff]  }
  0x3d   : > { %1745 = vmatprep.subr.bf16.mxu0 %v2719_v45  ;;  %1917 = vmatprep.subr.bf16.mxu1 %v2721_v46  ;;  %v2817_v45 = vld [vmem:[%s3078_s30 + $0x34c] ss:$16 sps:$4 sm:$0xff]   ;;  %v2812_v46 = vld [vmem:[%s3078_s30 + $0x340] ss:$16 sps:$4 sm:$0xff]  }
  0x40   : > { %1746 = vmatpush1.bf16.msra.mxu0 %v2723_v47  ;;  %1918 = vmatpush1.bf16.msra.mxu1 %v2724_v48  ;;  %v2815_v47 = vld [vmem:[%s3078_s30 + $0x348] ss:$16 sps:$4 sm:$0xff]   ;;  %v2820_v48 = vld [vmem:[%s3078_s30 + $0x364] ss:$16 sps:$4 sm:$0xff]  }
  0x41   : > { %1747 = vmatprep.subr.bf16.mxu0 %v2725_v49  ;;  %1919 = vmatprep.subr.bf16.mxu1 %v2727_v50  ;;  %v2823_v49 = vld [vmem:[%s3078_s30 + $0x36c] ss:$16 sps:$4 sm:$0xff]   ;;  %v2818_v50 = vld [vmem:[%s3078_s30 + $0x360] ss:$16 sps:$4 sm:$0xff]  }
  0x44   : > { %1748 = vmatpush1.bf16.msra.mxu0 %v2729_v51  ;;  %1920 = vmatpush1.bf16.msra.mxu1 %v2730_v52  ;;  %v2821_v51 = vld [vmem:[%s3078_s30 + $0x368] ss:$16 sps:$4 sm:$0xff]   ;;  %v2826_v52 = vld [vmem:[%s3078_s30 + $0x384] ss:$16 sps:$4 sm:$0xff]  }
  0x45   : > { %1749 = vmatprep.subr.bf16.mxu0 %v2731_v53  ;;  %1921 = vmatprep.subr.bf16.mxu1 %v2733_v54  ;;  %v2829_v53 = vld [vmem:[%s3078_s30 + $0x38c] ss:$16 sps:$4 sm:$0xff]   ;;  %v2824_v54 = vld [vmem:[%s3078_s30 + $0x380] ss:$16 sps:$4 sm:$0xff]  }
  0x48   : > { %1750 = vmatpush1.bf16.msra.mxu0 %v2735_v55  ;;  %1922 = vmatpush1.bf16.msra.mxu1 %v2736_v56  ;;  %v2827_v55 = vld [vmem:[%s3078_s30 + $0x388] ss:$16 sps:$4 sm:$0xff]   ;;  %v2832_v56 = vld [vmem:[%s3078_s30 + $0x3a4] ss:$16 sps:$4 sm:$0xff]  }
  0x49   : > { %1751 = vmatprep.subr.bf16.mxu0 %v2737_v57  ;;  %1923 = vmatprep.subr.bf16.mxu1 %v2739_v58  ;;  %v2835_v57 = vld [vmem:[%s3078_s30 + $0x3ac] ss:$16 sps:$4 sm:$0xff]   ;;  %v2830_v58 = vld [vmem:[%s3078_s30 + $0x3a0] ss:$16 sps:$4 sm:$0xff]  }
  0x4c   : > { %1752 = vmatpush1.bf16.msra.mxu0 %v2741_v59  ;;  %1924 = vmatpush1.bf16.msra.mxu1 %v2742_v60  ;;  %v2833_v59 = vld [vmem:[%s3078_s30 + $0x3a8] ss:$16 sps:$4 sm:$0xff]   ;;  %v2838_v60 = vld [vmem:[%s3078_s30 + $0x3c4] ss:$16 sps:$4 sm:$0xff]  }
  0x4d   : > { %1753 = vmatprep.subr.bf16.mxu0 %v2743_v61  ;;  %1925 = vmatprep.subr.bf16.mxu1 %v2745_v62  ;;  %v2841_v61 = vld [vmem:[%s3078_s30 + $0x3cc] ss:$16 sps:$4 sm:$0xff]   ;;  %v2836_v62 = vld [vmem:[%s3078_s30 + $0x3c0] ss:$16 sps:$4 sm:$0xff]  }
  0x50   : > { %1754 = vmatpush1.bf16.msra.mxu0 %v2747_v63  ;;  %1926 = vmatpush1.bf16.msra.mxu1 %v2748_v0  ;;  %v2839_v63 = vld [vmem:[%s3078_s30 + $0x3c8] ss:$16 sps:$4 sm:$0xff]   ;;  %v2844_v0 = vld [vmem:[%s3078_s30 + $0x3e4] ss:$16 sps:$4 sm:$0xff]  }
  0x51   : > { %1766 = vmatprep.subr.bf16.mxu0 %v2754_v1  ;;  %1938 = vmatprep.subr.bf16.mxu1 %v2757_v2  ;;  %v2847_v1 = vld [vmem:[%s3078_s30 + $0x3ec] ss:$16 sps:$4 sm:$0xff]   ;;  %v2842_v2 = vld [vmem:[%s3078_s30 + $0x3e0] ss:$16 sps:$4 sm:$0xff]  }
  0x53   : > { %1756 = vmatmul.mubr.bf16.vlgmr.msra.gmra.mrb[0].mxu0 %v2749_v3  ;;  %1928 = vmatmul.mubr.bf16.vlgmr.msra.gmra.mrb[0].mxu1 %v2749_v3  ;;  %v2845_v3 = vld [vmem:[%s3078_s30 + $0x3e8] ss:$16 sps:$4 sm:$0xff]  }
  0x54   : > { %1767 = vmatpush1.bf16.msra.mxu0 %v2752_v4  ;;  %1939 = vmatpush1.bf16.msra.mxu1 %v2755_v5  ;;  %v2853_v4 = vld [vmem:[%s3078_s30 + $0x404] ss:$16 sps:$4 sm:$0xff]   ;;  %v2856_v5 = vld [vmem:[%s3078_s30 + $0x40c] ss:$16 sps:$4 sm:$0xff]  }
  0x55   : > { %1768 = vmatprep.subr.bf16.mxu0 %v2760_v6  ;;  %1940 = vmatprep.subr.bf16.mxu1 %v2763_v7  ;;  %v2848_v6 = vld [vmem:[%s3399_s0 + $0x8] ss:$28 sps:$4 sm:$0xff]   ;;  %v2851_v7 = vld [vmem:[%s3078_s30 + $0x400] ss:$16 sps:$4 sm:$0xff]  }
  0x56   : > { %1798 = vmatprep.mubr.bf16.mxu0 %v2850_v28  ;;  %1970 = vmatprep.mubr.bf16.mxu1 %v2850_v28  ;;  %v592_v28 = vld [vmem:[%s3400_s1] sm:$0xff] }
  0x57   : > { %596 = vperm.xlu0 %2651, %v592_v28   ;;  %v2977_v28 = vld [vmem:[%s3078_s30 + $0x688] ss:$16 sps:$4 sm:$0xff]  }
  0x58   : > { %1769 = vmatpush1.bf16.msra.mxu0 %v2758_v8  ;;  %1941 = vmatpush1.bf16.msra.mxu1 %v2761_v9  ;;  %v2854_v8 = vld [vmem:[%s3078_s30 + $0x408] ss:$16 sps:$4 sm:$0xff]   ;;  %v2859_v9 = vld [vmem:[%s3078_s30 + $0x424] ss:$16 sps:$4 sm:$0xff]  }
  0x59   : > { %1770 = vmatprep.subr.bf16.mxu0 %v2766_v10  ;;  %1942 = vmatprep.subr.bf16.mxu1 %v2769_v11  ;;  %v2862_v10 = vld [vmem:[%s3078_s30 + $0x42c] ss:$16 sps:$4 sm:$0xff]   ;;  %v2949_v11 = vld [vmem:[%s3399_s0 + $0x14] ss:$28 sps:$4 sm:$0xff]  }
  0x5c   : > { %1771 = vmatpush1.bf16.msra.mxu0 %v2764_v12  ;;  %1943 = vmatpush1.bf16.msra.mxu1 %v2767_v13  ;;  %v2857_v12 = vld [vmem:[%s3078_s30 + $0x420] ss:$16 sps:$4 sm:$0xff]   ;;  %v2860_v13 = vld [vmem:[%s3078_s30 + $0x428] ss:$16 sps:$4 sm:$0xff]  }
  0x5d   : > { %1772 = vmatprep.subr.bf16.mxu0 %v2772_v14  ;;  %1944 = vmatprep.subr.bf16.mxu1 %v2775_v15  ;;  %v2865_v14 = vld [vmem:[%s3078_s30 + $0x444] ss:$16 sps:$4 sm:$0xff]   ;;  %v2868_v15 = vld [vmem:[%s3078_s30 + $0x44c] ss:$16 sps:$4 sm:$0xff]  }
  0x60   : > { %1773 = vmatpush1.bf16.msra.mxu0 %v2770_v16  ;;  %1945 = vmatpush1.bf16.msra.mxu1 %v2773_v17  ;;  %v2863_v16 = vld [vmem:[%s3078_s30 + $0x440] ss:$16 sps:$4 sm:$0xff]   ;;  %v2866_v17 = vld [vmem:[%s3078_s30 + $0x448] ss:$16 sps:$4 sm:$0xff]  }
  0x61   : > { %1774 = vmatprep.subr.bf16.mxu0 %v2778_v18  ;;  %1946 = vmatprep.subr.bf16.mxu1 %v2781_v19  ;;  %v2871_v18 = vld [vmem:[%s3078_s30 + $0x464] ss:$16 sps:$4 sm:$0xff]   ;;  %v2874_v19 = vld [vmem:[%s3078_s30 + $0x46c] ss:$16 sps:$4 sm:$0xff]  }
  0x64   : > { %1775 = vmatpush1.bf16.msra.mxu0 %v2776_v20  ;;  %1947 = vmatpush1.bf16.msra.mxu1 %v2779_v21  ;;  %v2869_v20 = vld [vmem:[%s3078_s30 + $0x460] ss:$16 sps:$4 sm:$0xff]   ;;  %v2872_v21 = vld [vmem:[%s3078_s30 + $0x468] ss:$16 sps:$4 sm:$0xff]  }
  0x65   : > { %1776 = vmatprep.subr.bf16.mxu0 %v2784_v22  ;;  %1948 = vmatprep.subr.bf16.mxu1 %v2787_v23  ;;  %v2877_v22 = vld [vmem:[%s3078_s30 + $0x484] ss:$16 sps:$4 sm:$0xff]   ;;  %v2880_v23 = vld [vmem:[%s3078_s30 + $0x48c] ss:$16 sps:$4 sm:$0xff]  }
  0x68   : > { %1777 = vmatpush1.bf16.msra.mxu0 %v2782_v24  ;;  %1949 = vmatpush1.bf16.msra.mxu1 %v2785_v25  ;;  %v2875_v24 = vld [vmem:[%s3078_s30 + $0x480] ss:$16 sps:$4 sm:$0xff]   ;;  %v2878_v25 = vld [vmem:[%s3078_s30 + $0x488] ss:$16 sps:$4 sm:$0xff]  }
  0x69   : > { %1778 = vmatprep.subr.bf16.mxu0 %v2790_v26  ;;  %1950 = vmatprep.subr.bf16.mxu1 %v2793_v27  ;;  %v2883_v26 = vld [vmem:[%s3078_s30 + $0x4a4] ss:$16 sps:$4 sm:$0xff]   ;;  %v2886_v27 = vld [vmem:[%s3078_s30 + $0x4ac] ss:$16 sps:$4 sm:$0xff]  }
  0x6c   : > { %1779 = vmatpush1.bf16.msra.mxu0 %v2788_v29  ;;  %1951 = vmatpush1.bf16.msra.mxu1 %v2791_v30  ;;  %v593_v29 = vld [vmem:[%s3400_s1 + $0x8] sm:$0xff]  ;;  %v2881_v30 = vld [vmem:[%s3078_s30 + $0x4a0] ss:$16 sps:$4 sm:$0xff]  }
  0x6d   : > { %1780 = vmatprep.subr.bf16.mxu0 %v2796_v31  ;;  %1952 = vmatprep.subr.bf16.mxu1 %v2799_v32  ;;  %v2884_v31 = vld [vmem:[%s3078_s30 + $0x4a8] ss:$16 sps:$4 sm:$0xff]   ;;  %v2889_v32 = vld [vmem:[%s3078_s30 + $0x4c4] ss:$16 sps:$4 sm:$0xff]  }
  0x6e   : > { %601 = vperm.xlu0 %2651, %v593_v29   ;;  %v2982_v29 = vld [vmem:[%s3078_s30 + $0x6a4] ss:$16 sps:$4 sm:$0xff]  }
  0x70   : > { %1781 = vmatpush1.bf16.msra.mxu0 %v2794_v34  ;;  %1953 = vmatpush1.bf16.msra.mxu1 %v2797_v35  ;;  %v2892_v34 = vld [vmem:[%s3078_s30 + $0x4cc] ss:$16 sps:$4 sm:$0xff]   ;;  %v2887_v35 = vld [vmem:[%s3078_s30 + $0x4c0] ss:$16 sps:$4 sm:$0xff]  }
  0x71   : > { %1782 = vmatprep.subr.bf16.mxu0 %v2802_v36  ;;  %1954 = vmatprep.subr.bf16.mxu1 %v2805_v37  ;;  %v2890_v36 = vld [vmem:[%s3078_s30 + $0x4c8] ss:$16 sps:$4 sm:$0xff]   ;;  %v2895_v37 = vld [vmem:[%s3078_s30 + $0x4e4] ss:$16 sps:$4 sm:$0xff]  }
  0x74   : > { %1783 = vmatpush1.bf16.msra.mxu0 %v2800_v38  ;;  %1955 = vmatpush1.bf16.msra.mxu1 %v2803_v39  ;;  %v2898_v38 = vld [vmem:[%s3078_s30 + $0x4ec] ss:$16 sps:$4 sm:$0xff]   ;;  %v2893_v39 = vld [vmem:[%s3078_s30 + $0x4e0] ss:$16 sps:$4 sm:$0xff]  }
  0x75   : > { %1784 = vmatprep.subr.bf16.mxu0 %v2808_v40  ;;  %1956 = vmatprep.subr.bf16.mxu1 %v2811_v41  ;;  %v2896_v40 = vld [vmem:[%s3078_s30 + $0x4e8] ss:$16 sps:$4 sm:$0xff]   ;;  %v2901_v41 = vld [vmem:[%s3078_s30 + $0x504] ss:$16 sps:$4 sm:$0xff]  }
  0x78   : > { %1785 = vmatpush1.bf16.msra.mxu0 %v2806_v42  ;;  %1957 = vmatpush1.bf16.msra.mxu1 %v2809_v43  ;;  %v2904_v42 = vld [vmem:[%s3078_s30 + $0x50c] ss:$16 sps:$4 sm:$0xff]   ;;  %v2899_v43 = vld [vmem:[%s3078_s30 + $0x500] ss:$16 sps:$4 sm:$0xff]  }
  0x79   : > { %1786 = vmatprep.subr.bf16.mxu0 %v2814_v44  ;;  %1958 = vmatprep.subr.bf16.mxu1 %v2817_v45  ;;  %v2902_v44 = vld [vmem:[%s3078_s30 + $0x508] ss:$16 sps:$4 sm:$0xff]   ;;  %v2907_v45 = vld [vmem:[%s3078_s30 + $0x524] ss:$16 sps:$4 sm:$0xff]  }
  0x7c   : > { %1787 = vmatpush1.bf16.msra.mxu0 %v2812_v46  ;;  %1959 = vmatpush1.bf16.msra.mxu1 %v2815_v47  ;;  %v2910_v46 = vld [vmem:[%s3078_s30 + $0x52c] ss:$16 sps:$4 sm:$0xff]   ;;  %v2905_v47 = vld [vmem:[%s3078_s30 + $0x520] ss:$16 sps:$4 sm:$0xff]  }
  0x7d   : > { %1788 = vmatprep.subr.bf16.mxu0 %v2820_v48  ;;  %1960 = vmatprep.subr.bf16.mxu1 %v2823_v49  ;;  %v2908_v48 = vld [vmem:[%s3078_s30 + $0x528] ss:$16 sps:$4 sm:$0xff]   ;;  %v2913_v49 = vld [vmem:[%s3078_s30 + $0x544] ss:$16 sps:$4 sm:$0xff]  }
  0x80   : > { %1789 = vmatpush1.bf16.msra.mxu0 %v2818_v50  ;;  %1961 = vmatpush1.bf16.msra.mxu1 %v2821_v51  ;;  %v2916_v50 = vld [vmem:[%s3078_s30 + $0x54c] ss:$16 sps:$4 sm:$0xff]   ;;  %v2911_v51 = vld [vmem:[%s3078_s30 + $0x540] ss:$16 sps:$4 sm:$0xff]  }
  0x81   : > { %1790 = vmatprep.subr.bf16.mxu0 %v2826_v52  ;;  %1962 = vmatprep.subr.bf16.mxu1 %v2829_v53  ;;  %v2914_v52 = vld [vmem:[%s3078_s30 + $0x548] ss:$16 sps:$4 sm:$0xff]   ;;  %v2919_v53 = vld [vmem:[%s3078_s30 + $0x564] ss:$16 sps:$4 sm:$0xff]  }
  0x84   : > { %1791 = vmatpush1.bf16.msra.mxu0 %v2824_v54  ;;  %1963 = vmatpush1.bf16.msra.mxu1 %v2827_v55  ;;  %v2922_v54 = vld [vmem:[%s3078_s30 + $0x56c] ss:$16 sps:$4 sm:$0xff]   ;;  %v2917_v55 = vld [vmem:[%s3078_s30 + $0x560] ss:$16 sps:$4 sm:$0xff]  }
  0x85   : > { %1792 = vmatprep.subr.bf16.mxu0 %v2832_v56  ;;  %1964 = vmatprep.subr.bf16.mxu1 %v2835_v57  ;;  %v2920_v56 = vld [vmem:[%s3078_s30 + $0x568] ss:$16 sps:$4 sm:$0xff]   ;;  %v2925_v57 = vld [vmem:[%s3078_s30 + $0x584] ss:$16 sps:$4 sm:$0xff]  }
  0x88   : > { %1793 = vmatpush1.bf16.msra.mxu0 %v2830_v58  ;;  %1965 = vmatpush1.bf16.msra.mxu1 %v2833_v59  ;;  %v2928_v58 = vld [vmem:[%s3078_s30 + $0x58c] ss:$16 sps:$4 sm:$0xff]   ;;  %v2923_v59 = vld [vmem:[%s3078_s30 + $0x580] ss:$16 sps:$4 sm:$0xff]  }
  0x89   : > { %1794 = vmatprep.subr.bf16.mxu0 %v2838_v60  ;;  %1966 = vmatprep.subr.bf16.mxu1 %v2841_v61  ;;  %v2926_v60 = vld [vmem:[%s3078_s30 + $0x588] ss:$16 sps:$4 sm:$0xff]   ;;  %v2931_v61 = vld [vmem:[%s3078_s30 + $0x5a4] ss:$16 sps:$4 sm:$0xff]  }
  0x8c   : > { %1795 = vmatpush1.bf16.msra.mxu0 %v2836_v62  ;;  %1967 = vmatpush1.bf16.msra.mxu1 %v2839_v63  ;;  %v2934_v62 = vld [vmem:[%s3078_s30 + $0x5ac] ss:$16 sps:$4 sm:$0xff]   ;;  %v2929_v63 = vld [vmem:[%s3078_s30 + $0x5a0] ss:$16 sps:$4 sm:$0xff]  }
  0x8d   : > { %1796 = vmatprep.subr.bf16.mxu0 %v2844_v0  ;;  %1968 = vmatprep.subr.bf16.mxu1 %v2847_v1  ;;  %v2932_v0 = vld [vmem:[%s3078_s30 + $0x5a8] ss:$16 sps:$4 sm:$0xff]   ;;  %v2937_v1 = vld [vmem:[%s3078_s30 + $0x5c4] ss:$16 sps:$4 sm:$0xff]  }
  0x90   : > { %1797 = vmatpush1.bf16.msra.mxu0 %v2842_v2  ;;  %1969 = vmatpush1.bf16.msra.mxu1 %v2845_v3  ;;  %v2940_v2 = vld [vmem:[%s3078_s30 + $0x5cc] ss:$16 sps:$4 sm:$0xff]   ;;  %v2935_v3 = vld [vmem:[%s3078_s30 + $0x5c0] ss:$16 sps:$4 sm:$0xff]  }
  0x91   : > { %1809 = vmatprep.subr.bf16.mxu0 %v2853_v4  ;;  %1981 = vmatprep.subr.bf16.mxu1 %v2856_v5  ;;  %v2938_v4 = vld [vmem:[%s3078_s30 + $0x5c8] ss:$16 sps:$4 sm:$0xff]   ;;  %v2943_v5 = vld [vmem:[%s3078_s30 + $0x5e4] ss:$16 sps:$4 sm:$0xff]  }
  0x93   : > { %1799 = vmatmul.mubr.bf16.vlgmr.msra.gmra.mrb[0].mxu0 %v2848_v6  ;;  %1971 = vmatmul.mubr.bf16.vlgmr.msra.gmra.mrb[0].mxu1 %v2848_v6  ;;  %v2946_v6 = vld [vmem:[%s3078_s30 + $0x5ec] ss:$16 sps:$4 sm:$0xff]  }
  0x94   : > { %1810 = vmatpush1.bf16.msra.mxu0 %v2851_v7  ;;  %1982 = vmatpush1.bf16.msra.mxu1 %v2854_v8  ;;  %v2941_v7 = vld [vmem:[%s3078_s30 + $0x5e0] ss:$16 sps:$4 sm:$0xff]   ;;  %v2944_v8 = vld [vmem:[%s3078_s30 + $0x5e8] ss:$16 sps:$4 sm:$0xff]  }
  0x95   : > { %1811 = vmatprep.subr.bf16.mxu0 %v2859_v9  ;;  %1983 = vmatprep.subr.bf16.mxu1 %v2862_v10  ;;  %v2952_v9 = vld [vmem:[%s3078_s30 + $0x604] ss:$16 sps:$4 sm:$0xff]   ;;  %v2955_v10 = vld [vmem:[%s3078_s30 + $0x60c] ss:$16 sps:$4 sm:$0xff]  }
  0x96   : > { %1841 = vmatprep.mubr.bf16.mxu0 %v2949_v11  ;;  %2013 = vmatprep.mubr.bf16.mxu1 %v2949_v11  ;;  %v2947_v11 = vld [vmem:[%s3399_s0 + $0x10] ss:$28 sps:$4 sm:$0xff]  }
  0x98   : > { %1812 = vmatpush1.bf16.msra.mxu0 %v2857_v12  ;;  %1984 = vmatpush1.bf16.msra.mxu1 %v2860_v13  ;;  %v2950_v12 = vld [vmem:[%s3078_s30 + $0x600] ss:$16 sps:$4 sm:$0xff]   ;;  %v2953_v13 = vld [vmem:[%s3078_s30 + $0x608] ss:$16 sps:$4 sm:$0xff]  }
  0x99   : > { %1813 = vmatprep.subr.bf16.mxu0 %v2865_v14  ;;  %1985 = vmatprep.subr.bf16.mxu1 %v2868_v15  ;;  %v2958_v14 = vld [vmem:[%s3078_s30 + $0x624] ss:$16 sps:$4 sm:$0xff]   ;;  %v2961_v15 = vld [vmem:[%s3078_s30 + $0x62c] ss:$16 sps:$4 sm:$0xff]  }
  0x9c   : > { %1814 = vmatpush1.bf16.msra.mxu0 %v2863_v16  ;;  %1986 = vmatpush1.bf16.msra.mxu1 %v2866_v17  ;;  %v2956_v16 = vld [vmem:[%s3078_s30 + $0x620] ss:$16 sps:$4 sm:$0xff]   ;;  %v2959_v17 = vld [vmem:[%s3078_s30 + $0x628] ss:$16 sps:$4 sm:$0xff]  }
  0x9d   : > { %1815 = vmatprep.subr.bf16.mxu0 %v2871_v18  ;;  %1987 = vmatprep.subr.bf16.mxu1 %v2874_v19  ;;  %v2964_v18 = vld [vmem:[%s3078_s30 + $0x644] ss:$16 sps:$4 sm:$0xff]   ;;  %v2967_v19 = vld [vmem:[%s3078_s30 + $0x64c] ss:$16 sps:$4 sm:$0xff]  }
  0xa0   : > { %1816 = vmatpush1.bf16.msra.mxu0 %v2869_v20  ;;  %1988 = vmatpush1.bf16.msra.mxu1 %v2872_v21  ;;  %v2962_v20 = vld [vmem:[%s3078_s30 + $0x640] ss:$16 sps:$4 sm:$0xff]   ;;  %v2965_v21 = vld [vmem:[%s3078_s30 + $0x648] ss:$16 sps:$4 sm:$0xff]  }
  0xa1   : > { %1817 = vmatprep.subr.bf16.mxu0 %v2877_v22  ;;  %1989 = vmatprep.subr.bf16.mxu1 %v2880_v23  ;;  %v2970_v22 = vld [vmem:[%s3078_s30 + $0x664] ss:$16 sps:$4 sm:$0xff]   ;;  %v2973_v23 = vld [vmem:[%s3078_s30 + $0x66c] ss:$16 sps:$4 sm:$0xff]  }
  0xa4   : > { %1818 = vmatpush1.bf16.msra.mxu0 %v2875_v24  ;;  %1990 = vmatpush1.bf16.msra.mxu1 %v2878_v25  ;;  %v2968_v24 = vld [vmem:[%s3078_s30 + $0x660] ss:$16 sps:$4 sm:$0xff]   ;;  %v2971_v25 = vld [vmem:[%s3078_s30 + $0x668] ss:$16 sps:$4 sm:$0xff]  }
  0xa5   : > { %1819 = vmatprep.subr.bf16.mxu0 %v2883_v26  ;;  %1991 = vmatprep.subr.bf16.mxu1 %v2886_v27  ;;  %v2979_v26 = vld [vmem:[%s3078_s30 + $0x68c] ss:$16 sps:$4 sm:$0xff]   ;;  %v2974_v27 = vld [vmem:[%s3078_s30 + $0x680] ss:$16 sps:$4 sm:$0xff]  }
  0xa8   : > { %1820 = vmatpush1.bf16.msra.mxu0 %v2881_v30  ;;  %1992 = vmatpush1.bf16.msra.mxu1 %v2884_v31  ;;  %v2985_v30 = vld [vmem:[%s3078_s30 + $0x6ac] ss:$16 sps:$4 sm:$0xff]   ;;  %v2980_v31 = vld [vmem:[%s3078_s30 + $0x6a0] ss:$16 sps:$4 sm:$0xff]  }
  0xa9   : > { %1821 = vmatprep.subr.bf16.mxu0 %v2889_v32  ;;  %1993 = vmatprep.subr.bf16.mxu1 %v2892_v34  ;;  %v2983_v32 = vld [vmem:[%s3078_s30 + $0x6a8] ss:$16 sps:$4 sm:$0xff]  }
  0xaa   : > { %v2986_v34 = vld [vmem:[%s3399_s0 + $0x18] ss:$28 sps:$4 sm:$0xff]  }
  0xac   : > { %1822 = vmatpush1.bf16.msra.mxu0 %v2887_v35  ;;  %1994 = vmatpush1.bf16.msra.mxu1 %v2890_v36 }
  0xad   : > { %1823 = vmatprep.subr.bf16.mxu0 %v2895_v37  ;;  %1995 = vmatprep.subr.bf16.mxu1 %v2898_v38 }
  0xb0   : > { %1824 = vmatpush1.bf16.msra.mxu0 %v2893_v39  ;;  %1996 = vmatpush1.bf16.msra.mxu1 %v2896_v40 }
  0xb1   : > { %1825 = vmatprep.subr.bf16.mxu0 %v2901_v41  ;;  %1997 = vmatprep.subr.bf16.mxu1 %v2904_v42 }
  0xb4   : > { %1826 = vmatpush1.bf16.msra.mxu0 %v2899_v43  ;;  %1998 = vmatpush1.bf16.msra.mxu1 %v2902_v44 }
  0xb5   : > { %1827 = vmatprep.subr.bf16.mxu0 %v2907_v45  ;;  %1999 = vmatprep.subr.bf16.mxu1 %v2910_v46 }
  0xb8   : > { %1828 = vmatpush1.bf16.msra.mxu0 %v2905_v47  ;;  %2000 = vmatpush1.bf16.msra.mxu1 %v2908_v48 }
  0xb9   : > { %1829 = vmatprep.subr.bf16.mxu0 %v2913_v49  ;;  %2001 = vmatprep.subr.bf16.mxu1 %v2916_v50 }
  0xbc   : > { %1830 = vmatpush1.bf16.msra.mxu0 %v2911_v51  ;;  %2002 = vmatpush1.bf16.msra.mxu1 %v2914_v52 }
  0xbd   : > { %1831 = vmatprep.subr.bf16.mxu0 %v2919_v53  ;;  %2003 = vmatprep.subr.bf16.mxu1 %v2922_v54 }
  0xc0   : > { %1832 = vmatpush1.bf16.msra.mxu0 %v2917_v55  ;;  %2004 = vmatpush1.bf16.msra.mxu1 %v2920_v56 }
  0xc1   : > { %1833 = vmatprep.subr.bf16.mxu0 %v2925_v57  ;;  %2005 = vmatprep.subr.bf16.mxu1 %v2928_v58 }
  0xc4   : > { %1834 = vmatpush1.bf16.msra.mxu0 %v2923_v59  ;;  %2006 = vmatpush1.bf16.msra.mxu1 %v2926_v60 }
  0xc5   : > { %1835 = vmatprep.subr.bf16.mxu0 %v2931_v61  ;;  %2007 = vmatprep.subr.bf16.mxu1 %v2934_v62 }
  0xc8   : > { %1836 = vmatpush1.bf16.msra.mxu0 %v2929_v63  ;;  %2008 = vmatpush1.bf16.msra.mxu1 %v2932_v0 }
  0xc9   : > { %1837 = vmatprep.subr.bf16.mxu0 %v2937_v1  ;;  %2009 = vmatprep.subr.bf16.mxu1 %v2940_v2 }
  0xcc   : > { %1838 = vmatpush1.bf16.msra.mxu0 %v2935_v3  ;;  %2010 = vmatpush1.bf16.msra.mxu1 %v2938_v4 }
  0xcd   : > { %1839 = vmatprep.subr.bf16.mxu0 %v2943_v5  ;;  %2011 = vmatprep.subr.bf16.mxu1 %v2946_v6 }
  0xd0   : > { %1840 = vmatpush1.bf16.msra.mxu0 %v2941_v7  ;;  %2012 = vmatpush1.bf16.msra.mxu1 %v2944_v8 }
  0xd1   : > { %1852 = vmatprep.subr.bf16.mxu0 %v2952_v9  ;;  %2024 = vmatprep.subr.bf16.mxu1 %v2955_v10 }
  0xd3   : > { %1842 = vmatmul.mubr.bf16.vlgmr.msra.gmra.mrb[0].mxu0 %v2947_v11  ;;  %2014 = vmatmul.mubr.bf16.vlgmr.msra.gmra.mrb[0].mxu1 %v2947_v11 }
  0xd4   : > { %1853 = vmatpush1.bf16.msra.mxu0 %v2950_v12  ;;  %2025 = vmatpush1.bf16.msra.mxu1 %v2953_v13 }
  0xd5   : > { %1854 = vmatprep.subr.bf16.mxu0 %v2958_v14  ;;  %2026 = vmatprep.subr.bf16.mxu1 %v2961_v15 }
  0xd6   : > { %1884 = vmatprep.mubr.bf16.mxu0 %v3015_v33  ;;  %2056 = vmatprep.mubr.bf16.mxu1 %v3015_v33  ;;  %v2976_v33 = vld [vmem:[%s3078_s30 + $0x684] ss:$16 sps:$4 sm:$0xff]   ;;  %v597_v35 = vpop.permute.xlu0 %596  ;;  %s346_s30 = scalar_lea.vmem %s3403_s4, %s2585_s27 }
  0xd8   : > { %1855 = vmatpush1.bf16.msra.mxu0 %v2956_v16  ;;  %2027 = vmatpush1.bf16.msra.mxu1 %v2959_v17 }
  0xd9   : > { %1856 = vmatprep.subr.bf16.mxu0 %v2964_v18  ;;  %2028 = vmatprep.subr.bf16.mxu1 %v2967_v19 }
  0xdc   : > { %1857 = vmatpush1.bf16.msra.mxu0 %v2962_v20  ;;  %2029 = vmatpush1.bf16.msra.mxu1 %v2965_v21 }
  0xdd   : > { %1858 = vmatprep.subr.bf16.mxu0 %v2970_v22  ;;  %2030 = vmatprep.subr.bf16.mxu1 %v2973_v23 }
  0xe0   : > { %1859 = vmatpush1.bf16.msra.mxu0 %v2968_v24  ;;  %2031 = vmatpush1.bf16.msra.mxu1 %v2971_v25  ;;  %v2107_v25 = vld [vmem:[%s346_s30] sm:$0xff] }
  0xe1   : > { %1860 = vmatprep.subr.bf16.mxu0 %v2976_v33  ;;  %2032 = vmatprep.subr.bf16.mxu1 %v2979_v26 }
  0xe4   : > { %1861 = vmatpush1.bf16.msra.mxu0 %v2974_v27  ;;  %2033 = vmatpush1.bf16.msra.mxu1 %v2977_v28  ;;  %v2108_v27 = vld [vmem:[%s346_s30 + $0x8] sm:$0xff] }
  0xe5   : > { %1862 = vmatprep.subr.bf16.mxu0 %v2982_v29  ;;  %2034 = vmatprep.subr.bf16.mxu1 %v2985_v30 }
  0xe8   : > { %1863 = vmatpush1.bf16.msra.mxu0 %v2980_v31  ;;  %2035 = vmatpush1.bf16.msra.mxu1 %v2983_v32  ;;  %v2105_v31 = vld [vmem:[%s341_s9] sm:$0xff] }
  0xeb   : > { %2577 = vmatmul.mubr.msk.bf16.vlgmr.msra.gmra.mrb[0].mxu0 %vm1719_vm0, %v2986_v34  ;;  %2578 = vmatmul.mubr.msk.bf16.vlgmr.msra.gmra.mrb[0].mxu1 %vm1719_vm0, %v2986_v34 }
  0xed   : > { %v602_v36 = vpop.permute.xlu0 %601 }
 0x1be   : > { %v1886_v37 = vpop.f32.mrb[0].mxu0  ;;  %v2058_v38 = vpop.f32.mrb[0].mxu1 }
 0x1bf   : > { %v3324_v39 = vadd.f32 %v1886_v37, %v597_v35  ;;  %v3326_v40 = vadd.f32 %v2058_v38, %v597_v35  ;;  %v1888_v41 = vpop.f32.mrb[1].mxu0  ;;  %v2060_v42 = vpop.f32.mrb[1].mxu1 }
 0x1c0   : > { %v3328_v43 = vadd.f32 %v1888_v41, %v597_v35  ;;  %v1890_v44 = vpop.f32.mrb[2].mxu0  ;;  %v2062_v45 = vpop.f32.mrb[2].mxu1  ;;  %v3332_v47 = vadd.f32 %v2060_v42, %v597_v35  ;;  %v2106_v35 = vld [vmem:[%s341_s9 + $0x8] sm:$0xff]  ;;  %v2109_v41 = vld [vmem:[%s355_s13] sm:$0xff] }
 0x1c1   : > { %v2079_v46 = vmul.f32 %v3324_v39, %v3324_v39  ;;  %v3334_v48 = vadd.f32 %v1890_v44, %v602_v36  ;;  %v1892_v49 = vpop.f32.mrb[3].mxu0  ;;  %v2064_v50 = vpop.f32.mrb[3].mxu1  ;;  %v2081_v54 = vmul.f32 %v3326_v40, %v3326_v40  ;;  %v3346_v56 = vadd.f32 %v2062_v45, %v602_v36  ;;  %v2110_v42 = vld [vmem:[%s355_s13 + $0x8] sm:$0xff] }
 0x1c2   : > { %v2080_v51 = vmul.f32 %v3328_v43, %v3328_v43  ;;  %v3338_v52 = vadd.f32 %v1892_v49, %v602_v36  ;;  %v2067_v53 = vadd.f32 %v3328_v43, %v3324_v39  ;;  %v2082_v61 = vmul.f32 %v3332_v47, %v3332_v47 }
 0x1c3   : > { %v2083_v55 = vmul.f32 %v3334_v48, %v3334_v48  ;;  %v2085_v2 = vmul.f32 %v3346_v56, %v3346_v56  ;;  %v3359_v3 = vadd.f32 %v2064_v50, %v602_v36  ;;  %v2111_v50 = vld [vmem:[%s355_s13 + $0x10] sm:$0xff] }
 0x1c4   : > { %v2072_v57 = vadd.f32 %v3338_v52, %v3334_v48  ;;  %v2084_v58 = vmul.f32 %v3338_v52, %v3338_v52  ;;  %v2068_v59 = vadd.f32 %v3326_v40, %v2067_v53  ;;  %v2087_v60 = vadd.f32 %v2080_v51, %v2079_v46  ;;  %v2112_v51 = vld [vmem:[%s355_s13 + $0x18] sm:$0xff] }
 0x1c5   : > { %v2086_v7 = vmul.f32 %v3359_v3, %v3359_v3  ;;  %v2167_v53 = vunpack.c.l.bf16 %v2109_v41 }
 0x1c6   : > { %v2069_v62 = vadd.f32 %v3332_v47, %v2068_v59  ;;  %v2088_v63 = vadd.f32 %v2087_v60, %v2081_v54  ;;  %v2073_v0 = vadd.f32 %v3346_v56, %v2072_v57  ;;  %v2092_v1 = vadd.f32 %v2084_v58, %v2083_v55 }
 0x1c7   : > { %v2168_v54 = vunpack.c.h.bf16 %v2109_v41  ;;  %v2169_v55 = vunpack.c.l.bf16 %v2110_v42  ;;  %v2170_v57 = vunpack.c.h.bf16 %v2110_v42 }
 0x1c8   : > { %2070 = vadd.xlane.f32.xlu1 %v2069_v62  ;;  %v2089_v4 = vadd.f32 %v2088_v63, %v2082_v61  ;;  %v2074_v5 = vadd.f32 %v3359_v3, %v2073_v0  ;;  %v2093_v6 = vadd.f32 %v2092_v1, %v2085_v2  ;;  %v2171_v63 = vunpack.c.l.bf16 %v2111_v50 }
 0x1c9   : > { %v2172_v0 = vunpack.c.h.bf16 %v2111_v50 }
 0x1ca   : > { %2090 = vadd.xlane.f32.xlu0 %v2089_v4  ;;  %v2094_v8 = vadd.f32 %v2093_v6, %v2086_v7 }
 0x1cc   : > { %2075 = vadd.xlane.f32.xlu1 %v2074_v5 }
 0x1d0   : > { %2095 = vadd.xlane.f32.xlu1 %v2094_v8 }
 0x255   : > { %v2071_v9 = vpop.xlane.xlu1 %2070 }
 0x256   : > { %v2077_v10 = vmul.f32 0.001953125, %v2071_v9 }
 0x257   : > { %v2091_v11 = vpop.xlane.xlu0 %2090 }
 0x258   : > { %v2099_v12 = vmul.f32 %v2077_v10, %v2077_v10  ;;  %v2097_v13 = vmul.f32 0.001953125, %v2091_v11 }
 0x259   : > { %v2076_v14 = vpop.xlane.xlu1 %2075 }
 0x25a   : > { %v2101_v15 = vsub.f32 %v2097_v13, %v2099_v12  ;;  %v2078_v16 = vmul.f32 0.001953125, %v2076_v14 }
 0x25c   : > { %v2103_v17 = vmax.f32 %v2101_v15, 0.0  ;;  %v2100_v20 = vmul.f32 %v2078_v16, %v2078_v16 }
 0x25d   : > { %v2096_v18 = vpop.xlane.xlu1 %2095 }
 0x25e   : > { %v2113_v19 = vadd.f32 1e-05, %v2103_v17  ;;  %v2098_v21 = vmul.f32 0.001953125, %v2096_v18 }
 0x260   : > { %2987 = vrsqrt.f32 %v2113_v19  ;;  %v2102_v22 = vsub.f32 %v2098_v21, %v2100_v20 }
 0x262   : > { %v2104_v23 = vmax.f32 %v2102_v22, 0.0 }
 0x264   : > { %v2114_v24 = vadd.f32 1e-05, %v2104_v23 }
 0x266   : > { %2989 = vrsqrt.f32 %v2114_v24 }
 0x26a   : > { %v2988_v33 = vpop.eup %2987 }
 0x26b   : > { %v2117_v26 = vmul.f32 %v2988_v33, %v2107_v25 }
 0x26d   : > { %2125 = vperm.xlu1 %2652, %v2117_v26   ;;  %v2119_v30 = vmul.f32 %v2117_v26, %v2077_v10 }
 0x26f   : > { %v2121_v32 = vsub.f32 %v2105_v31, %v2119_v30 }
 0x270   : > { %v2990_v28 = vpop.eup %2989 }
 0x271   : > { %v2118_v29 = vmul.f32 %v2990_v28, %v2108_v27 }
 0x273   : > { %2130 = vperm.xlu1 %2652, %v2118_v29   ;;  %v2120_v34 = vmul.f32 %v2118_v29, %v2078_v16 }
 0x275   : > { %v2122_v36 = vsub.f32 %v2106_v35, %v2120_v34 }
 0x277   : > { %2143 = vperm.xlu1 %2652, %v2121_v32  }
 0x27b   : > { %2148 = vperm.xlu1 %2652, %v2122_v36  }
 0x2ec   : > { %v2126_v37 = vpop.permute.xlu1 %2125 }
 0x2ed   : > { %v2133_v44 = vmul.f32 %v3324_v39, %v2126_v37  ;;  %v2134_v45 = vmul.f32 %v3328_v43, %v2126_v37  ;;  %v2135_v46 = vmul.f32 %v3326_v40, %v2126_v37  ;;  %v2136_v49 = vmul.f32 %v3332_v47, %v2126_v37 }
 0x2ee   : > { %v2173_v39 = vunpack.c.l.bf16 %v2112_v51  ;;  %v2174_v43 = vunpack.c.h.bf16 %v2112_v51 }
 0x2f2   : > { %v2131_v38 = vpop.permute.xlu1 %2130 }
 0x2f3   : > { %v2137_v4 = vmul.f32 %v3334_v48, %v2131_v38  ;;  %v2138_v5 = vmul.f32 %v3338_v52, %v2131_v38  ;;  %v2139_v6 = vmul.f32 %v3346_v56, %v2131_v38  ;;  %v2140_v7 = vmul.f32 %v3359_v3, %v2131_v38 }
 0x2f6   : > { %v2144_v58 = vpop.permute.xlu1 %2143 }
 0x2f7   : > { %v2151_v59 = vadd.f32 %v2144_v58, %v2133_v44  ;;  %v2152_v60 = vadd.f32 %v2144_v58, %v2134_v45  ;;  %v2153_v61 = vadd.f32 %v2144_v58, %v2135_v46  ;;  %v2154_v62 = vadd.f32 %v2144_v58, %v2136_v49 }
 0x2f9   : > { %v2159_v1 = vmax.f32 %v2151_v59, 0.0  ;;  %v2160_v40 = vmax.f32 %v2152_v60, 0.0  ;;  %v2161_v2 = vmax.f32 %v2153_v61, 0.0  ;;  %v2162_v47 = vmax.f32 %v2154_v62, 0.0 }
 0x2fa   : > { %v2149_v8 = vpop.permute.xlu1 %2148 }
 0x2fb   : > { %v2175_v9 = vadd.f32 %v2167_v53, %v2159_v1  ;;  %v2176_v10 = vadd.f32 %v2168_v54, %v2160_v40  ;;  %v2177_v11 = vadd.f32 %v2169_v55, %v2161_v2  ;;  %v2178_v12 = vadd.f32 %v2170_v57, %v2162_v47 }
 0x2fc   : > { %v2155_v13 = vadd.f32 %v2149_v8, %v2137_v4  ;;  %v2156_v14 = vadd.f32 %v2149_v8, %v2138_v5  ;;  %v2157_v15 = vadd.f32 %v2149_v8, %v2139_v6  ;;  %v2158_v48 = vadd.f32 %v2149_v8, %v2140_v7 }
 0x2fd   : > { %v2589_v16 = vpack.c.bf16 %v2176_v10, %v2175_v9  ;;  %v2590_v52 = vpack.c.bf16 %v2178_v12, %v2177_v11 }
 0x2fe   : > { %v2163_v17 = vmax.f32 %v2155_v13, 0.0  ;;  %v2164_v56 = vmax.f32 %v2156_v14, 0.0  ;;  %v2165_v18 = vmax.f32 %v2157_v15, 0.0  ;;  %v2166_v3 = vmax.f32 %v2158_v48, 0.0 }
 0x2ff   : > { %2207 = vst [vmem:[%s365_s16] sm:$0xff] %v2589_v16  ;;  %2208 = vst [vmem:[%s365_s16 + $0x8] sm:$0xff] %v2590_v52 }
 0x300   : > { %v2179_v19 = vadd.f32 %v2171_v63, %v2163_v17  ;;  %v2180_v20 = vadd.f32 %v2172_v0, %v2164_v56  ;;  %v2181_v21 = vadd.f32 %v2173_v39, %v2165_v18  ;;  %v2182_v22 = vadd.f32 %v2174_v43, %v2166_v3 }
 0x302   : > { %v2591_v23 = vpack.c.bf16 %v2180_v20, %v2179_v19  ;;  %v2592_v24 = vpack.c.bf16 %v2182_v22, %v2181_v21 }
 0x304   : > { %2209 = vst [vmem:[%s365_s16 + $0x10] sm:$0xff] %v2591_v23  ;;  %2210 = vst [vmem:[%s365_s16 + $0x18] sm:$0xff] %v2592_v24 }
 0x305 PF: > { %s16_s23 = sadd.s32 1, %s3013_s23   ;;  %s3406_s21 = smov %s3009_s22 }
 0x306   : > { %p13_p5 = scmp.ge.s32.totalorder %s16_s23, 4   ;;  %s3407_s22 = smov %s3409_s24 }
 0x308   :  { %15 = sbr.rel (!%p13_p5) target bundleno = 2 (0x2), region = 83 }

// kernel: unet_adain_forward.18
= control target key start
LH: loop header
LB: loop body
LE: loop exit
PB: predicated region body
PF: predicated region fallthrough
CT: control target
= control target key end

     0   :  { %s5398_s18 = smov 0   ;;  %s5400_s19 = smov 0   ;;  %s6956_s0 = inlined_call_operand.vmem [shape: bf16[8,432], index: 0, kind: input, shape index: {}]   ;;  %s6957_s1 = inlined_call_operand.vmem [shape: f32[8,1], index: 1, kind: input, shape index: {}]   ;;  %s6958_s2 = inlined_call_operand.vmem [shape: bf16[2,432,4096], index: 2, kind: input, shape index: {}]   ;;  %s6959_s3 = inlined_call_operand.vmem [shape: bf16[2,8,4096], index: 3, kind: output, shape index: {0}]   ;;  %s6960_s4 = inlined_call_operand.vmem [shape: f32[2,8,1], index: 4, kind: output, shape index: {1}]   ;;  %s6961_s5 = inlined_call_operand.vmem [shape: f32[2,8,1], index: 5, kind: output, shape index: {2}]  }
   0x1   :  { %s5402_s20 = smov 0   ;;  %s5404_s21 = smov 0  }
   0x2   :  { %s5406_s22 = smov 0   ;;  %s5408_s23 = smov 0  }
   0x3   :  { %s5410_s24 = smov 0  }
   0x4 LB: > { %s25_s25 = sadd.s32 1, %s5356_s22  ;;  %s28_s26 = sadd.s32 1, %s5360_s23  ;;  %s5364_s24 = sphi %s5410_s24, %s16_s24   ;;  %s5360_s23 = sphi %s5408_s23, %s6967_s23   ;;  %s5356_s22 = sphi %s5406_s22, %s6966_s22   ;;  %s5352_s21 = sphi %s5404_s21, %s6965_s21   ;;  %s5348_s20 = sphi %s5402_s20, %s6964_s20   ;;  %s5344_s19 = sphi %s5400_s19, %s6963_s19   ;;  %s5340_s18 = sphi %s5398_s18, %s6962_s18  }
   0x5   : > { %p26_p0 = scmp.ge.s32.totalorder %s25_s25, 2  ;;  %p86_p1 = scmp.ne.s32.totalorder %s5344_s19, %s5340_s18 }
   0x6   : > { %p87_p2 = scmp.eq.s32.totalorder %s5364_s24, 0  ;;  %s79_s30 = sadd.s32 1, %s5344_s19 }
   0x7   : > { %s6969_s25 = smov (%p26_p0, %s25_s25), 0  ;;  %s6971_s26 = smov (!%p26_p0, %s28_s26), %s5360_s23 }
   0x8   : > { %p88_p3 = por %p87_p2, %p86_p1  ;;  %p30_p4 = scmp.ge.s32.totalorder %s6971_s26, 2 }
   0x9   : > { %s75_s27 = ssub.s32 %s5356_s22, %s6969_s25  ;;  %p4724_p6 = scmp.ge.s32.totalorder %s5364_s24, 4 }
   0xa   : > { %s6973_s26 = smov (%p30_p4, %s6971_s26), 0 }
   0xb   : > { %s74_s28 = ssub.s32 %s5360_s23, %s6973_s26  ;;  %198 = sbr.rel (%p4724_p6) target bundleno = 242 (0xf2), region = 24 }
   0xc   : > { %s76_s29 = sor.u32 %s75_s27, %s74_s28 }
   0xd   : > { %p77_p5 = scmp.eq.s32.totalorder %s76_s29, 0 }
   0xf   : > { %s5449_s6 = scalar_select %p77_p5, %s5344_s19, %s79_s30  }
  0x12   : > { %201 = sbr.rel (!%p88_p3) target bundleno = 242 (0xf2), region = 28  ;;  %s203_s7 = sand.u32 (%p88_p3), 1, %s5344_s19  }
  0x13   : > { %s5244_s8 = smul.u32 (%p88_p3), 3456, %s203_s7  ;;  %s4725_s9 = sshll.u32 (%p88_p3), %s5356_s22, 4 }
  0x14   : > { %s5245_s10 = smul.u32 (%p88_p3), 1728, %s5360_s23 }
  0x15   : > { %s5463_s16 = scalar_lea.vmem (%p88_p3), [#allocation2], %s5244_s8 }
  0x16   : > { %s208_s11 = sadd.s32 (%p88_p3), %s5245_s10, %s4725_s9 }
  0x17   : > { %s4726_s12 = sshll.u32 (%p88_p3), %s208_s11, 2 }
  0x18   : > { %s5458_s15 = scalar_lea.vmem (%p88_p3), %s6958_s2, %s4726_s12 }
  0x19   : > { %v223_v0 = vld [vmem:[%s5458_s15] sm:$0xff]  ;;  %v225_v1 = vld [vmem:[%s5458_s15 + $0x8] sm:$0xff]  ;;  %v227_v2 = vld [vmem:[%s5458_s15 + $0x10] sm:$0xff] }
  0x1a   : > { %224 = vst [vmem:[%s5463_s16] sm:$0xff] %v223_v0  ;;  %226 = vst [vmem:[%s5463_s16 + $0x8] sm:$0xff] %v225_v1  ;;  %v229_v3 = vld [vmem:[%s5458_s15 + $0x18] sm:$0xff]  ;;  %v231_v4 = vld [vmem:[%s5458_s15 + $0x20] sm:$0xff] }
  0x1b   : > { %228 = vst [vmem:[%s5463_s16 + $0x10] sm:$0xff] %v227_v2  ;;  %v233_v5 = vld [vmem:[%s5458_s15 + $0x28] sm:$0xff]  ;;  %230 = vst [vmem:[%s5463_s16 + $0x18] sm:$0xff] %v229_v3  ;;  %v235_v6 = vld [vmem:[%s5458_s15 + $0x30] sm:$0xff] }
  0x1c   : > { %232 = vst [vmem:[%s5463_s16 + $0x20] sm:$0xff] %v231_v4  ;;  %234 = vst [vmem:[%s5463_s16 + $0x28] sm:$0xff] %v233_v5  ;;  %v237_v7 = vld [vmem:[%s5458_s15 + $0x38] sm:$0xff]  ;;  %v239_v8 = vld [vmem:[%s5458_s15 + $0x80] sm:$0xff] }
  0x1d   : > { %236 = vst [vmem:[%s5463_s16 + $0x30] sm:$0xff] %v235_v6  ;;  %238 = vst [vmem:[%s5463_s16 + $0x38] sm:$0xff] %v237_v7  ;;  %v241_v9 = vld [vmem:[%s5458_s15 + $0x88] sm:$0xff]  ;;  %v243_v10 = vld [vmem:[%s5458_s15 + $0x90] sm:$0xff] }
  0x1e   : > { %240 = vst [vmem:[%s5463_s16 + $0x40] sm:$0xff] %v239_v8  ;;  %v245_v11 = vld [vmem:[%s5458_s15 + $0x98] sm:$0xff]  ;;  %242 = vst [vmem:[%s5463_s16 + $0x48] sm:$0xff] %v241_v9  ;;  %v247_v12 = vld [vmem:[%s5458_s15 + $0xa0] sm:$0xff] }
  0x1f   : > { %244 = vst [vmem:[%s5463_s16 + $0x50] sm:$0xff] %v243_v10  ;;  %246 = vst [vmem:[%s5463_s16 + $0x58] sm:$0xff] %v245_v11  ;;  %v249_v13 = vld [vmem:[%s5458_s15 + $0xa8] sm:$0xff]  ;;  %v251_v14 = vld [vmem:[%s5458_s15 + $0xb0] sm:$0xff] }
  0x20   : > { %248 = vst [vmem:[%s5463_s16 + $0x60] sm:$0xff] %v247_v12  ;;  %250 = vst [vmem:[%s5463_s16 + $0x68] sm:$0xff] %v249_v13  ;;  %v253_v15 = vld [vmem:[%s5458_s15 + $0xb8] sm:$0xff]  ;;  %v255_v16 = vld [vmem:[%s5458_s15 + $0x100] sm:$0xff] }
  0x21   : > { %252 = vst [vmem:[%s5463_s16 + $0x70] sm:$0xff] %v251_v14  ;;  %v257_v17 = vld [vmem:[%s5458_s15 + $0x108] sm:$0xff]  ;;  %254 = vst [vmem:[%s5463_s16 + $0x78] sm:$0xff] %v253_v15  ;;  %v259_v18 = vld [vmem:[%s5458_s15 + $0x110] sm:$0xff] }
  0x22   : > { %256 = vst [vmem:[%s5463_s16 + $0x80] sm:$0xff] %v255_v16  ;;  %258 = vst [vmem:[%s5463_s16 + $0x88] sm:$0xff] %v257_v17  ;;  %v261_v19 = vld [vmem:[%s5458_s15 + $0x118] sm:$0xff]  ;;  %v263_v20 = vld [vmem:[%s5458_s15 + $0x120] sm:$0xff] }
  0x23   : > { %260 = vst [vmem:[%s5463_s16 + $0x90] sm:$0xff] %v259_v18  ;;  %262 = vst [vmem:[%s5463_s16 + $0x98] sm:$0xff] %v261_v19  ;;  %v265_v21 = vld [vmem:[%s5458_s15 + $0x128] sm:$0xff]  ;;  %v267_v22 = vld [vmem:[%s5458_s15 + $0x130] sm:$0xff] }
  0x24   : > { %264 = vst [vmem:[%s5463_s16 + $0xa0] sm:$0xff] %v263_v20  ;;  %v269_v23 = vld [vmem:[%s5458_s15 + $0x138] sm:$0xff]  ;;  %266 = vst [vmem:[%s5463_s16 + $0xa8] sm:$0xff] %v265_v21  ;;  %v271_v24 = vld [vmem:[%s5458_s15 + $0x180] sm:$0xff] }
  0x25   : > { %268 = vst [vmem:[%s5463_s16 + $0xb0] sm:$0xff] %v267_v22  ;;  %270 = vst [vmem:[%s5463_s16 + $0xb8] sm:$0xff] %v269_v23  ;;  %v273_v25 = vld [vmem:[%s5458_s15 + $0x188] sm:$0xff]  ;;  %v275_v26 = vld [vmem:[%s5458_s15 + $0x190] sm:$0xff] }
  0x26   : > { %272 = vst [vmem:[%s5463_s16 + $0xc0] sm:$0xff] %v271_v24  ;;  %274 = vst [vmem:[%s5463_s16 + $0xc8] sm:$0xff] %v273_v25  ;;  %v277_v27 = vld [vmem:[%s5458_s15 + $0x198] sm:$0xff]  ;;  %v279_v28 = vld [vmem:[%s5458_s15 + $0x1a0] sm:$0xff] }
  0x27   : > { %276 = vst [vmem:[%s5463_s16 + $0xd0] sm:$0xff] %v275_v26  ;;  %v281_v29 = vld [vmem:[%s5458_s15 + $0x1a8] sm:$0xff]  ;;  %278 = vst [vmem:[%s5463_s16 + $0xd8] sm:$0xff] %v277_v27  ;;  %v283_v30 = vld [vmem:[%s5458_s15 + $0x1b0] sm:$0xff] }
  0x28   : > { %280 = vst [vmem:[%s5463_s16 + $0xe0] sm:$0xff] %v279_v28  ;;  %282 = vst [vmem:[%s5463_s16 + $0xe8] sm:$0xff] %v281_v29  ;;  %v285_v31 = vld [vmem:[%s5458_s15 + $0x1b8] sm:$0xff]  ;;  %v287_v32 = vld [vmem:[%s5458_s15 + $0x200] sm:$0xff] }
  0x29   : > { %284 = vst [vmem:[%s5463_s16 + $0xf0] sm:$0xff] %v283_v30  ;;  %286 = vst [vmem:[%s5463_s16 + $0xf8] sm:$0xff] %v285_v31  ;;  %v289_v33 = vld [vmem:[%s5458_s15 + $0x208] sm:$0xff]  ;;  %v291_v34 = vld [vmem:[%s5458_s15 + $0x210] sm:$0xff] }
  0x2a   : > { %288 = vst [vmem:[%s5463_s16 + $0x100] sm:$0xff] %v287_v32  ;;  %v293_v35 = vld [vmem:[%s5458_s15 + $0x218] sm:$0xff]  ;;  %290 = vst [vmem:[%s5463_s16 + $0x108] sm:$0xff] %v289_v33  ;;  %v295_v36 = vld [vmem:[%s5458_s15 + $0x220] sm:$0xff] }
  0x2b   : > { %292 = vst [vmem:[%s5463_s16 + $0x110] sm:$0xff] %v291_v34  ;;  %294 = vst [vmem:[%s5463_s16 + $0x118] sm:$0xff] %v293_v35  ;;  %v297_v37 = vld [vmem:[%s5458_s15 + $0x228] sm:$0xff]  ;;  %v299_v38 = vld [vmem:[%s5458_s15 + $0x230] sm:$0xff] }
  0x2c   : > { %296 = vst [vmem:[%s5463_s16 + $0x120] sm:$0xff] %v295_v36  ;;  %298 = vst [vmem:[%s5463_s16 + $0x128] sm:$0xff] %v297_v37  ;;  %v301_v39 = vld [vmem:[%s5458_s15 + $0x238] sm:$0xff]  ;;  %v303_v40 = vld [vmem:[%s5458_s15 + $0x280] sm:$0xff] }
  0x2d   : > { %300 = vst [vmem:[%s5463_s16 + $0x130] sm:$0xff] %v299_v38  ;;  %v305_v41 = vld [vmem:[%s5458_s15 + $0x288] sm:$0xff]  ;;  %302 = vst [vmem:[%s5463_s16 + $0x138] sm:$0xff] %v301_v39  ;;  %v307_v42 = vld [vmem:[%s5458_s15 + $0x290] sm:$0xff] }
  0x2e   : > { %304 = vst [vmem:[%s5463_s16 + $0x140] sm:$0xff] %v303_v40  ;;  %306 = vst [vmem:[%s5463_s16 + $0x148] sm:$0xff] %v305_v41  ;;  %v309_v43 = vld [vmem:[%s5458_s15 + $0x298] sm:$0xff]  ;;  %v311_v44 = vld [vmem:[%s5458_s15 + $0x2a0] sm:$0xff] }
  0x2f   : > { %308 = vst [vmem:[%s5463_s16 + $0x150] sm:$0xff] %v307_v42  ;;  %310 = vst [vmem:[%s5463_s16 + $0x158] sm:$0xff] %v309_v43  ;;  %v313_v45 = vld [vmem:[%s5458_s15 + $0x2a8] sm:$0xff]  ;;  %v315_v46 = vld [vmem:[%s5458_s15 + $0x2b0] sm:$0xff] }
  0x30   : > { %312 = vst [vmem:[%s5463_s16 + $0x160] sm:$0xff] %v311_v44  ;;  %v317_v47 = vld [vmem:[%s5458_s15 + $0x2b8] sm:$0xff]  ;;  %314 = vst [vmem:[%s5463_s16 + $0x168] sm:$0xff] %v313_v45  ;;  %v319_v48 = vld [vmem:[%s5458_s15 + $0x300] sm:$0xff] }
  0x31   : > { %316 = vst [vmem:[%s5463_s16 + $0x170] sm:$0xff] %v315_v46  ;;  %318 = vst [vmem:[%s5463_s16 + $0x178] sm:$0xff] %v317_v47  ;;  %v321_v49 = vld [vmem:[%s5458_s15 + $0x308] sm:$0xff]  ;;  %v323_v50 = vld [vmem:[%s5458_s15 + $0x310] sm:$0xff] }
  0x32   : > { %320 = vst [vmem:[%s5463_s16 + $0x180] sm:$0xff] %v319_v48  ;;  %322 = vst [vmem:[%s5463_s16 + $0x188] sm:$0xff] %v321_v49  ;;  %v325_v51 = vld [vmem:[%s5458_s15 + $0x318] sm:$0xff]  ;;  %v327_v52 = vld [vmem:[%s5458_s15 + $0x320] sm:$0xff] }
  0x33   : > { %324 = vst [vmem:[%s5463_s16 + $0x190] sm:$0xff] %v323_v50  ;;  %v329_v53 = vld [vmem:[%s5458_s15 + $0x328] sm:$0xff]  ;;  %326 = vst [vmem:[%s5463_s16 + $0x198] sm:$0xff] %v325_v51  ;;  %v331_v54 = vld [vmem:[%s5458_s15 + $0x330] sm:$0xff] }
  0x34   : > { %328 = vst [vmem:[%s5463_s16 + $0x1a0] sm:$0xff] %v327_v52  ;;  %330 = vst [vmem:[%s5463_s16 + $0x1a8] sm:$0xff] %v329_v53  ;;  %v333_v55 = vld [vmem:[%s5458_s15 + $0x338] sm:$0xff]  ;;  %v335_v56 = vld [vmem:[%s5458_s15 + $0x380] sm:$0xff] }
  0x35   : > { %332 = vst [vmem:[%s5463_s16 + $0x1b0] sm:$0xff] %v331_v54  ;;  %334 = vst [vmem:[%s5463_s16 + $0x1b8] sm:$0xff] %v333_v55  ;;  %v337_v57 = vld [vmem:[%s5458_s15 + $0x388] sm:$0xff]  ;;  %v339_v58 = vld [vmem:[%s5458_s15 + $0x390] sm:$0xff] }
  0x36   : > { %336 = vst [vmem:[%s5463_s16 + $0x1c0] sm:$0xff] %v335_v56  ;;  %v341_v59 = vld [vmem:[%s5458_s15 + $0x398] sm:$0xff]  ;;  %338 = vst [vmem:[%s5463_s16 + $0x1c8] sm:$0xff] %v337_v57  ;;  %v343_v60 = vld [vmem:[%s5458_s15 + $0x3a0] sm:$0xff] }
  0x37   : > { %340 = vst [vmem:[%s5463_s16 + $0x1d0] sm:$0xff] %v339_v58  ;;  %342 = vst [vmem:[%s5463_s16 + $0x1d8] sm:$0xff] %v341_v59  ;;  %v345_v61 = vld [vmem:[%s5458_s15 + $0x3a8] sm:$0xff]  ;;  %v347_v62 = vld [vmem:[%s5458_s15 + $0x3b0] sm:$0xff] }
  0x38   : > { %344 = vst [vmem:[%s5463_s16 + $0x1e0] sm:$0xff] %v343_v60  ;;  %346 = vst [vmem:[%s5463_s16 + $0x1e8] sm:$0xff] %v345_v61  ;;  %v349_v63 = vld [vmem:[%s5458_s15 + $0x3b8] sm:$0xff]  ;;  %v351_v0 = vld [vmem:[%s5458_s15 + $0x400] sm:$0xff] }
  0x39   : > { %348 = vst [vmem:[%s5463_s16 + $0x1f0] sm:$0xff] %v347_v62  ;;  %v353_v1 = vld [vmem:[%s5458_s15 + $0x408] sm:$0xff]  ;;  %350 = vst [vmem:[%s5463_s16 + $0x1f8] sm:$0xff] %v349_v63  ;;  %v355_v2 = vld [vmem:[%s5458_s15 + $0x410] sm:$0xff] }
  0x3a   : > { %352 = vst [vmem:[%s5463_s16 + $0x200] sm:$0xff] %v351_v0  ;;  %354 = vst [vmem:[%s5463_s16 + $0x208] sm:$0xff] %v353_v1  ;;  %v357_v3 = vld [vmem:[%s5458_s15 + $0x418] sm:$0xff]  ;;  %v359_v4 = vld [vmem:[%s5458_s15 + $0x420] sm:$0xff] }
  0x3b   : > { %356 = vst [vmem:[%s5463_s16 + $0x210] sm:$0xff] %v355_v2  ;;  %358 = vst [vmem:[%s5463_s16 + $0x218] sm:$0xff] %v357_v3  ;;  %v361_v5 = vld [vmem:[%s5458_s15 + $0x428] sm:$0xff]  ;;  %v363_v6 = vld [vmem:[%s5458_s15 + $0x430] sm:$0xff] }
  0x3c   : > { %360 = vst [vmem:[%s5463_s16 + $0x220] sm:$0xff] %v359_v4  ;;  %v365_v7 = vld [vmem:[%s5458_s15 + $0x438] sm:$0xff]  ;;  %362 = vst [vmem:[%s5463_s16 + $0x228] sm:$0xff] %v361_v5  ;;  %v367_v8 = vld [vmem:[%s5458_s15 + $0x480] sm:$0xff] }
  0x3d   : > { %364 = vst [vmem:[%s5463_s16 + $0x230] sm:$0xff] %v363_v6  ;;  %366 = vst [vmem:[%s5463_s16 + $0x238] sm:$0xff] %v365_v7  ;;  %v369_v9 = vld [vmem:[%s5458_s15 + $0x488] sm:$0xff]  ;;  %v371_v10 = vld [vmem:[%s5458_s15 + $0x490] sm:$0xff] }
  0x3e   : > { %368 = vst [vmem:[%s5463_s16 + $0x240] sm:$0xff] %v367_v8  ;;  %370 = vst [vmem:[%s5463_s16 + $0x248] sm:$0xff] %v369_v9  ;;  %v373_v11 = vld [vmem:[%s5458_s15 + $0x498] sm:$0xff]  ;;  %v375_v12 = vld [vmem:[%s5458_s15 + $0x4a0] sm:$0xff] }
  0x3f   : > { %372 = vst [vmem:[%s5463_s16 + $0x250] sm:$0xff] %v371_v10  ;;  %v377_v13 = vld [vmem:[%s5458_s15 + $0x4a8] sm:$0xff]  ;;  %374 = vst [vmem:[%s5463_s16 + $0x258] sm:$0xff] %v373_v11  ;;  %v379_v14 = vld [vmem:[%s5458_s15 + $0x4b0] sm:$0xff] }
  0x40   : > { %376 = vst [vmem:[%s5463_s16 + $0x260] sm:$0xff] %v375_v12  ;;  %378 = vst [vmem:[%s5463_s16 + $0x268] sm:$0xff] %v377_v13  ;;  %v381_v15 = vld [vmem:[%s5458_s15 + $0x4b8] sm:$0xff]  ;;  %v383_v16 = vld [vmem:[%s5458_s15 + $0x500] sm:$0xff] }
  0x41   : > { %380 = vst [vmem:[%s5463_s16 + $0x270] sm:$0xff] %v379_v14  ;;  %382 = vst [vmem:[%s5463_s16 + $0x278] sm:$0xff] %v381_v15  ;;  %v385_v17 = vld [vmem:[%s5458_s15 + $0x508] sm:$0xff]  ;;  %v387_v18 = vld [vmem:[%s5458_s15 + $0x510] sm:$0xff] }
  0x42   : > { %384 = vst [vmem:[%s5463_s16 + $0x280] sm:$0xff] %v383_v16  ;;  %v389_v19 = vld [vmem:[%s5458_s15 + $0x518] sm:$0xff]  ;;  %386 = vst [vmem:[%s5463_s16 + $0x288] sm:$0xff] %v385_v17  ;;  %v391_v20 = vld [vmem:[%s5458_s15 + $0x520] sm:$0xff] }
  0x43   : > { %388 = vst [vmem:[%s5463_s16 + $0x290] sm:$0xff] %v387_v18  ;;  %390 = vst [vmem:[%s5463_s16 + $0x298] sm:$0xff] %v389_v19  ;;  %v393_v21 = vld [vmem:[%s5458_s15 + $0x528] sm:$0xff]  ;;  %v395_v22 = vld [vmem:[%s5458_s15 + $0x530] sm:$0xff] }
  0x44   : > { %392 = vst [vmem:[%s5463_s16 + $0x2a0] sm:$0xff] %v391_v20  ;;  %394 = vst [vmem:[%s5463_s16 + $0x2a8] sm:$0xff] %v393_v21  ;;  %v397_v23 = vld [vmem:[%s5458_s15 + $0x538] sm:$0xff]  ;;  %v399_v24 = vld [vmem:[%s5458_s15 + $0x580] sm:$0xff] }
  0x45   : > { %396 = vst [vmem:[%s5463_s16 + $0x2b0] sm:$0xff] %v395_v22  ;;  %v401_v25 = vld [vmem:[%s5458_s15 + $0x588] sm:$0xff]  ;;  %398 = vst [vmem:[%s5463_s16 + $0x2b8] sm:$0xff] %v397_v23  ;;  %v403_v26 = vld [vmem:[%s5458_s15 + $0x590] sm:$0xff] }
  0x46   : > { %400 = vst [vmem:[%s5463_s16 + $0x2c0] sm:$0xff] %v399_v24  ;;  %402 = vst [vmem:[%s5463_s16 + $0x2c8] sm:$0xff] %v401_v25  ;;  %v405_v27 = vld [vmem:[%s5458_s15 + $0x598] sm:$0xff]  ;;  %v407_v28 = vld [vmem:[%s5458_s15 + $0x5a0] sm:$0xff] }
  0x47   : > { %404 = vst [vmem:[%s5463_s16 + $0x2d0] sm:$0xff] %v403_v26  ;;  %406 = vst [vmem:[%s5463_s16 + $0x2d8] sm:$0xff] %v405_v27  ;;  %v409_v29 = vld [vmem:[%s5458_s15 + $0x5a8] sm:$0xff]  ;;  %v411_v30 = vld [vmem:[%s5458_s15 + $0x5b0] sm:$0xff] }
  0x48   : > { %408 = vst [vmem:[%s5463_s16 + $0x2e0] sm:$0xff] %v407_v28  ;;  %v413_v31 = vld [vmem:[%s5458_s15 + $0x5b8] sm:$0xff]  ;;  %410 = vst [vmem:[%s5463_s16 + $0x2e8] sm:$0xff] %v409_v29  ;;  %v415_v32 = vld [vmem:[%s5458_s15 + $0x600] sm:$0xff] }
  0x49   : > { %412 = vst [vmem:[%s5463_s16 + $0x2f0] sm:$0xff] %v411_v30  ;;  %414 = vst [vmem:[%s5463_s16 + $0x2f8] sm:$0xff] %v413_v31  ;;  %v417_v33 = vld [vmem:[%s5458_s15 + $0x608] sm:$0xff]  ;;  %v419_v34 = vld [vmem:[%s5458_s15 + $0x610] sm:$0xff] }
  0x4a   : > { %416 = vst [vmem:[%s5463_s16 + $0x300] sm:$0xff] %v415_v32  ;;  %418 = vst [vmem:[%s5463_s16 + $0x308] sm:$0xff] %v417_v33  ;;  %v421_v35 = vld [vmem:[%s5458_s15 + $0x618] sm:$0xff]  ;;  %v423_v36 = vld [vmem:[%s5458_s15 + $0x620] sm:$0xff] }
  0x4b   : > { %420 = vst [vmem:[%s5463_s16 + $0x310] sm:$0xff] %v419_v34  ;;  %v425_v37 = vld [vmem:[%s5458_s15 + $0x628] sm:$0xff]  ;;  %422 = vst [vmem:[%s5463_s16 + $0x318] sm:$0xff] %v421_v35  ;;  %v427_v38 = vld [vmem:[%s5458_s15 + $0x630] sm:$0xff] }
  0x4c   : > { %424 = vst [vmem:[%s5463_s16 + $0x320] sm:$0xff] %v423_v36  ;;  %426 = vst [vmem:[%s5463_s16 + $0x328] sm:$0xff] %v425_v37  ;;  %v429_v39 = vld [vmem:[%s5458_s15 + $0x638] sm:$0xff]  ;;  %v431_v40 = vld [vmem:[%s5458_s15 + $0x680] sm:$0xff] }
  0x4d   : > { %428 = vst [vmem:[%s5463_s16 + $0x330] sm:$0xff] %v427_v38  ;;  %430 = vst [vmem:[%s5463_s16 + $0x338] sm:$0xff] %v429_v39  ;;  %v433_v41 = vld [vmem:[%s5458_s15 + $0x688] sm:$0xff]  ;;  %v435_v42 = vld [vmem:[%s5458_s15 + $0x690] sm:$0xff] }
  0x4e   : > { %432 = vst [vmem:[%s5463_s16 + $0x340] sm:$0xff] %v431_v40  ;;  %v437_v43 = vld [vmem:[%s5458_s15 + $0x698] sm:$0xff]  ;;  %434 = vst [vmem:[%s5463_s16 + $0x348] sm:$0xff] %v433_v41  ;;  %v439_v44 = vld [vmem:[%s5458_s15 + $0x6a0] sm:$0xff] }
  0x4f   : > { %436 = vst [vmem:[%s5463_s16 + $0x350] sm:$0xff] %v435_v42  ;;  %438 = vst [vmem:[%s5463_s16 + $0x358] sm:$0xff] %v437_v43  ;;  %v441_v45 = vld [vmem:[%s5458_s15 + $0x6a8] sm:$0xff]  ;;  %v443_v46 = vld [vmem:[%s5458_s15 + $0x6b0] sm:$0xff] }
  0x50   : > { %440 = vst [vmem:[%s5463_s16 + $0x360] sm:$0xff] %v439_v44  ;;  %442 = vst [vmem:[%s5463_s16 + $0x368] sm:$0xff] %v441_v45  ;;  %v445_v47 = vld [vmem:[%s5458_s15 + $0x6b8] sm:$0xff]  ;;  %v447_v48 = vld [vmem:[%s5458_s15 + $0x700] sm:$0xff] }
  0x51   : > { %444 = vst [vmem:[%s5463_s16 + $0x370] sm:$0xff] %v443_v46  ;;  %v449_v49 = vld [vmem:[%s5458_s15 + $0x708] sm:$0xff]  ;;  %446 = vst [vmem:[%s5463_s16 + $0x378] sm:$0xff] %v445_v47  ;;  %v451_v50 = vld [vmem:[%s5458_s15 + $0x710] sm:$0xff] }
  0x52   : > { %448 = vst [vmem:[%s5463_s16 + $0x380] sm:$0xff] %v447_v48  ;;  %450 = vst [vmem:[%s5463_s16 + $0x388] sm:$0xff] %v449_v49  ;;  %v453_v51 = vld [vmem:[%s5458_s15 + $0x718] sm:$0xff]  ;;  %v455_v52 = vld [vmem:[%s5458_s15 + $0x720] sm:$0xff] }
  0x53   : > { %452 = vst [vmem:[%s5463_s16 + $0x390] sm:$0xff] %v451_v50  ;;  %454 = vst [vmem:[%s5463_s16 + $0x398] sm:$0xff] %v453_v51  ;;  %v457_v53 = vld [vmem:[%s5458_s15 + $0x728] sm:$0xff]  ;;  %v459_v54 = vld [vmem:[%s5458_s15 + $0x730] sm:$0xff] }
  0x54   : > { %456 = vst [vmem:[%s5463_s16 + $0x3a0] sm:$0xff] %v455_v52  ;;  %v461_v55 = vld [vmem:[%s5458_s15 + $0x738] sm:$0xff]  ;;  %458 = vst [vmem:[%s5463_s16 + $0x3a8] sm:$0xff] %v457_v53  ;;  %v463_v56 = vld [vmem:[%s5458_s15 + $0x780] sm:$0xff] }
  0x55   : > { %460 = vst [vmem:[%s5463_s16 + $0x3b0] sm:$0xff] %v459_v54  ;;  %462 = vst [vmem:[%s5463_s16 + $0x3b8] sm:$0xff] %v461_v55  ;;  %v465_v57 = vld [vmem:[%s5458_s15 + $0x788] sm:$0xff]  ;;  %v467_v58 = vld [vmem:[%s5458_s15 + $0x790] sm:$0xff] }
  0x56   : > { %464 = vst [vmem:[%s5463_s16 + $0x3c0] sm:$0xff] %v463_v56  ;;  %466 = vst [vmem:[%s5463_s16 + $0x3c8] sm:$0xff] %v465_v57  ;;  %v469_v59 = vld [vmem:[%s5458_s15 + $0x798] sm:$0xff]  ;;  %v471_v60 = vld [vmem:[%s5458_s15 + $0x7a0] sm:$0xff] }
  0x57   : > { %468 = vst [vmem:[%s5463_s16 + $0x3d0] sm:$0xff] %v467_v58  ;;  %v473_v61 = vld [vmem:[%s5458_s15 + $0x7a8] sm:$0xff]  ;;  %470 = vst [vmem:[%s5463_s16 + $0x3d8] sm:$0xff] %v469_v59  ;;  %v475_v62 = vld [vmem:[%s5458_s15 + $0x7b0] sm:$0xff] }
  0x58   : > { %472 = vst [vmem:[%s5463_s16 + $0x3e0] sm:$0xff] %v471_v60  ;;  %474 = vst [vmem:[%s5463_s16 + $0x3e8] sm:$0xff] %v473_v61  ;;  %v477_v63 = vld [vmem:[%s5458_s15 + $0x7b8] sm:$0xff]  ;;  %v479_v0 = vld [vmem:[%s5458_s15 + $0x800] sm:$0xff] }
  0x59   : > { %476 = vst [vmem:[%s5463_s16 + $0x3f0] sm:$0xff] %v475_v62  ;;  %478 = vst [vmem:[%s5463_s16 + $0x3f8] sm:$0xff] %v477_v63  ;;  %v481_v1 = vld [vmem:[%s5458_s15 + $0x808] sm:$0xff]  ;;  %v483_v2 = vld [vmem:[%s5458_s15 + $0x810] sm:$0xff] }
  0x5a   : > { %480 = vst [vmem:[%s5463_s16 + $0x400] sm:$0xff] %v479_v0  ;;  %v485_v3 = vld [vmem:[%s5458_s15 + $0x818] sm:$0xff]  ;;  %482 = vst [vmem:[%s5463_s16 + $0x408] sm:$0xff] %v481_v1  ;;  %v487_v4 = vld [vmem:[%s5458_s15 + $0x820] sm:$0xff] }
  0x5b   : > { %484 = vst [vmem:[%s5463_s16 + $0x410] sm:$0xff] %v483_v2  ;;  %486 = vst [vmem:[%s5463_s16 + $0x418] sm:$0xff] %v485_v3  ;;  %v489_v5 = vld [vmem:[%s5458_s15 + $0x828] sm:$0xff]  ;;  %v491_v6 = vld [vmem:[%s5458_s15 + $0x830] sm:$0xff] }
  0x5c   : > { %488 = vst [vmem:[%s5463_s16 + $0x420] sm:$0xff] %v487_v4  ;;  %490 = vst [vmem:[%s5463_s16 + $0x428] sm:$0xff] %v489_v5  ;;  %v493_v7 = vld [vmem:[%s5458_s15 + $0x838] sm:$0xff]  ;;  %v495_v8 = vld [vmem:[%s5458_s15 + $0x880] sm:$0xff] }
  0x5d   : > { %492 = vst [vmem:[%s5463_s16 + $0x430] sm:$0xff] %v491_v6  ;;  %v497_v9 = vld [vmem:[%s5458_s15 + $0x888] sm:$0xff]  ;;  %494 = vst [vmem:[%s5463_s16 + $0x438] sm:$0xff] %v493_v7  ;;  %v499_v10 = vld [vmem:[%s5458_s15 + $0x890] sm:$0xff] }
  0x5e   : > { %496 = vst [vmem:[%s5463_s16 + $0x440] sm:$0xff] %v495_v8  ;;  %498 = vst [vmem:[%s5463_s16 + $0x448] sm:$0xff] %v497_v9  ;;  %v501_v11 = vld [vmem:[%s5458_s15 + $0x898] sm:$0xff]  ;;  %v503_v12 = vld [vmem:[%s5458_s15 + $0x8a0] sm:$0xff] }
  0x5f   : > { %500 = vst [vmem:[%s5463_s16 + $0x450] sm:$0xff] %v499_v10  ;;  %502 = vst [vmem:[%s5463_s16 + $0x458] sm:$0xff] %v501_v11  ;;  %v505_v13 = vld [vmem:[%s5458_s15 + $0x8a8] sm:$0xff]  ;;  %v507_v14 = vld [vmem:[%s5458_s15 + $0x8b0] sm:$0xff] }
  0x60   : > { %504 = vst [vmem:[%s5463_s16 + $0x460] sm:$0xff] %v503_v12  ;;  %v509_v15 = vld [vmem:[%s5458_s15 + $0x8b8] sm:$0xff]  ;;  %506 = vst [vmem:[%s5463_s16 + $0x468] sm:$0xff] %v505_v13  ;;  %v511_v16 = vld [vmem:[%s5458_s15 + $0x900] sm:$0xff] }
  0x61   : > { %508 = vst [vmem:[%s5463_s16 + $0x470] sm:$0xff] %v507_v14  ;;  %510 = vst [vmem:[%s5463_s16 + $0x478] sm:$0xff] %v509_v15  ;;  %v513_v17 = vld [vmem:[%s5458_s15 + $0x908] sm:$0xff]  ;;  %v515_v18 = vld [vmem:[%s5458_s15 + $0x910] sm:$0xff] }
  0x62   : > { %512 = vst [vmem:[%s5463_s16 + $0x480] sm:$0xff] %v511_v16  ;;  %514 = vst [vmem:[%s5463_s16 + $0x488] sm:$0xff] %v513_v17  ;;  %v517_v19 = vld [vmem:[%s5458_s15 + $0x918] sm:$0xff]  ;;  %v519_v20 = vld [vmem:[%s5458_s15 + $0x920] sm:$0xff] }
  0x63   : > { %516 = vst [vmem:[%s5463_s16 + $0x490] sm:$0xff] %v515_v18  ;;  %v521_v21 = vld [vmem:[%s5458_s15 + $0x928] sm:$0xff]  ;;  %518 = vst [vmem:[%s5463_s16 + $0x498] sm:$0xff] %v517_v19  ;;  %v523_v22 = vld [vmem:[%s5458_s15 + $0x930] sm:$0xff] }
  0x64   : > { %520 = vst [vmem:[%s5463_s16 + $0x4a0] sm:$0xff] %v519_v20  ;;  %522 = vst [vmem:[%s5463_s16 + $0x4a8] sm:$0xff] %v521_v21  ;;  %v525_v23 = vld [vmem:[%s5458_s15 + $0x938] sm:$0xff]  ;;  %v527_v24 = vld [vmem:[%s5458_s15 + $0x980] sm:$0xff] }
  0x65   : > { %524 = vst [vmem:[%s5463_s16 + $0x4b0] sm:$0xff] %v523_v22  ;;  %526 = vst [vmem:[%s5463_s16 + $0x4b8] sm:$0xff] %v525_v23  ;;  %v529_v25 = vld [vmem:[%s5458_s15 + $0x988] sm:$0xff]  ;;  %v531_v26 = vld [vmem:[%s5458_s15 + $0x990] sm:$0xff] }
  0x66   : > { %528 = vst [vmem:[%s5463_s16 + $0x4c0] sm:$0xff] %v527_v24  ;;  %v533_v27 = vld [vmem:[%s5458_s15 + $0x998] sm:$0xff]  ;;  %530 = vst [vmem:[%s5463_s16 + $0x4c8] sm:$0xff] %v529_v25  ;;  %v535_v28 = vld [vmem:[%s5458_s15 + $0x9a0] sm:$0xff] }
  0x67   : > { %532 = vst [vmem:[%s5463_s16 + $0x4d0] sm:$0xff] %v531_v26  ;;  %534 = vst [vmem:[%s5463_s16 + $0x4d8] sm:$0xff] %v533_v27  ;;  %v537_v29 = vld [vmem:[%s5458_s15 + $0x9a8] sm:$0xff]  ;;  %v539_v30 = vld [vmem:[%s5458_s15 + $0x9b0] sm:$0xff] }
  0x68   : > { %536 = vst [vmem:[%s5463_s16 + $0x4e0] sm:$0xff] %v535_v28  ;;  %538 = vst [vmem:[%s5463_s16 + $0x4e8] sm:$0xff] %v537_v29  ;;  %v541_v31 = vld [vmem:[%s5458_s15 + $0x9b8] sm:$0xff]  ;;  %v543_v32 = vld [vmem:[%s5458_s15 + $0xa00] sm:$0xff] }
  0x69   : > { %540 = vst [vmem:[%s5463_s16 + $0x4f0] sm:$0xff] %v539_v30  ;;  %v545_v33 = vld [vmem:[%s5458_s15 + $0xa08] sm:$0xff]  ;;  %542 = vst [vmem:[%s5463_s16 + $0x4f8] sm:$0xff] %v541_v31  ;;  %v547_v34 = vld [vmem:[%s5458_s15 + $0xa10] sm:$0xff] }
  0x6a   : > { %544 = vst [vmem:[%s5463_s16 + $0x500] sm:$0xff] %v543_v32  ;;  %546 = vst [vmem:[%s5463_s16 + $0x508] sm:$0xff] %v545_v33  ;;  %v549_v35 = vld [vmem:[%s5458_s15 + $0xa18] sm:$0xff]  ;;  %v551_v36 = vld [vmem:[%s5458_s15 + $0xa20] sm:$0xff] }
  0x6b   : > { %548 = vst [vmem:[%s5463_s16 + $0x510] sm:$0xff] %v547_v34  ;;  %550 = vst [vmem:[%s5463_s16 + $0x518] sm:$0xff] %v549_v35  ;;  %v553_v37 = vld [vmem:[%s5458_s15 + $0xa28] sm:$0xff]  ;;  %v555_v38 = vld [vmem:[%s5458_s15 + $0xa30] sm:$0xff] }
  0x6c   : > { %552 = vst [vmem:[%s5463_s16 + $0x520] sm:$0xff] %v551_v36  ;;  %v557_v39 = vld [vmem:[%s5458_s15 + $0xa38] sm:$0xff]  ;;  %554 = vst [vmem:[%s5463_s16 + $0x528] sm:$0xff] %v553_v37  ;;  %v559_v40 = vld [vmem:[%s5458_s15 + $0xa80] sm:$0xff] }
  0x6d   : > { %556 = vst [vmem:[%s5463_s16 + $0x530] sm:$0xff] %v555_v38  ;;  %558 = vst [vmem:[%s5463_s16 + $0x538] sm:$0xff] %v557_v39  ;;  %v561_v41 = vld [vmem:[%s5458_s15 + $0xa88] sm:$0xff]  ;;  %v563_v42 = vld [vmem:[%s5458_s15 + $0xa90] sm:$0xff] }
  0x6e   : > { %560 = vst [vmem:[%s5463_s16 + $0x540] sm:$0xff] %v559_v40  ;;  %562 = vst [vmem:[%s5463_s16 + $0x548] sm:$0xff] %v561_v41  ;;  %v565_v43 = vld [vmem:[%s5458_s15 + $0xa98] sm:$0xff]  ;;  %v567_v44 = vld [vmem:[%s5458_s15 + $0xaa0] sm:$0xff] }
  0x6f   : > { %564 = vst [vmem:[%s5463_s16 + $0x550] sm:$0xff] %v563_v42  ;;  %v569_v45 = vld [vmem:[%s5458_s15 + $0xaa8] sm:$0xff]  ;;  %566 = vst [vmem:[%s5463_s16 + $0x558] sm:$0xff] %v565_v43  ;;  %v571_v46 = vld [vmem:[%s5458_s15 + $0xab0] sm:$0xff] }
  0x70   : > { %568 = vst [vmem:[%s5463_s16 + $0x560] sm:$0xff] %v567_v44  ;;  %570 = vst [vmem:[%s5463_s16 + $0x568] sm:$0xff] %v569_v45  ;;  %v573_v47 = vld [vmem:[%s5458_s15 + $0xab8] sm:$0xff]  ;;  %v575_v48 = vld [vmem:[%s5458_s15 + $0xb00] sm:$0xff] }
  0x71   : > { %572 = vst [vmem:[%s5463_s16 + $0x570] sm:$0xff] %v571_v46  ;;  %574 = vst [vmem:[%s5463_s16 + $0x578] sm:$0xff] %v573_v47  ;;  %v577_v49 = vld [vmem:[%s5458_s15 + $0xb08] sm:$0xff]  ;;  %v579_v50 = vld [vmem:[%s5458_s15 + $0xb10] sm:$0xff] }
  0x72   : > { %576 = vst [vmem:[%s5463_s16 + $0x580] sm:$0xff] %v575_v48  ;;  %v581_v51 = vld [vmem:[%s5458_s15 + $0xb18] sm:$0xff]  ;;  %578 = vst [vmem:[%s5463_s16 + $0x588] sm:$0xff] %v577_v49  ;;  %v583_v52 = vld [vmem:[%s5458_s15 + $0xb20] sm:$0xff] }
  0x73   : > { %580 = vst [vmem:[%s5463_s16 + $0x590] sm:$0xff] %v579_v50  ;;  %582 = vst [vmem:[%s5463_s16 + $0x598] sm:$0xff] %v581_v51  ;;  %v585_v53 = vld [vmem:[%s5458_s15 + $0xb28] sm:$0xff]  ;;  %v587_v54 = vld [vmem:[%s5458_s15 + $0xb30] sm:$0xff] }
  0x74   : > { %584 = vst [vmem:[%s5463_s16 + $0x5a0] sm:$0xff] %v583_v52  ;;  %586 = vst [vmem:[%s5463_s16 + $0x5a8] sm:$0xff] %v585_v53  ;;  %v589_v55 = vld [vmem:[%s5458_s15 + $0xb38] sm:$0xff]  ;;  %v591_v56 = vld [vmem:[%s5458_s15 + $0xb80] sm:$0xff] }
  0x75   : > { %588 = vst [vmem:[%s5463_s16 + $0x5b0] sm:$0xff] %v587_v54  ;;  %v593_v57 = vld [vmem:[%s5458_s15 + $0xb88] sm:$0xff]  ;;  %590 = vst [vmem:[%s5463_s16 + $0x5b8] sm:$0xff] %v589_v55  ;;  %v595_v58 = vld [vmem:[%s5458_s15 + $0xb90] sm:$0xff] }
  0x76   : > { %592 = vst [vmem:[%s5463_s16 + $0x5c0] sm:$0xff] %v591_v56  ;;  %594 = vst [vmem:[%s5463_s16 + $0x5c8] sm:$0xff] %v593_v57  ;;  %v597_v59 = vld [vmem:[%s5458_s15 + $0xb98] sm:$0xff]  ;;  %v599_v60 = vld [vmem:[%s5458_s15 + $0xba0] sm:$0xff] }
  0x77   : > { %596 = vst [vmem:[%s5463_s16 + $0x5d0] sm:$0xff] %v595_v58  ;;  %598 = vst [vmem:[%s5463_s16 + $0x5d8] sm:$0xff] %v597_v59  ;;  %v601_v61 = vld [vmem:[%s5458_s15 + $0xba8] sm:$0xff]  ;;  %v603_v62 = vld [vmem:[%s5458_s15 + $0xbb0] sm:$0xff] }
  0x78   : > { %600 = vst [vmem:[%s5463_s16 + $0x5e0] sm:$0xff] %v599_v60  ;;  %v605_v63 = vld [vmem:[%s5458_s15 + $0xbb8] sm:$0xff]  ;;  %602 = vst [vmem:[%s5463_s16 + $0x5e8] sm:$0xff] %v601_v61  ;;  %v607_v0 = vld [vmem:[%s5458_s15 + $0xc00] sm:$0xff] }
  0x79   : > { %604 = vst [vmem:[%s5463_s16 + $0x5f0] sm:$0xff] %v603_v62  ;;  %606 = vst [vmem:[%s5463_s16 + $0x5f8] sm:$0xff] %v605_v63  ;;  %v609_v1 = vld [vmem:[%s5458_s15 + $0xc08] sm:$0xff]  ;;  %v611_v2 = vld [vmem:[%s5458_s15 + $0xc10] sm:$0xff] }
  0x7a   : > { %608 = vst [vmem:[%s5463_s16 + $0x600] sm:$0xff] %v607_v0  ;;  %610 = vst [vmem:[%s5463_s16 + $0x608] sm:$0xff] %v609_v1  ;;  %v613_v3 = vld [vmem:[%s5458_s15 + $0xc18] sm:$0xff]  ;;  %v615_v4 = vld [vmem:[%s5458_s15 + $0xc20] sm:$0xff] }
  0x7b   : > { %612 = vst [vmem:[%s5463_s16 + $0x610] sm:$0xff] %v611_v2  ;;  %v617_v5 = vld [vmem:[%s5458_s15 + $0xc28] sm:$0xff]  ;;  %614 = vst [vmem:[%s5463_s16 + $0x618] sm:$0xff] %v613_v3  ;;  %v619_v6 = vld [vmem:[%s5458_s15 + $0xc30] sm:$0xff] }
  0x7c   : > { %616 = vst [vmem:[%s5463_s16 + $0x620] sm:$0xff] %v615_v4  ;;  %618 = vst [vmem:[%s5463_s16 + $0x628] sm:$0xff] %v617_v5  ;;  %v621_v7 = vld [vmem:[%s5458_s15 + $0xc38] sm:$0xff]  ;;  %v623_v8 = vld [vmem:[%s5458_s15 + $0xc80] sm:$0xff] }
  0x7d   : > { %620 = vst [vmem:[%s5463_s16 + $0x630] sm:$0xff] %v619_v6  ;;  %622 = vst [vmem:[%s5463_s16 + $0x638] sm:$0xff] %v621_v7  ;;  %v625_v9 = vld [vmem:[%s5458_s15 + $0xc88] sm:$0xff]  ;;  %v627_v10 = vld [vmem:[%s5458_s15 + $0xc90] sm:$0xff] }
  0x7e   : > { %624 = vst [vmem:[%s5463_s16 + $0x640] sm:$0xff] %v623_v8  ;;  %v629_v11 = vld [vmem:[%s5458_s15 + $0xc98] sm:$0xff]  ;;  %626 = vst [vmem:[%s5463_s16 + $0x648] sm:$0xff] %v625_v9  ;;  %v631_v12 = vld [vmem:[%s5458_s15 + $0xca0] sm:$0xff] }
  0x7f   : > { %628 = vst [vmem:[%s5463_s16 + $0x650] sm:$0xff] %v627_v10  ;;  %630 = vst [vmem:[%s5463_s16 + $0x658] sm:$0xff] %v629_v11  ;;  %v633_v13 = vld [vmem:[%s5458_s15 + $0xca8] sm:$0xff]  ;;  %v635_v14 = vld [vmem:[%s5458_s15 + $0xcb0] sm:$0xff] }
  0x80   : > { %632 = vst [vmem:[%s5463_s16 + $0x660] sm:$0xff] %v631_v12  ;;  %634 = vst [vmem:[%s5463_s16 + $0x668] sm:$0xff] %v633_v13  ;;  %v637_v15 = vld [vmem:[%s5458_s15 + $0xcb8] sm:$0xff]  ;;  %v639_v16 = vld [vmem:[%s5458_s15 + $0xd00] sm:$0xff] }
  0x81   : > { %636 = vst [vmem:[%s5463_s16 + $0x670] sm:$0xff] %v635_v14  ;;  %v641_v17 = vld [vmem:[%s5458_s15 + $0xd08] sm:$0xff]  ;;  %638 = vst [vmem:[%s5463_s16 + $0x678] sm:$0xff] %v637_v15  ;;  %v643_v18 = vld [vmem:[%s5458_s15 + $0xd10] sm:$0xff] }
  0x82   : > { %640 = vst [vmem:[%s5463_s16 + $0x680] sm:$0xff] %v639_v16  ;;  %642 = vst [vmem:[%s5463_s16 + $0x688] sm:$0xff] %v641_v17  ;;  %v645_v19 = vld [vmem:[%s5458_s15 + $0xd18] sm:$0xff]  ;;  %v647_v20 = vld [vmem:[%s5458_s15 + $0xd20] sm:$0xff] }
  0x83   : > { %644 = vst [vmem:[%s5463_s16 + $0x690] sm:$0xff] %v643_v18  ;;  %646 = vst [vmem:[%s5463_s16 + $0x698] sm:$0xff] %v645_v19  ;;  %v649_v21 = vld [vmem:[%s5458_s15 + $0xd28] sm:$0xff]  ;;  %v651_v22 = vld [vmem:[%s5458_s15 + $0xd30] sm:$0xff] }
  0x84   : > { %648 = vst [vmem:[%s5463_s16 + $0x6a0] sm:$0xff] %v647_v20  ;;  %v653_v23 = vld [vmem:[%s5458_s15 + $0xd38] sm:$0xff]  ;;  %650 = vst [vmem:[%s5463_s16 + $0x6a8] sm:$0xff] %v649_v21  ;;  %v655_v24 = vld [vmem:[%s5458_s15 + $0xd80] sm:$0xff] }
  0x85   : > { %652 = vst [vmem:[%s5463_s16 + $0x6b0] sm:$0xff] %v651_v22  ;;  %654 = vst [vmem:[%s5463_s16 + $0x6b8] sm:$0xff] %v653_v23  ;;  %v657_v25 = vld [vmem:[%s5458_s15 + $0xd88] sm:$0xff]  ;;  %v659_v26 = vld [vmem:[%s5458_s15 + $0xd90] sm:$0xff] }
  0x86   : > { %656 = vst [vmem:[%s5463_s16 + $0x6c0] sm:$0xff] %v655_v24  ;;  %658 = vst [vmem:[%s5463_s16 + $0x6c8] sm:$0xff] %v657_v25  ;;  %v661_v27 = vld [vmem:[%s5458_s15 + $0xd98] sm:$0xff]  ;;  %v663_v28 = vld [vmem:[%s5458_s15 + $0xda0] sm:$0xff] }
  0x87   : > { %660 = vst [vmem:[%s5463_s16 + $0x6d0] sm:$0xff] %v659_v26  ;;  %v665_v29 = vld [vmem:[%s5458_s15 + $0xda8] sm:$0xff]  ;;  %662 = vst [vmem:[%s5463_s16 + $0x6d8] sm:$0xff] %v661_v27  ;;  %v667_v30 = vld [vmem:[%s5458_s15 + $0xdb0] sm:$0xff] }
  0x88   : > { %664 = vst [vmem:[%s5463_s16 + $0x6e0] sm:$0xff] %v663_v28  ;;  %666 = vst [vmem:[%s5463_s16 + $0x6e8] sm:$0xff] %v665_v29  ;;  %v669_v31 = vld [vmem:[%s5458_s15 + $0xdb8] sm:$0xff]  ;;  %v671_v32 = vld [vmem:[%s5458_s15 + $0xe00] sm:$0xff] }
  0x89   : > { %668 = vst [vmem:[%s5463_s16 + $0x6f0] sm:$0xff] %v667_v30  ;;  %670 = vst [vmem:[%s5463_s16 + $0x6f8] sm:$0xff] %v669_v31  ;;  %v673_v33 = vld [vmem:[%s5458_s15 + $0xe08] sm:$0xff]  ;;  %v675_v34 = vld [vmem:[%s5458_s15 + $0xe10] sm:$0xff] }
  0x8a   : > { %672 = vst [vmem:[%s5463_s16 + $0x700] sm:$0xff] %v671_v32  ;;  %v677_v35 = vld [vmem:[%s5458_s15 + $0xe18] sm:$0xff]  ;;  %674 = vst [vmem:[%s5463_s16 + $0x708] sm:$0xff] %v673_v33  ;;  %v679_v36 = vld [vmem:[%s5458_s15 + $0xe20] sm:$0xff] }
  0x8b   : > { %676 = vst [vmem:[%s5463_s16 + $0x710] sm:$0xff] %v675_v34  ;;  %678 = vst [vmem:[%s5463_s16 + $0x718] sm:$0xff] %v677_v35  ;;  %v681_v37 = vld [vmem:[%s5458_s15 + $0xe28] sm:$0xff]  ;;  %v683_v38 = vld [vmem:[%s5458_s15 + $0xe30] sm:$0xff] }
  0x8c   : > { %680 = vst [vmem:[%s5463_s16 + $0x720] sm:$0xff] %v679_v36  ;;  %682 = vst [vmem:[%s5463_s16 + $0x728] sm:$0xff] %v681_v37  ;;  %v685_v39 = vld [vmem:[%s5458_s15 + $0xe38] sm:$0xff]  ;;  %v687_v40 = vld [vmem:[%s5458_s15 + $0xe80] sm:$0xff] }
  0x8d   : > { %684 = vst [vmem:[%s5463_s16 + $0x730] sm:$0xff] %v683_v38  ;;  %v689_v41 = vld [vmem:[%s5458_s15 + $0xe88] sm:$0xff]  ;;  %686 = vst [vmem:[%s5463_s16 + $0x738] sm:$0xff] %v685_v39  ;;  %v691_v42 = vld [vmem:[%s5458_s15 + $0xe90] sm:$0xff] }
  0x8e   : > { %688 = vst [vmem:[%s5463_s16 + $0x740] sm:$0xff] %v687_v40  ;;  %690 = vst [vmem:[%s5463_s16 + $0x748] sm:$0xff] %v689_v41  ;;  %v693_v43 = vld [vmem:[%s5458_s15 + $0xe98] sm:$0xff]  ;;  %v695_v44 = vld [vmem:[%s5458_s15 + $0xea0] sm:$0xff] }
  0x8f   : > { %692 = vst [vmem:[%s5463_s16 + $0x750] sm:$0xff] %v691_v42  ;;  %694 = vst [vmem:[%s5463_s16 + $0x758] sm:$0xff] %v693_v43  ;;  %v697_v45 = vld [vmem:[%s5458_s15 + $0xea8] sm:$0xff]  ;;  %v699_v46 = vld [vmem:[%s5458_s15 + $0xeb0] sm:$0xff] }
  0x90   : > { %696 = vst [vmem:[%s5463_s16 + $0x760] sm:$0xff] %v695_v44  ;;  %v701_v47 = vld [vmem:[%s5458_s15 + $0xeb8] sm:$0xff]  ;;  %698 = vst [vmem:[%s5463_s16 + $0x768] sm:$0xff] %v697_v45  ;;  %v703_v48 = vld [vmem:[%s5458_s15 + $0xf00] sm:$0xff] }
  0x91   : > { %700 = vst [vmem:[%s5463_s16 + $0x770] sm:$0xff] %v699_v46  ;;  %702 = vst [vmem:[%s5463_s16 + $0x778] sm:$0xff] %v701_v47  ;;  %v705_v49 = vld [vmem:[%s5458_s15 + $0xf08] sm:$0xff]  ;;  %v707_v50 = vld [vmem:[%s5458_s15 + $0xf10] sm:$0xff] }
  0x92   : > { %704 = vst [vmem:[%s5463_s16 + $0x780] sm:$0xff] %v703_v48  ;;  %706 = vst [vmem:[%s5463_s16 + $0x788] sm:$0xff] %v705_v49  ;;  %v709_v51 = vld [vmem:[%s5458_s15 + $0xf18] sm:$0xff]  ;;  %v711_v52 = vld [vmem:[%s5458_s15 + $0xf20] sm:$0xff] }
  0x93   : > { %708 = vst [vmem:[%s5463_s16 + $0x790] sm:$0xff] %v707_v50  ;;  %v713_v53 = vld [vmem:[%s5458_s15 + $0xf28] sm:$0xff]  ;;  %710 = vst [vmem:[%s5463_s16 + $0x798] sm:$0xff] %v709_v51  ;;  %v715_v54 = vld [vmem:[%s5458_s15 + $0xf30] sm:$0xff] }
  0x94   : > { %712 = vst [vmem:[%s5463_s16 + $0x7a0] sm:$0xff] %v711_v52  ;;  %714 = vst [vmem:[%s5463_s16 + $0x7a8] sm:$0xff] %v713_v53  ;;  %v717_v55 = vld [vmem:[%s5458_s15 + $0xf38] sm:$0xff]  ;;  %v719_v56 = vld [vmem:[%s5458_s15 + $0xf80] sm:$0xff] }
  0x95   : > { %716 = vst [vmem:[%s5463_s16 + $0x7b0] sm:$0xff] %v715_v54  ;;  %718 = vst [vmem:[%s5463_s16 + $0x7b8] sm:$0xff] %v717_v55  ;;  %v721_v57 = vld [vmem:[%s5458_s15 + $0xf88] sm:$0xff]  ;;  %v723_v58 = vld [vmem:[%s5458_s15 + $0xf90] sm:$0xff] }
  0x96   : > { %720 = vst [vmem:[%s5463_s16 + $0x7c0] sm:$0xff] %v719_v56  ;;  %v725_v59 = vld [vmem:[%s5458_s15 + $0xf98] sm:$0xff]  ;;  %722 = vst [vmem:[%s5463_s16 + $0x7c8] sm:$0xff] %v721_v57  ;;  %v727_v60 = vld [vmem:[%s5458_s15 + $0xfa0] sm:$0xff] }
  0x97   : > { %724 = vst [vmem:[%s5463_s16 + $0x7d0] sm:$0xff] %v723_v58  ;;  %726 = vst [vmem:[%s5463_s16 + $0x7d8] sm:$0xff] %v725_v59  ;;  %v729_v61 = vld [vmem:[%s5458_s15 + $0xfa8] sm:$0xff]  ;;  %v731_v62 = vld [vmem:[%s5458_s15 + $0xfb0] sm:$0xff] }
  0x98   : > { %728 = vst [vmem:[%s5463_s16 + $0x7e0] sm:$0xff] %v727_v60  ;;  %730 = vst [vmem:[%s5463_s16 + $0x7e8] sm:$0xff] %v729_v61  ;;  %v733_v63 = vld [vmem:[%s5458_s15 + $0xfb8] sm:$0xff]  ;;  %v735_v0 = vld [vmem:[%s5458_s15 + $0x1000] sm:$0xff] }
  0x99   : > { %732 = vst [vmem:[%s5463_s16 + $0x7f0] sm:$0xff] %v731_v62  ;;  %v737_v1 = vld [vmem:[%s5458_s15 + $0x1008] sm:$0xff]  ;;  %734 = vst [vmem:[%s5463_s16 + $0x7f8] sm:$0xff] %v733_v63  ;;  %v739_v2 = vld [vmem:[%s5458_s15 + $0x1010] sm:$0xff] }
  0x9a   : > { %736 = vst [vmem:[%s5463_s16 + $0x800] sm:$0xff] %v735_v0  ;;  %738 = vst [vmem:[%s5463_s16 + $0x808] sm:$0xff] %v737_v1  ;;  %v741_v3 = vld [vmem:[%s5458_s15 + $0x1018] sm:$0xff]  ;;  %v743_v4 = vld [vmem:[%s5458_s15 + $0x1020] sm:$0xff] }
  0x9b   : > { %740 = vst [vmem:[%s5463_s16 + $0x810] sm:$0xff] %v739_v2  ;;  %742 = vst [vmem:[%s5463_s16 + $0x818] sm:$0xff] %v741_v3  ;;  %v745_v5 = vld [vmem:[%s5458_s15 + $0x1028] sm:$0xff]  ;;  %v747_v6 = vld [vmem:[%s5458_s15 + $0x1030] sm:$0xff] }
  0x9c   : > { %744 = vst [vmem:[%s5463_s16 + $0x820] sm:$0xff] %v743_v4  ;;  %v749_v7 = vld [vmem:[%s5458_s15 + $0x1038] sm:$0xff]  ;;  %746 = vst [vmem:[%s5463_s16 + $0x828] sm:$0xff] %v745_v5  ;;  %v751_v8 = vld [vmem:[%s5458_s15 + $0x1080] sm:$0xff] }
  0x9d   : > { %748 = vst [vmem:[%s5463_s16 + $0x830] sm:$0xff] %v747_v6  ;;  %750 = vst [vmem:[%s5463_s16 + $0x838] sm:$0xff] %v749_v7  ;;  %v753_v9 = vld [vmem:[%s5458_s15 + $0x1088] sm:$0xff]  ;;  %v755_v10 = vld [vmem:[%s5458_s15 + $0x1090] sm:$0xff] }
  0x9e   : > { %752 = vst [vmem:[%s5463_s16 + $0x840] sm:$0xff] %v751_v8  ;;  %754 = vst [vmem:[%s5463_s16 + $0x848] sm:$0xff] %v753_v9  ;;  %v757_v11 = vld [vmem:[%s5458_s15 + $0x1098] sm:$0xff]  ;;  %v759_v12 = vld [vmem:[%s5458_s15 + $0x10a0] sm:$0xff] }
  0x9f   : > { %756 = vst [vmem:[%s5463_s16 + $0x850] sm:$0xff] %v755_v10  ;;  %v761_v13 = vld [vmem:[%s5458_s15 + $0x10a8] sm:$0xff]  ;;  %758 = vst [vmem:[%s5463_s16 + $0x858] sm:$0xff] %v757_v11  ;;  %v763_v14 = vld [vmem:[%s5458_s15 + $0x10b0] sm:$0xff] }
  0xa0   : > { %760 = vst [vmem:[%s5463_s16 + $0x860] sm:$0xff] %v759_v12  ;;  %762 = vst [vmem:[%s5463_s16 + $0x868] sm:$0xff] %v761_v13  ;;  %v765_v15 = vld [vmem:[%s5458_s15 + $0x10b8] sm:$0xff]  ;;  %v767_v16 = vld [vmem:[%s5458_s15 + $0x1100] sm:$0xff] }
  0xa1   : > { %764 = vst [vmem:[%s5463_s16 + $0x870] sm:$0xff] %v763_v14  ;;  %766 = vst [vmem:[%s5463_s16 + $0x878] sm:$0xff] %v765_v15  ;;  %v769_v17 = vld [vmem:[%s5458_s15 + $0x1108] sm:$0xff]  ;;  %v771_v18 = vld [vmem:[%s5458_s15 + $0x1110] sm:$0xff] }
  0xa2   : > { %768 = vst [vmem:[%s5463_s16 + $0x880] sm:$0xff] %v767_v16  ;;  %v773_v19 = vld [vmem:[%s5458_s15 + $0x1118] sm:$0xff]  ;;  %770 = vst [vmem:[%s5463_s16 + $0x888] sm:$0xff] %v769_v17  ;;  %v775_v20 = vld [vmem:[%s5458_s15 + $0x1120] sm:$0xff] }
  0xa3   : > { %772 = vst [vmem:[%s5463_s16 + $0x890] sm:$0xff] %v771_v18  ;;  %774 = vst [vmem:[%s5463_s16 + $0x898] sm:$0xff] %v773_v19  ;;  %v777_v21 = vld [vmem:[%s5458_s15 + $0x1128] sm:$0xff]  ;;  %v779_v22 = vld [vmem:[%s5458_s15 + $0x1130] sm:$0xff] }
  0xa4   : > { %776 = vst [vmem:[%s5463_s16 + $0x8a0] sm:$0xff] %v775_v20  ;;  %778 = vst [vmem:[%s5463_s16 + $0x8a8] sm:$0xff] %v777_v21  ;;  %v781_v23 = vld [vmem:[%s5458_s15 + $0x1138] sm:$0xff]  ;;  %v783_v24 = vld [vmem:[%s5458_s15 + $0x1180] sm:$0xff] }
  0xa5   : > { %780 = vst [vmem:[%s5463_s16 + $0x8b0] sm:$0xff] %v779_v22  ;;  %v785_v25 = vld [vmem:[%s5458_s15 + $0x1188] sm:$0xff]  ;;  %782 = vst [vmem:[%s5463_s16 + $0x8b8] sm:$0xff] %v781_v23  ;;  %v787_v26 = vld [vmem:[%s5458_s15 + $0x1190] sm:$0xff] }
  0xa6   : > { %784 = vst [vmem:[%s5463_s16 + $0x8c0] sm:$0xff] %v783_v24  ;;  %786 = vst [vmem:[%s5463_s16 + $0x8c8] sm:$0xff] %v785_v25  ;;  %v789_v27 = vld [vmem:[%s5458_s15 + $0x1198] sm:$0xff]  ;;  %v791_v28 = vld [vmem:[%s5458_s15 + $0x11a0] sm:$0xff] }
  0xa7   : > { %788 = vst [vmem:[%s5463_s16 + $0x8d0] sm:$0xff] %v787_v26  ;;  %790 = vst [vmem:[%s5463_s16 + $0x8d8] sm:$0xff] %v789_v27  ;;  %v793_v29 = vld [vmem:[%s5458_s15 + $0x11a8] sm:$0xff]  ;;  %v795_v30 = vld [vmem:[%s5458_s15 + $0x11b0] sm:$0xff] }
  0xa8   : > { %792 = vst [vmem:[%s5463_s16 + $0x8e0] sm:$0xff] %v791_v28  ;;  %v797_v31 = vld [vmem:[%s5458_s15 + $0x11b8] sm:$0xff]  ;;  %794 = vst [vmem:[%s5463_s16 + $0x8e8] sm:$0xff] %v793_v29  ;;  %v799_v32 = vld [vmem:[%s5458_s15 + $0x1200] sm:$0xff] }
  0xa9   : > { %796 = vst [vmem:[%s5463_s16 + $0x8f0] sm:$0xff] %v795_v30  ;;  %798 = vst [vmem:[%s5463_s16 + $0x8f8] sm:$0xff] %v797_v31  ;;  %v801_v33 = vld [vmem:[%s5458_s15 + $0x1208] sm:$0xff]  ;;  %v803_v34 = vld [vmem:[%s5458_s15 + $0x1210] sm:$0xff] }
  0xaa   : > { %800 = vst [vmem:[%s5463_s16 + $0x900] sm:$0xff] %v799_v32  ;;  %802 = vst [vmem:[%s5463_s16 + $0x908] sm:$0xff] %v801_v33  ;;  %v805_v35 = vld [vmem:[%s5458_s15 + $0x1218] sm:$0xff]  ;;  %v807_v36 = vld [vmem:[%s5458_s15 + $0x1220] sm:$0xff] }
  0xab   : > { %804 = vst [vmem:[%s5463_s16 + $0x910] sm:$0xff] %v803_v34  ;;  %v809_v37 = vld [vmem:[%s5458_s15 + $0x1228] sm:$0xff]  ;;  %806 = vst [vmem:[%s5463_s16 + $0x918] sm:$0xff] %v805_v35  ;;  %v811_v38 = vld [vmem:[%s5458_s15 + $0x1230] sm:$0xff] }
  0xac   : > { %808 = vst [vmem:[%s5463_s16 + $0x920] sm:$0xff] %v807_v36  ;;  %810 = vst [vmem:[%s5463_s16 + $0x928] sm:$0xff] %v809_v37  ;;  %v813_v39 = vld [vmem:[%s5458_s15 + $0x1238] sm:$0xff]  ;;  %v815_v40 = vld [vmem:[%s5458_s15 + $0x1280] sm:$0xff] }
  0xad   : > { %812 = vst [vmem:[%s5463_s16 + $0x930] sm:$0xff] %v811_v38  ;;  %814 = vst [vmem:[%s5463_s16 + $0x938] sm:$0xff] %v813_v39  ;;  %v817_v41 = vld [vmem:[%s5458_s15 + $0x1288] sm:$0xff]  ;;  %v819_v42 = vld [vmem:[%s5458_s15 + $0x1290] sm:$0xff] }
  0xae   : > { %816 = vst [vmem:[%s5463_s16 + $0x940] sm:$0xff] %v815_v40  ;;  %v821_v43 = vld [vmem:[%s5458_s15 + $0x1298] sm:$0xff]  ;;  %818 = vst [vmem:[%s5463_s16 + $0x948] sm:$0xff] %v817_v41  ;;  %v823_v44 = vld [vmem:[%s5458_s15 + $0x12a0] sm:$0xff] }
  0xaf   : > { %820 = vst [vmem:[%s5463_s16 + $0x950] sm:$0xff] %v819_v42  ;;  %822 = vst [vmem:[%s5463_s16 + $0x958] sm:$0xff] %v821_v43  ;;  %v825_v45 = vld [vmem:[%s5458_s15 + $0x12a8] sm:$0xff]  ;;  %v827_v46 = vld [vmem:[%s5458_s15 + $0x12b0] sm:$0xff] }
  0xb0   : > { %824 = vst [vmem:[%s5463_s16 + $0x960] sm:$0xff] %v823_v44  ;;  %826 = vst [vmem:[%s5463_s16 + $0x968] sm:$0xff] %v825_v45  ;;  %v829_v47 = vld [vmem:[%s5458_s15 + $0x12b8] sm:$0xff]  ;;  %v831_v48 = vld [vmem:[%s5458_s15 + $0x1300] sm:$0xff] }
  0xb1   : > { %828 = vst [vmem:[%s5463_s16 + $0x970] sm:$0xff] %v827_v46  ;;  %v833_v49 = vld [vmem:[%s5458_s15 + $0x1308] sm:$0xff]  ;;  %830 = vst [vmem:[%s5463_s16 + $0x978] sm:$0xff] %v829_v47  ;;  %v835_v50 = vld [vmem:[%s5458_s15 + $0x1310] sm:$0xff] }
  0xb2   : > { %832 = vst [vmem:[%s5463_s16 + $0x980] sm:$0xff] %v831_v48  ;;  %834 = vst [vmem:[%s5463_s16 + $0x988] sm:$0xff] %v833_v49  ;;  %v837_v51 = vld [vmem:[%s5458_s15 + $0x1318] sm:$0xff]  ;;  %v839_v52 = vld [vmem:[%s5458_s15 + $0x1320] sm:$0xff] }
  0xb3   : > { %836 = vst [vmem:[%s5463_s16 + $0x990] sm:$0xff] %v835_v50  ;;  %838 = vst [vmem:[%s5463_s16 + $0x998] sm:$0xff] %v837_v51  ;;  %v841_v53 = vld [vmem:[%s5458_s15 + $0x1328] sm:$0xff]  ;;  %v843_v54 = vld [vmem:[%s5458_s15 + $0x1330] sm:$0xff] }
  0xb4   : > { %840 = vst [vmem:[%s5463_s16 + $0x9a0] sm:$0xff] %v839_v52  ;;  %v845_v55 = vld [vmem:[%s5458_s15 + $0x1338] sm:$0xff]  ;;  %842 = vst [vmem:[%s5463_s16 + $0x9a8] sm:$0xff] %v841_v53  ;;  %v847_v56 = vld [vmem:[%s5458_s15 + $0x1380] sm:$0xff] }
  0xb5   : > { %844 = vst [vmem:[%s5463_s16 + $0x9b0] sm:$0xff] %v843_v54  ;;  %846 = vst [vmem:[%s5463_s16 + $0x9b8] sm:$0xff] %v845_v55  ;;  %v849_v57 = vld [vmem:[%s5458_s15 + $0x1388] sm:$0xff]  ;;  %v851_v58 = vld [vmem:[%s5458_s15 + $0x1390] sm:$0xff] }
  0xb6   : > { %848 = vst [vmem:[%s5463_s16 + $0x9c0] sm:$0xff] %v847_v56  ;;  %850 = vst [vmem:[%s5463_s16 + $0x9c8] sm:$0xff] %v849_v57  ;;  %v853_v59 = vld [vmem:[%s5458_s15 + $0x1398] sm:$0xff]  ;;  %v855_v60 = vld [vmem:[%s5458_s15 + $0x13a0] sm:$0xff] }
  0xb7   : > { %852 = vst [vmem:[%s5463_s16 + $0x9d0] sm:$0xff] %v851_v58  ;;  %v857_v61 = vld [vmem:[%s5458_s15 + $0x13a8] sm:$0xff]  ;;  %854 = vst [vmem:[%s5463_s16 + $0x9d8] sm:$0xff] %v853_v59  ;;  %v859_v62 = vld [vmem:[%s5458_s15 + $0x13b0] sm:$0xff] }
  0xb8   : > { %856 = vst [vmem:[%s5463_s16 + $0x9e0] sm:$0xff] %v855_v60  ;;  %858 = vst [vmem:[%s5463_s16 + $0x9e8] sm:$0xff] %v857_v61  ;;  %v861_v63 = vld [vmem:[%s5458_s15 + $0x13b8] sm:$0xff]  ;;  %v863_v0 = vld [vmem:[%s5458_s15 + $0x1400] sm:$0xff] }
  0xb9   : > { %860 = vst [vmem:[%s5463_s16 + $0x9f0] sm:$0xff] %v859_v62  ;;  %862 = vst [vmem:[%s5463_s16 + $0x9f8] sm:$0xff] %v861_v63  ;;  %v865_v1 = vld [vmem:[%s5458_s15 + $0x1408] sm:$0xff]  ;;  %v867_v2 = vld [vmem:[%s5458_s15 + $0x1410] sm:$0xff] }
  0xba   : > { %864 = vst [vmem:[%s5463_s16 + $0xa00] sm:$0xff] %v863_v0  ;;  %v869_v3 = vld [vmem:[%s5458_s15 + $0x1418] sm:$0xff]  ;;  %866 = vst [vmem:[%s5463_s16 + $0xa08] sm:$0xff] %v865_v1  ;;  %v871_v4 = vld [vmem:[%s5458_s15 + $0x1420] sm:$0xff] }
  0xbb   : > { %868 = vst [vmem:[%s5463_s16 + $0xa10] sm:$0xff] %v867_v2  ;;  %870 = vst [vmem:[%s5463_s16 + $0xa18] sm:$0xff] %v869_v3  ;;  %v873_v5 = vld [vmem:[%s5458_s15 + $0x1428] sm:$0xff]  ;;  %v875_v6 = vld [vmem:[%s5458_s15 + $0x1430] sm:$0xff] }
  0xbc   : > { %872 = vst [vmem:[%s5463_s16 + $0xa20] sm:$0xff] %v871_v4  ;;  %874 = vst [vmem:[%s5463_s16 + $0xa28] sm:$0xff] %v873_v5  ;;  %v877_v7 = vld [vmem:[%s5458_s15 + $0x1438] sm:$0xff]  ;;  %v879_v8 = vld [vmem:[%s5458_s15 + $0x1480] sm:$0xff] }
  0xbd   : > { %876 = vst [vmem:[%s5463_s16 + $0xa30] sm:$0xff] %v875_v6  ;;  %v881_v9 = vld [vmem:[%s5458_s15 + $0x1488] sm:$0xff]  ;;  %878 = vst [vmem:[%s5463_s16 + $0xa38] sm:$0xff] %v877_v7  ;;  %v883_v10 = vld [vmem:[%s5458_s15 + $0x1490] sm:$0xff] }
  0xbe   : > { %880 = vst [vmem:[%s5463_s16 + $0xa40] sm:$0xff] %v879_v8  ;;  %882 = vst [vmem:[%s5463_s16 + $0xa48] sm:$0xff] %v881_v9  ;;  %v885_v11 = vld [vmem:[%s5458_s15 + $0x1498] sm:$0xff]  ;;  %v887_v12 = vld [vmem:[%s5458_s15 + $0x14a0] sm:$0xff] }
  0xbf   : > { %884 = vst [vmem:[%s5463_s16 + $0xa50] sm:$0xff] %v883_v10  ;;  %886 = vst [vmem:[%s5463_s16 + $0xa58] sm:$0xff] %v885_v11  ;;  %v889_v13 = vld [vmem:[%s5458_s15 + $0x14a8] sm:$0xff]  ;;  %v891_v14 = vld [vmem:[%s5458_s15 + $0x14b0] sm:$0xff] }
  0xc0   : > { %888 = vst [vmem:[%s5463_s16 + $0xa60] sm:$0xff] %v887_v12  ;;  %v893_v15 = vld [vmem:[%s5458_s15 + $0x14b8] sm:$0xff]  ;;  %890 = vst [vmem:[%s5463_s16 + $0xa68] sm:$0xff] %v889_v13  ;;  %v895_v16 = vld [vmem:[%s5458_s15 + $0x1500] sm:$0xff] }
  0xc1   : > { %892 = vst [vmem:[%s5463_s16 + $0xa70] sm:$0xff] %v891_v14  ;;  %894 = vst [vmem:[%s5463_s16 + $0xa78] sm:$0xff] %v893_v15  ;;  %v897_v17 = vld [vmem:[%s5458_s15 + $0x1508] sm:$0xff]  ;;  %v899_v18 = vld [vmem:[%s5458_s15 + $0x1510] sm:$0xff] }
  0xc2   : > { %896 = vst [vmem:[%s5463_s16 + $0xa80] sm:$0xff] %v895_v16  ;;  %898 = vst [vmem:[%s5463_s16 + $0xa88] sm:$0xff] %v897_v17  ;;  %v901_v19 = vld [vmem:[%s5458_s15 + $0x1518] sm:$0xff]  ;;  %v903_v20 = vld [vmem:[%s5458_s15 + $0x1520] sm:$0xff] }
  0xc3   : > { %900 = vst [vmem:[%s5463_s16 + $0xa90] sm:$0xff] %v899_v18  ;;  %v905_v21 = vld [vmem:[%s5458_s15 + $0x1528] sm:$0xff]  ;;  %902 = vst [vmem:[%s5463_s16 + $0xa98] sm:$0xff] %v901_v19  ;;  %v907_v22 = vld [vmem:[%s5458_s15 + $0x1530] sm:$0xff] }
  0xc4   : > { %904 = vst [vmem:[%s5463_s16 + $0xaa0] sm:$0xff] %v903_v20  ;;  %906 = vst [vmem:[%s5463_s16 + $0xaa8] sm:$0xff] %v905_v21  ;;  %v909_v23 = vld [vmem:[%s5458_s15 + $0x1538] sm:$0xff]  ;;  %v911_v24 = vld [vmem:[%s5458_s15 + $0x1580] sm:$0xff] }
  0xc5   : > { %908 = vst [vmem:[%s5463_s16 + $0xab0] sm:$0xff] %v907_v22  ;;  %910 = vst [vmem:[%s5463_s16 + $0xab8] sm:$0xff] %v909_v23  ;;  %v913_v25 = vld [vmem:[%s5458_s15 + $0x1588] sm:$0xff]  ;;  %v915_v26 = vld [vmem:[%s5458_s15 + $0x1590] sm:$0xff] }
  0xc6   : > { %912 = vst [vmem:[%s5463_s16 + $0xac0] sm:$0xff] %v911_v24  ;;  %v917_v27 = vld [vmem:[%s5458_s15 + $0x1598] sm:$0xff]  ;;  %914 = vst [vmem:[%s5463_s16 + $0xac8] sm:$0xff] %v913_v25  ;;  %v919_v28 = vld [vmem:[%s5458_s15 + $0x15a0] sm:$0xff] }
  0xc7   : > { %916 = vst [vmem:[%s5463_s16 + $0xad0] sm:$0xff] %v915_v26  ;;  %918 = vst [vmem:[%s5463_s16 + $0xad8] sm:$0xff] %v917_v27  ;;  %v921_v29 = vld [vmem:[%s5458_s15 + $0x15a8] sm:$0xff]  ;;  %v923_v30 = vld [vmem:[%s5458_s15 + $0x15b0] sm:$0xff] }
  0xc8   : > { %920 = vst [vmem:[%s5463_s16 + $0xae0] sm:$0xff] %v919_v28  ;;  %922 = vst [vmem:[%s5463_s16 + $0xae8] sm:$0xff] %v921_v29  ;;  %v925_v31 = vld [vmem:[%s5458_s15 + $0x15b8] sm:$0xff]  ;;  %v927_v32 = vld [vmem:[%s5458_s15 + $0x1600] sm:$0xff] }
  0xc9   : > { %924 = vst [vmem:[%s5463_s16 + $0xaf0] sm:$0xff] %v923_v30  ;;  %v929_v33 = vld [vmem:[%s5458_s15 + $0x1608] sm:$0xff]  ;;  %926 = vst [vmem:[%s5463_s16 + $0xaf8] sm:$0xff] %v925_v31  ;;  %v931_v34 = vld [vmem:[%s5458_s15 + $0x1610] sm:$0xff] }
  0xca   : > { %928 = vst [vmem:[%s5463_s16 + $0xb00] sm:$0xff] %v927_v32  ;;  %930 = vst [vmem:[%s5463_s16 + $0xb08] sm:$0xff] %v929_v33  ;;  %v933_v35 = vld [vmem:[%s5458_s15 + $0x1618] sm:$0xff]  ;;  %v935_v36 = vld [vmem:[%s5458_s15 + $0x1620] sm:$0xff] }
  0xcb   : > { %932 = vst [vmem:[%s5463_s16 + $0xb10] sm:$0xff] %v931_v34  ;;  %934 = vst [vmem:[%s5463_s16 + $0xb18] sm:$0xff] %v933_v35  ;;  %v937_v37 = vld [vmem:[%s5458_s15 + $0x1628] sm:$0xff]  ;;  %v939_v38 = vld [vmem:[%s5458_s15 + $0x1630] sm:$0xff] }
  0xcc   : > { %936 = vst [vmem:[%s5463_s16 + $0xb20] sm:$0xff] %v935_v36  ;;  %v941_v39 = vld [vmem:[%s5458_s15 + $0x1638] sm:$0xff]  ;;  %938 = vst [vmem:[%s5463_s16 + $0xb28] sm:$0xff] %v937_v37  ;;  %v943_v40 = vld [vmem:[%s5458_s15 + $0x1680] sm:$0xff] }
  0xcd   : > { %940 = vst [vmem:[%s5463_s16 + $0xb30] sm:$0xff] %v939_v38  ;;  %942 = vst [vmem:[%s5463_s16 + $0xb38] sm:$0xff] %v941_v39  ;;  %v945_v41 = vld [vmem:[%s5458_s15 + $0x1688] sm:$0xff]  ;;  %v947_v42 = vld [vmem:[%s5458_s15 + $0x1690] sm:$0xff] }
  0xce   : > { %944 = vst [vmem:[%s5463_s16 + $0xb40] sm:$0xff] %v943_v40  ;;  %946 = vst [vmem:[%s5463_s16 + $0xb48] sm:$0xff] %v945_v41  ;;  %v949_v43 = vld [vmem:[%s5458_s15 + $0x1698] sm:$0xff]  ;;  %v951_v44 = vld [vmem:[%s5458_s15 + $0x16a0] sm:$0xff] }
  0xcf   : > { %948 = vst [vmem:[%s5463_s16 + $0xb50] sm:$0xff] %v947_v42  ;;  %v953_v45 = vld [vmem:[%s5458_s15 + $0x16a8] sm:$0xff]  ;;  %950 = vst [vmem:[%s5463_s16 + $0xb58] sm:$0xff] %v949_v43  ;;  %v955_v46 = vld [vmem:[%s5458_s15 + $0x16b0] sm:$0xff] }
  0xd0   : > { %952 = vst [vmem:[%s5463_s16 + $0xb60] sm:$0xff] %v951_v44  ;;  %954 = vst [vmem:[%s5463_s16 + $0xb68] sm:$0xff] %v953_v45  ;;  %v957_v47 = vld [vmem:[%s5458_s15 + $0x16b8] sm:$0xff]  ;;  %v959_v48 = vld [vmem:[%s5458_s15 + $0x1700] sm:$0xff] }
  0xd1   : > { %956 = vst [vmem:[%s5463_s16 + $0xb70] sm:$0xff] %v955_v46  ;;  %958 = vst [vmem:[%s5463_s16 + $0xb78] sm:$0xff] %v957_v47  ;;  %v961_v49 = vld [vmem:[%s5458_s15 + $0x1708] sm:$0xff]  ;;  %v963_v50 = vld [vmem:[%s5458_s15 + $0x1710] sm:$0xff] }
  0xd2   : > { %960 = vst [vmem:[%s5463_s16 + $0xb80] sm:$0xff] %v959_v48  ;;  %v965_v51 = vld [vmem:[%s5458_s15 + $0x1718] sm:$0xff]  ;;  %962 = vst [vmem:[%s5463_s16 + $0xb88] sm:$0xff] %v961_v49  ;;  %v967_v52 = vld [vmem:[%s5458_s15 + $0x1720] sm:$0xff] }
  0xd3   : > { %964 = vst [vmem:[%s5463_s16 + $0xb90] sm:$0xff] %v963_v50  ;;  %966 = vst [vmem:[%s5463_s16 + $0xb98] sm:$0xff] %v965_v51  ;;  %v969_v53 = vld [vmem:[%s5458_s15 + $0x1728] sm:$0xff]  ;;  %v971_v54 = vld [vmem:[%s5458_s15 + $0x1730] sm:$0xff] }
  0xd4   : > { %968 = vst [vmem:[%s5463_s16 + $0xba0] sm:$0xff] %v967_v52  ;;  %970 = vst [vmem:[%s5463_s16 + $0xba8] sm:$0xff] %v969_v53  ;;  %v973_v55 = vld [vmem:[%s5458_s15 + $0x1738] sm:$0xff]  ;;  %v975_v56 = vld [vmem:[%s5458_s15 + $0x1780] sm:$0xff] }
  0xd5   : > { %972 = vst [vmem:[%s5463_s16 + $0xbb0] sm:$0xff] %v971_v54  ;;  %v977_v57 = vld [vmem:[%s5458_s15 + $0x1788] sm:$0xff]  ;;  %974 = vst [vmem:[%s5463_s16 + $0xbb8] sm:$0xff] %v973_v55  ;;  %v979_v58 = vld [vmem:[%s5458_s15 + $0x1790] sm:$0xff] }
  0xd6   : > { %976 = vst [vmem:[%s5463_s16 + $0xbc0] sm:$0xff] %v975_v56  ;;  %978 = vst [vmem:[%s5463_s16 + $0xbc8] sm:$0xff] %v977_v57  ;;  %v981_v59 = vld [vmem:[%s5458_s15 + $0x1798] sm:$0xff]  ;;  %v983_v60 = vld [vmem:[%s5458_s15 + $0x17a0] sm:$0xff] }
  0xd7   : > { %980 = vst [vmem:[%s5463_s16 + $0xbd0] sm:$0xff] %v979_v58  ;;  %982 = vst [vmem:[%s5463_s16 + $0xbd8] sm:$0xff] %v981_v59  ;;  %v985_v61 = vld [vmem:[%s5458_s15 + $0x17a8] sm:$0xff]  ;;  %v987_v62 = vld [vmem:[%s5458_s15 + $0x17b0] sm:$0xff] }
  0xd8   : > { %984 = vst [vmem:[%s5463_s16 + $0xbe0] sm:$0xff] %v983_v60  ;;  %v989_v63 = vld [vmem:[%s5458_s15 + $0x17b8] sm:$0xff]  ;;  %986 = vst [vmem:[%s5463_s16 + $0xbe8] sm:$0xff] %v985_v61  ;;  %v991_v0 = vld [vmem:[%s5458_s15 + $0x1800] sm:$0xff] }
  0xd9   : > { %988 = vst [vmem:[%s5463_s16 + $0xbf0] sm:$0xff] %v987_v62  ;;  %990 = vst [vmem:[%s5463_s16 + $0xbf8] sm:$0xff] %v989_v63  ;;  %v993_v1 = vld [vmem:[%s5458_s15 + $0x1808] sm:$0xff]  ;;  %v995_v2 = vld [vmem:[%s5458_s15 + $0x1810] sm:$0xff] }
  0xda   : > { %992 = vst [vmem:[%s5463_s16 + $0xc00] sm:$0xff] %v991_v0  ;;  %994 = vst [vmem:[%s5463_s16 + $0xc08] sm:$0xff] %v993_v1  ;;  %v997_v3 = vld [vmem:[%s5458_s15 + $0x1818] sm:$0xff]  ;;  %v999_v4 = vld [vmem:[%s5458_s15 + $0x1820] sm:$0xff] }
  0xdb   : > { %996 = vst [vmem:[%s5463_s16 + $0xc10] sm:$0xff] %v995_v2  ;;  %v1001_v5 = vld [vmem:[%s5458_s15 + $0x1828] sm:$0xff]  ;;  %998 = vst [vmem:[%s5463_s16 + $0xc18] sm:$0xff] %v997_v3  ;;  %v1003_v6 = vld [vmem:[%s5458_s15 + $0x1830] sm:$0xff] }
  0xdc   : > { %1000 = vst [vmem:[%s5463_s16 + $0xc20] sm:$0xff] %v999_v4  ;;  %1002 = vst [vmem:[%s5463_s16 + $0xc28] sm:$0xff] %v1001_v5  ;;  %v1005_v7 = vld [vmem:[%s5458_s15 + $0x1838] sm:$0xff]  ;;  %v1007_v8 = vld [vmem:[%s5458_s15 + $0x1880] sm:$0xff] }
  0xdd   : > { %1004 = vst [vmem:[%s5463_s16 + $0xc30] sm:$0xff] %v1003_v6  ;;  %1006 = vst [vmem:[%s5463_s16 + $0xc38] sm:$0xff] %v1005_v7  ;;  %v1009_v9 = vld [vmem:[%s5458_s15 + $0x1888] sm:$0xff]  ;;  %v1011_v10 = vld [vmem:[%s5458_s15 + $0x1890] sm:$0xff] }
  0xde   : > { %1008 = vst [vmem:[%s5463_s16 + $0xc40] sm:$0xff] %v1007_v8  ;;  %v1013_v11 = vld [vmem:[%s5458_s15 + $0x1898] sm:$0xff]  ;;  %1010 = vst [vmem:[%s5463_s16 + $0xc48] sm:$0xff] %v1009_v9  ;;  %v1015_v12 = vld [vmem:[%s5458_s15 + $0x18a0] sm:$0xff] }
  0xdf   : > { %1012 = vst [vmem:[%s5463_s16 + $0xc50] sm:$0xff] %v1011_v10  ;;  %1014 = vst [vmem:[%s5463_s16 + $0xc58] sm:$0xff] %v1013_v11  ;;  %v1017_v13 = vld [vmem:[%s5458_s15 + $0x18a8] sm:$0xff]  ;;  %v1019_v14 = vld [vmem:[%s5458_s15 + $0x18b0] sm:$0xff] }
  0xe0   : > { %1016 = vst [vmem:[%s5463_s16 + $0xc60] sm:$0xff] %v1015_v12  ;;  %1018 = vst [vmem:[%s5463_s16 + $0xc68] sm:$0xff] %v1017_v13  ;;  %v1021_v15 = vld [vmem:[%s5458_s15 + $0x18b8] sm:$0xff]  ;;  %v1023_v16 = vld [vmem:[%s5458_s15 + $0x1900] sm:$0xff] }
  0xe1   : > { %1020 = vst [vmem:[%s5463_s16 + $0xc70] sm:$0xff] %v1019_v14  ;;  %v1025_v17 = vld [vmem:[%s5458_s15 + $0x1908] sm:$0xff]  ;;  %1022 = vst [vmem:[%s5463_s16 + $0xc78] sm:$0xff] %v1021_v15  ;;  %v1027_v18 = vld [vmem:[%s5458_s15 + $0x1910] sm:$0xff] }
  0xe2   : > { %1024 = vst [vmem:[%s5463_s16 + $0xc80] sm:$0xff] %v1023_v16  ;;  %1026 = vst [vmem:[%s5463_s16 + $0xc88] sm:$0xff] %v1025_v17  ;;  %v1029_v19 = vld [vmem:[%s5458_s15 + $0x1918] sm:$0xff]  ;;  %v1031_v20 = vld [vmem:[%s5458_s15 + $0x1920] sm:$0xff] }
  0xe3   : > { %1028 = vst [vmem:[%s5463_s16 + $0xc90] sm:$0xff] %v1027_v18  ;;  %1030 = vst [vmem:[%s5463_s16 + $0xc98] sm:$0xff] %v1029_v19  ;;  %v1033_v21 = vld [vmem:[%s5458_s15 + $0x1928] sm:$0xff]  ;;  %v1035_v22 = vld [vmem:[%s5458_s15 + $0x1930] sm:$0xff] }
  0xe4   : > { %1032 = vst [vmem:[%s5463_s16 + $0xca0] sm:$0xff] %v1031_v20  ;;  %v1037_v23 = vld [vmem:[%s5458_s15 + $0x1938] sm:$0xff]  ;;  %1034 = vst [vmem:[%s5463_s16 + $0xca8] sm:$0xff] %v1033_v21  ;;  %v1039_v24 = vld [vmem:[%s5458_s15 + $0x1980] sm:$0xff] }
  0xe5   : > { %1036 = vst [vmem:[%s5463_s16 + $0xcb0] sm:$0xff] %v1035_v22  ;;  %1038 = vst [vmem:[%s5463_s16 + $0xcb8] sm:$0xff] %v1037_v23  ;;  %v1041_v25 = vld [vmem:[%s5458_s15 + $0x1988] sm:$0xff]  ;;  %v1043_v26 = vld [vmem:[%s5458_s15 + $0x1990] sm:$0xff] }
  0xe6   : > { %1040 = vst [vmem:[%s5463_s16 + $0xcc0] sm:$0xff] %v1039_v24  ;;  %1042 = vst [vmem:[%s5463_s16 + $0xcc8] sm:$0xff] %v1041_v25  ;;  %v1045_v27 = vld [vmem:[%s5458_s15 + $0x1998] sm:$0xff]  ;;  %v1047_v28 = vld [vmem:[%s5458_s15 + $0x19a0] sm:$0xff] }
  0xe7   : > { %1044 = vst [vmem:[%s5463_s16 + $0xcd0] sm:$0xff] %v1043_v26  ;;  %v1049_v29 = vld [vmem:[%s5458_s15 + $0x19a8] sm:$0xff]  ;;  %1046 = vst [vmem:[%s5463_s16 + $0xcd8] sm:$0xff] %v1045_v27  ;;  %v1051_v30 = vld [vmem:[%s5458_s15 + $0x19b0] sm:$0xff] }
  0xe8   : > { %1048 = vst [vmem:[%s5463_s16 + $0xce0] sm:$0xff] %v1047_v28  ;;  %1050 = vst [vmem:[%s5463_s16 + $0xce8] sm:$0xff] %v1049_v29  ;;  %v1053_v31 = vld [vmem:[%s5458_s15 + $0x19b8] sm:$0xff]  ;;  %v1055_v32 = vld [vmem:[%s5458_s15 + $0x1a00] sm:$0xff] }
  0xe9   : > { %1052 = vst [vmem:[%s5463_s16 + $0xcf0] sm:$0xff] %v1051_v30  ;;  %1054 = vst [vmem:[%s5463_s16 + $0xcf8] sm:$0xff] %v1053_v31  ;;  %v1057_v33 = vld [vmem:[%s5458_s15 + $0x1a08] sm:$0xff]  ;;  %v1059_v34 = vld [vmem:[%s5458_s15 + $0x1a10] sm:$0xff] }
  0xea   : > { %1056 = vst [vmem:[%s5463_s16 + $0xd00] sm:$0xff] %v1055_v32  ;;  %v1061_v35 = vld [vmem:[%s5458_s15 + $0x1a18] sm:$0xff]  ;;  %1058 = vst [vmem:[%s5463_s16 + $0xd08] sm:$0xff] %v1057_v33  ;;  %v1063_v36 = vld [vmem:[%s5458_s15 + $0x1a20] sm:$0xff] }
  0xeb   : > { %1060 = vst [vmem:[%s5463_s16 + $0xd10] sm:$0xff] %v1059_v34  ;;  %1062 = vst [vmem:[%s5463_s16 + $0xd18] sm:$0xff] %v1061_v35  ;;  %v1065_v37 = vld [vmem:[%s5458_s15 + $0x1a28] sm:$0xff]  ;;  %v1067_v38 = vld [vmem:[%s5458_s15 + $0x1a30] sm:$0xff] }
  0xec   : > { %1064 = vst [vmem:[%s5463_s16 + $0xd20] sm:$0xff] %v1063_v36  ;;  %1066 = vst [vmem:[%s5463_s16 + $0xd28] sm:$0xff] %v1065_v37  ;;  %v1069_v39 = vld [vmem:[%s5458_s15 + $0x1a38] sm:$0xff]  ;;  %v1071_v40 = vld [vmem:[%s5458_s15 + $0x1a80] sm:$0xff] }
  0xed   : > { %1068 = vst [vmem:[%s5463_s16 + $0xd30] sm:$0xff] %v1067_v38  ;;  %v1073_v41 = vld [vmem:[%s5458_s15 + $0x1a88] sm:$0xff]  ;;  %1070 = vst [vmem:[%s5463_s16 + $0xd38] sm:$0xff] %v1069_v39  ;;  %v1075_v42 = vld [vmem:[%s5458_s15 + $0x1a90] sm:$0xff] }
  0xee   : > { %1072 = vst [vmem:[%s5463_s16 + $0xd40] sm:$0xff] %v1071_v40  ;;  %1074 = vst [vmem:[%s5463_s16 + $0xd48] sm:$0xff] %v1073_v41  ;;  %v1077_v43 = vld [vmem:[%s5458_s15 + $0x1a98] sm:$0xff]  ;;  %v1079_v44 = vld [vmem:[%s5458_s15 + $0x1aa0] sm:$0xff] }
  0xef   : > { %1076 = vst [vmem:[%s5463_s16 + $0xd50] sm:$0xff] %v1075_v42  ;;  %1078 = vst [vmem:[%s5463_s16 + $0xd58] sm:$0xff] %v1077_v43  ;;  %v1081_v45 = vld [vmem:[%s5458_s15 + $0x1aa8] sm:$0xff]  ;;  %v1083_v46 = vld [vmem:[%s5458_s15 + $0x1ab0] sm:$0xff] }
  0xf0   : > { %1080 = vst [vmem:[%s5463_s16 + $0xd60] sm:$0xff] %v1079_v44  ;;  %v1085_v47 = vld [vmem:[%s5458_s15 + $0x1ab8] sm:$0xff]  ;;  %1082 = vst [vmem:[%s5463_s16 + $0xd68] sm:$0xff] %v1081_v45 }
  0xf1   : > { %1084 = vst [vmem:[%s5463_s16 + $0xd70] sm:$0xff] %v1083_v46  ;;  %1086 = vst [vmem:[%s5463_s16 + $0xd78] sm:$0xff] %v1085_v47 }
  0xf2 PF: > { %p4727_p7 = scmp.ge.s32.totalorder %s5364_s24, 1  ;;  %p1091_p8 = scmp.lt.s32.totalorder %s5364_s24, 5 }
  0xf4   : > { %p1092_p9 = pnand %p4727_p7, %p1091_p8 }
  0xf5   : > { %s1098_s17 = sand.u32 (!%p1092_p9), 1, %s5340_s18   ;;  %v6332_v48 = vld [vmem:[%s6956_s0] sm:$0xff] (!%p1092_p9)  ;;  %vm3770_vm0 = vcmask (!%p1092_p9), 392192   ;;  %p1139_p10 = scmp.lt.s32.totalorder (!%p1092_p9), %s5352_s21, 1 }
  0xf6   : > { %1095 = sbr.rel (%p1092_p9) target bundleno = 1083 (0x43b), region = 51  ;;  %v6336_v49 = vcombine.high (!%p1092_p9), %v6332_v48, %v6332_v48  ;;  %p5185_p12 = scmp.ne.s32.totalorder (!%p1092_p9), %s5348_s20, 0 }
  0xf7   : > { %s5246_s29 = smul.u32 (!%p1092_p9), 3456, %s1098_s17  ;;  %s4728_s17 = sshll.u32 (!%p1092_p9), %s5348_s20, 4 }
  0xf8   : > { %3806 = vmatprep.mubr.bf16.mxu0 (!%p1092_p9), %v6336_v49  ;;  %3888 = vmatprep.mubr.bf16.mxu1 (!%p1092_p9), %v6336_v49  ;;  %p1141_p11 = scmp.lt.s32.totalorder (!%p1092_p9), %s4728_s17, 31 }
  0xf9   : > { %s6340_s30 = scalar_lea.vmem (!%p1092_p9), [#allocation2], %s5246_s29 }
  0xfa   : > { %v1159_v50 = vld [vmem:[%s6340_s30] sm:$0xff] (!%p1092_p9)  ;;  %v1160_v52 = vld [vmem:[%s6340_s30 + $0x8] sm:$0xff] (!%p1092_p9) }
  0xfb   : > { %v1167_v51 = vld [vmem:[%s6340_s30 + $0x40] sm:$0xff] (!%p1092_p9)  ;;  %v1168_v54 = vld [vmem:[%s6340_s30 + $0x48] sm:$0xff] (!%p1092_p9) }
  0xfc   : > { %v4738_v53 = vcombine.high (!%p1092_p9), %v1159_v50, %v1167_v51  ;;  %v4737_v55 = vcombine.low (!%p1092_p9), %v1159_v50, %v1167_v51  ;;  %v1175_v56 = vld [vmem:[%s6340_s30 + $0x80] sm:$0xff] (!%p1092_p9)  ;;  %v4740_v58 = vcombine.high (!%p1092_p9), %v1160_v52, %v1168_v54  ;;  %v4739_v59 = vcombine.low (!%p1092_p9), %v1160_v52, %v1168_v54  ;;  %v1176_v61 = vld [vmem:[%s6340_s30 + $0x88] sm:$0xff] (!%p1092_p9) }
  0xfd   : > { %v1183_v57 = vld [vmem:[%s6340_s30 + $0xc0] sm:$0xff]  ;;  %v1184_v62 = vld [vmem:[%s6340_s30 + $0xc8] sm:$0xff]  ;;  %s6975_s21 = smov (!%p1139_p10, %s5352_s21), 1  ;;  %s6977_s17 = smov (!%p1141_p11, %s4728_s17), 31 }
  0xfe   : > { %v4754_v60 = vcombine.high %v1175_v56, %v1183_v57  ;;  %v1191_v63 = vld [vmem:[%s6340_s30 + $0x100] sm:$0xff]  ;;  %3774 = vmatprep.subr.bf16.mxu0 %v4738_v53  ;;  %v4756_v0 = vcombine.high %v1176_v61, %v1184_v62  ;;  %v1192_v2 = vld [vmem:[%s6340_s30 + $0x108] sm:$0xff]  ;;  %3856 = vmatprep.subr.bf16.mxu1 %v4740_v58  ;;  %v4753_v4 = vcombine.low %v1175_v56, %v1183_v57  ;;  %s4731_s10 = sshll.u32 %s6975_s21, 3  ;;  %s4729_s27 = sshll.u32 %s6975_s21, 5  ;;  %vm4506_vm1 = vcmask (!%p5185_p12), 7168  }
  0xff   : > { %v1199_v1 = vld [vmem:[%s6340_s30 + $0x140] sm:$0xff]  ;;  %v1200_v3 = vld [vmem:[%s6340_s30 + $0x148] sm:$0xff]  ;;  %3775 = vmatpush1.bf16.msra.mxu0 %v4737_v55  ;;  %3857 = vmatpush1.bf16.msra.mxu1 %v4739_v59  ;;  %v4755_v5 = vcombine.low %v1176_v61, %v1184_v62  ;;  %s6592_s13 = scalar_lea.vmem %s6960_s4, %s4731_s10  ;;  %s6599_s16 = scalar_lea.vmem %s6961_s5, %s4731_s10 }
 0x100   : > { %3776 = vmatprep.subr.bf16.mxu0 %v4754_v60  ;;  %v4770_v6 = vcombine.high %v1191_v63, %v1199_v1  ;;  %3858 = vmatprep.subr.bf16.mxu1 %v4756_v0  ;;  %v4772_v7 = vcombine.high %v1192_v2, %v1200_v3  ;;  %v1207_v8 = vld [vmem:[%s6340_s30 + $0x180] sm:$0xff]  ;;  %v1208_v10 = vld [vmem:[%s6340_s30 + $0x188] sm:$0xff]  ;;  %v4769_v12 = vcombine.low %v1191_v63, %v1199_v1  ;;  %s1144_s28 = sadd.s32 %s4729_s27, %s6977_s17 }
 0x101   : > { %v1215_v9 = vld [vmem:[%s6340_s30 + $0x1c0] sm:$0xff]  ;;  %v1216_v11 = vld [vmem:[%s6340_s30 + $0x1c8] sm:$0xff]  ;;  %v4771_v13 = vcombine.low %v1192_v2, %v1200_v3  ;;  %s4730_s21 = sshll.u32 %s1144_s28, 2 }
 0x102   : > { %v4786_v14 = vcombine.high %v1207_v8, %v1215_v9  ;;  %v4788_v15 = vcombine.high %v1208_v10, %v1216_v11  ;;  %v1223_v16 = vld [vmem:[%s6340_s30 + $0x200] sm:$0xff]  ;;  %v1224_v18 = vld [vmem:[%s6340_s30 + $0x208] sm:$0xff]  ;;  %v4785_v20 = vcombine.low %v1207_v8, %v1215_v9  ;;  %v4787_v21 = vcombine.low %v1208_v10, %v1216_v11  ;;  %s6751_s7 = scalar_lea.vmem %s6959_s3, %s4730_s21 }
 0x103   : > { %3777 = vmatpush1.bf16.msra.mxu0 %v4753_v4  ;;  %3859 = vmatpush1.bf16.msra.mxu1 %v4755_v5  ;;  %v1231_v17 = vld [vmem:[%s6340_s30 + $0x240] sm:$0xff]  ;;  %v1232_v19 = vld [vmem:[%s6340_s30 + $0x248] sm:$0xff] }
 0x104   : > { %3778 = vmatprep.subr.bf16.mxu0 %v4770_v6  ;;  %3860 = vmatprep.subr.bf16.mxu1 %v4772_v7  ;;  %v4802_v22 = vcombine.high %v1223_v16, %v1231_v17  ;;  %v4804_v23 = vcombine.high %v1224_v18, %v1232_v19  ;;  %v1239_v24 = vld [vmem:[%s6340_s30 + $0x280] sm:$0xff]  ;;  %v1240_v26 = vld [vmem:[%s6340_s30 + $0x288] sm:$0xff]  ;;  %v4801_v28 = vcombine.low %v1223_v16, %v1231_v17 }
 0x105   : > { %v1247_v25 = vld [vmem:[%s6340_s30 + $0x2c0] sm:$0xff]  ;;  %v1248_v27 = vld [vmem:[%s6340_s30 + $0x2c8] sm:$0xff]  ;;  %v4803_v29 = vcombine.low %v1224_v18, %v1232_v19 }
 0x106   : > { %v4818_v30 = vcombine.high %v1239_v24, %v1247_v25  ;;  %v4820_v31 = vcombine.high %v1240_v26, %v1248_v27  ;;  %v1255_v32 = vld [vmem:[%s6340_s30 + $0x300] sm:$0xff]  ;;  %v1256_v34 = vld [vmem:[%s6340_s30 + $0x308] sm:$0xff]  ;;  %v4817_v36 = vcombine.low %v1239_v24, %v1247_v25  ;;  %v4819_v37 = vcombine.low %v1240_v26, %v1248_v27 }
 0x107   : > { %3779 = vmatpush1.bf16.msra.mxu0 %v4769_v12  ;;  %3861 = vmatpush1.bf16.msra.mxu1 %v4771_v13  ;;  %v1263_v33 = vld [vmem:[%s6340_s30 + $0x340] sm:$0xff]  ;;  %v1264_v35 = vld [vmem:[%s6340_s30 + $0x348] sm:$0xff] }
 0x108   : > { %3780 = vmatprep.subr.bf16.mxu0 %v4786_v14  ;;  %3862 = vmatprep.subr.bf16.mxu1 %v4788_v15  ;;  %v4834_v38 = vcombine.high %v1255_v32, %v1263_v33  ;;  %v4836_v39 = vcombine.high %v1256_v34, %v1264_v35  ;;  %v1271_v40 = vld [vmem:[%s6340_s30 + $0x380] sm:$0xff]  ;;  %v1272_v42 = vld [vmem:[%s6340_s30 + $0x388] sm:$0xff]  ;;  %v4833_v44 = vcombine.low %v1255_v32, %v1263_v33 }
 0x109   : > { %v1279_v41 = vld [vmem:[%s6340_s30 + $0x3c0] sm:$0xff]  ;;  %v1280_v43 = vld [vmem:[%s6340_s30 + $0x3c8] sm:$0xff]  ;;  %v4835_v45 = vcombine.low %v1256_v34, %v1264_v35 }
 0x10a   : > { %v4850_v46 = vcombine.high %v1271_v40, %v1279_v41  ;;  %v4852_v47 = vcombine.high %v1272_v42, %v1280_v43  ;;  %v1287_v50 = vld [vmem:[%s6340_s30 + $0x400] sm:$0xff]  ;;  %v1288_v52 = vld [vmem:[%s6340_s30 + $0x408] sm:$0xff]  ;;  %v4849_v54 = vcombine.low %v1271_v40, %v1279_v41  ;;  %v4851_v55 = vcombine.low %v1272_v42, %v1280_v43 }
 0x10b   : > { %3781 = vmatpush1.bf16.msra.mxu0 %v4785_v20  ;;  %3863 = vmatpush1.bf16.msra.mxu1 %v4787_v21  ;;  %v1295_v51 = vld [vmem:[%s6340_s30 + $0x440] sm:$0xff]  ;;  %v1296_v53 = vld [vmem:[%s6340_s30 + $0x448] sm:$0xff] }
 0x10c   : > { %3782 = vmatprep.subr.bf16.mxu0 %v4802_v22  ;;  %3864 = vmatprep.subr.bf16.mxu1 %v4804_v23  ;;  %v4866_v56 = vcombine.high %v1287_v50, %v1295_v51  ;;  %v4868_v57 = vcombine.high %v1288_v52, %v1296_v53  ;;  %v1303_v58 = vld [vmem:[%s6340_s30 + $0x480] sm:$0xff]  ;;  %v1304_v60 = vld [vmem:[%s6340_s30 + $0x488] sm:$0xff]  ;;  %v4865_v62 = vcombine.low %v1287_v50, %v1295_v51 }
 0x10d   : > { %v1311_v59 = vld [vmem:[%s6340_s30 + $0x4c0] sm:$0xff]  ;;  %v1312_v61 = vld [vmem:[%s6340_s30 + $0x4c8] sm:$0xff]  ;;  %v4867_v63 = vcombine.low %v1288_v52, %v1296_v53 }
 0x10e   : > { %v4882_v0 = vcombine.high %v1303_v58, %v1311_v59  ;;  %v4884_v1 = vcombine.high %v1304_v60, %v1312_v61  ;;  %v1319_v2 = vld [vmem:[%s6340_s30 + $0x500] sm:$0xff]  ;;  %v1320_v4 = vld [vmem:[%s6340_s30 + $0x508] sm:$0xff]  ;;  %v4881_v6 = vcombine.low %v1303_v58, %v1311_v59  ;;  %v4883_v7 = vcombine.low %v1304_v60, %v1312_v61 }
 0x10f   : > { %3783 = vmatpush1.bf16.msra.mxu0 %v4801_v28  ;;  %3865 = vmatpush1.bf16.msra.mxu1 %v4803_v29  ;;  %v1327_v3 = vld [vmem:[%s6340_s30 + $0x540] sm:$0xff]  ;;  %v1328_v5 = vld [vmem:[%s6340_s30 + $0x548] sm:$0xff] }
 0x110   : > { %3784 = vmatprep.subr.bf16.mxu0 %v4818_v30  ;;  %3866 = vmatprep.subr.bf16.mxu1 %v4820_v31  ;;  %v4898_v8 = vcombine.high %v1319_v2, %v1327_v3  ;;  %v4900_v9 = vcombine.high %v1320_v4, %v1328_v5  ;;  %v1335_v10 = vld [vmem:[%s6340_s30 + $0x580] sm:$0xff]  ;;  %v1336_v12 = vld [vmem:[%s6340_s30 + $0x588] sm:$0xff]  ;;  %v4897_v14 = vcombine.low %v1319_v2, %v1327_v3 }
 0x111   : > { %v1343_v11 = vld [vmem:[%s6340_s30 + $0x5c0] sm:$0xff]  ;;  %v1344_v13 = vld [vmem:[%s6340_s30 + $0x5c8] sm:$0xff]  ;;  %v4899_v15 = vcombine.low %v1320_v4, %v1328_v5 }
 0x112   : > { %v4914_v16 = vcombine.high %v1335_v10, %v1343_v11  ;;  %v4916_v17 = vcombine.high %v1336_v12, %v1344_v13  ;;  %v1351_v18 = vld [vmem:[%s6340_s30 + $0x600] sm:$0xff]  ;;  %v1352_v20 = vld [vmem:[%s6340_s30 + $0x608] sm:$0xff]  ;;  %v4913_v22 = vcombine.low %v1335_v10, %v1343_v11  ;;  %v4915_v23 = vcombine.low %v1336_v12, %v1344_v13 }
 0x113   : > { %3785 = vmatpush1.bf16.msra.mxu0 %v4817_v36  ;;  %3867 = vmatpush1.bf16.msra.mxu1 %v4819_v37  ;;  %v1359_v19 = vld [vmem:[%s6340_s30 + $0x640] sm:$0xff]  ;;  %v1360_v21 = vld [vmem:[%s6340_s30 + $0x648] sm:$0xff] }
 0x114   : > { %3786 = vmatprep.subr.bf16.mxu0 %v4834_v38  ;;  %3868 = vmatprep.subr.bf16.mxu1 %v4836_v39  ;;  %v4930_v24 = vcombine.high %v1351_v18, %v1359_v19  ;;  %v4932_v25 = vcombine.high %v1352_v20, %v1360_v21  ;;  %v1367_v26 = vld [vmem:[%s6340_s30 + $0x680] sm:$0xff]  ;;  %v1368_v28 = vld [vmem:[%s6340_s30 + $0x688] sm:$0xff]  ;;  %v4929_v30 = vcombine.low %v1351_v18, %v1359_v19 }
 0x115   : > { %v1375_v27 = vld [vmem:[%s6340_s30 + $0x6c0] sm:$0xff]  ;;  %v1376_v29 = vld [vmem:[%s6340_s30 + $0x6c8] sm:$0xff]  ;;  %v4931_v31 = vcombine.low %v1352_v20, %v1360_v21 }
 0x116   : > { %v4946_v32 = vcombine.high %v1367_v26, %v1375_v27  ;;  %v4948_v33 = vcombine.high %v1368_v28, %v1376_v29  ;;  %v1383_v34 = vld [vmem:[%s6340_s30 + $0x700] sm:$0xff]  ;;  %v1384_v36 = vld [vmem:[%s6340_s30 + $0x708] sm:$0xff]  ;;  %v4945_v38 = vcombine.low %v1367_v26, %v1375_v27  ;;  %v4947_v39 = vcombine.low %v1368_v28, %v1376_v29 }
 0x117   : > { %3787 = vmatpush1.bf16.msra.mxu0 %v4833_v44  ;;  %3869 = vmatpush1.bf16.msra.mxu1 %v4835_v45  ;;  %v1391_v35 = vld [vmem:[%s6340_s30 + $0x740] sm:$0xff]  ;;  %v1392_v37 = vld [vmem:[%s6340_s30 + $0x748] sm:$0xff] }
 0x118   : > { %3788 = vmatprep.subr.bf16.mxu0 %v4850_v46  ;;  %3870 = vmatprep.subr.bf16.mxu1 %v4852_v47  ;;  %v4962_v40 = vcombine.high %v1383_v34, %v1391_v35  ;;  %v4964_v41 = vcombine.high %v1384_v36, %v1392_v37  ;;  %v1399_v42 = vld [vmem:[%s6340_s30 + $0x780] sm:$0xff]  ;;  %v1400_v44 = vld [vmem:[%s6340_s30 + $0x788] sm:$0xff]  ;;  %v4961_v46 = vcombine.low %v1383_v34, %v1391_v35 }
 0x119   : > { %v1407_v43 = vld [vmem:[%s6340_s30 + $0x7c0] sm:$0xff]  ;;  %v1408_v45 = vld [vmem:[%s6340_s30 + $0x7c8] sm:$0xff]  ;;  %v4963_v47 = vcombine.low %v1384_v36, %v1392_v37 }
 0x11a   : > { %v4978_v50 = vcombine.high %v1399_v42, %v1407_v43  ;;  %v4980_v51 = vcombine.high %v1400_v44, %v1408_v45  ;;  %v1415_v52 = vld [vmem:[%s6340_s30 + $0x800] sm:$0xff]  ;;  %v1448_v10 = vld [vmem:[%s6340_s30 + $0x908] sm:$0xff] }
 0x11b   : > { %3789 = vmatpush1.bf16.msra.mxu0 %v4849_v54  ;;  %3871 = vmatpush1.bf16.msra.mxu1 %v4851_v55  ;;  %v1423_v53 = vld [vmem:[%s6340_s30 + $0x840] sm:$0xff]  ;;  %v1416_v54 = vld [vmem:[%s6340_s30 + $0x808] sm:$0xff] }
 0x11c   : > { %3790 = vmatprep.subr.bf16.mxu0 %v4866_v56  ;;  %3872 = vmatprep.subr.bf16.mxu1 %v4868_v57  ;;  %v1424_v55 = vld [vmem:[%s6340_s30 + $0x848] sm:$0xff]  ;;  %v4977_v56 = vcombine.low %v1399_v42, %v1407_v43  ;;  %v4979_v57 = vcombine.low %v1400_v44, %v1408_v45  ;;  %v4994_v58 = vcombine.high %v1415_v52, %v1423_v53  ;;  %v1431_v60 = vld [vmem:[%s6340_s30 + $0x880] sm:$0xff] }
 0x11d   : > { %v4996_v59 = vcombine.high %v1416_v54, %v1424_v55  ;;  %v1439_v61 = vld [vmem:[%s6340_s30 + $0x8c0] sm:$0xff]  ;;  %v4993_v2 = vcombine.low %v1415_v52, %v1423_v53  ;;  %v4995_v3 = vcombine.low %v1416_v54, %v1424_v55  ;;  %v1456_v11 = vld [vmem:[%s6340_s30 + $0x948] sm:$0xff] }
 0x11e   : > { %v5010_v4 = vcombine.high %v1431_v60, %v1439_v61  ;;  %v5009_v12 = vcombine.low %v1431_v60, %v1439_v61  ;;  %v1464_v18 = vld [vmem:[%s6340_s30 + $0x988] sm:$0xff]  ;;  %v5027_v21 = vcombine.low %v1448_v10, %v1456_v11 }
 0x11f   : > { %3791 = vmatpush1.bf16.msra.mxu0 %v4865_v62  ;;  %3873 = vmatpush1.bf16.msra.mxu1 %v4867_v63  ;;  %v6414_v62 = vcombine.low %v6332_v48, %v6332_v48  ;;  %v1432_v63 = vld [vmem:[%s6340_s30 + $0x888] sm:$0xff]  ;;  %v1591_v48 = vld [vmem:[%s6957_s1] sm:$0xff] }
 0x120   : > { %3792 = vmatprep.subr.bf16.mxu0 %v4882_v0  ;;  %3874 = vmatprep.subr.bf16.mxu1 %v4884_v1  ;;  %v1440_v0 = vld [vmem:[%s6340_s30 + $0x8c8] sm:$0xff] }
 0x121   : > { %v6421_v1 = vld [vmem:[%s6956_s0 + $0x8] sm:$0xff]  ;;  %v5012_v5 = vcombine.high %v1432_v63, %v1440_v0  ;;  %v5011_v13 = vcombine.low %v1432_v63, %v1440_v0 }
 0x122   : > { %v1472_v19 = vld [vmem:[%s6340_s30 + $0x9c8] sm:$0xff] }
 0x123   : > { %3793 = vmatpush1.bf16.msra.mxu0 %v4881_v6  ;;  %3875 = vmatpush1.bf16.msra.mxu1 %v4883_v7  ;;  %v1447_v6 = vld [vmem:[%s6340_s30 + $0x900] sm:$0xff]  ;;  %v1480_v26 = vld [vmem:[%s6340_s30 + $0xa08] sm:$0xff]  ;;  %v5043_v29 = vcombine.low %v1464_v18, %v1472_v19 }
 0x124   : > { %3794 = vmatprep.subr.bf16.mxu0 %v4898_v8  ;;  %3876 = vmatprep.subr.bf16.mxu1 %v4900_v9  ;;  %v1455_v7 = vld [vmem:[%s6340_s30 + $0x940] sm:$0xff]  ;;  %v6430_v8 = vcombine.high %v6421_v1, %v6421_v1  ;;  %v5366_v9 = vmov 0   ;;  %v1488_v27 = vld [vmem:[%s6340_s30 + $0xa48] sm:$0xff] }
 0x125   : > { %5305 = vset.pattern.permute.xlu0 %v5366_v9  ;;  %v5025_v20 = vcombine.low %v1447_v6, %v1455_v7  ;;  %v1496_v34 = vld [vmem:[%s6340_s30 + $0xa88] sm:$0xff]  ;;  %v5059_v37 = vcombine.low %v1480_v26, %v1488_v27 }
 0x126   : > { %1594 = vperm.xlu0 %5305, %v1591_v48   ;;  %v1504_v35 = vld [vmem:[%s6340_s30 + $0xac8] sm:$0xff]  ;;  %v1567_v48 = vld [vmem:[%s6340_s30 + $0xcc0] sm:$0xff] }
 0x127   : > { %3795 = vmatpush1.bf16.msra.mxu0 %v4897_v14  ;;  %3877 = vmatpush1.bf16.msra.mxu1 %v4899_v15  ;;  %v5026_v14 = vcombine.high %v1447_v6, %v1455_v7  ;;  %v5028_v15 = vcombine.high %v1448_v10, %v1456_v11  ;;  %v1512_v42 = vld [vmem:[%s6340_s30 + $0xb08] sm:$0xff]  ;;  %v5075_v45 = vcombine.low %v1496_v34, %v1504_v35 }
 0x128   : > { %3796 = vmatprep.subr.bf16.mxu0 %v4914_v16  ;;  %3878 = vmatprep.subr.bf16.mxu1 %v4916_v17  ;;  %v1463_v16 = vld [vmem:[%s6340_s30 + $0x980] sm:$0xff]  ;;  %v1520_v43 = vld [vmem:[%s6340_s30 + $0xb48] sm:$0xff] }
 0x129   : > { %v1471_v17 = vld [vmem:[%s6340_s30 + $0x9c0] sm:$0xff]  ;;  %v1528_v52 = vld [vmem:[%s6340_s30 + $0xb88] sm:$0xff]  ;;  %v5091_v55 = vcombine.low %v1512_v42, %v1520_v43 }
 0x12a   : > { %v5041_v28 = vcombine.low %v1463_v16, %v1471_v17  ;;  %v1536_v53 = vld [vmem:[%s6340_s30 + $0xbc8] sm:$0xff] }
 0x12b   : > { %3797 = vmatpush1.bf16.msra.mxu0 %v4913_v22  ;;  %3879 = vmatpush1.bf16.msra.mxu1 %v4915_v23  ;;  %v5042_v22 = vcombine.high %v1463_v16, %v1471_v17  ;;  %v5044_v23 = vcombine.high %v1464_v18, %v1472_v19  ;;  %v1544_v60 = vld [vmem:[%s6340_s30 + $0xc08] sm:$0xff]  ;;  %v5107_v0 = vcombine.low %v1528_v52, %v1536_v53 }
 0x12c   : > { %3798 = vmatprep.subr.bf16.mxu0 %v4930_v24  ;;  %3880 = vmatprep.subr.bf16.mxu1 %v4932_v25  ;;  %v1479_v24 = vld [vmem:[%s6340_s30 + $0xa00] sm:$0xff]  ;;  %v1552_v61 = vld [vmem:[%s6340_s30 + $0xc48] sm:$0xff] }
 0x12d   : > { %v1487_v25 = vld [vmem:[%s6340_s30 + $0xa40] sm:$0xff]  ;;  %v1568_v6 = vld [vmem:[%s6340_s30 + $0xcc8] sm:$0xff]  ;;  %v5123_v9 = vcombine.low %v1544_v60, %v1552_v61 }
 0x12e   : > { %v5057_v36 = vcombine.low %v1479_v24, %v1487_v25 }
 0x12f   : > { %3799 = vmatpush1.bf16.msra.mxu0 %v4929_v30  ;;  %3881 = vmatpush1.bf16.msra.mxu1 %v4931_v31  ;;  %v5058_v30 = vcombine.high %v1479_v24, %v1487_v25  ;;  %v5060_v31 = vcombine.high %v1480_v26, %v1488_v27 }
 0x130   : > { %3800 = vmatprep.subr.bf16.mxu0 %v4946_v32  ;;  %3882 = vmatprep.subr.bf16.mxu1 %v4948_v33  ;;  %v1495_v32 = vld [vmem:[%s6340_s30 + $0xa80] sm:$0xff] }
 0x131   : > { %v1503_v33 = vld [vmem:[%s6340_s30 + $0xac0] sm:$0xff] }
 0x132   : > { %v5073_v44 = vcombine.low %v1495_v32, %v1503_v33 }
 0x133   : > { %3801 = vmatpush1.bf16.msra.mxu0 %v4945_v38  ;;  %3883 = vmatpush1.bf16.msra.mxu1 %v4947_v39  ;;  %v5074_v38 = vcombine.high %v1495_v32, %v1503_v33  ;;  %v5076_v39 = vcombine.high %v1496_v34, %v1504_v35  ;;  %v1186_v32 = vld [vmem:[%s6340_s30 + $0xd8] sm:$0xff] }
 0x134   : > { %3802 = vmatprep.subr.bf16.mxu0 %v4962_v40  ;;  %3884 = vmatprep.subr.bf16.mxu1 %v4964_v41  ;;  %v1511_v40 = vld [vmem:[%s6340_s30 + $0xb00] sm:$0xff] }
 0x135   : > { %v1519_v41 = vld [vmem:[%s6340_s30 + $0xb40] sm:$0xff] }
 0x136   : > { %v5089_v54 = vcombine.low %v1511_v40, %v1519_v41 }
 0x137   : > { %3803 = vmatpush1.bf16.msra.mxu0 %v4961_v46  ;;  %3885 = vmatpush1.bf16.msra.mxu1 %v4963_v47  ;;  %v5090_v46 = vcombine.high %v1511_v40, %v1519_v41  ;;  %v5092_v47 = vcombine.high %v1512_v42, %v1520_v43 }
 0x138   : > { %3804 = vmatprep.subr.bf16.mxu0 %v4978_v50  ;;  %3886 = vmatprep.subr.bf16.mxu1 %v4980_v51  ;;  %v1527_v50 = vld [vmem:[%s6340_s30 + $0xb80] sm:$0xff] }
 0x139   : > { %v1535_v51 = vld [vmem:[%s6340_s30 + $0xbc0] sm:$0xff] }
 0x13a   : > { %v5105_v63 = vcombine.low %v1527_v50, %v1535_v51 }
 0x13b   : > { %3805 = vmatpush1.bf16.msra.mxu0 %v4977_v56  ;;  %3887 = vmatpush1.bf16.msra.mxu1 %v4979_v57  ;;  %v5106_v56 = vcombine.high %v1527_v50, %v1535_v51  ;;  %v5108_v57 = vcombine.high %v1528_v52, %v1536_v53 }
 0x13c   : > { %3815 = vmatprep.subr.bf16.mxu0 %v4994_v58  ;;  %3897 = vmatprep.subr.bf16.mxu1 %v4996_v59  ;;  %v1543_v58 = vld [vmem:[%s6340_s30 + $0xc00] sm:$0xff] }
 0x13d   : > { %v1551_v59 = vld [vmem:[%s6340_s30 + $0xc40] sm:$0xff] }
 0x13e   : > { %3807 = vmatmul.mubr.bf16.vlgmr.msra.gmra.mrb[0].mxu0 %v6414_v62  ;;  %3889 = vmatmul.mubr.bf16.vlgmr.msra.gmra.mrb[0].mxu1 %v6414_v62  ;;  %v5121_v7 = vcombine.low %v1543_v58, %v1551_v59 }
 0x13f   : > { %3816 = vmatpush1.bf16.msra.mxu0 %v4993_v2  ;;  %3898 = vmatpush1.bf16.msra.mxu1 %v4995_v3  ;;  %v5122_v2 = vcombine.high %v1543_v58, %v1551_v59  ;;  %v5124_v3 = vcombine.high %v1544_v60, %v1552_v61 }
 0x140   : > { %3817 = vmatprep.subr.bf16.mxu0 %v5010_v4  ;;  %3899 = vmatprep.subr.bf16.mxu1 %v5012_v5  ;;  %v1559_v4 = vld [vmem:[%s6340_s30 + $0xc80] sm:$0xff]  ;;  %v1560_v5 = vld [vmem:[%s6340_s30 + $0xc88] sm:$0xff] }
 0x141   : > { %5169 = vmatprep.mubr.msk.bf16.mxu0 %vm3770_vm0, %v6430_v8  ;;  %5170 = vmatprep.mubr.msk.bf16.mxu1 %vm3770_vm0, %v6430_v8  ;;  %v5138_v10 = vcombine.high %v1559_v4, %v1567_v48  ;;  %v5140_v11 = vcombine.high %v1560_v5, %v1568_v6  ;;  %v5137_v16 = vcombine.low %v1559_v4, %v1567_v48 }
 0x142   : > { %v5139_v17 = vcombine.low %v1560_v5, %v1568_v6 }
 0x143   : > { %3818 = vmatpush1.bf16.msra.mxu0 %v5009_v12  ;;  %3900 = vmatpush1.bf16.msra.mxu1 %v5011_v13  ;;  %v1575_v12 = vld [vmem:[%s6340_s30 + $0xd00] sm:$0xff] }
 0x144   : > { %3819 = vmatprep.subr.bf16.mxu0 %v5026_v14  ;;  %3901 = vmatprep.subr.bf16.mxu1 %v5028_v15  ;;  %v1583_v13 = vld [vmem:[%s6340_s30 + $0xd40] sm:$0xff]  ;;  %v1576_v14 = vld [vmem:[%s6340_s30 + $0xd08] sm:$0xff] }
 0x145   : > { %v1584_v15 = vld [vmem:[%s6340_s30 + $0xd48] sm:$0xff]  ;;  %v5154_v18 = vcombine.high %v1575_v12, %v1583_v13  ;;  %v5153_v24 = vcombine.low %v1575_v12, %v1583_v13 }
 0x146   : > { %v5156_v19 = vcombine.high %v1576_v14, %v1584_v15  ;;  %v5155_v25 = vcombine.low %v1576_v14, %v1584_v15 }
 0x147   : > { %3820 = vmatpush1.bf16.msra.mxu0 %v5025_v20  ;;  %3902 = vmatpush1.bf16.msra.mxu1 %v5027_v21  ;;  %v1161_v20 = vld [vmem:[%s6340_s30 + $0x10] sm:$0xff] }
 0x148   : > { %3821 = vmatprep.subr.bf16.mxu0 %v5042_v22  ;;  %3903 = vmatprep.subr.bf16.mxu1 %v5044_v23  ;;  %v1169_v21 = vld [vmem:[%s6340_s30 + $0x50] sm:$0xff]  ;;  %v1162_v22 = vld [vmem:[%s6340_s30 + $0x18] sm:$0xff] }
 0x149   : > { %v1170_v23 = vld [vmem:[%s6340_s30 + $0x58] sm:$0xff]  ;;  %v4742_v26 = vcombine.high %v1161_v20, %v1169_v21  ;;  %v4741_v33 = vcombine.low %v1161_v20, %v1169_v21 }
 0x14a   : > { %v4744_v27 = vcombine.high %v1162_v22, %v1170_v23  ;;  %v4743_v34 = vcombine.low %v1162_v22, %v1170_v23 }
 0x14b   : > { %3822 = vmatpush1.bf16.msra.mxu0 %v5041_v28  ;;  %3904 = vmatpush1.bf16.msra.mxu1 %v5043_v29  ;;  %v1177_v28 = vld [vmem:[%s6340_s30 + $0x90] sm:$0xff] }
 0x14c   : > { %3823 = vmatprep.subr.bf16.mxu0 %v5058_v30  ;;  %3905 = vmatprep.subr.bf16.mxu1 %v5060_v31  ;;  %v1185_v29 = vld [vmem:[%s6340_s30 + $0xd0] sm:$0xff]  ;;  %v6480_v30 = vcombine.low %v6421_v1, %v6421_v1  ;;  %v1178_v31 = vld [vmem:[%s6340_s30 + $0x98] sm:$0xff] }
 0x14d   : > { %v4758_v35 = vcombine.high %v1177_v28, %v1185_v29  ;;  %v1194_v1 = vld [vmem:[%s6340_s30 + $0x118] sm:$0xff]  ;;  %v4757_v40 = vcombine.low %v1177_v28, %v1185_v29  ;;  %v4759_v41 = vcombine.low %v1178_v31, %v1186_v32 }
 0x14f   : > { %3824 = vmatpush1.bf16.msra.mxu0 %v5057_v36  ;;  %3906 = vmatpush1.bf16.msra.mxu1 %v5059_v37  ;;  %v4760_v36 = vcombine.high %v1178_v31, %v1186_v32  ;;  %v1193_v37 = vld [vmem:[%s6340_s30 + $0x110] sm:$0xff] }
 0x150   : > { %3825 = vmatprep.subr.bf16.mxu0 %v5074_v38  ;;  %3907 = vmatprep.subr.bf16.mxu1 %v5076_v39  ;;  %v1201_v38 = vld [vmem:[%s6340_s30 + $0x150] sm:$0xff]  ;;  %v1202_v39 = vld [vmem:[%s6340_s30 + $0x158] sm:$0xff] }
 0x151   : > { %v4774_v42 = vcombine.high %v1193_v37, %v1201_v38  ;;  %v4776_v43 = vcombine.high %v1194_v1, %v1202_v39  ;;  %v4773_v50 = vcombine.low %v1193_v37, %v1201_v38  ;;  %v4775_v51 = vcombine.low %v1194_v1, %v1202_v39 }
 0x153   : > { %3826 = vmatpush1.bf16.msra.mxu0 %v5073_v44  ;;  %3908 = vmatpush1.bf16.msra.mxu1 %v5075_v45  ;;  %v1209_v44 = vld [vmem:[%s6340_s30 + $0x190] sm:$0xff] }
 0x154   : > { %3827 = vmatprep.subr.bf16.mxu0 %v5090_v46  ;;  %3909 = vmatprep.subr.bf16.mxu1 %v5092_v47  ;;  %v1217_v45 = vld [vmem:[%s6340_s30 + $0x1d0] sm:$0xff]  ;;  %v1210_v46 = vld [vmem:[%s6340_s30 + $0x198] sm:$0xff] }
 0x155   : > { %v1218_v47 = vld [vmem:[%s6340_s30 + $0x1d8] sm:$0xff]  ;;  %v4790_v52 = vcombine.high %v1209_v44, %v1217_v45  ;;  %v4789_v58 = vcombine.low %v1209_v44, %v1217_v45 }
 0x156   : > { %v4792_v53 = vcombine.high %v1210_v46, %v1218_v47  ;;  %v4791_v59 = vcombine.low %v1210_v46, %v1218_v47 }
 0x157   : > { %3828 = vmatpush1.bf16.msra.mxu0 %v5089_v54  ;;  %3910 = vmatpush1.bf16.msra.mxu1 %v5091_v55  ;;  %v1225_v54 = vld [vmem:[%s6340_s30 + $0x210] sm:$0xff] }
 0x158   : > { %3829 = vmatprep.subr.bf16.mxu0 %v5106_v56  ;;  %3911 = vmatprep.subr.bf16.mxu1 %v5108_v57  ;;  %v1233_v55 = vld [vmem:[%s6340_s30 + $0x250] sm:$0xff]  ;;  %v1226_v56 = vld [vmem:[%s6340_s30 + $0x218] sm:$0xff] }
 0x159   : > { %v1234_v57 = vld [vmem:[%s6340_s30 + $0x258] sm:$0xff]  ;;  %v4806_v60 = vcombine.high %v1225_v54, %v1233_v55  ;;  %v4805_v4 = vcombine.low %v1225_v54, %v1233_v55 }
 0x15a   : > { %v4808_v61 = vcombine.high %v1226_v56, %v1234_v57  ;;  %v4807_v48 = vcombine.low %v1226_v56, %v1234_v57 }
 0x15b   : > { %3830 = vmatpush1.bf16.msra.mxu0 %v5105_v63  ;;  %3912 = vmatpush1.bf16.msra.mxu1 %v5107_v0  ;;  %v1241_v63 = vld [vmem:[%s6340_s30 + $0x290] sm:$0xff] }
 0x15c   : > { %3831 = vmatprep.subr.bf16.mxu0 %v5122_v2  ;;  %3913 = vmatprep.subr.bf16.mxu1 %v5124_v3  ;;  %v1249_v0 = vld [vmem:[%s6340_s30 + $0x2d0] sm:$0xff]  ;;  %v1242_v2 = vld [vmem:[%s6340_s30 + $0x298] sm:$0xff] }
 0x15d   : > { %v1250_v3 = vld [vmem:[%s6340_s30 + $0x2d8] sm:$0xff]  ;;  %v4822_v5 = vcombine.high %v1241_v63, %v1249_v0  ;;  %v4821_v12 = vcombine.low %v1241_v63, %v1249_v0 }
 0x15e   : > { %v4824_v6 = vcombine.high %v1242_v2, %v1250_v3  ;;  %v4823_v13 = vcombine.low %v1242_v2, %v1250_v3 }
 0x15f   : > { %3832 = vmatpush1.bf16.msra.mxu0 %v5121_v7  ;;  %3914 = vmatpush1.bf16.msra.mxu1 %v5123_v9  ;;  %v1257_v7 = vld [vmem:[%s6340_s30 + $0x310] sm:$0xff] }
 0x160   : > { %3833 = vmatprep.subr.bf16.mxu0 %v5138_v10  ;;  %3915 = vmatprep.subr.bf16.mxu1 %v5140_v11  ;;  %v1265_v9 = vld [vmem:[%s6340_s30 + $0x350] sm:$0xff]  ;;  %v1258_v10 = vld [vmem:[%s6340_s30 + $0x318] sm:$0xff] }
 0x161   : > { %v1266_v11 = vld [vmem:[%s6340_s30 + $0x358] sm:$0xff]  ;;  %v4838_v14 = vcombine.high %v1257_v7, %v1265_v9  ;;  %v4837_v20 = vcombine.low %v1257_v7, %v1265_v9 }
 0x162   : > { %v4840_v15 = vcombine.high %v1258_v10, %v1266_v11  ;;  %v4839_v21 = vcombine.low %v1258_v10, %v1266_v11 }
 0x163   : > { %3834 = vmatpush1.bf16.msra.mxu0 %v5137_v16  ;;  %3916 = vmatpush1.bf16.msra.mxu1 %v5139_v17  ;;  %v1273_v16 = vld [vmem:[%s6340_s30 + $0x390] sm:$0xff] }
 0x164   : > { %3835 = vmatprep.subr.bf16.mxu0 %v5154_v18  ;;  %3917 = vmatprep.subr.bf16.mxu1 %v5156_v19  ;;  %v1281_v17 = vld [vmem:[%s6340_s30 + $0x3d0] sm:$0xff]  ;;  %v1274_v18 = vld [vmem:[%s6340_s30 + $0x398] sm:$0xff] }
 0x165   : > { %v1282_v19 = vld [vmem:[%s6340_s30 + $0x3d8] sm:$0xff]  ;;  %v4854_v22 = vcombine.high %v1273_v16, %v1281_v17  ;;  %v4853_v28 = vcombine.low %v1273_v16, %v1281_v17 }
 0x166   : > { %v4856_v23 = vcombine.high %v1274_v18, %v1282_v19  ;;  %v4855_v29 = vcombine.low %v1274_v18, %v1282_v19 }
 0x167   : > { %3836 = vmatpush1.bf16.msra.mxu0 %v5153_v24  ;;  %3918 = vmatpush1.bf16.msra.mxu1 %v5155_v25  ;;  %v1289_v24 = vld [vmem:[%s6340_s30 + $0x410] sm:$0xff] }
 0x168   : > { %3938 = vmatprep.subr.bf16.mxu0 %v4742_v26  ;;  %4020 = vmatprep.subr.bf16.mxu1 %v4744_v27  ;;  %v1297_v25 = vld [vmem:[%s6340_s30 + $0x450] sm:$0xff]  ;;  %v1290_v26 = vld [vmem:[%s6340_s30 + $0x418] sm:$0xff] }
 0x169   : > { %v1298_v27 = vld [vmem:[%s6340_s30 + $0x458] sm:$0xff]  ;;  %v4870_v31 = vcombine.high %v1289_v24, %v1297_v25  ;;  %v4869_v37 = vcombine.low %v1289_v24, %v1297_v25 }
 0x16a   : > { %3848 = vmatmul.mubr.bf16.vlgmr.msra.gmra.mrb[0].mxu0 %v6480_v30  ;;  %3930 = vmatmul.mubr.bf16.vlgmr.msra.gmra.mrb[0].mxu1 %v6480_v30  ;;  %v4872_v32 = vcombine.high %v1290_v26, %v1298_v27  ;;  %v4871_v38 = vcombine.low %v1290_v26, %v1298_v27 }
 0x16b   : > { %3939 = vmatpush1.bf16.msra.mxu0 %v4741_v33  ;;  %4021 = vmatpush1.bf16.msra.mxu1 %v4743_v34  ;;  %v1305_v33 = vld [vmem:[%s6340_s30 + $0x490] sm:$0xff] }
 0x16c   : > { %3940 = vmatprep.subr.bf16.mxu0 %v4758_v35  ;;  %4022 = vmatprep.subr.bf16.mxu1 %v4760_v36  ;;  %v1313_v34 = vld [vmem:[%s6340_s30 + $0x4d0] sm:$0xff]  ;;  %v1306_v35 = vld [vmem:[%s6340_s30 + $0x498] sm:$0xff] }
 0x16d   : > { %3970 = vmatprep.mubr.bf16.mxu0 %v6336_v49  ;;  %4052 = vmatprep.mubr.bf16.mxu1 %v6336_v49  ;;  %v1314_v36 = vld [vmem:[%s6340_s30 + $0x4d8] sm:$0xff]  ;;  %v4886_v1 = vcombine.high %v1305_v33, %v1313_v34  ;;  %v4885_v44 = vcombine.low %v1305_v33, %v1313_v34 }
 0x16e   : > { %v4888_v39 = vcombine.high %v1306_v35, %v1314_v36  ;;  %v4887_v45 = vcombine.low %v1306_v35, %v1314_v36 }
 0x16f   : > { %3941 = vmatpush1.bf16.msra.mxu0 %v4757_v40  ;;  %4023 = vmatpush1.bf16.msra.mxu1 %v4759_v41  ;;  %v1321_v40 = vld [vmem:[%s6340_s30 + $0x510] sm:$0xff] }
 0x170   : > { %3942 = vmatprep.subr.bf16.mxu0 %v4774_v42  ;;  %4024 = vmatprep.subr.bf16.mxu1 %v4776_v43  ;;  %v1329_v41 = vld [vmem:[%s6340_s30 + $0x550] sm:$0xff]  ;;  %v1322_v42 = vld [vmem:[%s6340_s30 + $0x518] sm:$0xff] }
 0x171   : > { %v1330_v43 = vld [vmem:[%s6340_s30 + $0x558] sm:$0xff]  ;;  %v4902_v46 = vcombine.high %v1321_v40, %v1329_v41  ;;  %v4901_v54 = vcombine.low %v1321_v40, %v1329_v41 }
 0x172   : > { %v4904_v47 = vcombine.high %v1322_v42, %v1330_v43  ;;  %v4903_v55 = vcombine.low %v1322_v42, %v1330_v43 }
 0x173   : > { %3943 = vmatpush1.bf16.msra.mxu0 %v4773_v50  ;;  %4025 = vmatpush1.bf16.msra.mxu1 %v4775_v51  ;;  %v1337_v50 = vld [vmem:[%s6340_s30 + $0x590] sm:$0xff] }
 0x174   : > { %3944 = vmatprep.subr.bf16.mxu0 %v4790_v52  ;;  %4026 = vmatprep.subr.bf16.mxu1 %v4792_v53  ;;  %v1345_v51 = vld [vmem:[%s6340_s30 + $0x5d0] sm:$0xff]  ;;  %v1338_v52 = vld [vmem:[%s6340_s30 + $0x598] sm:$0xff] }
 0x175   : > { %v1346_v53 = vld [vmem:[%s6340_s30 + $0x5d8] sm:$0xff]  ;;  %v4918_v56 = vcombine.high %v1337_v50, %v1345_v51  ;;  %v4917_v63 = vcombine.low %v1337_v50, %v1345_v51 }
 0x176   : > { %v4920_v57 = vcombine.high %v1338_v52, %v1346_v53  ;;  %v4919_v0 = vcombine.low %v1338_v52, %v1346_v53 }
 0x177   : > { %3945 = vmatpush1.bf16.msra.mxu0 %v4789_v58  ;;  %4027 = vmatpush1.bf16.msra.mxu1 %v4791_v59  ;;  %v1353_v58 = vld [vmem:[%s6340_s30 + $0x610] sm:$0xff] }
 0x178   : > { %3946 = vmatprep.subr.bf16.mxu0 %v4806_v60  ;;  %4028 = vmatprep.subr.bf16.mxu1 %v4808_v61  ;;  %v1361_v59 = vld [vmem:[%s6340_s30 + $0x650] sm:$0xff]  ;;  %v1354_v60 = vld [vmem:[%s6340_s30 + $0x618] sm:$0xff] }
 0x179   : > { %v1362_v61 = vld [vmem:[%s6340_s30 + $0x658] sm:$0xff]  ;;  %v4934_v2 = vcombine.high %v1353_v58, %v1361_v59  ;;  %v4933_v7 = vcombine.low %v1353_v58, %v1361_v59 }
 0x17a   : > { %v4936_v3 = vcombine.high %v1354_v60, %v1362_v61  ;;  %v4935_v9 = vcombine.low %v1354_v60, %v1362_v61 }
 0x17b   : > { %3947 = vmatpush1.bf16.msra.mxu0 %v4805_v4  ;;  %4029 = vmatpush1.bf16.msra.mxu1 %v4807_v48  ;;  %v1369_v4 = vld [vmem:[%s6340_s30 + $0x690] sm:$0xff] }
 0x17c   : > { %3948 = vmatprep.subr.bf16.mxu0 %v4822_v5  ;;  %4030 = vmatprep.subr.bf16.mxu1 %v4824_v6  ;;  %v1377_v48 = vld [vmem:[%s6340_s30 + $0x6d0] sm:$0xff]  ;;  %v1370_v5 = vld [vmem:[%s6340_s30 + $0x698] sm:$0xff] }
 0x17d   : > { %v1378_v6 = vld [vmem:[%s6340_s30 + $0x6d8] sm:$0xff]  ;;  %v4950_v10 = vcombine.high %v1369_v4, %v1377_v48  ;;  %v4949_v16 = vcombine.low %v1369_v4, %v1377_v48 }
 0x17e   : > { %v4952_v11 = vcombine.high %v1370_v5, %v1378_v6  ;;  %v4951_v17 = vcombine.low %v1370_v5, %v1378_v6 }
 0x17f   : > { %3949 = vmatpush1.bf16.msra.mxu0 %v4821_v12  ;;  %4031 = vmatpush1.bf16.msra.mxu1 %v4823_v13  ;;  %v1385_v12 = vld [vmem:[%s6340_s30 + $0x710] sm:$0xff] }
 0x180   : > { %3950 = vmatprep.subr.bf16.mxu0 %v4838_v14  ;;  %4032 = vmatprep.subr.bf16.mxu1 %v4840_v15  ;;  %v1393_v13 = vld [vmem:[%s6340_s30 + $0x750] sm:$0xff]  ;;  %v1386_v14 = vld [vmem:[%s6340_s30 + $0x718] sm:$0xff] }
 0x181   : > { %v1394_v15 = vld [vmem:[%s6340_s30 + $0x758] sm:$0xff]  ;;  %v4966_v18 = vcombine.high %v1385_v12, %v1393_v13  ;;  %v4965_v24 = vcombine.low %v1385_v12, %v1393_v13 }
 0x182   : > { %v4968_v19 = vcombine.high %v1386_v14, %v1394_v15  ;;  %v4967_v25 = vcombine.low %v1386_v14, %v1394_v15 }
 0x183   : > { %3951 = vmatpush1.bf16.msra.mxu0 %v4837_v20  ;;  %4033 = vmatpush1.bf16.msra.mxu1 %v4839_v21  ;;  %v1401_v20 = vld [vmem:[%s6340_s30 + $0x790] sm:$0xff] }
 0x184   : > { %3952 = vmatprep.subr.bf16.mxu0 %v4854_v22  ;;  %4034 = vmatprep.subr.bf16.mxu1 %v4856_v23  ;;  %v1409_v21 = vld [vmem:[%s6340_s30 + $0x7d0] sm:$0xff]  ;;  %v1402_v22 = vld [vmem:[%s6340_s30 + $0x798] sm:$0xff] }
 0x185   : > { %v1410_v23 = vld [vmem:[%s6340_s30 + $0x7d8] sm:$0xff]  ;;  %v4982_v26 = vcombine.high %v1401_v20, %v1409_v21  ;;  %v4981_v33 = vcombine.low %v1401_v20, %v1409_v21 }
 0x186   : > { %v4984_v27 = vcombine.high %v1402_v22, %v1410_v23  ;;  %v4983_v34 = vcombine.low %v1402_v22, %v1410_v23 }
 0x187   : > { %3953 = vmatpush1.bf16.msra.mxu0 %v4853_v28  ;;  %4035 = vmatpush1.bf16.msra.mxu1 %v4855_v29  ;;  %v1417_v28 = vld [vmem:[%s6340_s30 + $0x810] sm:$0xff] }
 0x188   : > { %3954 = vmatprep.subr.bf16.mxu0 %v4870_v31  ;;  %4036 = vmatprep.subr.bf16.mxu1 %v4872_v32  ;;  %v1425_v29 = vld [vmem:[%s6340_s30 + $0x850] sm:$0xff]  ;;  %v1418_v31 = vld [vmem:[%s6340_s30 + $0x818] sm:$0xff] }
 0x189   : > { %v1426_v32 = vld [vmem:[%s6340_s30 + $0x858] sm:$0xff]  ;;  %v4998_v35 = vcombine.high %v1417_v28, %v1425_v29  ;;  %v4997_v40 = vcombine.low %v1417_v28, %v1425_v29 }
 0x18a   : > { %v5000_v36 = vcombine.high %v1418_v31, %v1426_v32  ;;  %v4999_v41 = vcombine.low %v1418_v31, %v1426_v32 }
 0x18b   : > { %3955 = vmatpush1.bf16.msra.mxu0 %v4869_v37  ;;  %4037 = vmatpush1.bf16.msra.mxu1 %v4871_v38  ;;  %v1433_v37 = vld [vmem:[%s6340_s30 + $0x890] sm:$0xff] }
 0x18c   : > { %3956 = vmatprep.subr.bf16.mxu0 %v4886_v1  ;;  %4038 = vmatprep.subr.bf16.mxu1 %v4888_v39  ;;  %v1441_v38 = vld [vmem:[%s6340_s30 + $0x8d0] sm:$0xff]  ;;  %v1434_v1 = vld [vmem:[%s6340_s30 + $0x898] sm:$0xff] }
 0x18d   : > { %v1442_v39 = vld [vmem:[%s6340_s30 + $0x8d8] sm:$0xff]  ;;  %v5014_v42 = vcombine.high %v1433_v37, %v1441_v38  ;;  %v5013_v50 = vcombine.low %v1433_v37, %v1441_v38 }
 0x18e   : > { %v5016_v43 = vcombine.high %v1434_v1, %v1442_v39  ;;  %v5015_v51 = vcombine.low %v1434_v1, %v1442_v39 }
 0x18f   : > { %3957 = vmatpush1.bf16.msra.mxu0 %v4885_v44  ;;  %4039 = vmatpush1.bf16.msra.mxu1 %v4887_v45  ;;  %v1449_v44 = vld [vmem:[%s6340_s30 + $0x910] sm:$0xff] }
 0x190   : > { %3958 = vmatprep.subr.bf16.mxu0 %v4902_v46  ;;  %4040 = vmatprep.subr.bf16.mxu1 %v4904_v47  ;;  %v1457_v45 = vld [vmem:[%s6340_s30 + $0x950] sm:$0xff]  ;;  %v1450_v46 = vld [vmem:[%s6340_s30 + $0x918] sm:$0xff] }
 0x191   : > { %v1458_v47 = vld [vmem:[%s6340_s30 + $0x958] sm:$0xff]  ;;  %v5030_v52 = vcombine.high %v1449_v44, %v1457_v45  ;;  %v5029_v58 = vcombine.low %v1449_v44, %v1457_v45 }
 0x192   : > { %v5032_v53 = vcombine.high %v1450_v46, %v1458_v47  ;;  %v5031_v59 = vcombine.low %v1450_v46, %v1458_v47 }
 0x193   : > { %3959 = vmatpush1.bf16.msra.mxu0 %v4901_v54  ;;  %4041 = vmatpush1.bf16.msra.mxu1 %v4903_v55  ;;  %v1465_v54 = vld [vmem:[%s6340_s30 + $0x990] sm:$0xff] }
 0x194   : > { %3960 = vmatprep.subr.bf16.mxu0 %v4918_v56  ;;  %4042 = vmatprep.subr.bf16.mxu1 %v4920_v57  ;;  %v1473_v55 = vld [vmem:[%s6340_s30 + $0x9d0] sm:$0xff]  ;;  %v1466_v56 = vld [vmem:[%s6340_s30 + $0x998] sm:$0xff] }
 0x195   : > { %v1474_v57 = vld [vmem:[%s6340_s30 + $0x9d8] sm:$0xff]  ;;  %v5046_v60 = vcombine.high %v1465_v54, %v1473_v55  ;;  %v5045_v4 = vcombine.low %v1465_v54, %v1473_v55 }
 0x196   : > { %v5048_v61 = vcombine.high %v1466_v56, %v1474_v57  ;;  %v5047_v48 = vcombine.low %v1466_v56, %v1474_v57 }
 0x197   : > { %3961 = vmatpush1.bf16.msra.mxu0 %v4917_v63  ;;  %4043 = vmatpush1.bf16.msra.mxu1 %v4919_v0  ;;  %v1481_v63 = vld [vmem:[%s6340_s30 + $0xa10] sm:$0xff] }
 0x198   : > { %3962 = vmatprep.subr.bf16.mxu0 %v4934_v2  ;;  %4044 = vmatprep.subr.bf16.mxu1 %v4936_v3  ;;  %v1489_v0 = vld [vmem:[%s6340_s30 + $0xa50] sm:$0xff]  ;;  %v1482_v2 = vld [vmem:[%s6340_s30 + $0xa18] sm:$0xff] }
 0x199   : > { %v1490_v3 = vld [vmem:[%s6340_s30 + $0xa58] sm:$0xff]  ;;  %v5062_v5 = vcombine.high %v1481_v63, %v1489_v0  ;;  %v5061_v12 = vcombine.low %v1481_v63, %v1489_v0 }
 0x19a   : > { %v5064_v6 = vcombine.high %v1482_v2, %v1490_v3  ;;  %v5063_v13 = vcombine.low %v1482_v2, %v1490_v3 }
 0x19b   : > { %3963 = vmatpush1.bf16.msra.mxu0 %v4933_v7  ;;  %4045 = vmatpush1.bf16.msra.mxu1 %v4935_v9  ;;  %v1497_v7 = vld [vmem:[%s6340_s30 + $0xa90] sm:$0xff] }
 0x19c   : > { %3964 = vmatprep.subr.bf16.mxu0 %v4950_v10  ;;  %4046 = vmatprep.subr.bf16.mxu1 %v4952_v11  ;;  %v1505_v9 = vld [vmem:[%s6340_s30 + $0xad0] sm:$0xff]  ;;  %v1498_v10 = vld [vmem:[%s6340_s30 + $0xa98] sm:$0xff] }
 0x19d   : > { %v1506_v11 = vld [vmem:[%s6340_s30 + $0xad8] sm:$0xff]  ;;  %v5078_v14 = vcombine.high %v1497_v7, %v1505_v9  ;;  %v5077_v20 = vcombine.low %v1497_v7, %v1505_v9 }
 0x19e   : > { %v5080_v15 = vcombine.high %v1498_v10, %v1506_v11  ;;  %v5079_v21 = vcombine.low %v1498_v10, %v1506_v11 }
 0x19f   : > { %3965 = vmatpush1.bf16.msra.mxu0 %v4949_v16  ;;  %4047 = vmatpush1.bf16.msra.mxu1 %v4951_v17  ;;  %v1513_v16 = vld [vmem:[%s6340_s30 + $0xb10] sm:$0xff] }
 0x1a0   : > { %3966 = vmatprep.subr.bf16.mxu0 %v4966_v18  ;;  %4048 = vmatprep.subr.bf16.mxu1 %v4968_v19  ;;  %v1521_v17 = vld [vmem:[%s6340_s30 + $0xb50] sm:$0xff]  ;;  %v1514_v18 = vld [vmem:[%s6340_s30 + $0xb18] sm:$0xff] }
 0x1a1   : > { %v1522_v19 = vld [vmem:[%s6340_s30 + $0xb58] sm:$0xff]  ;;  %v5094_v22 = vcombine.high %v1513_v16, %v1521_v17  ;;  %v5093_v28 = vcombine.low %v1513_v16, %v1521_v17 }
 0x1a2   : > { %v5096_v23 = vcombine.high %v1514_v18, %v1522_v19  ;;  %v5095_v29 = vcombine.low %v1514_v18, %v1522_v19 }
 0x1a3   : > { %3967 = vmatpush1.bf16.msra.mxu0 %v4965_v24  ;;  %4049 = vmatpush1.bf16.msra.mxu1 %v4967_v25  ;;  %v1529_v24 = vld [vmem:[%s6340_s30 + $0xb90] sm:$0xff] }
 0x1a4   : > { %3968 = vmatprep.subr.bf16.mxu0 %v4982_v26  ;;  %4050 = vmatprep.subr.bf16.mxu1 %v4984_v27  ;;  %v1537_v25 = vld [vmem:[%s6340_s30 + $0xbd0] sm:$0xff]  ;;  %v1530_v26 = vld [vmem:[%s6340_s30 + $0xb98] sm:$0xff] }
 0x1a5   : > { %v1538_v27 = vld [vmem:[%s6340_s30 + $0xbd8] sm:$0xff]  ;;  %v5110_v31 = vcombine.high %v1529_v24, %v1537_v25  ;;  %v5109_v37 = vcombine.low %v1529_v24, %v1537_v25 }
 0x1a6   : > { %v5112_v32 = vcombine.high %v1530_v26, %v1538_v27  ;;  %v5111_v38 = vcombine.low %v1530_v26, %v1538_v27 }
 0x1a7   : > { %3969 = vmatpush1.bf16.msra.mxu0 %v4981_v33  ;;  %4051 = vmatpush1.bf16.msra.mxu1 %v4983_v34  ;;  %v1545_v33 = vld [vmem:[%s6340_s30 + $0xc10] sm:$0xff] }
 0x1a8   : > { %3979 = vmatprep.subr.bf16.mxu0 %v4998_v35  ;;  %4061 = vmatprep.subr.bf16.mxu1 %v5000_v36  ;;  %v1553_v34 = vld [vmem:[%s6340_s30 + $0xc50] sm:$0xff]  ;;  %v1546_v35 = vld [vmem:[%s6340_s30 + $0xc18] sm:$0xff] }
 0x1a9   : > { %v1554_v36 = vld [vmem:[%s6340_s30 + $0xc58] sm:$0xff]  ;;  %v5126_v1 = vcombine.high %v1545_v33, %v1553_v34  ;;  %v5125_v44 = vcombine.low %v1545_v33, %v1553_v34 }
 0x1aa   : > { %3971 = vmatmul.mubr.bf16.vlgmr.msra.gmra.mrb[4].mxu0 %v6414_v62  ;;  %4053 = vmatmul.mubr.bf16.vlgmr.msra.gmra.mrb[4].mxu1 %v6414_v62  ;;  %v5128_v39 = vcombine.high %v1546_v35, %v1554_v36  ;;  %v5127_v45 = vcombine.low %v1546_v35, %v1554_v36 }
 0x1ab   : > { %3980 = vmatpush1.bf16.msra.mxu0 %v4997_v40  ;;  %4062 = vmatpush1.bf16.msra.mxu1 %v4999_v41  ;;  %v1561_v40 = vld [vmem:[%s6340_s30 + $0xc90] sm:$0xff] }
 0x1ac   : > { %3981 = vmatprep.subr.bf16.mxu0 %v5014_v42  ;;  %4063 = vmatprep.subr.bf16.mxu1 %v5016_v43  ;;  %v1569_v41 = vld [vmem:[%s6340_s30 + $0xcd0] sm:$0xff]  ;;  %v1562_v42 = vld [vmem:[%s6340_s30 + $0xc98] sm:$0xff] }
 0x1ad   : > { %5171 = vmatprep.mubr.msk.bf16.mxu0 %vm3770_vm0, %v6430_v8  ;;  %5172 = vmatprep.mubr.msk.bf16.mxu1 %vm3770_vm0, %v6430_v8  ;;  %v1570_v43 = vld [vmem:[%s6340_s30 + $0xcd8] sm:$0xff]  ;;  %v5142_v46 = vcombine.high %v1561_v40, %v1569_v41  ;;  %v5141_v54 = vcombine.low %v1561_v40, %v1569_v41 }
 0x1ae   : > { %v5144_v47 = vcombine.high %v1562_v42, %v1570_v43  ;;  %v5143_v55 = vcombine.low %v1562_v42, %v1570_v43 }
 0x1af   : > { %3982 = vmatpush1.bf16.msra.mxu0 %v5013_v50  ;;  %4064 = vmatpush1.bf16.msra.mxu1 %v5015_v51  ;;  %v1577_v50 = vld [vmem:[%s6340_s30 + $0xd10] sm:$0xff] }
 0x1b0   : > { %3983 = vmatprep.subr.bf16.mxu0 %v5030_v52  ;;  %4065 = vmatprep.subr.bf16.mxu1 %v5032_v53  ;;  %v1585_v51 = vld [vmem:[%s6340_s30 + $0xd50] sm:$0xff]  ;;  %v1578_v52 = vld [vmem:[%s6340_s30 + $0xd18] sm:$0xff] }
 0x1b1   : > { %v1586_v53 = vld [vmem:[%s6340_s30 + $0xd58] sm:$0xff]  ;;  %v5158_v56 = vcombine.high %v1577_v50, %v1585_v51  ;;  %v5157_v63 = vcombine.low %v1577_v50, %v1585_v51 }
 0x1b2   : > { %v5160_v57 = vcombine.high %v1578_v52, %v1586_v53  ;;  %v5159_v0 = vcombine.low %v1578_v52, %v1586_v53 }
 0x1b3   : > { %3984 = vmatpush1.bf16.msra.mxu0 %v5029_v58  ;;  %4066 = vmatpush1.bf16.msra.mxu1 %v5031_v59  ;;  %v1163_v58 = vld [vmem:[%s6340_s30 + $0x20] sm:$0xff] }
 0x1b4   : > { %3985 = vmatprep.subr.bf16.mxu0 %v5046_v60  ;;  %4067 = vmatprep.subr.bf16.mxu1 %v5048_v61  ;;  %v1171_v59 = vld [vmem:[%s6340_s30 + $0x60] sm:$0xff]  ;;  %v1164_v60 = vld [vmem:[%s6340_s30 + $0x28] sm:$0xff] }
 0x1b5   : > { %v1172_v61 = vld [vmem:[%s6340_s30 + $0x68] sm:$0xff]  ;;  %v4746_v2 = vcombine.high %v1163_v58, %v1171_v59  ;;  %v4745_v7 = vcombine.low %v1163_v58, %v1171_v59 }
 0x1b6   : > { %v4748_v3 = vcombine.high %v1164_v60, %v1172_v61  ;;  %v4747_v9 = vcombine.low %v1164_v60, %v1172_v61 }
 0x1b7   : > { %3986 = vmatpush1.bf16.msra.mxu0 %v5045_v4  ;;  %4068 = vmatpush1.bf16.msra.mxu1 %v5047_v48  ;;  %v1179_v4 = vld [vmem:[%s6340_s30 + $0xa0] sm:$0xff] }
 0x1b8   : > { %3987 = vmatprep.subr.bf16.mxu0 %v5062_v5  ;;  %4069 = vmatprep.subr.bf16.mxu1 %v5064_v6  ;;  %v1187_v48 = vld [vmem:[%s6340_s30 + $0xe0] sm:$0xff]  ;;  %v1180_v5 = vld [vmem:[%s6340_s30 + $0xa8] sm:$0xff] }
 0x1b9   : > { %v1188_v6 = vld [vmem:[%s6340_s30 + $0xe8] sm:$0xff]  ;;  %v4762_v10 = vcombine.high %v1179_v4, %v1187_v48  ;;  %v4761_v16 = vcombine.low %v1179_v4, %v1187_v48 }
 0x1ba   : > { %v4764_v11 = vcombine.high %v1180_v5, %v1188_v6  ;;  %v4763_v17 = vcombine.low %v1180_v5, %v1188_v6 }
 0x1bb   : > { %3988 = vmatpush1.bf16.msra.mxu0 %v5061_v12  ;;  %4070 = vmatpush1.bf16.msra.mxu1 %v5063_v13  ;;  %v1195_v12 = vld [vmem:[%s6340_s30 + $0x120] sm:$0xff] }
 0x1bc   : > { %3989 = vmatprep.subr.bf16.mxu0 %v5078_v14  ;;  %4071 = vmatprep.subr.bf16.mxu1 %v5080_v15  ;;  %v1203_v13 = vld [vmem:[%s6340_s30 + $0x160] sm:$0xff]  ;;  %v1196_v14 = vld [vmem:[%s6340_s30 + $0x128] sm:$0xff] }
 0x1bd   : > { %v1204_v15 = vld [vmem:[%s6340_s30 + $0x168] sm:$0xff]  ;;  %v4778_v18 = vcombine.high %v1195_v12, %v1203_v13  ;;  %v4777_v24 = vcombine.low %v1195_v12, %v1203_v13 }
 0x1be   : > { %v4780_v19 = vcombine.high %v1196_v14, %v1204_v15  ;;  %v4779_v25 = vcombine.low %v1196_v14, %v1204_v15 }
 0x1bf   : > { %3990 = vmatpush1.bf16.msra.mxu0 %v5077_v20  ;;  %4072 = vmatpush1.bf16.msra.mxu1 %v5079_v21  ;;  %v1211_v20 = vld [vmem:[%s6340_s30 + $0x1a0] sm:$0xff] }
 0x1c0   : > { %3991 = vmatprep.subr.bf16.mxu0 %v5094_v22  ;;  %4073 = vmatprep.subr.bf16.mxu1 %v5096_v23  ;;  %v1219_v21 = vld [vmem:[%s6340_s30 + $0x1e0] sm:$0xff]  ;;  %v1212_v22 = vld [vmem:[%s6340_s30 + $0x1a8] sm:$0xff] }
 0x1c1   : > { %v1220_v23 = vld [vmem:[%s6340_s30 + $0x1e8] sm:$0xff]  ;;  %v4794_v26 = vcombine.high %v1211_v20, %v1219_v21  ;;  %v4793_v33 = vcombine.low %v1211_v20, %v1219_v21 }
 0x1c2   : > { %v4796_v27 = vcombine.high %v1212_v22, %v1220_v23  ;;  %v4795_v34 = vcombine.low %v1212_v22, %v1220_v23 }
 0x1c3   : > { %3992 = vmatpush1.bf16.msra.mxu0 %v5093_v28  ;;  %4074 = vmatpush1.bf16.msra.mxu1 %v5095_v29  ;;  %v1227_v28 = vld [vmem:[%s6340_s30 + $0x220] sm:$0xff] }
 0x1c4   : > { %3993 = vmatprep.subr.bf16.mxu0 %v5110_v31  ;;  %4075 = vmatprep.subr.bf16.mxu1 %v5112_v32  ;;  %v1235_v29 = vld [vmem:[%s6340_s30 + $0x260] sm:$0xff]  ;;  %v1228_v31 = vld [vmem:[%s6340_s30 + $0x228] sm:$0xff] }
 0x1c5   : > { %v1236_v32 = vld [vmem:[%s6340_s30 + $0x268] sm:$0xff]  ;;  %v4810_v35 = vcombine.high %v1227_v28, %v1235_v29  ;;  %v4809_v40 = vcombine.low %v1227_v28, %v1235_v29 }
 0x1c6   : > { %v4812_v36 = vcombine.high %v1228_v31, %v1236_v32  ;;  %v4811_v41 = vcombine.low %v1228_v31, %v1236_v32 }
 0x1c7   : > { %3994 = vmatpush1.bf16.msra.mxu0 %v5109_v37  ;;  %4076 = vmatpush1.bf16.msra.mxu1 %v5111_v38  ;;  %v1243_v37 = vld [vmem:[%s6340_s30 + $0x2a0] sm:$0xff] }
 0x1c8   : > { %3995 = vmatprep.subr.bf16.mxu0 %v5126_v1  ;;  %4077 = vmatprep.subr.bf16.mxu1 %v5128_v39  ;;  %v1251_v38 = vld [vmem:[%s6340_s30 + $0x2e0] sm:$0xff]  ;;  %v1244_v1 = vld [vmem:[%s6340_s30 + $0x2a8] sm:$0xff] }
 0x1c9   : > { %v1252_v39 = vld [vmem:[%s6340_s30 + $0x2e8] sm:$0xff]  ;;  %v4826_v42 = vcombine.high %v1243_v37, %v1251_v38  ;;  %v4825_v50 = vcombine.low %v1243_v37, %v1251_v38 }
 0x1ca   : > { %v4828_v43 = vcombine.high %v1244_v1, %v1252_v39  ;;  %v4827_v51 = vcombine.low %v1244_v1, %v1252_v39 }
 0x1cb   : > { %3996 = vmatpush1.bf16.msra.mxu0 %v5125_v44  ;;  %4078 = vmatpush1.bf16.msra.mxu1 %v5127_v45  ;;  %v1259_v44 = vld [vmem:[%s6340_s30 + $0x320] sm:$0xff] }
 0x1cc   : > { %3997 = vmatprep.subr.bf16.mxu0 %v5142_v46  ;;  %4079 = vmatprep.subr.bf16.mxu1 %v5144_v47  ;;  %v1267_v45 = vld [vmem:[%s6340_s30 + $0x360] sm:$0xff]  ;;  %v1260_v46 = vld [vmem:[%s6340_s30 + $0x328] sm:$0xff] }
 0x1cd   : > { %v1268_v47 = vld [vmem:[%s6340_s30 + $0x368] sm:$0xff]  ;;  %v4842_v52 = vcombine.high %v1259_v44, %v1267_v45  ;;  %v4841_v58 = vcombine.low %v1259_v44, %v1267_v45 }
 0x1ce   : > { %v4844_v53 = vcombine.high %v1260_v46, %v1268_v47  ;;  %v4843_v59 = vcombine.low %v1260_v46, %v1268_v47 }
 0x1cf   : > { %3998 = vmatpush1.bf16.msra.mxu0 %v5141_v54  ;;  %4080 = vmatpush1.bf16.msra.mxu1 %v5143_v55  ;;  %v1275_v54 = vld [vmem:[%s6340_s30 + $0x3a0] sm:$0xff] }
 0x1d0   : > { %3999 = vmatprep.subr.bf16.mxu0 %v5158_v56  ;;  %4081 = vmatprep.subr.bf16.mxu1 %v5160_v57  ;;  %v1283_v55 = vld [vmem:[%s6340_s30 + $0x3e0] sm:$0xff]  ;;  %v1276_v56 = vld [vmem:[%s6340_s30 + $0x3a8] sm:$0xff] }
 0x1d1   : > { %v1284_v57 = vld [vmem:[%s6340_s30 + $0x3e8] sm:$0xff]  ;;  %v4858_v60 = vcombine.high %v1275_v54, %v1283_v55  ;;  %v4857_v4 = vcombine.low %v1275_v54, %v1283_v55 }
 0x1d2   : > { %v4860_v61 = vcombine.high %v1276_v56, %v1284_v57  ;;  %v4859_v48 = vcombine.low %v1276_v56, %v1284_v57 }
 0x1d3   : > { %4000 = vmatpush1.bf16.msra.mxu0 %v5157_v63  ;;  %4082 = vmatpush1.bf16.msra.mxu1 %v5159_v0  ;;  %v1291_v63 = vld [vmem:[%s6340_s30 + $0x420] sm:$0xff] }
 0x1d4   : > { %4102 = vmatprep.subr.bf16.mxu0 %v4746_v2  ;;  %4184 = vmatprep.subr.bf16.mxu1 %v4748_v3  ;;  %v1299_v0 = vld [vmem:[%s6340_s30 + $0x460] sm:$0xff]  ;;  %v1292_v2 = vld [vmem:[%s6340_s30 + $0x428] sm:$0xff] }
 0x1d5   : > { %v1300_v3 = vld [vmem:[%s6340_s30 + $0x468] sm:$0xff]  ;;  %v4874_v5 = vcombine.high %v1291_v63, %v1299_v0  ;;  %v4873_v12 = vcombine.low %v1291_v63, %v1299_v0 }
 0x1d6   : > { %4012 = vmatmul.mubr.bf16.vlgmr.msra.gmra.mrb[4].mxu0 %v6480_v30  ;;  %4094 = vmatmul.mubr.bf16.vlgmr.msra.gmra.mrb[4].mxu1 %v6480_v30  ;;  %v4876_v6 = vcombine.high %v1292_v2, %v1300_v3  ;;  %v4875_v13 = vcombine.low %v1292_v2, %v1300_v3 }
 0x1d7   : > { %4103 = vmatpush1.bf16.msra.mxu0 %v4745_v7  ;;  %4185 = vmatpush1.bf16.msra.mxu1 %v4747_v9  ;;  %v1307_v7 = vld [vmem:[%s6340_s30 + $0x4a0] sm:$0xff] }
 0x1d8   : > { %4104 = vmatprep.subr.bf16.mxu0 %v4762_v10  ;;  %4186 = vmatprep.subr.bf16.mxu1 %v4764_v11  ;;  %v1315_v9 = vld [vmem:[%s6340_s30 + $0x4e0] sm:$0xff]  ;;  %v1308_v10 = vld [vmem:[%s6340_s30 + $0x4a8] sm:$0xff] }
 0x1d9   : > { %4134 = vmatprep.mubr.bf16.mxu0 %v6336_v49  ;;  %4216 = vmatprep.mubr.bf16.mxu1 %v6336_v49  ;;  %v1316_v11 = vld [vmem:[%s6340_s30 + $0x4e8] sm:$0xff]  ;;  %v4890_v14 = vcombine.high %v1307_v7, %v1315_v9  ;;  %v4889_v20 = vcombine.low %v1307_v7, %v1315_v9 }
 0x1da   : > { %v4892_v15 = vcombine.high %v1308_v10, %v1316_v11  ;;  %v4891_v21 = vcombine.low %v1308_v10, %v1316_v11 }
 0x1db   : > { %4105 = vmatpush1.bf16.msra.mxu0 %v4761_v16  ;;  %4187 = vmatpush1.bf16.msra.mxu1 %v4763_v17  ;;  %v1323_v16 = vld [vmem:[%s6340_s30 + $0x520] sm:$0xff] }
 0x1dc   : > { %4106 = vmatprep.subr.bf16.mxu0 %v4778_v18  ;;  %4188 = vmatprep.subr.bf16.mxu1 %v4780_v19  ;;  %v1331_v17 = vld [vmem:[%s6340_s30 + $0x560] sm:$0xff]  ;;  %v1324_v18 = vld [vmem:[%s6340_s30 + $0x528] sm:$0xff] }
 0x1dd   : > { %v1332_v19 = vld [vmem:[%s6340_s30 + $0x568] sm:$0xff]  ;;  %v4906_v22 = vcombine.high %v1323_v16, %v1331_v17  ;;  %v4905_v28 = vcombine.low %v1323_v16, %v1331_v17 }
 0x1de   : > { %v4908_v23 = vcombine.high %v1324_v18, %v1332_v19  ;;  %v4907_v29 = vcombine.low %v1324_v18, %v1332_v19 }
 0x1df   : > { %4107 = vmatpush1.bf16.msra.mxu0 %v4777_v24  ;;  %4189 = vmatpush1.bf16.msra.mxu1 %v4779_v25  ;;  %v1339_v24 = vld [vmem:[%s6340_s30 + $0x5a0] sm:$0xff] }
 0x1e0   : > { %4108 = vmatprep.subr.bf16.mxu0 %v4794_v26  ;;  %4190 = vmatprep.subr.bf16.mxu1 %v4796_v27  ;;  %v1347_v25 = vld [vmem:[%s6340_s30 + $0x5e0] sm:$0xff]  ;;  %v1340_v26 = vld [vmem:[%s6340_s30 + $0x5a8] sm:$0xff] }
 0x1e1   : > { %v1348_v27 = vld [vmem:[%s6340_s30 + $0x5e8] sm:$0xff]  ;;  %v4922_v31 = vcombine.high %v1339_v24, %v1347_v25  ;;  %v4921_v37 = vcombine.low %v1339_v24, %v1347_v25 }
 0x1e2   : > { %v4924_v32 = vcombine.high %v1340_v26, %v1348_v27  ;;  %v4923_v38 = vcombine.low %v1340_v26, %v1348_v27 }
 0x1e3   : > { %4109 = vmatpush1.bf16.msra.mxu0 %v4793_v33  ;;  %4191 = vmatpush1.bf16.msra.mxu1 %v4795_v34  ;;  %v1355_v33 = vld [vmem:[%s6340_s30 + $0x620] sm:$0xff] }
 0x1e4   : > { %4110 = vmatprep.subr.bf16.mxu0 %v4810_v35  ;;  %4192 = vmatprep.subr.bf16.mxu1 %v4812_v36  ;;  %v1363_v34 = vld [vmem:[%s6340_s30 + $0x660] sm:$0xff]  ;;  %v1356_v35 = vld [vmem:[%s6340_s30 + $0x628] sm:$0xff] }
 0x1e5   : > { %v1364_v36 = vld [vmem:[%s6340_s30 + $0x668] sm:$0xff]  ;;  %v4938_v1 = vcombine.high %v1355_v33, %v1363_v34  ;;  %v4937_v44 = vcombine.low %v1355_v33, %v1363_v34 }
 0x1e6   : > { %v4940_v39 = vcombine.high %v1356_v35, %v1364_v36  ;;  %v4939_v45 = vcombine.low %v1356_v35, %v1364_v36 }
 0x1e7   : > { %4111 = vmatpush1.bf16.msra.mxu0 %v4809_v40  ;;  %4193 = vmatpush1.bf16.msra.mxu1 %v4811_v41  ;;  %v1371_v40 = vld [vmem:[%s6340_s30 + $0x6a0] sm:$0xff] }
 0x1e8   : > { %4112 = vmatprep.subr.bf16.mxu0 %v4826_v42  ;;  %4194 = vmatprep.subr.bf16.mxu1 %v4828_v43  ;;  %v1379_v41 = vld [vmem:[%s6340_s30 + $0x6e0] sm:$0xff]  ;;  %v1372_v42 = vld [vmem:[%s6340_s30 + $0x6a8] sm:$0xff] }
 0x1e9   : > { %v1380_v43 = vld [vmem:[%s6340_s30 + $0x6e8] sm:$0xff]  ;;  %v4954_v46 = vcombine.high %v1371_v40, %v1379_v41  ;;  %v4953_v54 = vcombine.low %v1371_v40, %v1379_v41 }
 0x1ea   : > { %v4956_v47 = vcombine.high %v1372_v42, %v1380_v43  ;;  %v4955_v55 = vcombine.low %v1372_v42, %v1380_v43 }
 0x1eb   : > { %4113 = vmatpush1.bf16.msra.mxu0 %v4825_v50  ;;  %4195 = vmatpush1.bf16.msra.mxu1 %v4827_v51  ;;  %v1387_v50 = vld [vmem:[%s6340_s30 + $0x720] sm:$0xff] }
 0x1ec   : > { %4114 = vmatprep.subr.bf16.mxu0 %v4842_v52  ;;  %4196 = vmatprep.subr.bf16.mxu1 %v4844_v53  ;;  %v1395_v51 = vld [vmem:[%s6340_s30 + $0x760] sm:$0xff]  ;;  %v1388_v52 = vld [vmem:[%s6340_s30 + $0x728] sm:$0xff] }
 0x1ed   : > { %v1396_v53 = vld [vmem:[%s6340_s30 + $0x768] sm:$0xff]  ;;  %v4970_v56 = vcombine.high %v1387_v50, %v1395_v51  ;;  %v4969_v63 = vcombine.low %v1387_v50, %v1395_v51 }
 0x1ee   : > { %v4972_v57 = vcombine.high %v1388_v52, %v1396_v53  ;;  %v4971_v0 = vcombine.low %v1388_v52, %v1396_v53 }
 0x1ef   : > { %4115 = vmatpush1.bf16.msra.mxu0 %v4841_v58  ;;  %4197 = vmatpush1.bf16.msra.mxu1 %v4843_v59  ;;  %v1403_v58 = vld [vmem:[%s6340_s30 + $0x7a0] sm:$0xff] }
 0x1f0   : > { %4116 = vmatprep.subr.bf16.mxu0 %v4858_v60  ;;  %4198 = vmatprep.subr.bf16.mxu1 %v4860_v61  ;;  %v1411_v59 = vld [vmem:[%s6340_s30 + $0x7e0] sm:$0xff]  ;;  %v1404_v60 = vld [vmem:[%s6340_s30 + $0x7a8] sm:$0xff] }
 0x1f1   : > { %v1412_v61 = vld [vmem:[%s6340_s30 + $0x7e8] sm:$0xff]  ;;  %v4986_v2 = vcombine.high %v1403_v58, %v1411_v59  ;;  %v4985_v7 = vcombine.low %v1403_v58, %v1411_v59 }
 0x1f2   : > { %v4988_v3 = vcombine.high %v1404_v60, %v1412_v61  ;;  %v4987_v9 = vcombine.low %v1404_v60, %v1412_v61 }
 0x1f3   : > { %4117 = vmatpush1.bf16.msra.mxu0 %v4857_v4  ;;  %4199 = vmatpush1.bf16.msra.mxu1 %v4859_v48  ;;  %v1419_v4 = vld [vmem:[%s6340_s30 + $0x820] sm:$0xff] }
 0x1f4   : > { %4118 = vmatprep.subr.bf16.mxu0 %v4874_v5  ;;  %4200 = vmatprep.subr.bf16.mxu1 %v4876_v6  ;;  %v1427_v48 = vld [vmem:[%s6340_s30 + $0x860] sm:$0xff]  ;;  %v1420_v5 = vld [vmem:[%s6340_s30 + $0x828] sm:$0xff] }
 0x1f5   : > { %v1428_v6 = vld [vmem:[%s6340_s30 + $0x868] sm:$0xff]  ;;  %v5002_v10 = vcombine.high %v1419_v4, %v1427_v48  ;;  %v5001_v16 = vcombine.low %v1419_v4, %v1427_v48 }
 0x1f6   : > { %v5004_v11 = vcombine.high %v1420_v5, %v1428_v6  ;;  %v5003_v17 = vcombine.low %v1420_v5, %v1428_v6 }
 0x1f7   : > { %4119 = vmatpush1.bf16.msra.mxu0 %v4873_v12  ;;  %4201 = vmatpush1.bf16.msra.mxu1 %v4875_v13  ;;  %v1435_v12 = vld [vmem:[%s6340_s30 + $0x8a0] sm:$0xff] }
 0x1f8   : > { %4120 = vmatprep.subr.bf16.mxu0 %v4890_v14  ;;  %4202 = vmatprep.subr.bf16.mxu1 %v4892_v15  ;;  %v1443_v13 = vld [vmem:[%s6340_s30 + $0x8e0] sm:$0xff]  ;;  %v1436_v14 = vld [vmem:[%s6340_s30 + $0x8a8] sm:$0xff] }
 0x1f9   : > { %v1444_v15 = vld [vmem:[%s6340_s30 + $0x8e8] sm:$0xff]  ;;  %v5018_v18 = vcombine.high %v1435_v12, %v1443_v13  ;;  %v5017_v24 = vcombine.low %v1435_v12, %v1443_v13 }
 0x1fa   : > { %v5020_v19 = vcombine.high %v1436_v14, %v1444_v15  ;;  %v5019_v25 = vcombine.low %v1436_v14, %v1444_v15 }
 0x1fb   : > { %4121 = vmatpush1.bf16.msra.mxu0 %v4889_v20  ;;  %4203 = vmatpush1.bf16.msra.mxu1 %v4891_v21  ;;  %v1451_v20 = vld [vmem:[%s6340_s30 + $0x920] sm:$0xff] }
 0x1fc   : > { %4122 = vmatprep.subr.bf16.mxu0 %v4906_v22  ;;  %4204 = vmatprep.subr.bf16.mxu1 %v4908_v23  ;;  %v1459_v21 = vld [vmem:[%s6340_s30 + $0x960] sm:$0xff]  ;;  %v1452_v22 = vld [vmem:[%s6340_s30 + $0x928] sm:$0xff] }
 0x1fd   : > { %v1460_v23 = vld [vmem:[%s6340_s30 + $0x968] sm:$0xff]  ;;  %v5034_v26 = vcombine.high %v1451_v20, %v1459_v21  ;;  %v5033_v33 = vcombine.low %v1451_v20, %v1459_v21 }
 0x1fe   : > { %v5036_v27 = vcombine.high %v1452_v22, %v1460_v23  ;;  %v5035_v34 = vcombine.low %v1452_v22, %v1460_v23 }
 0x1ff   : > { %4123 = vmatpush1.bf16.msra.mxu0 %v4905_v28  ;;  %4205 = vmatpush1.bf16.msra.mxu1 %v4907_v29  ;;  %v1467_v28 = vld [vmem:[%s6340_s30 + $0x9a0] sm:$0xff] }
 0x200   : > { %4124 = vmatprep.subr.bf16.mxu0 %v4922_v31  ;;  %4206 = vmatprep.subr.bf16.mxu1 %v4924_v32  ;;  %v1475_v29 = vld [vmem:[%s6340_s30 + $0x9e0] sm:$0xff]  ;;  %v1468_v31 = vld [vmem:[%s6340_s30 + $0x9a8] sm:$0xff] }
 0x201   : > { %v1476_v32 = vld [vmem:[%s6340_s30 + $0x9e8] sm:$0xff]  ;;  %v5050_v35 = vcombine.high %v1467_v28, %v1475_v29  ;;  %v5049_v40 = vcombine.low %v1467_v28, %v1475_v29 }
 0x202   : > { %v5052_v36 = vcombine.high %v1468_v31, %v1476_v32  ;;  %v5051_v41 = vcombine.low %v1468_v31, %v1476_v32 }
 0x203   : > { %4125 = vmatpush1.bf16.msra.mxu0 %v4921_v37  ;;  %4207 = vmatpush1.bf16.msra.mxu1 %v4923_v38  ;;  %v1483_v37 = vld [vmem:[%s6340_s30 + $0xa20] sm:$0xff] }
 0x204   : > { %4126 = vmatprep.subr.bf16.mxu0 %v4938_v1  ;;  %4208 = vmatprep.subr.bf16.mxu1 %v4940_v39  ;;  %v1491_v38 = vld [vmem:[%s6340_s30 + $0xa60] sm:$0xff]  ;;  %v1484_v1 = vld [vmem:[%s6340_s30 + $0xa28] sm:$0xff] }
 0x205   : > { %v1492_v39 = vld [vmem:[%s6340_s30 + $0xa68] sm:$0xff]  ;;  %v5066_v42 = vcombine.high %v1483_v37, %v1491_v38  ;;  %v5065_v50 = vcombine.low %v1483_v37, %v1491_v38  ;;  %v6733_v37 = vpop.permute.xlu0 %1594 }
 0x206   : > { %v5068_v43 = vcombine.high %v1484_v1, %v1492_v39  ;;  %v5067_v51 = vcombine.low %v1484_v1, %v1492_v39 }
 0x207   : > { %4127 = vmatpush1.bf16.msra.mxu0 %v4937_v44  ;;  %4209 = vmatpush1.bf16.msra.mxu1 %v4939_v45  ;;  %v1499_v44 = vld [vmem:[%s6340_s30 + $0xaa0] sm:$0xff] }
 0x208   : > { %4128 = vmatprep.subr.bf16.mxu0 %v4954_v46  ;;  %4210 = vmatprep.subr.bf16.mxu1 %v4956_v47  ;;  %v1507_v45 = vld [vmem:[%s6340_s30 + $0xae0] sm:$0xff]  ;;  %v1500_v46 = vld [vmem:[%s6340_s30 + $0xaa8] sm:$0xff] }
 0x209   : > { %v1508_v47 = vld [vmem:[%s6340_s30 + $0xae8] sm:$0xff]  ;;  %v5082_v52 = vcombine.high %v1499_v44, %v1507_v45  ;;  %v5081_v58 = vcombine.low %v1499_v44, %v1507_v45 }
 0x20a   : > { %v5084_v53 = vcombine.high %v1500_v46, %v1508_v47  ;;  %v5083_v59 = vcombine.low %v1500_v46, %v1508_v47  ;;  %v1182_v47 = vld [vmem:[%s6340_s30 + $0xb8] sm:$0xff] }
 0x20b   : > { %4129 = vmatpush1.bf16.msra.mxu0 %v4953_v54  ;;  %4211 = vmatpush1.bf16.msra.mxu1 %v4955_v55  ;;  %v1515_v54 = vld [vmem:[%s6340_s30 + $0xb20] sm:$0xff] }
 0x20c   : > { %4130 = vmatprep.subr.bf16.mxu0 %v4970_v56  ;;  %4212 = vmatprep.subr.bf16.mxu1 %v4972_v57  ;;  %v1523_v55 = vld [vmem:[%s6340_s30 + $0xb60] sm:$0xff]  ;;  %v1516_v56 = vld [vmem:[%s6340_s30 + $0xb28] sm:$0xff] }
 0x20d   : > { %v1524_v57 = vld [vmem:[%s6340_s30 + $0xb68] sm:$0xff]  ;;  %v5098_v60 = vcombine.high %v1515_v54, %v1523_v55  ;;  %v5097_v4 = vcombine.low %v1515_v54, %v1523_v55 }
 0x20e   : > { %v5100_v61 = vcombine.high %v1516_v56, %v1524_v57  ;;  %v5099_v48 = vcombine.low %v1516_v56, %v1524_v57 }
 0x20f   : > { %4131 = vmatpush1.bf16.msra.mxu0 %v4969_v63  ;;  %4213 = vmatpush1.bf16.msra.mxu1 %v4971_v0  ;;  %v1531_v63 = vld [vmem:[%s6340_s30 + $0xba0] sm:$0xff] }
 0x210   : > { %4132 = vmatprep.subr.bf16.mxu0 %v4986_v2  ;;  %4214 = vmatprep.subr.bf16.mxu1 %v4988_v3  ;;  %v1539_v0 = vld [vmem:[%s6340_s30 + $0xbe0] sm:$0xff]  ;;  %v1532_v2 = vld [vmem:[%s6340_s30 + $0xba8] sm:$0xff] }
 0x211   : > { %v1540_v3 = vld [vmem:[%s6340_s30 + $0xbe8] sm:$0xff]  ;;  %v5114_v5 = vcombine.high %v1531_v63, %v1539_v0  ;;  %v5113_v12 = vcombine.low %v1531_v63, %v1539_v0 }
 0x212   : > { %v5116_v6 = vcombine.high %v1532_v2, %v1540_v3  ;;  %v5115_v13 = vcombine.low %v1532_v2, %v1540_v3  ;;  %v1197_v2 = vld [vmem:[%s6340_s30 + $0x130] sm:$0xff] }
 0x213   : > { %4133 = vmatpush1.bf16.msra.mxu0 %v4985_v7  ;;  %4215 = vmatpush1.bf16.msra.mxu1 %v4987_v9  ;;  %v1547_v7 = vld [vmem:[%s6340_s30 + $0xc20] sm:$0xff]  ;;  %v1205_v3 = vld [vmem:[%s6340_s30 + $0x170] sm:$0xff] }
 0x214   : > { %4143 = vmatprep.subr.bf16.mxu0 %v5002_v10  ;;  %4225 = vmatprep.subr.bf16.mxu1 %v5004_v11  ;;  %v1555_v9 = vld [vmem:[%s6340_s30 + $0xc60] sm:$0xff]  ;;  %v1548_v10 = vld [vmem:[%s6340_s30 + $0xc28] sm:$0xff] }
 0x215   : > { %v1556_v11 = vld [vmem:[%s6340_s30 + $0xc68] sm:$0xff]  ;;  %v5130_v14 = vcombine.high %v1547_v7, %v1555_v9  ;;  %v5129_v20 = vcombine.low %v1547_v7, %v1555_v9  ;;  %v4782_v9 = vcombine.high %v1197_v2, %v1205_v3 }
 0x216   : > { %4135 = vmatmul.mubr.bf16.vlgmr.msra.gmra.mrb[8].mxu0 %v6414_v62  ;;  %4217 = vmatmul.mubr.bf16.vlgmr.msra.gmra.mrb[8].mxu1 %v6414_v62  ;;  %v5132_v15 = vcombine.high %v1548_v10, %v1556_v11  ;;  %v5131_v21 = vcombine.low %v1548_v10, %v1556_v11  ;;  %v1213_v11 = vld [vmem:[%s6340_s30 + $0x1b0] sm:$0xff] }
 0x217   : > { %4144 = vmatpush1.bf16.msra.mxu0 %v5001_v16  ;;  %4226 = vmatpush1.bf16.msra.mxu1 %v5003_v17  ;;  %v1563_v16 = vld [vmem:[%s6340_s30 + $0xca0] sm:$0xff] }
 0x218   : > { %4145 = vmatprep.subr.bf16.mxu0 %v5018_v18  ;;  %4227 = vmatprep.subr.bf16.mxu1 %v5020_v19  ;;  %v1571_v17 = vld [vmem:[%s6340_s30 + $0xce0] sm:$0xff]  ;;  %v1564_v18 = vld [vmem:[%s6340_s30 + $0xca8] sm:$0xff] }
 0x219   : > { %5173 = vmatprep.mubr.msk.bf16.mxu0 %vm3770_vm0, %v6430_v8  ;;  %5174 = vmatprep.mubr.msk.bf16.mxu1 %vm3770_vm0, %v6430_v8  ;;  %v1572_v19 = vld [vmem:[%s6340_s30 + $0xce8] sm:$0xff]  ;;  %v5146_v22 = vcombine.high %v1563_v16, %v1571_v17  ;;  %v5145_v28 = vcombine.low %v1563_v16, %v1571_v17 }
 0x21a   : > { %v5148_v23 = vcombine.high %v1564_v18, %v1572_v19  ;;  %v5147_v29 = vcombine.low %v1564_v18, %v1572_v19  ;;  %v1229_v19 = vld [vmem:[%s6340_s30 + $0x230] sm:$0xff] }
 0x21b   : > { %4146 = vmatpush1.bf16.msra.mxu0 %v5017_v24  ;;  %4228 = vmatpush1.bf16.msra.mxu1 %v5019_v25  ;;  %v1579_v24 = vld [vmem:[%s6340_s30 + $0xd20] sm:$0xff] }
 0x21c   : > { %4147 = vmatprep.subr.bf16.mxu0 %v5034_v26  ;;  %4229 = vmatprep.subr.bf16.mxu1 %v5036_v27  ;;  %v1587_v25 = vld [vmem:[%s6340_s30 + $0xd60] sm:$0xff]  ;;  %v1580_v26 = vld [vmem:[%s6340_s30 + $0xd28] sm:$0xff] }
 0x21d   : > { %v1588_v27 = vld [vmem:[%s6340_s30 + $0xd68] sm:$0xff]  ;;  %v5162_v31 = vcombine.high %v1579_v24, %v1587_v25  ;;  %v5161_v38 = vcombine.low %v1579_v24, %v1587_v25 }
 0x21e   : > { %v5164_v32 = vcombine.high %v1580_v26, %v1588_v27  ;;  %v5163_v1 = vcombine.low %v1580_v26, %v1588_v27  ;;  %v1245_v26 = vld [vmem:[%s6340_s30 + $0x2b0] sm:$0xff] }
 0x21f   : > { %4148 = vmatpush1.bf16.msra.mxu0 %v5033_v33  ;;  %4230 = vmatpush1.bf16.msra.mxu1 %v5035_v34  ;;  %v1165_v33 = vld [vmem:[%s6340_s30 + $0x30] sm:$0xff] }
 0x220   : > { %4149 = vmatprep.subr.bf16.mxu0 %v5050_v35  ;;  %4231 = vmatprep.subr.bf16.mxu1 %v5052_v36  ;;  %v1173_v34 = vld [vmem:[%s6340_s30 + $0x70] sm:$0xff]  ;;  %v1166_v35 = vld [vmem:[%s6340_s30 + $0x38] sm:$0xff] }
 0x221   : > { %v1174_v36 = vld [vmem:[%s6340_s30 + $0x78] sm:$0xff]  ;;  %v4750_v39 = vcombine.high %v1165_v33, %v1173_v34  ;;  %v4749_v55 = vcombine.low %v1165_v33, %v1173_v34  ;;  %v1253_v27 = vld [vmem:[%s6340_s30 + $0x2f0] sm:$0xff] }
 0x222   : > { %v4830_v33 = vcombine.high %v1245_v26, %v1253_v27 }
 0x223   : > { %4150 = vmatpush1.bf16.msra.mxu0 %v5049_v40  ;;  %4232 = vmatpush1.bf16.msra.mxu1 %v5051_v41  ;;  %v4752_v41 = vcombine.high %v1166_v35, %v1174_v36 }
 0x224   : > { %4151 = vmatprep.subr.bf16.mxu0 %v5066_v42  ;;  %4233 = vmatprep.subr.bf16.mxu1 %v5068_v43  ;;  %v1181_v42 = vld [vmem:[%s6340_s30 + $0xb0] sm:$0xff] }
 0x225   : > { %v1189_v43 = vld [vmem:[%s6340_s30 + $0xf0] sm:$0xff] }
 0x227   : > { %4152 = vmatpush1.bf16.msra.mxu0 %v5065_v50  ;;  %4234 = vmatpush1.bf16.msra.mxu1 %v5067_v51  ;;  %v1190_v50 = vld [vmem:[%s6340_s30 + $0xf8] sm:$0xff] }
 0x228   : > { %4153 = vmatprep.subr.bf16.mxu0 %v5082_v52  ;;  %4235 = vmatprep.subr.bf16.mxu1 %v5084_v53  ;;  %v4768_v0 = vcombine.high %v1182_v47, %v1190_v50  ;;  %v4767_v7 = vcombine.low %v1182_v47, %v1190_v50  ;;  %v1286_v47 = vld [vmem:[%s6340_s30 + $0x3f8] sm:$0xff] }
 0x22b   : > { %4154 = vmatpush1.bf16.msra.mxu0 %v5081_v58  ;;  %4236 = vmatpush1.bf16.msra.mxu1 %v5083_v59  ;;  %v4751_v59 = vcombine.low %v1166_v35, %v1174_v36  ;;  %v1261_v35 = vld [vmem:[%s6340_s30 + $0x330] sm:$0xff] }
 0x22c   : > { %4155 = vmatprep.subr.bf16.mxu0 %v5098_v60  ;;  %4237 = vmatprep.subr.bf16.mxu1 %v5100_v61  ;;  %v4766_v60 = vcombine.high %v1181_v42, %v1189_v43  ;;  %v1269_v36 = vld [vmem:[%s6340_s30 + $0x370] sm:$0xff] }
 0x22d   : > { %v4845_v50 = vcombine.low %v1261_v35, %v1269_v36 }
 0x22f   : > { %4156 = vmatpush1.bf16.msra.mxu0 %v5097_v4  ;;  %4238 = vmatpush1.bf16.msra.mxu1 %v5099_v48  ;;  %v1198_v48 = vld [vmem:[%s6340_s30 + $0x138] sm:$0xff] }
 0x230   : > { %4157 = vmatprep.subr.bf16.mxu0 %v5114_v5  ;;  %4239 = vmatprep.subr.bf16.mxu1 %v5116_v6  ;;  %v1206_v5 = vld [vmem:[%s6340_s30 + $0x178] sm:$0xff]  ;;  %v4765_v6 = vcombine.low %v1181_v42, %v1189_v43  ;;  %v1277_v43 = vld [vmem:[%s6340_s30 + $0x3b0] sm:$0xff] }
 0x231   : > { %v4784_v10 = vcombine.high %v1198_v48, %v1206_v5  ;;  %v4783_v16 = vcombine.low %v1198_v48, %v1206_v5  ;;  %v1310_v48 = vld [vmem:[%s6340_s30 + $0x4b8] sm:$0xff] }
 0x232   : > { %v1318_v5 = vld [vmem:[%s6340_s30 + $0x4f8] sm:$0xff] }
 0x233   : > { %4158 = vmatpush1.bf16.msra.mxu0 %v5113_v12  ;;  %4240 = vmatpush1.bf16.msra.mxu1 %v5115_v13  ;;  %v1221_v12 = vld [vmem:[%s6340_s30 + $0x1f0] sm:$0xff]  ;;  %v1214_v13 = vld [vmem:[%s6340_s30 + $0x1b8] sm:$0xff] }
 0x234   : > { %4159 = vmatprep.subr.bf16.mxu0 %v5130_v14  ;;  %4241 = vmatprep.subr.bf16.mxu1 %v5132_v15  ;;  %v1222_v14 = vld [vmem:[%s6340_s30 + $0x1f8] sm:$0xff]  ;;  %v4781_v15 = vcombine.low %v1197_v2, %v1205_v3  ;;  %v4798_v17 = vcombine.high %v1213_v11, %v1221_v12  ;;  %v1309_v3 = vld [vmem:[%s6340_s30 + $0x4b0] sm:$0xff] }
 0x235   : > { %v4800_v18 = vcombine.high %v1214_v13, %v1222_v14 }
 0x237   : > { %4160 = vmatpush1.bf16.msra.mxu0 %v5129_v20  ;;  %4242 = vmatpush1.bf16.msra.mxu1 %v5131_v21  ;;  %v1237_v20 = vld [vmem:[%s6340_s30 + $0x270] sm:$0xff]  ;;  %v1230_v21 = vld [vmem:[%s6340_s30 + $0x238] sm:$0xff] }
 0x238   : > { %4161 = vmatprep.subr.bf16.mxu0 %v5146_v22  ;;  %4243 = vmatprep.subr.bf16.mxu1 %v5148_v23  ;;  %v1238_v22 = vld [vmem:[%s6340_s30 + $0x278] sm:$0xff]  ;;  %v4797_v23 = vcombine.low %v1213_v11, %v1221_v12  ;;  %v4814_v24 = vcombine.high %v1229_v19, %v1237_v20  ;;  %v1325_v11 = vld [vmem:[%s6340_s30 + $0x530] sm:$0xff] }
 0x239   : > { %v4816_v25 = vcombine.high %v1230_v21, %v1238_v22  ;;  %v1333_v12 = vld [vmem:[%s6340_s30 + $0x570] sm:$0xff] }
 0x23b   : > { %4162 = vmatpush1.bf16.msra.mxu0 %v5145_v28  ;;  %4244 = vmatpush1.bf16.msra.mxu1 %v5147_v29  ;;  %v1246_v28 = vld [vmem:[%s6340_s30 + $0x2b8] sm:$0xff] }
 0x23c   : > { %4163 = vmatprep.subr.bf16.mxu0 %v5162_v31  ;;  %4245 = vmatprep.subr.bf16.mxu1 %v5164_v32  ;;  %v1254_v29 = vld [vmem:[%s6340_s30 + $0x2f8] sm:$0xff]  ;;  %v4813_v31 = vcombine.low %v1229_v19, %v1237_v20  ;;  %v4815_v32 = vcombine.low %v1230_v21, %v1238_v22  ;;  %v1341_v19 = vld [vmem:[%s6340_s30 + $0x5b0] sm:$0xff] }
 0x23d   : > { %v3849_v40 = vpop.f32.mrb[0].mxu0  ;;  %v3931_v45 = vpop.f32.mrb[0].mxu1  ;;  %v4832_v34 = vcombine.high %v1246_v28, %v1254_v29  ;;  %v1349_v20 = vld [vmem:[%s6340_s30 + $0x5f0] sm:$0xff]  ;;  %v1342_v21 = vld [vmem:[%s6340_s30 + $0x5b8] sm:$0xff] }
 0x23e   : > { %v6738_v44 = vadd.f32 %v3849_v40, %v6733_v37  ;;  %v3851_v46 = vpop.f32.mrb[1].mxu0  ;;  %v6743_v51 = vadd.f32 %v3931_v45, %v6733_v37  ;;  %v3933_v53 = vpop.f32.mrb[1].mxu1  ;;  %v4831_v40 = vcombine.low %v1246_v28, %v1254_v29  ;;  %v1285_v45 = vld [vmem:[%s6340_s30 + $0x3f0] sm:$0xff]  ;;  %v1350_v22 = vld [vmem:[%s6340_s30 + $0x5f8] sm:$0xff] }
 0x23f   : > { %v6746_v52 = vadd.f32 %v3851_v46, %v6733_v37  ;;  %v3853_v54 = vpop.f32.mrb[2].mxu0  ;;  %4164 = vmatpush1.bf16.msra.mxu0 %v5161_v38  ;;  %v6754_v56 = vadd.f32 %v3933_v53, %v6733_v37  ;;  %v3935_v57 = vpop.f32.mrb[2].mxu1  ;;  %4246 = vmatpush1.bf16.msra.mxu1 %v5163_v1  ;;  %v1262_v38 = vld [vmem:[%s6340_s30 + $0x338] sm:$0xff] }
 0x240   : > { %v3854_v58 = vpop.f32.mrb[3].mxu0  ;;  %4266 = vmatprep.subr.bf16.mxu0 %v4750_v39  ;;  %v3936_v63 = vpop.f32.mrb[3].mxu1  ;;  %4348 = vmatprep.subr.bf16.mxu1 %v4752_v41  ;;  %v1270_v1 = vld [vmem:[%s6340_s30 + $0x378] sm:$0xff]  ;;  %v4829_v39 = vcombine.low %v1245_v26, %v1253_v27  ;;  %v4846_v41 = vcombine.high %v1261_v35, %v1269_v36  ;;  %v4862_v54 = vcombine.high %v1277_v43, %v1285_v45  ;;  %v1293_v57 = vld [vmem:[%s6340_s30 + $0x430] sm:$0xff] }
 0x241   : > { %v5188_v61 = vpack.c.bf16 %v6746_v52, %v6738_v44  ;;  %v5189_v4 = vpack.c.bf16 %v6754_v56, %v6743_v51  ;;  %v4848_v42 = vcombine.high %v1262_v38, %v1270_v1  ;;  %v1278_v46 = vld [vmem:[%s6340_s30 + $0x3b8] sm:$0xff]  ;;  %v4847_v53 = vcombine.low %v1262_v38, %v1270_v1  ;;  %v1301_v58 = vld [vmem:[%s6340_s30 + $0x470] sm:$0xff] }
 0x242   : > { %4176 = vmatmul.mubr.bf16.vlgmr.msra.gmra.mrb[8].mxu0 %v6480_v30  ;;  %4258 = vmatmul.mubr.bf16.vlgmr.msra.gmra.mrb[8].mxu1 %v6480_v30  ;;  %v4863_v63 = vcombine.low %v1278_v46, %v1286_v47  ;;  %v1357_v26 = vld [vmem:[%s6340_s30 + $0x630] sm:$0xff]  ;;  %v1358_v28 = vld [vmem:[%s6340_s30 + $0x638] sm:$0xff] }
 0x243   : > { %4494 = vst [vmem:[%s6751_s7] sm:$0xff] %v5188_v61  ;;  %4267 = vmatpush1.bf16.msra.mxu0 %v4749_v55  ;;  %4495 = vst [vmem:[%s6751_s7 + $0x8] sm:$0xff] %v5189_v4  ;;  %4349 = vmatpush1.bf16.msra.mxu1 %v4751_v59  ;;  %v4864_v55 = vcombine.high %v1278_v46, %v1286_v47  ;;  %v1294_v59 = vld [vmem:[%s6340_s30 + $0x438] sm:$0xff]  ;;  %v4861_v61 = vcombine.low %v1277_v43, %v1285_v45  ;;  %v1317_v4 = vld [vmem:[%s6340_s30 + $0x4f0] sm:$0xff] }
 0x244   : > { %4268 = vmatprep.subr.bf16.mxu0 %v4766_v60  ;;  %4350 = vmatprep.subr.bf16.mxu1 %v4768_v0  ;;  %v1302_v60 = vld [vmem:[%s6340_s30 + $0x478] sm:$0xff]  ;;  %v4878_v0 = vcombine.high %v1293_v57, %v1301_v58  ;;  %v1365_v27 = vld [vmem:[%s6340_s30 + $0x670] sm:$0xff] }
 0x245   : > { %4298 = vmatprep.mubr.bf16.mxu0 %v6336_v49  ;;  %4380 = vmatprep.mubr.bf16.mxu1 %v6336_v49  ;;  %v4799_v49 = vcombine.low %v1214_v13, %v1222_v14  ;;  %v4880_v2 = vcombine.high %v1294_v59, %v1302_v60  ;;  %v1326_v13 = vld [vmem:[%s6340_s30 + $0x538] sm:$0xff]  ;;  %v1373_v35 = vld [vmem:[%s6340_s30 + $0x6b0] sm:$0xff] }
 0x246   : > { %v1334_v14 = vld [vmem:[%s6340_s30 + $0x578] sm:$0xff]  ;;  %v1381_v36 = vld [vmem:[%s6340_s30 + $0x6f0] sm:$0xff] }
 0x247   : > { %4269 = vmatpush1.bf16.msra.mxu0 %v4765_v6  ;;  %4351 = vmatpush1.bf16.msra.mxu1 %v4767_v7  ;;  %v4877_v6 = vcombine.low %v1293_v57, %v1301_v58  ;;  %v4879_v7 = vcombine.low %v1294_v59, %v1302_v60  ;;  %v1366_v29 = vld [vmem:[%s6340_s30 + $0x678] sm:$0xff]  ;;  %v1389_v43 = vld [vmem:[%s6340_s30 + $0x730] sm:$0xff] }
 0x248   : > { %4270 = vmatprep.subr.bf16.mxu0 %v4782_v9  ;;  %4352 = vmatprep.subr.bf16.mxu1 %v4784_v10  ;;  %v4894_v9 = vcombine.high %v1309_v3, %v1317_v4  ;;  %v4896_v10 = vcombine.high %v1310_v48, %v1318_v5  ;;  %v1374_v38 = vld [vmem:[%s6340_s30 + $0x6b8] sm:$0xff]  ;;  %v1397_v45 = vld [vmem:[%s6340_s30 + $0x770] sm:$0xff] }
 0x249   : > { %v1382_v1 = vld [vmem:[%s6340_s30 + $0x6f8] sm:$0xff]  ;;  %v1405_v57 = vld [vmem:[%s6340_s30 + $0x7b0] sm:$0xff] }
 0x24a   : > { %v1390_v46 = vld [vmem:[%s6340_s30 + $0x738] sm:$0xff]  ;;  %v1413_v58 = vld [vmem:[%s6340_s30 + $0x7f0] sm:$0xff] }
 0x24b   : > { %4271 = vmatpush1.bf16.msra.mxu0 %v4781_v15  ;;  %4353 = vmatpush1.bf16.msra.mxu1 %v4783_v16  ;;  %v4893_v15 = vcombine.low %v1309_v3, %v1317_v4  ;;  %v4895_v16 = vcombine.low %v1310_v48, %v1318_v5  ;;  %v1398_v47 = vld [vmem:[%s6340_s30 + $0x778] sm:$0xff]  ;;  %v1421_v3 = vld [vmem:[%s6340_s30 + $0x830] sm:$0xff] }
 0x24c   : > { %4272 = vmatprep.subr.bf16.mxu0 %v4798_v17  ;;  %4354 = vmatprep.subr.bf16.mxu1 %v4800_v18  ;;  %v4910_v17 = vcombine.high %v1325_v11, %v1333_v12  ;;  %v4912_v18 = vcombine.high %v1326_v13, %v1334_v14  ;;  %v1406_v59 = vld [vmem:[%s6340_s30 + $0x7b8] sm:$0xff]  ;;  %v1429_v4 = vld [vmem:[%s6340_s30 + $0x870] sm:$0xff] }
 0x24d   : > { %v1414_v60 = vld [vmem:[%s6340_s30 + $0x7f8] sm:$0xff] }
 0x24e   : > { %v1422_v48 = vld [vmem:[%s6340_s30 + $0x838] sm:$0xff] }
 0x24f   : > { %4273 = vmatpush1.bf16.msra.mxu0 %v4797_v23  ;;  %4355 = vmatpush1.bf16.msra.mxu1 %v4799_v49  ;;  %v4909_v23 = vcombine.low %v1325_v11, %v1333_v12  ;;  %v4911_v49 = vcombine.low %v1326_v13, %v1334_v14  ;;  %v1430_v5 = vld [vmem:[%s6340_s30 + $0x878] sm:$0xff]  ;;  %v1437_v11 = vld [vmem:[%s6340_s30 + $0x8b0] sm:$0xff] }
 0x250   : > { %4274 = vmatprep.subr.bf16.mxu0 %v4814_v24  ;;  %4356 = vmatprep.subr.bf16.mxu1 %v4816_v25  ;;  %v4926_v24 = vcombine.high %v1341_v19, %v1349_v20  ;;  %v4928_v25 = vcombine.high %v1342_v21, %v1350_v22  ;;  %v1445_v12 = vld [vmem:[%s6340_s30 + $0x8f0] sm:$0xff]  ;;  %v1438_v13 = vld [vmem:[%s6340_s30 + $0x8b8] sm:$0xff] }
 0x251   : > { %v1446_v14 = vld [vmem:[%s6340_s30 + $0x8f8] sm:$0xff] }
 0x253   : > { %4275 = vmatpush1.bf16.msra.mxu0 %v4813_v31  ;;  %4357 = vmatpush1.bf16.msra.mxu1 %v4815_v32  ;;  %v4925_v31 = vcombine.low %v1341_v19, %v1349_v20  ;;  %v4927_v32 = vcombine.low %v1342_v21, %v1350_v22  ;;  %v1453_v19 = vld [vmem:[%s6340_s30 + $0x930] sm:$0xff]  ;;  %v1454_v21 = vld [vmem:[%s6340_s30 + $0x938] sm:$0xff] }
 0x254   : > { %4276 = vmatprep.subr.bf16.mxu0 %v4830_v33  ;;  %4358 = vmatprep.subr.bf16.mxu1 %v4832_v34  ;;  %v4942_v33 = vcombine.high %v1357_v26, %v1365_v27  ;;  %v4944_v34 = vcombine.high %v1358_v28, %v1366_v29  ;;  %v1461_v20 = vld [vmem:[%s6340_s30 + $0x970] sm:$0xff]  ;;  %v1462_v22 = vld [vmem:[%s6340_s30 + $0x978] sm:$0xff] }
 0x257   : > { %4277 = vmatpush1.bf16.msra.mxu0 %v4829_v39  ;;  %4359 = vmatpush1.bf16.msra.mxu1 %v4831_v40  ;;  %v4941_v39 = vcombine.low %v1357_v26, %v1365_v27  ;;  %v4943_v40 = vcombine.low %v1358_v28, %v1366_v29  ;;  %v1469_v26 = vld [vmem:[%s6340_s30 + $0x9b0] sm:$0xff]  ;;  %v1470_v28 = vld [vmem:[%s6340_s30 + $0x9b8] sm:$0xff] }
 0x258   : > { %4278 = vmatprep.subr.bf16.mxu0 %v4846_v41  ;;  %4360 = vmatprep.subr.bf16.mxu1 %v4848_v42  ;;  %v4958_v41 = vcombine.high %v1373_v35, %v1381_v36  ;;  %v4960_v42 = vcombine.high %v1374_v38, %v1382_v1  ;;  %v1477_v27 = vld [vmem:[%s6340_s30 + $0x9f0] sm:$0xff]  ;;  %v1478_v29 = vld [vmem:[%s6340_s30 + $0x9f8] sm:$0xff] }
 0x25b   : > { %4279 = vmatpush1.bf16.msra.mxu0 %v4845_v50  ;;  %4361 = vmatpush1.bf16.msra.mxu1 %v4847_v53  ;;  %v4957_v50 = vcombine.low %v1373_v35, %v1381_v36  ;;  %v4959_v53 = vcombine.low %v1374_v38, %v1382_v1  ;;  %v1493_v35 = vld [vmem:[%s6340_s30 + $0xa70] sm:$0xff]  ;;  %v1486_v36 = vld [vmem:[%s6340_s30 + $0xa38] sm:$0xff]  ;;  %v5053_v1 = vcombine.low %v1469_v26, %v1477_v27 }
 0x25c   : > { %4280 = vmatprep.subr.bf16.mxu0 %v4862_v54  ;;  %4362 = vmatprep.subr.bf16.mxu1 %v4864_v55  ;;  %v4974_v54 = vcombine.high %v1389_v43, %v1397_v45  ;;  %v4976_v55 = vcombine.high %v1390_v46, %v1398_v47  ;;  %v1494_v38 = vld [vmem:[%s6340_s30 + $0xa78] sm:$0xff] }
 0x25f   : > { %4281 = vmatpush1.bf16.msra.mxu0 %v4861_v61  ;;  %4363 = vmatpush1.bf16.msra.mxu1 %v4863_v63  ;;  %v4973_v61 = vcombine.low %v1389_v43, %v1397_v45  ;;  %v4975_v63 = vcombine.low %v1390_v46, %v1398_v47  ;;  %v1502_v43 = vld [vmem:[%s6340_s30 + $0xab8] sm:$0xff]  ;;  %v5071_v47 = vcombine.low %v1486_v36, %v1494_v38 }
 0x260   : > { %4282 = vmatprep.subr.bf16.mxu0 %v4878_v0  ;;  %4364 = vmatprep.subr.bf16.mxu1 %v4880_v2  ;;  %v4990_v0 = vcombine.high %v1405_v57, %v1413_v58  ;;  %v4992_v2 = vcombine.high %v1406_v59, %v1414_v60  ;;  %v1510_v45 = vld [vmem:[%s6340_s30 + $0xaf8] sm:$0xff] }
 0x263   : > { %4283 = vmatpush1.bf16.msra.mxu0 %v4877_v6  ;;  %4365 = vmatpush1.bf16.msra.mxu1 %v4879_v7  ;;  %v4989_v6 = vcombine.low %v1405_v57, %v1413_v58  ;;  %v4991_v7 = vcombine.low %v1406_v59, %v1414_v60  ;;  %v1518_v57 = vld [vmem:[%s6340_s30 + $0xb38] sm:$0xff]  ;;  %v5087_v60 = vcombine.low %v1502_v43, %v1510_v45 }
 0x264   : > { %4284 = vmatprep.subr.bf16.mxu0 %v4894_v9  ;;  %4366 = vmatprep.subr.bf16.mxu1 %v4896_v10  ;;  %v5006_v9 = vcombine.high %v1421_v3, %v1429_v4  ;;  %v5008_v10 = vcombine.high %v1422_v48, %v1430_v5  ;;  %v1526_v58 = vld [vmem:[%s6340_s30 + $0xb78] sm:$0xff] }
 0x267   : > { %4285 = vmatpush1.bf16.msra.mxu0 %v4893_v15  ;;  %4367 = vmatpush1.bf16.msra.mxu1 %v4895_v16  ;;  %v5005_v15 = vcombine.low %v1421_v3, %v1429_v4  ;;  %v5007_v16 = vcombine.low %v1422_v48, %v1430_v5  ;;  %v1534_v3 = vld [vmem:[%s6340_s30 + $0xbb8] sm:$0xff]  ;;  %v5103_v5 = vcombine.low %v1518_v57, %v1526_v58 }
 0x268   : > { %4286 = vmatprep.subr.bf16.mxu0 %v4910_v17  ;;  %4368 = vmatprep.subr.bf16.mxu1 %v4912_v18  ;;  %v5022_v17 = vcombine.high %v1437_v11, %v1445_v12  ;;  %v5024_v18 = vcombine.high %v1438_v13, %v1446_v14  ;;  %v1542_v4 = vld [vmem:[%s6340_s30 + $0xbf8] sm:$0xff] }
 0x26b   : > { %4287 = vmatpush1.bf16.msra.mxu0 %v4909_v23  ;;  %4369 = vmatpush1.bf16.msra.mxu1 %v4911_v49  ;;  %v5021_v23 = vcombine.low %v1437_v11, %v1445_v12  ;;  %v5023_v49 = vcombine.low %v1438_v13, %v1446_v14  ;;  %v1550_v11 = vld [vmem:[%s6340_s30 + $0xc38] sm:$0xff]  ;;  %v5119_v14 = vcombine.low %v1534_v3, %v1542_v4 }
 0x26c   : > { %4288 = vmatprep.subr.bf16.mxu0 %v4926_v24  ;;  %4370 = vmatprep.subr.bf16.mxu1 %v4928_v25  ;;  %v5038_v24 = vcombine.high %v1453_v19, %v1461_v20  ;;  %v5040_v25 = vcombine.high %v1454_v21, %v1462_v22  ;;  %v1558_v12 = vld [vmem:[%s6340_s30 + $0xc78] sm:$0xff] }
 0x26f   : > { %4289 = vmatpush1.bf16.msra.mxu0 %v4925_v31  ;;  %4371 = vmatpush1.bf16.msra.mxu1 %v4927_v32  ;;  %v5039_v31 = vcombine.low %v1454_v21, %v1462_v22  ;;  %v5054_v32 = vcombine.high %v1469_v26, %v1477_v27  ;;  %v5135_v22 = vcombine.low %v1550_v11, %v1558_v12  ;;  %v1582_v26 = vld [vmem:[%s6340_s30 + $0xd38] sm:$0xff] }
 0x270   : > { %4290 = vmatprep.subr.bf16.mxu0 %v4942_v33  ;;  %4372 = vmatprep.subr.bf16.mxu1 %v4944_v34  ;;  %v5056_v33 = vcombine.high %v1470_v28, %v1478_v29  ;;  %v1485_v34 = vld [vmem:[%s6340_s30 + $0xa30] sm:$0xff]  ;;  %v1590_v27 = vld [vmem:[%s6340_s30 + $0xd78] sm:$0xff] }
 0x271   : > { %v5069_v46 = vcombine.low %v1485_v34, %v1493_v35 }
 0x273   : > { %4291 = vmatpush1.bf16.msra.mxu0 %v4941_v39  ;;  %4373 = vmatpush1.bf16.msra.mxu1 %v4943_v40  ;;  %v5070_v39 = vcombine.high %v1485_v34, %v1493_v35  ;;  %v5072_v40 = vcombine.high %v1486_v36, %v1494_v38 }
 0x274   : > { %4292 = vmatprep.subr.bf16.mxu0 %v4958_v41  ;;  %4374 = vmatprep.subr.bf16.mxu1 %v4960_v42  ;;  %v1501_v41 = vld [vmem:[%s6340_s30 + $0xab0] sm:$0xff] }
 0x275   : > { %v1509_v42 = vld [vmem:[%s6340_s30 + $0xaf0] sm:$0xff] }
 0x276   : > { %v5085_v59 = vcombine.low %v1501_v41, %v1509_v42 }
 0x277   : > { %4293 = vmatpush1.bf16.msra.mxu0 %v4957_v50  ;;  %4375 = vmatpush1.bf16.msra.mxu1 %v4959_v53  ;;  %v5086_v50 = vcombine.high %v1501_v41, %v1509_v42  ;;  %v5088_v53 = vcombine.high %v1502_v43, %v1510_v45 }
 0x278   : > { %4294 = vmatprep.subr.bf16.mxu0 %v4974_v54  ;;  %4376 = vmatprep.subr.bf16.mxu1 %v4976_v55  ;;  %v1517_v54 = vld [vmem:[%s6340_s30 + $0xb30] sm:$0xff] }
 0x279   : > { %v1525_v55 = vld [vmem:[%s6340_s30 + $0xb70] sm:$0xff] }
 0x27a   : > { %v5101_v48 = vcombine.low %v1517_v54, %v1525_v55 }
 0x27b   : > { %4295 = vmatpush1.bf16.msra.mxu0 %v4973_v61  ;;  %4377 = vmatpush1.bf16.msra.mxu1 %v4975_v63  ;;  %v5102_v61 = vcombine.high %v1517_v54, %v1525_v55  ;;  %v5104_v63 = vcombine.high %v1518_v57, %v1526_v58 }
 0x27c   : > { %4296 = vmatprep.subr.bf16.mxu0 %v4990_v0  ;;  %4378 = vmatprep.subr.bf16.mxu1 %v4992_v2  ;;  %v1533_v0 = vld [vmem:[%s6340_s30 + $0xbb0] sm:$0xff] }
 0x27d   : > { %v1541_v2 = vld [vmem:[%s6340_s30 + $0xbf0] sm:$0xff] }
 0x27e   : > { %v5117_v13 = vcombine.low %v1533_v0, %v1541_v2 }
 0x27f   : > { %4297 = vmatpush1.bf16.msra.mxu0 %v4989_v6  ;;  %4379 = vmatpush1.bf16.msra.mxu1 %v4991_v7  ;;  %v5118_v6 = vcombine.high %v1533_v0, %v1541_v2  ;;  %v5120_v7 = vcombine.high %v1534_v3, %v1542_v4 }
 0x280   : > { %4307 = vmatprep.subr.bf16.mxu0 %v5006_v9  ;;  %4389 = vmatprep.subr.bf16.mxu1 %v5008_v10  ;;  %v1549_v9 = vld [vmem:[%s6340_s30 + $0xc30] sm:$0xff] }
 0x281   : > { %v1557_v10 = vld [vmem:[%s6340_s30 + $0xc70] sm:$0xff] }
 0x282   : > { %4299 = vmatmul.mubr.bf16.vlgmr.msra.gmra.mrb[12].mxu0 %v6414_v62  ;;  %4381 = vmatmul.mubr.bf16.vlgmr.msra.gmra.mrb[12].mxu1 %v6414_v62  ;;  %v5037_v62 = vcombine.low %v1453_v19, %v1461_v20  ;;  %v1566_v19 = vld [vmem:[%s6340_s30 + $0xcb8] sm:$0xff]  ;;  %v5133_v21 = vcombine.low %v1549_v9, %v1557_v10 }
 0x283   : > { %4308 = vmatpush1.bf16.msra.mxu0 %v5005_v15  ;;  %4390 = vmatpush1.bf16.msra.mxu1 %v5007_v16  ;;  %v5134_v15 = vcombine.high %v1549_v9, %v1557_v10  ;;  %v5136_v16 = vcombine.high %v1550_v11, %v1558_v12  ;;  %v1574_v20 = vld [vmem:[%s6340_s30 + $0xcf8] sm:$0xff] }
 0x284   : > { %4309 = vmatprep.subr.bf16.mxu0 %v5022_v17  ;;  %4391 = vmatprep.subr.bf16.mxu1 %v5024_v18  ;;  %v1565_v17 = vld [vmem:[%s6340_s30 + $0xcb0] sm:$0xff] }
 0x285   : > { %5175 = vmatprep.mubr.msk.bf16.mxu0 %vm3770_vm0, %v6430_v8  ;;  %5176 = vmatprep.mubr.msk.bf16.mxu1 %vm3770_vm0, %v6430_v8  ;;  %v5055_v8 = vcombine.low %v1470_v28, %v1478_v29  ;;  %v1573_v18 = vld [vmem:[%s6340_s30 + $0xcf0] sm:$0xff]  ;;  %v5151_v29 = vcombine.low %v1566_v19, %v1574_v20 }
 0x286   : > { %v5149_v28 = vcombine.low %v1565_v17, %v1573_v18 }
 0x287   : > { %4310 = vmatpush1.bf16.msra.mxu0 %v5021_v23  ;;  %4392 = vmatpush1.bf16.msra.mxu1 %v5023_v49  ;;  %v5150_v23 = vcombine.high %v1565_v17, %v1573_v18  ;;  %v5152_v49 = vcombine.high %v1566_v19, %v1574_v20  ;;  %v5367_v18 = vmov (!%p5185_p12), 0.0  }
 0x288   : > { %4311 = vmatprep.subr.bf16.mxu0 %v5038_v24  ;;  %4393 = vmatprep.subr.bf16.mxu1 %v5040_v25  ;;  %v1581_v24 = vld [vmem:[%s6340_s30 + $0xd30] sm:$0xff]  ;;  %4507 = vst.msk [vmem:[%s6592_s13] sm:$0xff] (!%p5185_p12), %vm4506_vm1, %v5367_v18  ;;  %4508 = vst.msk [vmem:[%s6599_s16] sm:$0xff] (!%p5185_p12), %vm4506_vm1, %v5367_v18 }
 0x289   : > { %v1589_v25 = vld [vmem:[%s6340_s30 + $0xd70] sm:$0xff] }
 0x28b   : > { %4312 = vmatpush1.bf16.msra.mxu0 %v5037_v62  ;;  %4394 = vmatpush1.bf16.msra.mxu1 %v5039_v31  ;;  %v5166_v62 = vcombine.high %v1581_v24, %v1589_v25  ;;  %v5168_v31 = vcombine.high %v1582_v26, %v1590_v27 }
 0x28c   : > { %4313 = vmatprep.subr.bf16.mxu0 %v5054_v32  ;;  %4395 = vmatprep.subr.bf16.mxu1 %v5056_v33  ;;  %v5165_v32 = vcombine.low %v1581_v24, %v1589_v25  ;;  %v5167_v33 = vcombine.low %v1582_v26, %v1590_v27 }
 0x28f   : > { %4314 = vmatpush1.bf16.msra.mxu0 %v5053_v1  ;;  %4396 = vmatpush1.bf16.msra.mxu1 %v5055_v8 }
 0x290   : > { %4315 = vmatprep.subr.bf16.mxu0 %v5070_v39  ;;  %4397 = vmatprep.subr.bf16.mxu1 %v5072_v40 }
 0x293   : > { %4316 = vmatpush1.bf16.msra.mxu0 %v5069_v46  ;;  %4398 = vmatpush1.bf16.msra.mxu1 %v5071_v47 }
 0x294   : > { %4317 = vmatprep.subr.bf16.mxu0 %v5086_v50  ;;  %4399 = vmatprep.subr.bf16.mxu1 %v5088_v53 }
 0x297   : > { %4318 = vmatpush1.bf16.msra.mxu0 %v5085_v59  ;;  %4400 = vmatpush1.bf16.msra.mxu1 %v5087_v60 }
 0x298   : > { %4319 = vmatprep.subr.bf16.mxu0 %v5102_v61  ;;  %4401 = vmatprep.subr.bf16.mxu1 %v5104_v63 }
 0x29b   : > { %4320 = vmatpush1.bf16.msra.mxu0 %v5101_v48  ;;  %4402 = vmatpush1.bf16.msra.mxu1 %v5103_v5 }
 0x29c   : > { %4321 = vmatprep.subr.bf16.mxu0 %v5118_v6  ;;  %4403 = vmatprep.subr.bf16.mxu1 %v5120_v7 }
 0x29f   : > { %4322 = vmatpush1.bf16.msra.mxu0 %v5117_v13  ;;  %4404 = vmatpush1.bf16.msra.mxu1 %v5119_v14 }
 0x2a0   : > { %4323 = vmatprep.subr.bf16.mxu0 %v5134_v15  ;;  %4405 = vmatprep.subr.bf16.mxu1 %v5136_v16 }
 0x2a3   : > { %4324 = vmatpush1.bf16.msra.mxu0 %v5133_v21  ;;  %4406 = vmatpush1.bf16.msra.mxu1 %v5135_v22 }
 0x2a4   : > { %4325 = vmatprep.subr.bf16.mxu0 %v5150_v23  ;;  %4407 = vmatprep.subr.bf16.mxu1 %v5152_v49 }
 0x2a7   : > { %4326 = vmatpush1.bf16.msra.mxu0 %v5149_v28  ;;  %4408 = vmatpush1.bf16.msra.mxu1 %v5151_v29 }
 0x2a8   : > { %4327 = vmatprep.subr.bf16.mxu0 %v5166_v62  ;;  %4409 = vmatprep.subr.bf16.mxu1 %v5168_v31 }
 0x2a9   : > { %v4013_v34 = vpop.f32.mrb[4].mxu0  ;;  %v4095_v36 = vpop.f32.mrb[4].mxu1 }
 0x2aa   : > { %v6873_v35 = vadd.f32 %v4013_v34, %v6733_v37  ;;  %v4015_v38 = vpop.f32.mrb[5].mxu0  ;;  %v6876_v1 = vadd.f32 %v4095_v36, %v6733_v37  ;;  %v4097_v39 = vpop.f32.mrb[5].mxu1 }
 0x2ab   : > { %v6879_v8 = vadd.f32 %v4015_v38, %v6733_v37  ;;  %v4017_v40 = vpop.f32.mrb[6].mxu0  ;;  %4328 = vmatpush1.bf16.msra.mxu0 %v5165_v32  ;;  %v6882_v41 = vadd.f32 %v4097_v39, %v6733_v37  ;;  %v4099_v42 = vpop.f32.mrb[6].mxu1  ;;  %4410 = vmatpush1.bf16.msra.mxu1 %v5167_v33 }
 0x2ac   : > { %v4018_v43 = vpop.f32.mrb[7].mxu0  ;;  %v4100_v46 = vpop.f32.mrb[7].mxu1 }
 0x2ad   : > { %v5190_v45 = vpack.c.bf16 %v6879_v8, %v6873_v35  ;;  %v5191_v47 = vpack.c.bf16 %v6882_v41, %v6876_v1 }
 0x2ae   : > { %4340 = vmatmul.mubr.bf16.vlgmr.msra.gmra.mrb[12].mxu0 %v6480_v30  ;;  %4422 = vmatmul.mubr.bf16.vlgmr.msra.gmra.mrb[12].mxu1 %v6480_v30 }
 0x2af   : > { %4496 = vst [vmem:[%s6751_s7 + $0x10] sm:$0xff] %v5190_v45  ;;  %4497 = vst [vmem:[%s6751_s7 + $0x18] sm:$0xff] %v5191_v47 }
 0x315   : > { %v4177_v50 = vpop.f32.mrb[8].mxu0  ;;  %v4259_v54 = vpop.f32.mrb[8].mxu1 }
 0x316   : > { %v5204_v53 = vadd.f32 %v4177_v50, %v6733_v37  ;;  %v4179_v55 = vpop.f32.mrb[9].mxu0  ;;  %v5206_v57 = vadd.f32 %v4259_v54, %v6733_v37  ;;  %v4261_v59 = vpop.f32.mrb[9].mxu1 }
 0x317   : > { %v5205_v58 = vadd.f32 %v4179_v55, %v6733_v37  ;;  %v4181_v60 = vpop.f32.mrb[10].mxu0  ;;  %v5207_v61 = vadd.f32 %v4261_v59, %v6733_v37  ;;  %v4263_v63 = vpop.f32.mrb[10].mxu1 }
 0x318   : > { %v4182_v0 = vpop.f32.mrb[11].mxu0  ;;  %v4264_v30 = vpop.f32.mrb[11].mxu1 }
 0x319   : > { %v5192_v2 = vpack.c.bf16 %v5205_v58, %v5204_v53  ;;  %v5193_v3 = vpack.c.bf16 %v5207_v61, %v5206_v57 }
 0x31b   : > { %4498 = vst [vmem:[%s6751_s7 + $0x20] sm:$0xff] %v5192_v2  ;;  %4499 = vst [vmem:[%s6751_s7 + $0x28] sm:$0xff] %v5193_v3 }
 0x381   : > { %v4341_v4 = vpop.f32.mrb[12].mxu0  ;;  %v4423_v5 = vpop.f32.mrb[12].mxu1  ;;  %4505 = sbr.rel (%p5185_p12) target bundleno = 904 (0x388), region = 59 }
 0x382   : > { %v5208_v48 = vadd.f32 %v4341_v4, %v6733_v37  ;;  %v4343_v6 = vpop.f32.mrb[13].mxu0  ;;  %v5210_v7 = vadd.f32 %v4423_v5, %v6733_v37  ;;  %v4425_v10 = vpop.f32.mrb[13].mxu1 }
 0x383   : > { %v5209_v9 = vadd.f32 %v4343_v6, %v6733_v37  ;;  %v4345_v11 = vpop.f32.mrb[14].mxu0  ;;  %v5211_v12 = vadd.f32 %v4425_v10, %v6733_v37  ;;  %v4427_v13 = vpop.f32.mrb[14].mxu1 }
 0x384   : > { %v4346_v14 = vpop.f32.mrb[15].mxu0  ;;  %v4428_v16 = vpop.f32.mrb[15].mxu1 }
 0x385   : > { %v5194_v15 = vpack.c.bf16 %v5209_v9, %v5208_v48  ;;  %v5195_v17 = vpack.c.bf16 %v5211_v12, %v5210_v7 }
 0x387   : > { %4500 = vst [vmem:[%s6751_s7 + $0x30] sm:$0xff] %v5194_v15  ;;  %4501 = vst [vmem:[%s6751_s7 + $0x38] sm:$0xff] %v5195_v17 }
 0x388 PF: > { %v4510_v37 = vadd.f32 %v6746_v52, %v6738_v44  ;;  %v4531_v19 = vmul.f32 %v6738_v44, %v6738_v44  ;;  %v4532_v20 = vmul.f32 %v6746_v52, %v6746_v52  ;;  %v4533_v22 = vmul.f32 %v6743_v51, %v6743_v51  ;;  %v4509_v2 = vld [vmem:[%s6592_s13] sm:$0xff] }
 0x389   : > { %v4534_v49 = vmul.f32 %v6754_v56, %v6754_v56  ;;  %v4535_v26 = vmul.f32 %v6873_v35, %v6873_v35  ;;  %v4536_v52 = vmul.f32 %v6879_v8, %v6879_v8  ;;  %v4537_v29 = vmul.f32 %v6876_v1, %v6876_v1  ;;  %v4530_v4 = vld [vmem:[%s6599_s16] sm:$0xff] }
 0x38a   : > { %v4511_v21 = vadd.f32 %v6743_v51, %v4510_v37  ;;  %v4547_v24 = vadd.f32 %v4532_v20, %v4531_v19  ;;  %v4538_v31 = vmul.f32 %v6882_v41, %v6882_v41  ;;  %v4539_v34 = vmul.f32 %v5204_v53, %v5204_v53 }
 0x38b   : > { %v4540_v38 = vmul.f32 %v5205_v58, %v5205_v58  ;;  %v4541_v40 = vmul.f32 %v5206_v57, %v5206_v57  ;;  %v4542_v45 = vmul.f32 %v5207_v61, %v5207_v61  ;;  %v4543_v47 = vmul.f32 %v5208_v48, %v5208_v48 }
 0x38c   : > { %v4512_v23 = vadd.f32 %v6754_v56, %v4511_v21  ;;  %v4548_v44 = vadd.f32 %v4547_v24, %v4533_v22  ;;  %v4544_v55 = vmul.f32 %v5209_v9, %v5209_v9  ;;  %v4545_v59 = vmul.f32 %v5210_v7, %v5210_v7 }
 0x38d   : > { %v4546_v63 = vmul.f32 %v5211_v12, %v5211_v12  ;;  %vm4528_vm2 = vcmask 7168  }
 0x38e   : > { %v4513_v25 = vadd.f32 %v6873_v35, %v4512_v23  ;;  %v4549_v28 = vadd.f32 %v4548_v44, %v4534_v49 }
 0x390   : > { %v4514_v27 = vadd.f32 %v6879_v8, %v4513_v25  ;;  %v4550_v62 = vadd.f32 %v4549_v28, %v4535_v26 }
 0x392   : > { %v4515_v51 = vadd.f32 %v6876_v1, %v4514_v27  ;;  %v4551_v32 = vadd.f32 %v4550_v62, %v4536_v52 }
 0x394   : > { %v4516_v56 = vadd.f32 %v6882_v41, %v4515_v51  ;;  %v4552_v35 = vadd.f32 %v4551_v32, %v4537_v29 }
 0x396   : > { %v4517_v33 = vadd.f32 %v5204_v53, %v4516_v56  ;;  %v4553_v39 = vadd.f32 %v4552_v35, %v4538_v31 }
 0x398   : > { %v4518_v36 = vadd.f32 %v5205_v58, %v4517_v33  ;;  %v4554_v42 = vadd.f32 %v4553_v39, %v4539_v34 }
 0x39a   : > { %v4519_v8 = vadd.f32 %v5206_v57, %v4518_v36  ;;  %v4555_v46 = vadd.f32 %v4554_v42, %v4540_v38 }
 0x39c   : > { %v4520_v43 = vadd.f32 %v5207_v61, %v4519_v8  ;;  %v4556_v50 = vadd.f32 %v4555_v46, %v4541_v40 }
 0x39e   : > { %v4521_v1 = vadd.f32 %v5208_v48, %v4520_v43  ;;  %v4557_v41 = vadd.f32 %v4556_v50, %v4542_v45 }
 0x3a0   : > { %v4522_v54 = vadd.f32 %v5209_v9, %v4521_v1  ;;  %v4558_v60 = vadd.f32 %v4557_v41, %v4543_v47 }
 0x3a2   : > { %v4523_v53 = vadd.f32 %v5210_v7, %v4522_v54  ;;  %v4559_v57 = vadd.f32 %v4558_v60, %v4544_v55 }
 0x3a4   : > { %v4524_v58 = vadd.f32 %v5211_v12, %v4523_v53  ;;  %v4560_v0 = vadd.f32 %v4559_v57, %v4545_v59 }
 0x3a6   : > { %4525 = vadd.xlane.f32.xlu0 %v4524_v58  ;;  %v4561_v61 = vadd.f32 %v4560_v0, %v4546_v63 }
 0x3aa   : > { %4562 = vadd.xlane.f32.xlu0 %v4561_v61 }
 0x433   : > { %v4526_v30 = vpop.xlane.xlu0 %4525 }
 0x434   : > { %v4527_v3 = vadd.f32 %v4526_v30, %v4509_v2 }
 0x436   : > { %4529 = vst.msk [vmem:[%s6592_s13] sm:$0xff] %vm4528_vm2, %v4527_v3 }
 0x437   : > { %v4563_v48 = vpop.xlane.xlu0 %4562 }
 0x438   : > { %v4564_v5 = vadd.f32 %v4563_v48, %v4530_v4 }
 0x43a   : > { %4565 = vst.msk [vmem:[%s6599_s16] sm:$0xff] %vm4528_vm2, %v4564_v5 }
 0x43b PF: > { %s16_s24 = sadd.s32 1, %s5364_s24   ;;  %s6962_s18 = smov %s5344_s19 }
 0x43c   : > { %p13_p13 = scmp.ge.s32.totalorder %s16_s24, 6   ;;  %s6963_s19 = smov %s5449_s6 }
 0x43d   : > { %s6964_s20 = smov %s5356_s22  ;;  %s6965_s21 = smov %s5360_s23 }
 0x43e   : > { %s6966_s22 = smov %s6969_s25  ;;  %s6967_s23 = smov %s6973_s26 }
 0x43f   :  { %15 = sbr.rel (!%p13_p13) target bundleno = 4 (0x4), region = 118 }

// kernel: unet_adain_forward.19
= control target key start
LH: loop header
LB: loop body
LE: loop exit
PB: predicated region body
PF: predicated region fallthrough
CT: control target
= control target key end

     0   :  { %s1575_s27 = smov 0   ;;  %s1577_s28 = smov 0   ;;  %s1722_s0 = inlined_call_operand.vmem [shape: bf16[2,8,4096], index: 0, kind: input, shape index: {}]   ;;  %s1723_s1 = inlined_call_operand.vmem [shape: f32[2,8,1], index: 1, kind: input, shape index: {}]   ;;  %s1724_s2 = inlined_call_operand.vmem [shape: f32[2,8,1], index: 2, kind: input, shape index: {}]   ;;  %s1725_s3 = inlined_call_operand.vmem [shape: f32[2,8,1], index: 3, kind: input, shape index: {}]   ;;  %s1726_s4 = inlined_call_operand.vmem [shape: f32[2,8,1], index: 4, kind: input, shape index: {}]   ;;  %s1727_s5 = inlined_call_operand.vmem [shape: bf16[2,8,4096], index: 5, kind: input, shape index: {}]   ;;  %s1728_s6 = inlined_call_operand.vmem [shape: f32[2,8], index: 6, kind: input, shape index: {}]   ;;  %s1729_s7 = inlined_call_operand.vmem [shape: f32[2,1], index: 7, kind: input, shape index: {}]   ;;  %s1730_s8 = inlined_call_operand.vmem [shape: f32[2,2,4096], index: 8, kind: output, shape index: {}]  }
   0x1   :  { %s1579_s29 = smov 0   ;;  %s1581_s30 = smov 0  }
   0x2   :  { %s1583_s9 = smov 0  }
   0x3 LB: > { %s27_s10 = sadd.s32 1, %s1517_s29  ;;  %s30_s11 = sadd.s32 1, %s1521_s30  ;;  %s1525_s9 = sphi %s1583_s9, %s18_s9   ;;  %s1521_s30 = sphi %s1581_s30, %s1734_s30   ;;  %s1517_s29 = sphi %s1579_s29, %s1733_s29   ;;  %s1513_s28 = sphi %s1577_s28, %s1732_s28   ;;  %s1509_s27 = sphi %s1575_s27, %s1731_s27  }
   0x4   : > { %p28_p0 = scmp.ge.s32.totalorder %s27_s10, 2  ;;  %p1416_p1 = scmp.ge.s32.totalorder %s1525_s9, 1 }
   0x5   : > { %p336_p2 = scmp.lt.s32.totalorder %s1525_s9, 5 }
   0x6   : > { %s1736_s10 = smov (%p28_p0, %s27_s10), 0  ;;  %s1738_s11 = smov (!%p28_p0, %s30_s11), %s1521_s30 }
   0x7   : > { %p337_p3 = pnand %p1416_p1, %p336_p2  ;;  %p32_p4 = scmp.ge.s32.totalorder %s1738_s11, 2 }
   0x8   : > { %p404_p5 = scmp.lt.s32.totalorder (!%p337_p3), %s1513_s28, 1  ;;  %v1527_v0 = vmov (!%p337_p3), 0   ;;  %v1528_v15 = vmov (!%p337_p3), 0.0   ;;  %v491_v16 = vld [vmem:[%s1729_s7] sm:$0x3] (!%p337_p3)  ;;  %s1417_s13 = sshll.u32 (!%p337_p3), %s1509_s27, 4 }
   0x9   : > { %s1740_s11 = smov (%p32_p4, %s1738_s11), 0  ;;  %340 = sbr.rel (%p337_p3) target bundleno = 418 (0x1a2), region = 52 }
   0xa   : > { %1483 = vset.pattern.permute.xlu0 (!%p337_p3), %v1527_v0  ;;  %1484 = vset.pattern.permute.xlu1 (!%p337_p3), %v1527_v0  ;;  %p406_p6 = scmp.lt.s32.totalorder (!%p337_p3), %s1417_s13, 31  ;;  %vm592_vm0 = vcmask (!%p337_p3), 64512  }
   0xb   : > { %660 = vmatprep.mubr.f32.mxu0 (!%p337_p3), %v1528_v15  ;;  %731 = vmatprep.mubr.f32.mxu1 (!%p337_p3), %v1528_v15 }
   0xc   : > { %589 = vperm.xlu1 (!%p337_p3), %1484, %v491_v16  }
  0x10   : > { %s1742_s28 = smov (!%p404_p5, %s1513_s28), 1  ;;  %s1744_s13 = smov (!%p406_p6, %s1417_s13), 31 }
  0x11   : > { %s1420_s12 = sshll.u32 %s1742_s28, 3 }
  0x12   : > { %s416_s15 = scalar_lea.vmem %s1723_s1, %s1420_s12  ;;  %s420_s18 = scalar_lea.vmem %s1724_s2, %s1420_s12 }
  0x13   : > { %v473_v1 = vld [vmem:[%s416_s15] sm:$0xff]  ;;  %s428_s21 = scalar_lea.vmem %s1726_s4, %s1420_s12  ;;  %s424_s24 = scalar_lea.vmem %s1725_s3, %s1420_s12 }
  0x14   : > { %v475_v2 = vld [vmem:[%s420_s18] sm:$0xff]  ;;  %v474_v3 = vmul.f32 0.00024414063, %v473_v1  ;;  %s1418_s12 = sshll.u32 %s1742_s28, 5 }
  0x15   : > { %v476_v4 = vmul.f32 0.00024414063, %v475_v2  ;;  %v481_v9 = vld [vmem:[%s428_s21] sm:$0xff]  ;;  %s1629_s14 = sadd.s32 %s1418_s12, %s1744_s13 }
  0x16   : > { %v477_v5 = vmul.f32 %v474_v3, %v474_v3  ;;  %v480_v12 = vld [vmem:[%s424_s24] sm:$0xff]  ;;  %s1419_s15 = sshll.u32 %s1629_s14, 2  ;;  %s1429_s22 = sshll.u32 %s1629_s14, 1 }
  0x17   : > { %s411_s18 = scalar_lea.vmem %s1722_s0, %s1419_s15  ;;  %s1638_s21 = scalar_lea.vmem %s1727_s5, %s1419_s15 }
  0x18   : > { %v478_v6 = vsub.f32 %v476_v4, %v477_v5  ;;  %v449_v17 = vld [vmem:[%s411_s18] sm:$0xff]  ;;  %v450_v18 = vld [vmem:[%s411_s18 + $0x8] sm:$0xff]  ;;  %v451_v19 = vld [vmem:[%s411_s18 + $0x10] sm:$0xff]  ;;  %s1701_s25 = scalar_lea.vmem %s1730_s8, %s1429_s22 }
  0x19   : > { %v452_v20 = vld [vmem:[%s411_s18 + $0x18] sm:$0xff]  ;;  %v453_v21 = vld [vmem:[%s411_s18 + $0x20] sm:$0xff]  ;;  %v454_v22 = vld [vmem:[%s411_s18 + $0x28] sm:$0xff]  ;;  %v458_v23 = vunpack.c.h.bf16 %v449_v17  ;;  %v460_v24 = vunpack.c.h.bf16 %v450_v18  ;;  %v457_v25 = vunpack.c.l.bf16 %v449_v17  ;;  %v459_v26 = vunpack.c.l.bf16 %v450_v18 }
  0x1a   : > { %v479_v7 = vmax.f32 %v478_v6, 0.0  ;;  %v455_v27 = vld [vmem:[%s411_s18 + $0x30] sm:$0xff]  ;;  %v456_v28 = vld [vmem:[%s411_s18 + $0x38] sm:$0xff]  ;;  %v1641_v29 = vld [vmem:[%s1638_s21] sm:$0xff]  ;;  %v461_v31 = vunpack.c.l.bf16 %v451_v19  ;;  %v462_v32 = vunpack.c.h.bf16 %v451_v19  ;;  %v463_v33 = vunpack.c.l.bf16 %v452_v20 }
  0x1b   : > { %v1644_v30 = vld [vmem:[%s1638_s21 + $0x8] sm:$0xff]  ;;  %v464_v34 = vunpack.c.h.bf16 %v452_v20  ;;  %v1647_v35 = vld [vmem:[%s1638_s21 + $0x10] sm:$0xff]  ;;  %v1650_v36 = vld [vmem:[%s1638_s21 + $0x18] sm:$0xff]  ;;  %v465_v37 = vunpack.c.l.bf16 %v453_v21  ;;  %v466_v38 = vunpack.c.h.bf16 %v453_v21  ;;  %v467_v39 = vunpack.c.l.bf16 %v454_v22 }
  0x1c   : > { %v492_v8 = vadd.f32 1e-05, %v479_v7  ;;  %v468_v40 = vunpack.c.h.bf16 %v454_v22  ;;  %v1653_v41 = vld [vmem:[%s1638_s21 + $0x20] sm:$0xff]  ;;  %v1656_v42 = vld [vmem:[%s1638_s21 + $0x28] sm:$0xff]  ;;  %v469_v43 = vunpack.c.l.bf16 %v455_v27  ;;  %v470_v44 = vunpack.c.h.bf16 %v455_v27 }
  0x1d   : > { %v471_v45 = vunpack.c.l.bf16 %v456_v28  ;;  %v472_v46 = vunpack.c.h.bf16 %v456_v28  ;;  %v556_v47 = vunpack.c.h.bf16 %v1641_v29  ;;  %v558_v48 = vunpack.c.h.bf16 %v1644_v30 }
  0x1e   : > { %1485 = vrsqrt.f32 %v492_v8  ;;  %v555_v49 = vunpack.c.l.bf16 %v1641_v29  ;;  %v557_v50 = vunpack.c.l.bf16 %v1644_v30  ;;  %v559_v51 = vunpack.c.l.bf16 %v1647_v35  ;;  %v488_v30 = vld [vmem:[%s1638_s21 + $0x30] sm:$0xff] }
  0x1f   : > { %v560_v52 = vunpack.c.h.bf16 %v1647_v35  ;;  %v561_v53 = vunpack.c.l.bf16 %v1650_v36  ;;  %v562_v54 = vunpack.c.h.bf16 %v1650_v36  ;;  %v563_v56 = vunpack.c.l.bf16 %v1653_v41  ;;  %v489_v35 = vld [vmem:[%s1638_s21 + $0x38] sm:$0xff]  ;;  %v490_v36 = vld [vmem:[%s1728_s6] sm:$0x3] }
  0x20   : > { %v564_v57 = vunpack.c.h.bf16 %v1653_v41  ;;  %v565_v58 = vunpack.c.l.bf16 %v1656_v42  ;;  %v566_v59 = vunpack.c.h.bf16 %v1656_v42  ;;  %v1529_v42 = vmov 1983009808  }
  0x28   : > { %v1486_v10 = vpop.eup %1485 }
  0x29   : > { %v494_v11 = vmul.f32 %v1486_v10, %v481_v9 }
  0x2b   : > { %499 = vperm.xlu0 %1483, %v494_v11   ;;  %v495_v13 = vmul.f32 %v494_v11, %v474_v3 }
  0x2d   : > { %v496_v14 = vsub.f32 %v480_v12, %v495_v13 }
  0x2f   : > { %520 = vperm.xlu0 %1483, %v496_v14  }
  0xaa   : > { %v500_v55 = vpop.permute.xlu0 %499 }
  0xab   : > { %v503_v60 = vmul.f32 %v500_v55, %v458_v23  ;;  %v505_v61 = vmul.f32 %v500_v55, %v460_v24  ;;  %v502_v62 = vmul.f32 %v500_v55, %v457_v25  ;;  %v504_v63 = vmul.f32 %v500_v55, %v459_v26 }
  0xac   : > { %v507_v0 = vmul.f32 %v500_v55, %v462_v32  ;;  %v509_v1 = vmul.f32 %v500_v55, %v464_v34  ;;  %v506_v2 = vmul.f32 %v500_v55, %v461_v31  ;;  %v508_v3 = vmul.f32 %v500_v55, %v463_v33 }
  0xad   : > { %v511_v4 = vmul.f32 %v500_v55, %v466_v38  ;;  %v513_v5 = vmul.f32 %v500_v55, %v468_v40  ;;  %v510_v6 = vmul.f32 %v500_v55, %v465_v37  ;;  %v512_v7 = vmul.f32 %v500_v55, %v467_v39 }
  0xae   : > { %v521_v8 = vpop.permute.xlu0 %520  ;;  %v515_v9 = vmul.f32 %v500_v55, %v470_v44  ;;  %v517_v10 = vmul.f32 %v500_v55, %v472_v46  ;;  %v514_v11 = vmul.f32 %v500_v55, %v469_v43  ;;  %v516_v12 = vmul.f32 %v500_v55, %v471_v45 }
  0xaf   : > { %v524_v13 = vadd.f32 %v521_v8, %v503_v60  ;;  %v526_v14 = vadd.f32 %v521_v8, %v505_v61  ;;  %v523_v16 = vadd.f32 %v521_v8, %v502_v62  ;;  %v525_v17 = vadd.f32 %v521_v8, %v504_v63 }
  0xb0   : > { %v528_v18 = vadd.f32 %v521_v8, %v507_v0  ;;  %v530_v19 = vadd.f32 %v521_v8, %v509_v1  ;;  %v527_v20 = vadd.f32 %v521_v8, %v506_v2  ;;  %v529_v21 = vadd.f32 %v521_v8, %v508_v3 }
  0xb1   : > { %v540_v22 = vmax.f32 %v524_v13, 0.0  ;;  %v542_v23 = vmax.f32 %v526_v14, 0.0  ;;  %v539_v24 = vmax.f32 %v523_v16, 0.0  ;;  %v541_v25 = vmax.f32 %v525_v17, 0.0 }
  0xb2   : > { %v544_v26 = vmax.f32 %v528_v18, 0.0  ;;  %v546_v27 = vmax.f32 %v530_v19, 0.0  ;;  %v543_v28 = vmax.f32 %v527_v20, 0.0  ;;  %v545_v29 = vmax.f32 %v529_v21, 0.0 }
  0xb3   : > { %v572_v31 = vadd.f32 %v556_v47, %v540_v22  ;;  %v574_v32 = vadd.f32 %v558_v48, %v542_v23  ;;  %v571_v33 = vadd.f32 %v555_v49, %v539_v24  ;;  %v573_v34 = vadd.f32 %v557_v50, %v541_v25 }
  0xb4   : > { %v576_v37 = vadd.f32 %v560_v52, %v544_v26  ;;  %v578_v38 = vadd.f32 %v562_v54, %v546_v27  ;;  %v575_v39 = vadd.f32 %v559_v51, %v543_v28  ;;  %v577_v40 = vadd.f32 %v561_v53, %v545_v29 }
  0xb5   : > { %596 = vmatprep.subr.mxu0 %v572_v31  ;;  %667 = vmatprep.subr.mxu1 %v574_v32  ;;  %v532_v43 = vadd.f32 %v521_v8, %v511_v4  ;;  %v534_v44 = vadd.f32 %v521_v8, %v513_v5  ;;  %v531_v45 = vadd.f32 %v521_v8, %v510_v6  ;;  %v568_v46 = vunpack.c.h.bf16 %v488_v30 }
  0xb6   : > { %597 = vmatpush1.msra.mxu0 %v571_v33  ;;  %668 = vmatpush1.msra.mxu1 %v573_v34  ;;  %v533_v47 = vadd.f32 %v521_v8, %v512_v7  ;;  %v536_v48 = vadd.f32 %v521_v8, %v515_v9  ;;  %v538_v49 = vadd.f32 %v521_v8, %v517_v10  ;;  %v570_v50 = vunpack.c.h.bf16 %v489_v35 }
  0xb7   : > { %1430 = vmatmul.mubr.msk.f32.vlgmr.msra.gmra.mrb[0].mxu0 %vm592_vm0, %v490_v36  ;;  %1431 = vmatmul.mubr.msk.f32.vlgmr.msra.gmra.mrb[0].mxu1 %vm592_vm0, %v490_v36  ;;  %v548_v52 = vmax.f32 %v532_v43, 0.0  ;;  %v550_v54 = vmax.f32 %v534_v44, 0.0  ;;  %v547_v51 = vmax.f32 %v531_v45, 0.0  ;;  %v535_v53 = vadd.f32 %v521_v8, %v514_v11 }
  0xb8   : > { %738 = vmatprep.subr.mxu0 %v576_v37  ;;  %809 = vmatprep.subr.mxu1 %v578_v38  ;;  %v549_v55 = vmax.f32 %v533_v47, 0.0  ;;  %v552_v60 = vmax.f32 %v536_v48, 0.0  ;;  %v554_v61 = vmax.f32 %v538_v49, 0.0  ;;  %v537_v62 = vadd.f32 %v521_v8, %v516_v12  ;;  %v590_v8 = vpop.permute.xlu1 %589 }
  0xb9   : > { %739 = vmatpush1.msra.mxu0 %v575_v39  ;;  %810 = vmatpush1.msra.mxu1 %v577_v40  ;;  %v580_v63 = vadd.f32 %v564_v57, %v548_v52  ;;  %v582_v0 = vadd.f32 %v566_v59, %v550_v54  ;;  %v567_v1 = vunpack.c.l.bf16 %v488_v30  ;;  %v569_v2 = vunpack.c.l.bf16 %v489_v35 }
  0xba   : > { %802 = vmatprep.mubr.f32.mxu0 %v1528_v15  ;;  %873 = vmatprep.mubr.f32.mxu1 %v1528_v15  ;;  %v579_v3 = vadd.f32 %v563_v56, %v547_v51  ;;  %v581_v4 = vadd.f32 %v565_v58, %v549_v55  ;;  %v551_v5 = vmax.f32 %v535_v53, 0.0  ;;  %v553_v6 = vmax.f32 %v537_v62, 0.0 }
  0xbb   : > { %880 = vmatprep.subr.mxu0 %v580_v63  ;;  %951 = vmatprep.subr.mxu1 %v582_v0  ;;  %v584_v57 = vadd.f32 %v568_v46, %v552_v60  ;;  %v586_v59 = vadd.f32 %v570_v50, %v554_v61  ;;  %v1183_v58 = vunpack.c.l.s4 %v1529_v42  ;;  %v1185_v7 = vlaneseq }
  0xbc   : > { %1432 = vmatmul.mubr.msk.f32.vlgmr.msra.gmra.mrb[2].mxu0 %vm592_vm0, %v490_v36  ;;  %1433 = vmatmul.mubr.msk.f32.vlgmr.msra.gmra.mrb[2].mxu1 %vm592_vm0, %v490_v36  ;;  %v583_v41 = vadd.f32 %v567_v1, %v551_v5  ;;  %v585_v56 = vadd.f32 %v569_v2, %v553_v6 }
  0xbd   : > { %881 = vmatpush1.msra.mxu0 %v579_v3  ;;  %952 = vmatpush1.msra.mxu1 %v581_v4  ;;  %v1184_v9 = vunpack.c.0.s8 %v1183_v58  ;;  %v1186_v10 = vshrl.u32 %v1185_v7, 7 }
  0xbe   : > { %1022 = vmatprep.subr.mxu0 %v584_v57  ;;  %1093 = vmatprep.subr.mxu1 %v586_v59 }
  0xbf   : > { %944 = vmatprep.mubr.f32.mxu0 %v1528_v15  ;;  %1015 = vmatprep.mubr.f32.mxu1 %v1528_v15  ;;  %v1187_v19 = vsub.s32 %v1184_v9, %v1186_v10 }
  0xc0   : > { %1434 = vmatmul.mubr.msk.f32.vlgmr.msra.gmra.mrb[4].mxu0 %vm592_vm0, %v490_v36  ;;  %1435 = vmatmul.mubr.msk.f32.vlgmr.msra.gmra.mrb[4].mxu1 %vm592_vm0, %v490_v36 }
  0xc1   : > { %1023 = vmatpush1.msra.mxu0 %v583_v41  ;;  %1094 = vmatpush1.msra.mxu1 %v585_v56 }
  0xc2   : > { %1086 = vmatprep.mubr.f32.mxu0 %v1528_v15  ;;  %1157 = vmatprep.mubr.f32.mxu1 %v1528_v15 }
  0xc4   : > { %1436 = vmatmul.mubr.msk.f32.vlgmr.msra.gmra.mrb[6].mxu0 %vm592_vm0, %v490_v36  ;;  %1437 = vmatmul.mubr.msk.f32.vlgmr.msra.gmra.mrb[6].mxu1 %vm592_vm0, %v490_v36 }
 0x18a   : > { %v662_v11 = vpop.f32.mrb[0].mxu0  ;;  %v733_v12 = vpop.f32.mrb[0].mxu1 }
 0x18b   : > { %v663_v13 = vadd.f32 %v662_v11, %v590_v8  ;;  %v664_v14 = vpop.f32.mrb[1].mxu0  ;;  %v734_v16 = vadd.f32 %v733_v12, %v590_v8  ;;  %v735_v17 = vpop.f32.mrb[1].mxu1 }
 0x18c   : > { %v665_v18 = vadd.f32 %v664_v14, %v590_v8  ;;  %v736_v15 = vadd.f32 %v735_v17, %v590_v8 }
 0x18e   : > { %v1180_v20 = vcombine.low %v663_v13, %v665_v18  ;;  %v1181_v21 = vcombine.low %v734_v16, %v736_v15 }
 0x18f   : > { %v804_v22 = vpop.f32.mrb[2].mxu0  ;;  %v875_v23 = vpop.f32.mrb[2].mxu1 }
 0x190   : > { %v1188_v24 = vrot.slane %v1180_v20, %v1187_v19  ;;  %v1195_v25 = vrot.slane %v1181_v21, %v1187_v19  ;;  %v805_v26 = vadd.f32 %v804_v22, %v590_v8  ;;  %v876_v27 = vadd.f32 %v875_v23, %v590_v8  ;;  %v806_v28 = vpop.f32.mrb[3].mxu0  ;;  %v877_v29 = vpop.f32.mrb[3].mxu1 }
 0x191   : > { %v807_v30 = vadd.f32 %v806_v28, %v590_v8  ;;  %v878_v31 = vadd.f32 %v877_v29, %v590_v8 }
 0x192   : > { %v1196_v32 = vcombine.low %v1188_v24, %v1195_v25 }
 0x193   : > { %v1197_v33 = vcombine.low %v805_v26, %v807_v30  ;;  %v1198_v34 = vcombine.low %v876_v27, %v878_v31  ;;  %v946_v35 = vpop.f32.mrb[4].mxu0  ;;  %v1017_v36 = vpop.f32.mrb[4].mxu1 }
 0x194   : > { %1252 = vst [vmem:[%s1701_s25] sm:$0xff] %v1196_v32  ;;  %v947_v37 = vadd.f32 %v946_v35, %v590_v8  ;;  %v1018_v38 = vadd.f32 %v1017_v36, %v590_v8  ;;  %v948_v39 = vpop.f32.mrb[5].mxu0  ;;  %v1019_v40 = vpop.f32.mrb[5].mxu1 }
 0x195   : > { %v1205_v43 = vrot.slane %v1197_v33, %v1187_v19  ;;  %v1212_v44 = vrot.slane %v1198_v34, %v1187_v19  ;;  %v949_v45 = vadd.f32 %v948_v39, %v590_v8  ;;  %v1020_v46 = vadd.f32 %v1019_v40, %v590_v8 }
 0x197   : > { %v1213_v47 = vcombine.low %v1205_v43, %v1212_v44  ;;  %v1214_v48 = vcombine.low %v947_v37, %v949_v45  ;;  %v1215_v49 = vcombine.low %v1018_v38, %v1020_v46  ;;  %v1088_v50 = vpop.f32.mrb[6].mxu0  ;;  %v1159_v52 = vpop.f32.mrb[6].mxu1 }
 0x198   : > { %v1089_v54 = vadd.f32 %v1088_v50, %v590_v8  ;;  %v1160_v51 = vadd.f32 %v1159_v52, %v590_v8  ;;  %v1090_v53 = vpop.f32.mrb[7].mxu0  ;;  %v1161_v55 = vpop.f32.mrb[7].mxu1 }
 0x199   : > { %1253 = vst [vmem:[%s1701_s25 + $0x8] sm:$0xff] %v1213_v47  ;;  %v1222_v60 = vrot.slane %v1214_v48, %v1187_v19  ;;  %v1229_v61 = vrot.slane %v1215_v49, %v1187_v19  ;;  %v1091_v62 = vadd.f32 %v1090_v53, %v590_v8  ;;  %v1162_v63 = vadd.f32 %v1161_v55, %v590_v8 }
 0x19b   : > { %v1230_v0 = vcombine.low %v1222_v60, %v1229_v61  ;;  %v1231_v1 = vcombine.low %v1089_v54, %v1091_v62  ;;  %v1232_v2 = vcombine.low %v1160_v51, %v1162_v63 }
 0x19d   : > { %1254 = vst [vmem:[%s1701_s25 + $0x10] sm:$0xff] %v1230_v0  ;;  %v1239_v3 = vrot.slane %v1231_v1, %v1187_v19  ;;  %v1246_v4 = vrot.slane %v1232_v2, %v1187_v19 }
 0x19f   : > { %v1247_v5 = vcombine.low %v1239_v3, %v1246_v4 }
 0x1a1   : > { %1255 = vst [vmem:[%s1701_s25 + $0x18] sm:$0xff] %v1247_v5 }
 0x1a2 PF: > { %s18_s9 = sadd.s32 1, %s1525_s9   ;;  %s1731_s27 = smov %s1517_s29 }
 0x1a3   : > { %p15_p7 = scmp.ge.s32.totalorder %s18_s9, 6   ;;  %s1732_s28 = smov %s1521_s30 }
 0x1a4   : > { %s1733_s29 = smov %s1736_s10  ;;  %s1734_s30 = smov %s1740_s11 }
 0x1a5   :  { %17 = sbr.rel (!%p15_p7) target bundleno = 3 (0x3), region = 97 }

</bundles_post_ra>
